<compile_context>
chip_gen: v7x
topology: tpu7x:2x2x1
jax: 0.10.0
libtpu: 0.0.40
codegen_flags: <defaults>
</compile_context>

<pallas_src>
import functools

import jax
import jax.numpy as jnp
from jax.experimental import pallas as pl
from jax.experimental.pallas import tpu as pltpu


def _regressor_kernel(x_ref, w1_ref, w2_ref, b_ref, o_ref, acc_ref, *, inv_hw):
    s = pl.program_id(1)

    @pl.when(s == 0)
    def _():
        acc_ref[...] = jnp.zeros_like(acc_ref)

    # 1x1 conv (no bias) as MXU matmul: (1280, 256)bf16 @ (256, tile_hw)bf16,
    # f32 accumulation. x is cast to bf16 in VMEM (VPU), not in the wrapper.
    x_bf = x_ref[0].astype(jnp.bfloat16)                      # (256, tile_hw)
    h = jnp.dot(w1_ref[...], x_bf,
                preferred_element_type=jnp.float32)           # (1280, tile_hw) f32

    # SiLU in f32 (sigmoid -> EUP slot).
    h = h * jax.nn.sigmoid(h)

    # Partial spatial sum for AdaptiveAvgPool2d(1).
    acc_ref[...] += jnp.sum(h, axis=1, keepdims=True)         # (1280, 1)

    # Epilogue: finish pooling, Dropout(identity), Flatten(no-op), Linear+bias.
    @pl.when(s == pl.num_programs(1) - 1)
    def _():
        pooled = acc_ref[...] * inv_hw                        # (1280, 1)
        # Linear is tiny (1280 x P): broadcast-mul + sublane reduce, all f32.
        out = jnp.sum(pooled * w2_ref[...], axis=0, keepdims=True)  # (1, P)
        o_ref[0] = out + b_ref[...]


def regressor_forward(x_nchw, conv_w, lin_w, lin_b, *, max_tile_hw=1024):
    """x_nchw: (B, 256, H, W) float32
    conv_w:  (1280, 256)  -- torch Conv2d weight (out, in, 1, 1) squeezed
    lin_w:   (P, 1280)    -- torch Linear weight
    lin_b:   (P,)
    Returns (out (B, P), jnp.int32(0)) matching the PyTorch module."""
    B, C, H, W = x_nchw.shape
    HW = H * W
    OC, Cin = conv_w.shape
    assert Cin == C == 256
    P = lin_w.shape[0]

    # NCHW -> (B, C, H*W): a free reshape (no transpose / no extra HBM pass).
    x3d = x_nchw.reshape(B, C, HW)

    w1_bf = conv_w.astype(jnp.bfloat16)                       # (1280, 256), resident
    w2 = jnp.transpose(lin_w).astype(jnp.float32)             # (1280, P)
    b2 = lin_b.reshape(1, P).astype(jnp.float32)

    # Spatial tile: largest multiple of 128 (<= max_tile_hw) dividing HW;
    # fall back to full HW (always a legal block).
    tile_hw = HW
    cand = (max_tile_hw // 128) * 128
    while cand >= 128:
        if HW % cand == 0:
            tile_hw = cand
            break
        cand -= 128
    n_s = HW // tile_hw

    kernel = functools.partial(_regressor_kernel, inv_hw=1.0 / HW)

    out3 = pl.pallas_call(
        kernel,
        out_shape=jax.ShapeDtypeStruct((B, 1, P), jnp.float32),
        grid_spec=pltpu.PrefetchScalarGridSpec(
            num_scalar_prefetch=0,
            grid=(B, n_s),
            in_specs=[
                pl.BlockSpec((1, C, tile_hw), lambda b, s: (b, 0, s)),  # x tiles
                pl.BlockSpec((OC, C), lambda b, s: (0, 0)),             # conv W (bf16)
                pl.BlockSpec((OC, P), lambda b, s: (0, 0)),             # linear W
                pl.BlockSpec((1, P), lambda b, s: (0, 0)),              # linear b
            ],
            out_specs=pl.BlockSpec((1, 1, P), lambda b, s: (b, 0, 0)),
            scratch_shapes=[pltpu.VMEM((OC, 1), jnp.float32)],          # pool accumulator
        ),
        compiler_params=pltpu.CompilerParams(
            dimension_semantics=("parallel", "arbitrary"),
            vmem_limit_bytes=32 * 1024 * 1024,
        ),
    )(x3d, w1_bf, w2, b2)

    return out3.reshape(B, P), jnp.int32(0)


if __name__ == "__main__":
    key = jax.random.PRNGKey(0)
    k_x, k_w1, k_w2, k_b = jax.random.split(key, 4)

    B, C, H, W = 2, 256, 16, 16
    n_predictions = 8

    x = jax.random.normal(k_x, (B, C, H, W), dtype=jnp.float32)
    conv_w = jax.random.normal(k_w1, (1280, C), dtype=jnp.float32) * 0.02
    lin_w = jax.random.normal(k_w2, (n_predictions, 1280), dtype=jnp.float32) * 0.02
    lin_b = jax.random.normal(k_b, (n_predictions,), dtype=jnp.float32) * 0.02

    # Force a small spatial tile so the demo exercises multi-step accumulation.
    out, zero = regressor_forward(x, conv_w, lin_w, lin_b, max_tile_hw=128)
    out = jax.block_until_ready(out)

    # Plain-JAX f32 reference (module semantics).
    h_ref = jnp.einsum("bchw,oc->bohw", x, conv_w)
    h_ref = h_ref * jax.nn.sigmoid(h_ref)
    pooled_ref = h_ref.mean(axis=(2, 3))                      # (B, 1280)
    out_ref = pooled_ref @ lin_w.T + lin_b

    assert out.shape == (B, n_predictions)
    assert int(zero) == 0
    # Tolerance accounts for bf16 matmul inputs (f32 accumulation).
    assert jnp.allclose(out, out_ref, atol=2e-3, rtol=2e-2), float(
        jnp.max(jnp.abs(out - out_ref)))
    print("KERNEL_OK")
</pallas_src>

<mosaic_0001>
module attributes {stable_mosaic.version = 11 : i64} {
  func.func @_regressor_kernel(%arg0: i32, %arg1: i32, %arg2: memref<1x256x128xf32, #tpu.memory_space<vmem>>, %arg3: memref<1280x256xbf16, #tpu.memory_space<vmem>>, %arg4: memref<1280x8xf32, #tpu.memory_space<vmem>>, %arg5: memref<1x8xf32, #tpu.memory_space<vmem>>, %arg6: memref<1x1x8xf32, #tpu.memory_space<vmem>>, %arg7: memref<1280x1xf32, #tpu.memory_space<vmem>>) attributes {dimension_semantics = [#tpu.dimension_semantics<parallel>, #tpu.dimension_semantics<arbitrary>], iteration_bounds = array<i64: 2, 2>, scalar_prefetch = 0 : i64, scratch_operands = 1 : i64, tpu.core_type = #tpu.core_type<tc>, window_params = [{transform_indices = @transform_0, window_bounds = array<i64: 1, 256, 128>}, {pipeline_mode = #tpu.pipeline_mode<synchronous>, transform_indices = @transform_1, window_bounds = array<i64: 1280, 256>}, {pipeline_mode = #tpu.pipeline_mode<synchronous>, transform_indices = @transform_2, window_bounds = array<i64: 1280, 8>}, {pipeline_mode = #tpu.pipeline_mode<synchronous>, transform_indices = @transform_3, window_bounds = array<i64: 1, 8>}, {transform_indices = @transform_4, window_bounds = array<i64: 1, 1, 8>}]} {
    %c0_i32 = arith.constant 0 : i32
    %0 = arith.cmpi eq, %arg1, %c0_i32 : i32
    %1 = arith.extui %0 : i1 to i32
    %c0_i32_0 = arith.constant 0 : i32
    %2 = arith.cmpi ne, %1, %c0_i32_0 : i32
    scf.if %2 {
      %cst_12 = arith.constant 0.000000e+00 : f32
      %22 = vector.broadcast %cst_12 : f32 to vector<1280x1xf32>
      %c0_13 = arith.constant 0 : index
      %c0_14 = arith.constant 0 : index
      %23 = vector.load %arg7[%c0_13, %c0_14] : memref<1280x1xf32, #tpu.memory_space<vmem>>, vector<1280x1xf32>
      tpu.vector_store %arg7[%c0_13, %c0_14], %22 {strides = array<i32>} : memref<1280x1xf32, #tpu.memory_space<vmem>>, vector<1280x1xf32>,
    } else {
    }
    %c0 = arith.constant 0 : index
    %c0_1 = arith.constant 0 : index
    %c0_2 = arith.constant 0 : index
    %3 = vector.load %arg2[%c0, %c0_1, %c0_2] : memref<1x256x128xf32, #tpu.memory_space<vmem>>, vector<1x256x128xf32>
    %4 = vector.shape_cast %3 : vector<1x256x128xf32> to vector<256x128xf32>
    %5 = arith.truncf %4 : vector<256x128xf32> to vector<256x128xbf16>
    %c0_3 = arith.constant 0 : index
    %c0_4 = arith.constant 0 : index
    %6 = vector.load %arg3[%c0_3, %c0_4] : memref<1280x256xbf16, #tpu.memory_space<vmem>>, vector<1280x256xbf16>
    %cst = arith.constant dense<0.000000e+00> : vector<1280x128xf32>
    %7 = tpu.matmul %6, %5, %cst {dimension_numbers = #tpu.dot_dimension_numbers<[1], [0], [0], [1], [0, 0, 1, 1], [], []>} : vector<1280x256xbf16>, vector<256x128xbf16>, vector<1280x128xf32> -> vector<1280x128xf32>
    %8 = arith.negf %7 : vector<1280x128xf32>
    %9 = math.exp %8 : vector<1280x128xf32>
    %cst_5 = arith.constant 1.000000e+00 : f32
    %10 = vector.broadcast %cst_5 : f32 to vector<1280x128xf32>
    %11 = arith.addf %10, %9 : vector<1280x128xf32>
    %12 = arith.divf %10, %11 : vector<1280x128xf32>
    %13 = arith.mulf %7, %12 : vector<1280x128xf32>
    %c0_6 = arith.constant 0 : index
    %c0_7 = arith.constant 0 : index
    %14 = vector.load %arg7[%c0_6, %c0_7] : memref<1280x1xf32, #tpu.memory_space<vmem>>, vector<1280x1xf32>
    %cst_8 = arith.constant dense<0.000000e+00> : vector<1280xf32>
    %15 = vector.multi_reduction <add>, %13, %cst_8 [1] : vector<1280x128xf32> to vector<1280xf32>
    %16 = vector.shape_cast %15 : vector<1280xf32> to vector<1280x1xf32>
    %17 = arith.addf %14, %16 : vector<1280x1xf32>
    %c0_9 = arith.constant 0 : index
    %c0_10 = arith.constant 0 : index
    %18 = vector.load %arg7[%c0_9, %c0_10] : memref<1280x1xf32, #tpu.memory_space<vmem>>, vector<1280x1xf32>
    tpu.vector_store %arg7[%c0_9, %c0_10], %17 {strides = array<i32>} : memref<1280x1xf32, #tpu.memory_space<vmem>>, vector<1280x1xf32>,
    %c1_i32 = arith.constant 1 : i32
    %19 = arith.cmpi eq, %arg1, %c1_i32 : i32
    %20 = arith.extui %19 : i1 to i32
    %c0_i32_11 = arith.constant 0 : i32
    %21 = arith.cmpi ne, %20, %c0_i32_11 : i32
    scf.if %21 {
      %c0_12 = arith.constant 0 : index
      %c0_13 = arith.constant 0 : index
      %22 = vector.load %arg7[%c0_12, %c0_13] : memref<1280x1xf32, #tpu.memory_space<vmem>>, vector<1280x1xf32>
      %cst_14 = arith.constant 3.906250e-03 : f32
      %23 = vector.broadcast %cst_14 : f32 to vector<1280x1xf32>
      %24 = arith.mulf %22, %23 : vector<1280x1xf32>
      %c0_15 = arith.constant 0 : index
      %c0_16 = arith.constant 0 : index
      %25 = vector.load %arg4[%c0_15, %c0_16] : memref<1280x8xf32, #tpu.memory_space<vmem>>, vector<1280x8xf32>
      %26 = vector.broadcast %24 : vector<1280x1xf32> to vector<1280x8xf32>
      %27 = arith.mulf %26, %25 : vector<1280x8xf32>
      %cst_17 = arith.constant dense<0.000000e+00> : vector<8xf32>
      %28 = vector.multi_reduction <add>, %27, %cst_17 [0] : vector<1280x8xf32> to vector<8xf32>
      %29 = vector.shape_cast %28 : vector<8xf32> to vector<1x8xf32>
      %c0_18 = arith.constant 0 : index
      %c0_19 = arith.constant 0 : index
      %30 = vector.load %arg5[%c0_18, %c0_19] : memref<1x8xf32, #tpu.memory_space<vmem>>, vector<1x8xf32>
      %31 = arith.addf %29, %30 : vector<1x8xf32>
      %c0_20 = arith.constant 0 : index
      %c0_21 = arith.constant 0 : index
      %c0_22 = arith.constant 0 : index
      %32 = vector.load %arg6[%c0_20, %c0_21, %c0_22] : memref<1x1x8xf32, #tpu.memory_space<vmem>>, vector<1x1x8xf32>
      %33 = vector.shape_cast %32 : vector<1x1x8xf32> to vector<1x8xf32>
      %34 = vector.shape_cast %31 : vector<1x8xf32> to vector<1x1x8xf32>
      tpu.vector_store %arg6[%c0_20, %c0_21, %c0_22], %34 {strides = array<i32>} : memref<1x1x8xf32, #tpu.memory_space<vmem>>, vector<1x1x8xf32>,
    } else {
    }
    return
  }
  func.func @transform_0(%arg0: i32, %arg1: i32) -> (i32, i32, i32) {
    %c0_i32 = arith.constant 0 : i32
    %c0_i32_0 = arith.constant 0 : i32
    return %arg0, %c0_i32, %arg1 : i32, i32, i32
  }
  func.func @transform_1(%arg0: i32, %arg1: i32) -> (i32, i32) {
    %c0_i32 = arith.constant 0 : i32
    %c0_i32_0 = arith.constant 0 : i32
    %c0_i32_1 = arith.constant 0 : i32
    return %c0_i32, %c0_i32_0 : i32, i32
  }
  func.func @transform_2(%arg0: i32, %arg1: i32) -> (i32, i32) {
    %c0_i32 = arith.constant 0 : i32
    %c0_i32_0 = arith.constant 0 : i32
    %c0_i32_1 = arith.constant 0 : i32
    return %c0_i32, %c0_i32_0 : i32, i32
  }
  func.func @transform_3(%arg0: i32, %arg1: i32) -> (i32, i32) {
    %c0_i32 = arith.constant 0 : i32
    %c0_i32_0 = arith.constant 0 : i32
    %c0_i32_1 = arith.constant 0 : i32
    return %c0_i32, %c0_i32_0 : i32, i32
  }
  func.func @transform_4(%arg0: i32, %arg1: i32) -> (i32, i32, i32) {
    %c0_i32 = arith.constant 0 : i32
    %c0_i32_0 = arith.constant 0 : i32
    %c0_i32_1 = arith.constant 0 : i32
    return %arg0, %c0_i32, %c0_i32_0 : i32, i32, i32
  }
}

</mosaic_0001>

<bundles_post_ra>
// kernel: tpu_custom_call.1
= control target key start
LH: loop header
LB: loop body
LE: loop exit
PB: predicated region body
PF: predicated region fallthrough
CT: control target
= control target key end

     0   :  { %9 = vsyncpa [#allocation4], 0  ;;  %s9952_s0 = inlined_call_operand.hbm [shape: f32[2,256,256], index: 0, kind: input, shape index: {}]   ;;  %s9953_s1 = inlined_call_operand.vmem [shape: bf16[1280,256], index: 1, kind: input, shape index: {}]   ;;  %s9954_s2 = inlined_call_operand.vmem [shape: f32[1280,8], index: 2, kind: input, shape index: {}]   ;;  %s9955_s3 = inlined_call_operand.vmem [shape: f32[1,8], index: 3, kind: input, shape index: {}]   ;;  %s9956_s4 = inlined_call_operand.hbm [shape: f32[2,1,8], index: 4, kind: output, shape index: {}]  }
   0x1   :  { %11 = vsyncpa [#allocation4 + $0x1], 0 }
   0x2   :  { %12 = vsyncpa [#allocation5], 0 }
   0x3   :  { %14 = vsyncpa [#allocation5 + $0x1], 0  ;;  %s7407_s15 = smov 0   ;;  %s7409_s16 = smov 0  }
   0x4   :  { %s7411_s17 = smov 0   ;;  %s7413_s18 = smov 0  }
   0x5   :  { %s7415_s19 = smov 0   ;;  %s7417_s20 = smov 0  }
   0x6   :  { %s7419_s21 = smov 0   ;;  %s7421_s22 = smov 0  }
   0x7   :  { %s7423_s23 = smov 0   ;;  %s7425_s24 = smov 0  }
   0x8   :  { %s7427_s25 = smov 0  }
   0x9 LB: > { %s5864_s26 = sadd.s32 4294967295, %s7372_s25   ;;  %s5865_s27 = sadd.s32 4294967294, %s7372_s25   ;;  %s7372_s25 = sphi %s7427_s25, %s20_s25   ;;  %s7368_s24 = sphi %s7425_s24, %s9982_s24   ;;  %s7364_s23 = sphi %s7423_s23, %s9981_s23   ;;  %s7360_s22 = sphi %s7421_s22, %s9980_s22   ;;  %s7356_s21 = sphi %s7419_s21, %s9979_s21   ;;  %s7352_s20 = sphi %s7417_s20, %s9978_s20   ;;  %s7348_s19 = sphi %s7415_s19, %s9977_s19   ;;  %s7344_s18 = sphi %s7413_s18, %s9976_s18   ;;  %s7340_s17 = sphi %s7411_s17, %s9975_s17   ;;  %s7336_s16 = sphi %s7409_s16, %s9974_s16   ;;  %s7332_s15 = sphi %s7407_s15, %s9973_s15  }
   0xa   : > { %s29_s28 = sadd.s32 1, %s7364_s23  ;;  %s32_s29 = sadd.s32 1, %s7368_s24 }
   0xb   : > { %p30_p0 = scmp.ge.s32.totalorder %s29_s28, 2  ;;  %s41_s30 = sadd.s32 1, %s7352_s20 }
   0xc   : > { %p48_p1 = scmp.ne.s32.totalorder %s7352_s20, %s7348_s19  ;;  %p49_p2 = scmp.eq.s32.totalorder %s7372_s25, 0 }
   0xd   : > { %s9984_s28 = smov (%p30_p0, %s29_s28), 0  ;;  %s9986_s29 = smov (!%p30_p0, %s32_s29), %s7368_s24 }
   0xe   : > { %9960 = sst [smem:[#allocation9_spill]] %s9984_s28  ;;  %s37_s5 = ssub.s32 %s7364_s23, %s9984_s28 }
   0xf   : > { %p7473_p3 = por %p49_p2, %p48_p1  ;;  %p34_p4 = scmp.ge.s32.totalorder %s9986_s29, 2 }
  0x10   : > { %p54_p5 = scmp.ne.s32.totalorder %s7348_s19, %s7344_s18  ;;  %p55_p6 = scmp.eq.s32.totalorder %s5864_s26, 0 }
  0x11   : > { %s130_s7 = sadd.s32 1, %s7340_s17  ;;  %s9988_s29 = smov (%p34_p4, %s9986_s29), 0 }
  0x12   : > { %9962 = sst [smem:[#allocation10_spill]] %s9988_s29  ;;  %p7481_p7 = por %p55_p6, %p54_p5 }
  0x13   : > { %p140_p8 = scmp.ne.s32.totalorder %s7340_s17, %s7336_s16  ;;  %s36_s9 = ssub.s32 %s7368_s24, %s9988_s29 }
  0x14   : > { %p141_p9 = scmp.eq.s32.totalorder %s5864_s26, 3  ;;  %s38_s10 = sor.u32 %s37_s5, %s36_s9 }
  0x15   : > { %p128_p10 = scmp.eq.s32.totalorder %s36_s9, 0  ;;  %p39_p11 = scmp.eq.s32.totalorder %s38_s10, 0 }
  0x16   : > { %p7489_p12 = por %p141_p9, %p140_p8  ;;  %p146_p13 = scmp.ne.s32.totalorder %s7336_s16, %s7332_s15 }
  0x17   : > { %s7494_s12 = scalar_select %p128_p10, %s7340_s17, %s130_s7  }
  0x18   : > { %s9964_s11 = scalar_select %p7489_p12, 1, 0 }
  0x19   : > { %9965 = sst [smem:[#allocation11_spill]] %s7494_s12  ;;  %p147_p0 = scmp.eq.s32.totalorder %s5865_s27, 3 }
  0x1a   : > { %s7497_s13 = scalar_select %p39_p11, %s7352_s20, %s41_s30  }
  0x1b   : > { %p6242_p1 = scmp.lt.s32.totalorder %s7372_s25, 4  ;;  %p7502_p2 = por %p147_p0, %p146_p13 }
  0x1c   : > { %s176_s18 = sand.u32 1, %s7352_s20   ;;  %s5869_s5 = sshll.u32 %s7368_s24, 6 }
  0x1d   : > { %s9966_s14 = scalar_select %p7502_p2, 1, 0 }
  0x1e   : > { %s5868_s26 = sshll.u32 %s176_s18, 8  ;;  %s185_s9 = sadd.s32 %s7364_s23, %s5869_s5 }
  0x1f   : > { %s180_s10 = scalar_lea.vmem [#allocation3], %s5868_s26  ;;  %s5870_s28 = sshll.u32 %s185_s9, 7 }
  0x20   : > { %s188_s29 = sshll.u32 %s180_s10, 4  ;;  %s7514_s30 = scalar_lea.hbm %s9952_s0, %s5870_s28  ;;  %s7509_s29 = int_to_ptr.vmem [resolvable:$true] %s188_s29 }
  0x21   : > { %p7518_p4 = pnand %p6242_p1, %p7473_p3  ;;  %s7522_s26 = scalar_lea.sflag [#allocation4], %s176_s18 }
  0x22   : > { %s7220_s5 = scalar_lea.hbm %s7514_s30, 4096  ;;  %s7225_s12 = scalar_lea.hbm %s9952_s0, 16384 }
  0x23   : > { %p7221_p5 = scmp.ne.s32.totalorder %s7514_s30, %s7220_s5  ;;  %p7222_p6 = pneg %p7518_p4 }
  0x24   : > { %p7226_p3 = scmp.lt.u32.totalorder %s7514_s30, %s9952_s0  ;;  %p7227_p10 = scmp.lt.u32.totalorder %s7225_s12, %s7220_s5 }
  0x25   : > { %p7223_p8 = pnand %p7222_p6, %p7221_p5  ;;  %p7229_p13 = scmp.lt.u32.totalorder %s7220_s5, %s7514_s30 }
  0x26   : > { %p7228_p11 = por %p7227_p10, %p7226_p3 }
  0x27   : > { %p7224_p9 = pneg %p7223_p8 }
  0x28   : > { %p7230_p0 = por %p7229_p13, %p7228_p11 }
  0x2a   : > { %p7231_p1 = pnand %p7230_p0, %p7224_p9 }
  0x2c   : > { %7234 = shalt.err (!%p7231_p1)
}
  0x2d   : > { %s7235_s18 = scalar_lea.vmem %s7509_s29, 4096  ;;  %s7374_s7 = smov [#allocation3]  }
  0x2e   : > { %p7236_p5 = scmp.ne.s32.totalorder %s7509_s29, %s7235_s18  ;;  %s7240_s28 = sshll.u32 %s7374_s7, 4  ;;  %s7241_s28 = int_to_ptr.vmem [resolvable:$false] %s7240_s28 }
  0x2f   : > { %s7242_s6 = scalar_lea.vmem %s7241_s28, 8192  ;;  %p7243_p12 = scmp.lt.s32.totalorder %s7509_s29, %s7241_s28 }
  0x30   : > { %p7238_p8 = pnand %p7236_p5, %p7222_p6  ;;  %p7244_p3 = scmp.lt.s32.totalorder %s7242_s6, %s7235_s18 }
  0x32   : > { %p7239_p2 = pneg %p7238_p8  ;;  %p7245_p10 = por %p7244_p3, %p7243_p12 }
  0x34   : > { %p7246_p11 = pnand %p7245_p10, %p7239_p2 }
  0x36   : > { %7249 = shalt.err (!%p7246_p11)
}
  0x37   : > { %s7375_s5 = smov 256   ;;  %s7376_s12 = smov 128  }
  0x38   : > { %s7377_s9 = smov 8   ;;  %p5871_p6 = scmp.ge.s32.totalorder %s7372_s25, 1 }
  0x39   : > { %6237 = dma.hbm_to_vmem [thread:$0]  (!%p7518_p4), %s7514_s30, 4096, %s7509_s29, %s7522_s26, %s7375_s5, %s7376_s12, %s7377_s9  }
  0x3a   : > { %p196_p9 = scmp.lt.s32.totalorder %s7372_s25, 5 }
  0x3c   : > { %p197_p13 = pnand %p5871_p6, %p196_p9 }
  0x3d   : > { %s202_s10 = sand.u32 (!%p197_p13), 1, %s7348_s19  }
  0x3e   : > { %200 = sbr.rel (%p197_p13) target bundleno = 1419 (0x58b), region = 36  ;;  %s5872_s18 = sshll.u32 (!%p197_p13), %s202_s10, 8 }
  0x3f   : > { %s203_s7 = scalar_lea.sflag (!%p197_p13), [#allocation4], %s202_s10  ;;  %s7553_s28 = scalar_lea.vmem (!%p197_p13), [#allocation3], %s5872_s18 }
  0x45   : > { %7323 = dma.done.wait (%p7481_p7), %s203_s7, 4096  }
  0x46   : > { %7325 = vsyncadd (%p7481_p7), %s203_s7, 4294963200  ;;  %s228_s27 = sand.u32 1, %s7336_s16   ;;  %p5873_p12 = scmp.ne.s32.totalorder %s7356_s21, 0 }
  0x47   : > { %s7562_s29 = scalar_lea.vmem [#allocation6], %s228_s27  ;;  %vm235_vm0 = vcmask (!%p5873_p12), 7168   ;;  %v7378_v0 = vmov (!%p5873_p12), 0.0  }
  0x48   : > { %234 = sbr.rel (%p5873_p12) target bundleno = 152 (0x98), region = 44  ;;  %236 = vst.msk [vmem:[#allocation2] sm:$0xff] (!%p5873_p12), %vm235_vm0, %v7378_v0  ;;  %237 = vst.msk [vmem:[#allocation2 + $0x8] sm:$0xff] (!%p5873_p12), %vm235_vm0, %v7378_v0 }
  0x49   : > { %238 = vst.msk [vmem:[#allocation2 + $0x10] sm:$0xff] (!%p5873_p12), %vm235_vm0, %v7378_v0  ;;  %239 = vst.msk [vmem:[#allocation2 + $0x18] sm:$0xff] (!%p5873_p12), %vm235_vm0, %v7378_v0 }
  0x4a   : > { %240 = vst.msk [vmem:[#allocation2 + $0x20] sm:$0xff] (!%p5873_p12), %vm235_vm0, %v7378_v0  ;;  %241 = vst.msk [vmem:[#allocation2 + $0x28] sm:$0xff] (!%p5873_p12), %vm235_vm0, %v7378_v0 }
  0x4b   : > { %242 = vst.msk [vmem:[#allocation2 + $0x30] sm:$0xff] (!%p5873_p12), %vm235_vm0, %v7378_v0  ;;  %243 = vst.msk [vmem:[#allocation2 + $0x38] sm:$0xff] (!%p5873_p12), %vm235_vm0, %v7378_v0 }
  0x4c   : > { %244 = vst.msk [vmem:[#allocation2 + $0x40] sm:$0xff] (!%p5873_p12), %vm235_vm0, %v7378_v0  ;;  %245 = vst.msk [vmem:[#allocation2 + $0x48] sm:$0xff] (!%p5873_p12), %vm235_vm0, %v7378_v0 }
  0x4d   : > { %246 = vst.msk [vmem:[#allocation2 + $0x50] sm:$0xff] (!%p5873_p12), %vm235_vm0, %v7378_v0  ;;  %247 = vst.msk [vmem:[#allocation2 + $0x58] sm:$0xff] (!%p5873_p12), %vm235_vm0, %v7378_v0 }
  0x4e   : > { %248 = vst.msk [vmem:[#allocation2 + $0x60] sm:$0xff] (!%p5873_p12), %vm235_vm0, %v7378_v0  ;;  %249 = vst.msk [vmem:[#allocation2 + $0x68] sm:$0xff] (!%p5873_p12), %vm235_vm0, %v7378_v0 }
  0x4f   : > { %250 = vst.msk [vmem:[#allocation2 + $0x70] sm:$0xff] %vm235_vm0, %v7378_v0  ;;  %251 = vst.msk [vmem:[#allocation2 + $0x78] sm:$0xff] %vm235_vm0, %v7378_v0 }
  0x50   : > { %252 = vst.msk [vmem:[#allocation2 + $0x80] sm:$0xff] %vm235_vm0, %v7378_v0  ;;  %253 = vst.msk [vmem:[#allocation2 + $0x88] sm:$0xff] %vm235_vm0, %v7378_v0 }
  0x51   : > { %254 = vst.msk [vmem:[#allocation2 + $0x90] sm:$0xff] %vm235_vm0, %v7378_v0  ;;  %255 = vst.msk [vmem:[#allocation2 + $0x98] sm:$0xff] %vm235_vm0, %v7378_v0 }
  0x52   : > { %256 = vst.msk [vmem:[#allocation2 + $0xa0] sm:$0xff] %vm235_vm0, %v7378_v0  ;;  %257 = vst.msk [vmem:[#allocation2 + $0xa8] sm:$0xff] %vm235_vm0, %v7378_v0 }
  0x53   : > { %258 = vst.msk [vmem:[#allocation2 + $0xb0] sm:$0xff] %vm235_vm0, %v7378_v0  ;;  %259 = vst.msk [vmem:[#allocation2 + $0xb8] sm:$0xff] %vm235_vm0, %v7378_v0 }
  0x54   : > { %260 = vst.msk [vmem:[#allocation2 + $0xc0] sm:$0xff] %vm235_vm0, %v7378_v0  ;;  %261 = vst.msk [vmem:[#allocation2 + $0xc8] sm:$0xff] %vm235_vm0, %v7378_v0 }
  0x55   : > { %262 = vst.msk [vmem:[#allocation2 + $0xd0] sm:$0xff] %vm235_vm0, %v7378_v0  ;;  %263 = vst.msk [vmem:[#allocation2 + $0xd8] sm:$0xff] %vm235_vm0, %v7378_v0 }
  0x56   : > { %264 = vst.msk [vmem:[#allocation2 + $0xe0] sm:$0xff] %vm235_vm0, %v7378_v0  ;;  %265 = vst.msk [vmem:[#allocation2 + $0xe8] sm:$0xff] %vm235_vm0, %v7378_v0 }
  0x57   : > { %266 = vst.msk [vmem:[#allocation2 + $0xf0] sm:$0xff] %vm235_vm0, %v7378_v0  ;;  %267 = vst.msk [vmem:[#allocation2 + $0xf8] sm:$0xff] %vm235_vm0, %v7378_v0 }
  0x58   : > { %268 = vst.msk [vmem:[#allocation2 + $0x100] sm:$0xff] %vm235_vm0, %v7378_v0  ;;  %269 = vst.msk [vmem:[#allocation2 + $0x108] sm:$0xff] %vm235_vm0, %v7378_v0 }
  0x59   : > { %270 = vst.msk [vmem:[#allocation2 + $0x110] sm:$0xff] %vm235_vm0, %v7378_v0  ;;  %271 = vst.msk [vmem:[#allocation2 + $0x118] sm:$0xff] %vm235_vm0, %v7378_v0 }
  0x5a   : > { %272 = vst.msk [vmem:[#allocation2 + $0x120] sm:$0xff] %vm235_vm0, %v7378_v0  ;;  %273 = vst.msk [vmem:[#allocation2 + $0x128] sm:$0xff] %vm235_vm0, %v7378_v0 }
  0x5b   : > { %274 = vst.msk [vmem:[#allocation2 + $0x130] sm:$0xff] %vm235_vm0, %v7378_v0  ;;  %275 = vst.msk [vmem:[#allocation2 + $0x138] sm:$0xff] %vm235_vm0, %v7378_v0 }
  0x5c   : > { %276 = vst.msk [vmem:[#allocation2 + $0x140] sm:$0xff] %vm235_vm0, %v7378_v0  ;;  %277 = vst.msk [vmem:[#allocation2 + $0x148] sm:$0xff] %vm235_vm0, %v7378_v0 }
  0x5d   : > { %278 = vst.msk [vmem:[#allocation2 + $0x150] sm:$0xff] %vm235_vm0, %v7378_v0  ;;  %279 = vst.msk [vmem:[#allocation2 + $0x158] sm:$0xff] %vm235_vm0, %v7378_v0 }
  0x5e   : > { %280 = vst.msk [vmem:[#allocation2 + $0x160] sm:$0xff] %vm235_vm0, %v7378_v0  ;;  %281 = vst.msk [vmem:[#allocation2 + $0x168] sm:$0xff] %vm235_vm0, %v7378_v0 }
  0x5f   : > { %282 = vst.msk [vmem:[#allocation2 + $0x170] sm:$0xff] %vm235_vm0, %v7378_v0  ;;  %283 = vst.msk [vmem:[#allocation2 + $0x178] sm:$0xff] %vm235_vm0, %v7378_v0 }
  0x60   : > { %284 = vst.msk [vmem:[#allocation2 + $0x180] sm:$0xff] %vm235_vm0, %v7378_v0  ;;  %285 = vst.msk [vmem:[#allocation2 + $0x188] sm:$0xff] %vm235_vm0, %v7378_v0 }
  0x61   : > { %286 = vst.msk [vmem:[#allocation2 + $0x190] sm:$0xff] %vm235_vm0, %v7378_v0  ;;  %287 = vst.msk [vmem:[#allocation2 + $0x198] sm:$0xff] %vm235_vm0, %v7378_v0 }
  0x62   : > { %288 = vst.msk [vmem:[#allocation2 + $0x1a0] sm:$0xff] %vm235_vm0, %v7378_v0  ;;  %289 = vst.msk [vmem:[#allocation2 + $0x1a8] sm:$0xff] %vm235_vm0, %v7378_v0 }
  0x63   : > { %290 = vst.msk [vmem:[#allocation2 + $0x1b0] sm:$0xff] %vm235_vm0, %v7378_v0  ;;  %291 = vst.msk [vmem:[#allocation2 + $0x1b8] sm:$0xff] %vm235_vm0, %v7378_v0 }
  0x64   : > { %292 = vst.msk [vmem:[#allocation2 + $0x1c0] sm:$0xff] %vm235_vm0, %v7378_v0  ;;  %293 = vst.msk [vmem:[#allocation2 + $0x1c8] sm:$0xff] %vm235_vm0, %v7378_v0 }
  0x65   : > { %294 = vst.msk [vmem:[#allocation2 + $0x1d0] sm:$0xff] %vm235_vm0, %v7378_v0  ;;  %295 = vst.msk [vmem:[#allocation2 + $0x1d8] sm:$0xff] %vm235_vm0, %v7378_v0 }
  0x66   : > { %296 = vst.msk [vmem:[#allocation2 + $0x1e0] sm:$0xff] %vm235_vm0, %v7378_v0  ;;  %297 = vst.msk [vmem:[#allocation2 + $0x1e8] sm:$0xff] %vm235_vm0, %v7378_v0 }
  0x67   : > { %298 = vst.msk [vmem:[#allocation2 + $0x1f0] sm:$0xff] %vm235_vm0, %v7378_v0  ;;  %299 = vst.msk [vmem:[#allocation2 + $0x1f8] sm:$0xff] %vm235_vm0, %v7378_v0 }
  0x68   : > { %300 = vst.msk [vmem:[#allocation2 + $0x200] sm:$0xff] %vm235_vm0, %v7378_v0  ;;  %301 = vst.msk [vmem:[#allocation2 + $0x208] sm:$0xff] %vm235_vm0, %v7378_v0 }
  0x69   : > { %302 = vst.msk [vmem:[#allocation2 + $0x210] sm:$0xff] %vm235_vm0, %v7378_v0  ;;  %303 = vst.msk [vmem:[#allocation2 + $0x218] sm:$0xff] %vm235_vm0, %v7378_v0 }
  0x6a   : > { %304 = vst.msk [vmem:[#allocation2 + $0x220] sm:$0xff] %vm235_vm0, %v7378_v0  ;;  %305 = vst.msk [vmem:[#allocation2 + $0x228] sm:$0xff] %vm235_vm0, %v7378_v0 }
  0x6b   : > { %306 = vst.msk [vmem:[#allocation2 + $0x230] sm:$0xff] %vm235_vm0, %v7378_v0  ;;  %307 = vst.msk [vmem:[#allocation2 + $0x238] sm:$0xff] %vm235_vm0, %v7378_v0 }
  0x6c   : > { %308 = vst.msk [vmem:[#allocation2 + $0x240] sm:$0xff] %vm235_vm0, %v7378_v0  ;;  %309 = vst.msk [vmem:[#allocation2 + $0x248] sm:$0xff] %vm235_vm0, %v7378_v0 }
  0x6d   : > { %310 = vst.msk [vmem:[#allocation2 + $0x250] sm:$0xff] %vm235_vm0, %v7378_v0  ;;  %311 = vst.msk [vmem:[#allocation2 + $0x258] sm:$0xff] %vm235_vm0, %v7378_v0 }
  0x6e   : > { %312 = vst.msk [vmem:[#allocation2 + $0x260] sm:$0xff] %vm235_vm0, %v7378_v0  ;;  %313 = vst.msk [vmem:[#allocation2 + $0x268] sm:$0xff] %vm235_vm0, %v7378_v0 }
  0x6f   : > { %314 = vst.msk [vmem:[#allocation2 + $0x270] sm:$0xff] %vm235_vm0, %v7378_v0  ;;  %315 = vst.msk [vmem:[#allocation2 + $0x278] sm:$0xff] %vm235_vm0, %v7378_v0 }
  0x70   : > { %316 = vst.msk [vmem:[#allocation2 + $0x280] sm:$0xff] %vm235_vm0, %v7378_v0  ;;  %317 = vst.msk [vmem:[#allocation2 + $0x288] sm:$0xff] %vm235_vm0, %v7378_v0 }
  0x71   : > { %318 = vst.msk [vmem:[#allocation2 + $0x290] sm:$0xff] %vm235_vm0, %v7378_v0  ;;  %319 = vst.msk [vmem:[#allocation2 + $0x298] sm:$0xff] %vm235_vm0, %v7378_v0 }
  0x72   : > { %320 = vst.msk [vmem:[#allocation2 + $0x2a0] sm:$0xff] %vm235_vm0, %v7378_v0  ;;  %321 = vst.msk [vmem:[#allocation2 + $0x2a8] sm:$0xff] %vm235_vm0, %v7378_v0 }
  0x73   : > { %322 = vst.msk [vmem:[#allocation2 + $0x2b0] sm:$0xff] %vm235_vm0, %v7378_v0  ;;  %323 = vst.msk [vmem:[#allocation2 + $0x2b8] sm:$0xff] %vm235_vm0, %v7378_v0 }
  0x74   : > { %324 = vst.msk [vmem:[#allocation2 + $0x2c0] sm:$0xff] %vm235_vm0, %v7378_v0  ;;  %325 = vst.msk [vmem:[#allocation2 + $0x2c8] sm:$0xff] %vm235_vm0, %v7378_v0 }
  0x75   : > { %326 = vst.msk [vmem:[#allocation2 + $0x2d0] sm:$0xff] %vm235_vm0, %v7378_v0  ;;  %327 = vst.msk [vmem:[#allocation2 + $0x2d8] sm:$0xff] %vm235_vm0, %v7378_v0 }
  0x76   : > { %328 = vst.msk [vmem:[#allocation2 + $0x2e0] sm:$0xff] %vm235_vm0, %v7378_v0  ;;  %329 = vst.msk [vmem:[#allocation2 + $0x2e8] sm:$0xff] %vm235_vm0, %v7378_v0 }
  0x77   : > { %330 = vst.msk [vmem:[#allocation2 + $0x2f0] sm:$0xff] %vm235_vm0, %v7378_v0  ;;  %331 = vst.msk [vmem:[#allocation2 + $0x2f8] sm:$0xff] %vm235_vm0, %v7378_v0 }
  0x78   : > { %332 = vst.msk [vmem:[#allocation2 + $0x300] sm:$0xff] %vm235_vm0, %v7378_v0  ;;  %333 = vst.msk [vmem:[#allocation2 + $0x308] sm:$0xff] %vm235_vm0, %v7378_v0 }
  0x79   : > { %334 = vst.msk [vmem:[#allocation2 + $0x310] sm:$0xff] %vm235_vm0, %v7378_v0  ;;  %335 = vst.msk [vmem:[#allocation2 + $0x318] sm:$0xff] %vm235_vm0, %v7378_v0 }
  0x7a   : > { %336 = vst.msk [vmem:[#allocation2 + $0x320] sm:$0xff] %vm235_vm0, %v7378_v0  ;;  %337 = vst.msk [vmem:[#allocation2 + $0x328] sm:$0xff] %vm235_vm0, %v7378_v0 }
  0x7b   : > { %338 = vst.msk [vmem:[#allocation2 + $0x330] sm:$0xff] %vm235_vm0, %v7378_v0  ;;  %339 = vst.msk [vmem:[#allocation2 + $0x338] sm:$0xff] %vm235_vm0, %v7378_v0 }
  0x7c   : > { %340 = vst.msk [vmem:[#allocation2 + $0x340] sm:$0xff] %vm235_vm0, %v7378_v0  ;;  %341 = vst.msk [vmem:[#allocation2 + $0x348] sm:$0xff] %vm235_vm0, %v7378_v0 }
  0x7d   : > { %342 = vst.msk [vmem:[#allocation2 + $0x350] sm:$0xff] %vm235_vm0, %v7378_v0  ;;  %343 = vst.msk [vmem:[#allocation2 + $0x358] sm:$0xff] %vm235_vm0, %v7378_v0 }
  0x7e   : > { %344 = vst.msk [vmem:[#allocation2 + $0x360] sm:$0xff] %vm235_vm0, %v7378_v0  ;;  %345 = vst.msk [vmem:[#allocation2 + $0x368] sm:$0xff] %vm235_vm0, %v7378_v0 }
  0x7f   : > { %346 = vst.msk [vmem:[#allocation2 + $0x370] sm:$0xff] %vm235_vm0, %v7378_v0  ;;  %347 = vst.msk [vmem:[#allocation2 + $0x378] sm:$0xff] %vm235_vm0, %v7378_v0 }
  0x80   : > { %348 = vst.msk [vmem:[#allocation2 + $0x380] sm:$0xff] %vm235_vm0, %v7378_v0  ;;  %349 = vst.msk [vmem:[#allocation2 + $0x388] sm:$0xff] %vm235_vm0, %v7378_v0 }
  0x81   : > { %350 = vst.msk [vmem:[#allocation2 + $0x390] sm:$0xff] %vm235_vm0, %v7378_v0  ;;  %351 = vst.msk [vmem:[#allocation2 + $0x398] sm:$0xff] %vm235_vm0, %v7378_v0 }
  0x82   : > { %352 = vst.msk [vmem:[#allocation2 + $0x3a0] sm:$0xff] %vm235_vm0, %v7378_v0  ;;  %353 = vst.msk [vmem:[#allocation2 + $0x3a8] sm:$0xff] %vm235_vm0, %v7378_v0 }
  0x83   : > { %354 = vst.msk [vmem:[#allocation2 + $0x3b0] sm:$0xff] %vm235_vm0, %v7378_v0  ;;  %355 = vst.msk [vmem:[#allocation2 + $0x3b8] sm:$0xff] %vm235_vm0, %v7378_v0 }
  0x84   : > { %356 = vst.msk [vmem:[#allocation2 + $0x3c0] sm:$0xff] %vm235_vm0, %v7378_v0  ;;  %357 = vst.msk [vmem:[#allocation2 + $0x3c8] sm:$0xff] %vm235_vm0, %v7378_v0 }
  0x85   : > { %358 = vst.msk [vmem:[#allocation2 + $0x3d0] sm:$0xff] %vm235_vm0, %v7378_v0  ;;  %359 = vst.msk [vmem:[#allocation2 + $0x3d8] sm:$0xff] %vm235_vm0, %v7378_v0 }
  0x86   : > { %360 = vst.msk [vmem:[#allocation2 + $0x3e0] sm:$0xff] %vm235_vm0, %v7378_v0  ;;  %361 = vst.msk [vmem:[#allocation2 + $0x3e8] sm:$0xff] %vm235_vm0, %v7378_v0 }
  0x87   : > { %362 = vst.msk [vmem:[#allocation2 + $0x3f0] sm:$0xff] %vm235_vm0, %v7378_v0  ;;  %363 = vst.msk [vmem:[#allocation2 + $0x3f8] sm:$0xff] %vm235_vm0, %v7378_v0 }
  0x88   : > { %364 = vst.msk [vmem:[#allocation2 + $0x400] sm:$0xff] %vm235_vm0, %v7378_v0  ;;  %365 = vst.msk [vmem:[#allocation2 + $0x408] sm:$0xff] %vm235_vm0, %v7378_v0 }
  0x89   : > { %366 = vst.msk [vmem:[#allocation2 + $0x410] sm:$0xff] %vm235_vm0, %v7378_v0  ;;  %367 = vst.msk [vmem:[#allocation2 + $0x418] sm:$0xff] %vm235_vm0, %v7378_v0 }
  0x8a   : > { %368 = vst.msk [vmem:[#allocation2 + $0x420] sm:$0xff] %vm235_vm0, %v7378_v0  ;;  %369 = vst.msk [vmem:[#allocation2 + $0x428] sm:$0xff] %vm235_vm0, %v7378_v0 }
  0x8b   : > { %370 = vst.msk [vmem:[#allocation2 + $0x430] sm:$0xff] %vm235_vm0, %v7378_v0  ;;  %371 = vst.msk [vmem:[#allocation2 + $0x438] sm:$0xff] %vm235_vm0, %v7378_v0 }
  0x8c   : > { %372 = vst.msk [vmem:[#allocation2 + $0x440] sm:$0xff] %vm235_vm0, %v7378_v0  ;;  %373 = vst.msk [vmem:[#allocation2 + $0x448] sm:$0xff] %vm235_vm0, %v7378_v0 }
  0x8d   : > { %374 = vst.msk [vmem:[#allocation2 + $0x450] sm:$0xff] %vm235_vm0, %v7378_v0  ;;  %375 = vst.msk [vmem:[#allocation2 + $0x458] sm:$0xff] %vm235_vm0, %v7378_v0 }
  0x8e   : > { %376 = vst.msk [vmem:[#allocation2 + $0x460] sm:$0xff] %vm235_vm0, %v7378_v0  ;;  %377 = vst.msk [vmem:[#allocation2 + $0x468] sm:$0xff] %vm235_vm0, %v7378_v0 }
  0x8f   : > { %378 = vst.msk [vmem:[#allocation2 + $0x470] sm:$0xff] %vm235_vm0, %v7378_v0  ;;  %379 = vst.msk [vmem:[#allocation2 + $0x478] sm:$0xff] %vm235_vm0, %v7378_v0 }
  0x90   : > { %380 = vst.msk [vmem:[#allocation2 + $0x480] sm:$0xff] %vm235_vm0, %v7378_v0  ;;  %381 = vst.msk [vmem:[#allocation2 + $0x488] sm:$0xff] %vm235_vm0, %v7378_v0 }
  0x91   : > { %382 = vst.msk [vmem:[#allocation2 + $0x490] sm:$0xff] %vm235_vm0, %v7378_v0  ;;  %383 = vst.msk [vmem:[#allocation2 + $0x498] sm:$0xff] %vm235_vm0, %v7378_v0 }
  0x92   : > { %384 = vst.msk [vmem:[#allocation2 + $0x4a0] sm:$0xff] %vm235_vm0, %v7378_v0  ;;  %385 = vst.msk [vmem:[#allocation2 + $0x4a8] sm:$0xff] %vm235_vm0, %v7378_v0 }
  0x93   : > { %386 = vst.msk [vmem:[#allocation2 + $0x4b0] sm:$0xff] %vm235_vm0, %v7378_v0  ;;  %387 = vst.msk [vmem:[#allocation2 + $0x4b8] sm:$0xff] %vm235_vm0, %v7378_v0 }
  0x94   : > { %388 = vst.msk [vmem:[#allocation2 + $0x4c0] sm:$0xff] %vm235_vm0, %v7378_v0  ;;  %389 = vst.msk [vmem:[#allocation2 + $0x4c8] sm:$0xff] %vm235_vm0, %v7378_v0 }
  0x95   : > { %390 = vst.msk [vmem:[#allocation2 + $0x4d0] sm:$0xff] %vm235_vm0, %v7378_v0  ;;  %391 = vst.msk [vmem:[#allocation2 + $0x4d8] sm:$0xff] %vm235_vm0, %v7378_v0 }
  0x96   : > { %392 = vst.msk [vmem:[#allocation2 + $0x4e0] sm:$0xff] %vm235_vm0, %v7378_v0  ;;  %393 = vst.msk [vmem:[#allocation2 + $0x4e8] sm:$0xff] %vm235_vm0, %v7378_v0 }
  0x97   : > { %394 = vst.msk [vmem:[#allocation2 + $0x4f0] sm:$0xff] %vm235_vm0, %v7378_v0  ;;  %395 = vst.msk [vmem:[#allocation2 + $0x4f8] sm:$0xff] %vm235_vm0, %v7378_v0 }
  0x98 PF: > { %v396_v1 = vld [vmem:[%s7553_s28] sm:$0xff]  ;;  %v397_v2 = vld [vmem:[%s7553_s28 + $0x8] sm:$0xff]  ;;  %v398_v3 = vld [vmem:[%s7553_s28 + $0x10] sm:$0xff]  ;;  %v7379_v4 = vmov 0   ;;  %vm3837_vm1 = vcmask 7168   ;;  %p6194_p7 = scmp.ne.s32.totalorder %s7356_s21, 1 }
  0x99   : > { %1404 = vmatprep.subr.bf16.mxu0 %v7379_v4  ;;  %6198 = vmatprep.subr.bf16.mxu1 %v7379_v4  ;;  %v428_v5 = vpack.c.bf16 %v397_v2, %v396_v1  ;;  %v399_v6 = vld [vmem:[%s7553_s28 + $0x18] sm:$0xff]  ;;  %v400_v8 = vld [vmem:[%s7553_s28 + $0x20] sm:$0xff]  ;;  %v401_v9 = vld [vmem:[%s7553_s28 + $0x28] sm:$0xff]  ;;  %vm5442_vm2 = vcmask (!%p6194_p7), 64512   ;;  %vm5770_vm3 = vcmask (!%p6194_p7), 57344  }
  0x9a   : > { %v429_v7 = vpack.c.bf16 %v399_v6, %v398_v3  ;;  %v430_v10 = vpack.c.bf16 %v401_v9, %v400_v8  ;;  %v402_v11 = vld [vmem:[%s7553_s28 + $0x30] sm:$0xff]  ;;  %v403_v12 = vld [vmem:[%s7553_s28 + $0x38] sm:$0xff]  ;;  %v404_v14 = vld [vmem:[%s7553_s28 + $0x40] sm:$0xff] }
  0x9b   : > { %1405 = vmatpush1.bf16.msra.mxu0 %v428_v5  ;;  %6214 = vmatpush1.bf16.msra.mxu1 %v428_v5  ;;  %v431_v13 = vpack.c.bf16 %v403_v12, %v402_v11  ;;  %v6340_v15 = vld [vmem:[%s9953_s1 + $0x4] ss:$8 sps:$4 sm:$0xff]   ;;  %v406_v19 = vld [vmem:[%s7553_s28 + $0x50] sm:$0xff]  ;;  %v407_v20 = vld [vmem:[%s7553_s28 + $0x58] sm:$0xff] }
  0x9c   : > { %1406 = vmatprep.subr.bf16.mxu0 %v7379_v4  ;;  %6199 = vmatprep.subr.bf16.mxu1 %v7379_v4  ;;  %v405_v16 = vld [vmem:[%s7553_s28 + $0x48] sm:$0xff]  ;;  %v433_v21 = vpack.c.bf16 %v407_v20, %v406_v19  ;;  %v408_v22 = vld [vmem:[%s7553_s28 + $0x60] sm:$0xff]  ;;  %v410_v25 = vld [vmem:[%s7553_s28 + $0x70] sm:$0xff] }
  0x9d   : > { %1436 = vmatprep.mubr.bf16.mxu0 %v6340_v15  ;;  %v6343_v17 = vld [vmem:[%s9953_s1 + $0x284] ss:$8 sps:$4 sm:$0xff]   ;;  %v432_v18 = vpack.c.bf16 %v405_v16, %v404_v14  ;;  %v411_v26 = vld [vmem:[%s7553_s28 + $0x78] sm:$0xff]  ;;  %v414_v31 = vld [vmem:[%s7553_s28 + $0x90] sm:$0xff] }
  0x9e   : > { %1756 = vmatprep.mubr.bf16.mxu1 %v6343_v17  ;;  %v409_v23 = vld [vmem:[%s7553_s28 + $0x68] sm:$0xff]  ;;  %v435_v27 = vpack.c.bf16 %v411_v26, %v410_v25  ;;  %v412_v28 = vld [vmem:[%s7553_s28 + $0x80] sm:$0xff]  ;;  %v415_v32 = vld [vmem:[%s7553_s28 + $0x98] sm:$0xff] }
  0x9f   : > { %1407 = vmatpush1.bf16.msra.mxu0 %v429_v7  ;;  %6215 = vmatpush1.bf16.msra.mxu1 %v429_v7  ;;  %v434_v24 = vpack.c.bf16 %v409_v23, %v408_v22  ;;  %v413_v29 = vld [vmem:[%s7553_s28 + $0x88] sm:$0xff]  ;;  %v437_v33 = vpack.c.bf16 %v415_v32, %v414_v31  ;;  %v416_v34 = vld [vmem:[%s7553_s28 + $0xa0] sm:$0xff]  ;;  %v418_v37 = vld [vmem:[%s7553_s28 + $0xb0] sm:$0xff] }
  0xa0   : > { %1408 = vmatprep.subr.bf16.mxu0 %v7379_v4  ;;  %6200 = vmatprep.subr.bf16.mxu1 %v7379_v4  ;;  %v436_v30 = vpack.c.bf16 %v413_v29, %v412_v28  ;;  %v417_v35 = vld [vmem:[%s7553_s28 + $0xa8] sm:$0xff]  ;;  %v419_v38 = vld [vmem:[%s7553_s28 + $0xb8] sm:$0xff]  ;;  %v420_v40 = vld [vmem:[%s7553_s28 + $0xc0] sm:$0xff] }
  0xa1   : > { %v438_v36 = vpack.c.bf16 %v417_v35, %v416_v34  ;;  %v439_v39 = vpack.c.bf16 %v419_v38, %v418_v37  ;;  %v421_v41 = vld [vmem:[%s7553_s28 + $0xc8] sm:$0xff]  ;;  %v422_v43 = vld [vmem:[%s7553_s28 + $0xd0] sm:$0xff]  ;;  %v423_v44 = vld [vmem:[%s7553_s28 + $0xd8] sm:$0xff] }
  0xa2   : > { %v440_v42 = vpack.c.bf16 %v421_v41, %v420_v40  ;;  %v441_v45 = vpack.c.bf16 %v423_v44, %v422_v43  ;;  %v424_v46 = vld [vmem:[%s7553_s28 + $0xe0] sm:$0xff]  ;;  %v425_v47 = vld [vmem:[%s7553_s28 + $0xe8] sm:$0xff]  ;;  %v426_v48 = vld [vmem:[%s7553_s28 + $0xf0] sm:$0xff] }
  0xa3   : > { %1409 = vmatpush1.bf16.msra.mxu0 %v430_v10  ;;  %6216 = vmatpush1.bf16.msra.mxu1 %v430_v10  ;;  %v442_v49 = vpack.c.bf16 %v425_v47, %v424_v46  ;;  %v427_v50 = vld [vmem:[%s7553_s28 + $0xf8] sm:$0xff]  ;;  %v6338_v52 = vld [vmem:[%s9953_s1] ss:$8 sps:$4 sm:$0xff]   ;;  %v6350_v58 = vld [vmem:[%s9953_s1 + $0x24] ss:$8 sps:$4 sm:$0xff]  }
  0xa4   : > { %1410 = vmatprep.subr.bf16.mxu0 %v7379_v4  ;;  %6201 = vmatprep.subr.bf16.mxu1 %v7379_v4  ;;  %v443_v51 = vpack.c.bf16 %v427_v50, %v426_v48  ;;  %v6341_v53 = vld [vmem:[%s9953_s1 + $0x280] ss:$8 sps:$4 sm:$0xff]   ;;  %v6344_v54 = vld [vmem:[%s9953_s1 + $0x14] ss:$8 sps:$4 sm:$0xff]   ;;  %v6348_v56 = vld [vmem:[%s9953_s1 + $0x10] ss:$8 sps:$4 sm:$0xff]  }
  0xa5   : > { %v6346_v55 = vld [vmem:[%s9953_s1 + $0x294] ss:$8 sps:$4 sm:$0xff]   ;;  %v6349_v57 = vld [vmem:[%s9953_s1 + $0x290] ss:$8 sps:$4 sm:$0xff]   ;;  %v6352_v59 = vld [vmem:[%s9953_s1 + $0x2a4] ss:$8 sps:$4 sm:$0xff]  }
  0xa6   : > { %v6354_v60 = vld [vmem:[%s9953_s1 + $0x20] ss:$8 sps:$4 sm:$0xff]   ;;  %v6356_v62 = vld [vmem:[%s9953_s1 + $0x34] ss:$8 sps:$4 sm:$0xff]   ;;  %v6360_v0 = vld [vmem:[%s9953_s1 + $0x30] ss:$8 sps:$4 sm:$0xff]  }
  0xa7   : > { %1411 = vmatpush1.bf16.msra.mxu0 %v431_v13  ;;  %6217 = vmatpush1.bf16.msra.mxu1 %v431_v13  ;;  %v6355_v61 = vld [vmem:[%s9953_s1 + $0x2a0] ss:$8 sps:$4 sm:$0xff]   ;;  %v6358_v63 = vld [vmem:[%s9953_s1 + $0x2b4] ss:$8 sps:$4 sm:$0xff]   ;;  %v6361_v1 = vld [vmem:[%s9953_s1 + $0x2b0] ss:$8 sps:$4 sm:$0xff]  }
  0xa8   : > { %1412 = vmatprep.subr.bf16.mxu0 %v7379_v4  ;;  %6202 = vmatprep.subr.bf16.mxu1 %v7379_v4  ;;  %v6362_v2 = vld [vmem:[%s9953_s1 + $0x44] ss:$8 sps:$4 sm:$0xff]   ;;  %v6367_v5 = vld [vmem:[%s9953_s1 + $0x2c0] ss:$8 sps:$4 sm:$0xff]   ;;  %v6368_v6 = vld [vmem:[%s9953_s1 + $0x54] ss:$8 sps:$4 sm:$0xff]  }
  0xa9   : > { %v6364_v3 = vld [vmem:[%s9953_s1 + $0x2c4] ss:$8 sps:$4 sm:$0xff]   ;;  %v6370_v7 = vld [vmem:[%s9953_s1 + $0x2d4] ss:$8 sps:$4 sm:$0xff]   ;;  %v6372_v8 = vld [vmem:[%s9953_s1 + $0x50] ss:$8 sps:$4 sm:$0xff]  }
  0xaa   : > { %v6373_v9 = vld [vmem:[%s9953_s1 + $0x2d0] ss:$8 sps:$4 sm:$0xff]   ;;  %v6374_v10 = vld [vmem:[%s9953_s1 + $0x64] ss:$8 sps:$4 sm:$0xff]   ;;  %v6378_v12 = vld [vmem:[%s9953_s1 + $0x60] ss:$8 sps:$4 sm:$0xff]  }
  0xab   : > { %1413 = vmatpush1.bf16.msra.mxu0 %v432_v18  ;;  %6218 = vmatpush1.bf16.msra.mxu1 %v432_v18  ;;  %v6376_v11 = vld [vmem:[%s9953_s1 + $0x2e4] ss:$8 sps:$4 sm:$0xff]   ;;  %v6379_v13 = vld [vmem:[%s9953_s1 + $0x2e0] ss:$8 sps:$4 sm:$0xff]   ;;  %v6380_v14 = vld [vmem:[%s9953_s1 + $0x74] ss:$8 sps:$4 sm:$0xff]  }
  0xac   : > { %1414 = vmatprep.subr.bf16.mxu0 %v7379_v4  ;;  %6203 = vmatprep.subr.bf16.mxu1 %v7379_v4  ;;  %v6382_v15 = vld [vmem:[%s9953_s1 + $0x2f4] ss:$8 sps:$4 sm:$0xff]   ;;  %v6384_v16 = vld [vmem:[%s9953_s1 + $0x70] ss:$8 sps:$4 sm:$0xff]   ;;  %v6386_v18 = vld [vmem:[%s9953_s1 + $0x84] ss:$8 sps:$4 sm:$0xff]  }
  0xad   : > { %v6385_v17 = vld [vmem:[%s9953_s1 + $0x2f0] ss:$8 sps:$4 sm:$0xff]   ;;  %v6388_v19 = vld [vmem:[%s9953_s1 + $0x304] ss:$8 sps:$4 sm:$0xff]   ;;  %v6390_v20 = vld [vmem:[%s9953_s1 + $0x80] ss:$8 sps:$4 sm:$0xff]  }
  0xae   : > { %v6392_v22 = vld [vmem:[%s9953_s1 + $0x94] ss:$8 sps:$4 sm:$0xff]   ;;  %v6397_v25 = vld [vmem:[%s9953_s1 + $0x310] ss:$8 sps:$4 sm:$0xff]   ;;  %v6398_v26 = vld [vmem:[%s9953_s1 + $0xa4] ss:$8 sps:$4 sm:$0xff]  }
  0xaf   : > { %1415 = vmatpush1.bf16.msra.mxu0 %v433_v21  ;;  %6219 = vmatpush1.bf16.msra.mxu1 %v433_v21  ;;  %v6391_v21 = vld [vmem:[%s9953_s1 + $0x300] ss:$8 sps:$4 sm:$0xff]   ;;  %v6394_v23 = vld [vmem:[%s9953_s1 + $0x314] ss:$8 sps:$4 sm:$0xff]   ;;  %v6408_v32 = vld [vmem:[%s9953_s1 + $0xb0] ss:$8 sps:$4 sm:$0xff]  }
  0xb0   : > { %1416 = vmatprep.subr.bf16.mxu0 %v7379_v4  ;;  %6204 = vmatprep.subr.bf16.mxu1 %v7379_v4  ;;  %v6402_v28 = vld [vmem:[%s9953_s1 + $0xa0] ss:$8 sps:$4 sm:$0xff]   ;;  %v6406_v31 = vld [vmem:[%s9953_s1 + $0x334] ss:$8 sps:$4 sm:$0xff]   ;;  %v6410_v34 = vld [vmem:[%s9953_s1 + $0xc4] ss:$8 sps:$4 sm:$0xff]  }
  0xb1   : > { %v6403_v29 = vld [vmem:[%s9953_s1 + $0x320] ss:$8 sps:$4 sm:$0xff]   ;;  %v6412_v35 = vld [vmem:[%s9953_s1 + $0x344] ss:$8 sps:$4 sm:$0xff]   ;;  %v6416_v38 = vld [vmem:[%s9953_s1 + $0xd4] ss:$8 sps:$4 sm:$0xff]  }
  0xb2   : > { %v6415_v37 = vld [vmem:[%s9953_s1 + $0x340] ss:$8 sps:$4 sm:$0xff]   ;;  %v6420_v40 = vld [vmem:[%s9953_s1 + $0xd0] ss:$8 sps:$4 sm:$0xff]   ;;  %v6424_v43 = vld [vmem:[%s9953_s1 + $0x364] ss:$8 sps:$4 sm:$0xff]  }
  0xb3   : > { %1417 = vmatpush1.bf16.msra.mxu0 %v434_v24  ;;  %6220 = vmatpush1.bf16.msra.mxu1 %v434_v24  ;;  %v6396_v24 = vld [vmem:[%s9953_s1 + $0x90] ss:$8 sps:$4 sm:$0xff]   ;;  %v6426_v44 = vld [vmem:[%s9953_s1 + $0xe0] ss:$8 sps:$4 sm:$0xff]   ;;  %v6428_v46 = vld [vmem:[%s9953_s1 + $0xf4] ss:$8 sps:$4 sm:$0xff]  }
  0xb4   : > { %1418 = vmatprep.subr.bf16.mxu0 %v7379_v4  ;;  %6205 = vmatprep.subr.bf16.mxu1 %v7379_v4  ;;  %v6421_v41 = vld [vmem:[%s9953_s1 + $0x350] ss:$8 sps:$4 sm:$0xff]   ;;  %v6430_v47 = vld [vmem:[%s9953_s1 + $0x374] ss:$8 sps:$4 sm:$0xff]   ;;  %v6434_v50 = vld [vmem:[%s9953_s1 + $0x104] ss:$8 sps:$4 sm:$0xff]  }
  0xb5   : > { %v6432_v48 = vld [vmem:[%s9953_s1 + $0xf0] ss:$8 sps:$4 sm:$0xff]  }
  0xb7   : > { %1419 = vmatpush1.bf16.msra.mxu0 %v435_v27  ;;  %6221 = vmatpush1.bf16.msra.mxu1 %v435_v27  ;;  %v6400_v27 = vld [vmem:[%s9953_s1 + $0x324] ss:$8 sps:$4 sm:$0xff]  }
  0xb8   : > { %1420 = vmatprep.subr.bf16.mxu0 %v7379_v4  ;;  %6206 = vmatprep.subr.bf16.mxu1 %v7379_v4 }
  0xbb   : > { %1421 = vmatpush1.bf16.msra.mxu0 %v436_v30  ;;  %6222 = vmatpush1.bf16.msra.mxu1 %v436_v30  ;;  %v6404_v30 = vld [vmem:[%s9953_s1 + $0xb4] ss:$8 sps:$4 sm:$0xff]  }
  0xbc   : > { %1422 = vmatprep.subr.bf16.mxu0 %v7379_v4  ;;  %6207 = vmatprep.subr.bf16.mxu1 %v7379_v4 }
  0xbf   : > { %1423 = vmatpush1.bf16.msra.mxu0 %v437_v33  ;;  %6223 = vmatpush1.bf16.msra.mxu1 %v437_v33  ;;  %v6409_v33 = vld [vmem:[%s9953_s1 + $0x330] ss:$8 sps:$4 sm:$0xff]  }
  0xc0   : > { %1424 = vmatprep.subr.bf16.mxu0 %v7379_v4  ;;  %6208 = vmatprep.subr.bf16.mxu1 %v7379_v4 }
  0xc3   : > { %1425 = vmatpush1.bf16.msra.mxu0 %v438_v36  ;;  %6224 = vmatpush1.bf16.msra.mxu1 %v438_v36  ;;  %v6414_v36 = vld [vmem:[%s9953_s1 + $0xc0] ss:$8 sps:$4 sm:$0xff]  }
  0xc4   : > { %1426 = vmatprep.subr.bf16.mxu0 %v7379_v4  ;;  %6209 = vmatprep.subr.bf16.mxu1 %v7379_v4 }
  0xc7   : > { %1427 = vmatpush1.bf16.msra.mxu0 %v439_v39  ;;  %6225 = vmatpush1.bf16.msra.mxu1 %v439_v39  ;;  %v6418_v39 = vld [vmem:[%s9953_s1 + $0x354] ss:$8 sps:$4 sm:$0xff]  }
  0xc8   : > { %1428 = vmatprep.subr.bf16.mxu0 %v7379_v4  ;;  %6210 = vmatprep.subr.bf16.mxu1 %v7379_v4 }
  0xcb   : > { %1429 = vmatpush1.bf16.msra.mxu0 %v440_v42  ;;  %6226 = vmatpush1.bf16.msra.mxu1 %v440_v42  ;;  %v6422_v42 = vld [vmem:[%s9953_s1 + $0xe4] ss:$8 sps:$4 sm:$0xff]  }
  0xcc   : > { %1430 = vmatprep.subr.bf16.mxu0 %v7379_v4  ;;  %6211 = vmatprep.subr.bf16.mxu1 %v7379_v4 }
  0xcf   : > { %1431 = vmatpush1.bf16.msra.mxu0 %v441_v45  ;;  %6227 = vmatpush1.bf16.msra.mxu1 %v441_v45  ;;  %v6427_v45 = vld [vmem:[%s9953_s1 + $0x360] ss:$8 sps:$4 sm:$0xff]  }
  0xd0   : > { %1432 = vmatprep.subr.bf16.mxu0 %v7379_v4  ;;  %6212 = vmatprep.subr.bf16.mxu1 %v7379_v4 }
  0xd3   : > { %1433 = vmatpush1.bf16.msra.mxu0 %v442_v49  ;;  %6228 = vmatpush1.bf16.msra.mxu1 %v442_v49  ;;  %v6433_v49 = vld [vmem:[%s9953_s1 + $0x370] ss:$8 sps:$4 sm:$0xff]  }
  0xd4   : > { %1434 = vmatprep.subr.bf16.mxu0 %v7379_v4  ;;  %6213 = vmatprep.subr.bf16.mxu1 %v7379_v4  ;;  %v6366_v4 = vld [vmem:[%s9953_s1 + $0x40] ss:$8 sps:$4 sm:$0xff]  }
  0xd7   : > { %1435 = vmatpush1.bf16.msra.mxu0 %v443_v51  ;;  %6229 = vmatpush1.bf16.msra.mxu1 %v443_v51  ;;  %v6436_v51 = vld [vmem:[%s9953_s1 + $0x384] ss:$8 sps:$4 sm:$0xff]  }
  0xda   : > { %1437 = vmatmul.mubr.bf16.vlgmr.msra.gmra.mrb[0].mxu0 %v6338_v52  ;;  %1757 = vmatmul.mubr.bf16.vlgmr.msra.gmra.mrb[0].mxu1 %v6341_v53  ;;  %v6438_v52 = vld [vmem:[%s9953_s1 + $0x100] ss:$8 sps:$4 sm:$0xff]  }
  0xdb   : > { %1444 = vmatprep.mubr.bf16.mxu0 %v6344_v54  ;;  %1764 = vmatprep.mubr.bf16.mxu1 %v6346_v55  ;;  %v6439_v53 = vld [vmem:[%s9953_s1 + $0x380] ss:$8 sps:$4 sm:$0xff]   ;;  %v6440_v54 = vld [vmem:[%s9953_s1 + $0x114] ss:$8 sps:$4 sm:$0xff]  }
  0xdc   : > { %v6442_v55 = vld [vmem:[%s9953_s1 + $0x394] ss:$8 sps:$4 sm:$0xff]  }
  0xe2   : > { %1445 = vmatmul.mubr.bf16.gmra.mrb[4].mxu0 %v6348_v56  ;;  %1765 = vmatmul.mubr.bf16.gmra.mrb[4].mxu1 %v6349_v57  ;;  %v6444_v56 = vld [vmem:[%s9953_s1 + $0x110] ss:$8 sps:$4 sm:$0xff]  }
  0xe3   : > { %1452 = vmatprep.mubr.bf16.mxu0 %v6350_v58  ;;  %1772 = vmatprep.mubr.bf16.mxu1 %v6352_v59  ;;  %v6445_v57 = vld [vmem:[%s9953_s1 + $0x390] ss:$8 sps:$4 sm:$0xff]   ;;  %v6446_v58 = vld [vmem:[%s9953_s1 + $0x124] ss:$8 sps:$4 sm:$0xff]  }
  0xe4   : > { %v6448_v59 = vld [vmem:[%s9953_s1 + $0x3a4] ss:$8 sps:$4 sm:$0xff]  }
  0xea   : > { %1453 = vmatmul.mubr.bf16.gmra.mrb[8].mxu0 %v6354_v60  ;;  %1773 = vmatmul.mubr.bf16.gmra.mrb[8].mxu1 %v6355_v61  ;;  %v6450_v60 = vld [vmem:[%s9953_s1 + $0x120] ss:$8 sps:$4 sm:$0xff]  }
  0xeb   : > { %1460 = vmatprep.mubr.bf16.mxu0 %v6356_v62  ;;  %1780 = vmatprep.mubr.bf16.mxu1 %v6358_v63  ;;  %v6451_v61 = vld [vmem:[%s9953_s1 + $0x3a0] ss:$8 sps:$4 sm:$0xff]   ;;  %v6452_v62 = vld [vmem:[%s9953_s1 + $0x134] ss:$8 sps:$4 sm:$0xff]  }
  0xec   : > { %v6454_v63 = vld [vmem:[%s9953_s1 + $0x3b4] ss:$8 sps:$4 sm:$0xff]  }
  0xf2   : > { %1461 = vmatmul.mubr.bf16.gmra.mrb[12].mxu0 %v6360_v0  ;;  %1781 = vmatmul.mubr.bf16.gmra.mrb[12].mxu1 %v6361_v1  ;;  %v6456_v0 = vld [vmem:[%s9953_s1 + $0x130] ss:$8 sps:$4 sm:$0xff]  }
  0xf3   : > { %1468 = vmatprep.mubr.bf16.mxu0 %v6362_v2  ;;  %1788 = vmatprep.mubr.bf16.mxu1 %v6364_v3  ;;  %v6457_v1 = vld [vmem:[%s9953_s1 + $0x3b0] ss:$8 sps:$4 sm:$0xff]   ;;  %v6458_v2 = vld [vmem:[%s9953_s1 + $0x144] ss:$8 sps:$4 sm:$0xff]  }
  0xf4   : > { %v6460_v3 = vld [vmem:[%s9953_s1 + $0x3c4] ss:$8 sps:$4 sm:$0xff]  }
  0xfa   : > { %1469 = vmatmul.mubr.bf16.gmra.mrb[16].mxu0 %v6366_v4  ;;  %1789 = vmatmul.mubr.bf16.gmra.mrb[16].mxu1 %v6367_v5  ;;  %v6462_v4 = vld [vmem:[%s9953_s1 + $0x140] ss:$8 sps:$4 sm:$0xff]  }
  0xfb   : > { %1476 = vmatprep.mubr.bf16.mxu0 %v6368_v6  ;;  %1796 = vmatprep.mubr.bf16.mxu1 %v6370_v7  ;;  %v6463_v5 = vld [vmem:[%s9953_s1 + $0x3c0] ss:$8 sps:$4 sm:$0xff]   ;;  %v6464_v6 = vld [vmem:[%s9953_s1 + $0x154] ss:$8 sps:$4 sm:$0xff]  }
  0xfc   : > { %v6466_v7 = vld [vmem:[%s9953_s1 + $0x3d4] ss:$8 sps:$4 sm:$0xff]  }
 0x102   : > { %1477 = vmatmul.mubr.bf16.gmra.mrb[20].mxu0 %v6372_v8  ;;  %1797 = vmatmul.mubr.bf16.gmra.mrb[20].mxu1 %v6373_v9  ;;  %v6468_v8 = vld [vmem:[%s9953_s1 + $0x150] ss:$8 sps:$4 sm:$0xff]  }
 0x103   : > { %1484 = vmatprep.mubr.bf16.mxu0 %v6374_v10  ;;  %1804 = vmatprep.mubr.bf16.mxu1 %v6376_v11  ;;  %v6469_v9 = vld [vmem:[%s9953_s1 + $0x3d0] ss:$8 sps:$4 sm:$0xff]   ;;  %v6470_v10 = vld [vmem:[%s9953_s1 + $0x164] ss:$8 sps:$4 sm:$0xff]  }
 0x104   : > { %v6472_v11 = vld [vmem:[%s9953_s1 + $0x3e4] ss:$8 sps:$4 sm:$0xff]  }
 0x10a   : > { %1485 = vmatmul.mubr.bf16.gmra.mrb[24].mxu0 %v6378_v12  ;;  %1805 = vmatmul.mubr.bf16.gmra.mrb[24].mxu1 %v6379_v13  ;;  %v6474_v12 = vld [vmem:[%s9953_s1 + $0x160] ss:$8 sps:$4 sm:$0xff]  }
 0x10b   : > { %1492 = vmatprep.mubr.bf16.mxu0 %v6380_v14  ;;  %1812 = vmatprep.mubr.bf16.mxu1 %v6382_v15  ;;  %v6475_v13 = vld [vmem:[%s9953_s1 + $0x3e0] ss:$8 sps:$4 sm:$0xff]   ;;  %v6476_v14 = vld [vmem:[%s9953_s1 + $0x174] ss:$8 sps:$4 sm:$0xff]  }
 0x10c   : > { %v6478_v15 = vld [vmem:[%s9953_s1 + $0x3f4] ss:$8 sps:$4 sm:$0xff]  }
 0x112   : > { %1493 = vmatmul.mubr.bf16.gmra.mrb[28].mxu0 %v6384_v16  ;;  %1813 = vmatmul.mubr.bf16.gmra.mrb[28].mxu1 %v6385_v17  ;;  %v6480_v16 = vld [vmem:[%s9953_s1 + $0x170] ss:$8 sps:$4 sm:$0xff]  }
 0x113   : > { %1500 = vmatprep.mubr.bf16.mxu0 %v6386_v18  ;;  %1820 = vmatprep.mubr.bf16.mxu1 %v6388_v19  ;;  %v6481_v17 = vld [vmem:[%s9953_s1 + $0x3f0] ss:$8 sps:$4 sm:$0xff]   ;;  %v6482_v18 = vld [vmem:[%s9953_s1 + $0x184] ss:$8 sps:$4 sm:$0xff]  }
 0x114   : > { %v6484_v19 = vld [vmem:[%s9953_s1 + $0x404] ss:$8 sps:$4 sm:$0xff]  }
 0x11a   : > { %1501 = vmatmul.mubr.bf16.gmra.mrb[32].mxu0 %v6390_v20  ;;  %1821 = vmatmul.mubr.bf16.gmra.mrb[32].mxu1 %v6391_v21  ;;  %v6486_v20 = vld [vmem:[%s9953_s1 + $0x180] ss:$8 sps:$4 sm:$0xff]  }
 0x11b   : > { %1508 = vmatprep.mubr.bf16.mxu0 %v6392_v22  ;;  %1828 = vmatprep.mubr.bf16.mxu1 %v6394_v23  ;;  %v6487_v21 = vld [vmem:[%s9953_s1 + $0x400] ss:$8 sps:$4 sm:$0xff]   ;;  %v6488_v22 = vld [vmem:[%s9953_s1 + $0x194] ss:$8 sps:$4 sm:$0xff]  }
 0x11c   : > { %v6490_v23 = vld [vmem:[%s9953_s1 + $0x414] ss:$8 sps:$4 sm:$0xff]  }
 0x122   : > { %1509 = vmatmul.mubr.bf16.gmra.mrb[36].mxu0 %v6396_v24  ;;  %1829 = vmatmul.mubr.bf16.gmra.mrb[36].mxu1 %v6397_v25  ;;  %v6492_v24 = vld [vmem:[%s9953_s1 + $0x190] ss:$8 sps:$4 sm:$0xff]  }
 0x123   : > { %1516 = vmatprep.mubr.bf16.mxu0 %v6398_v26  ;;  %1836 = vmatprep.mubr.bf16.mxu1 %v6400_v27  ;;  %v6493_v25 = vld [vmem:[%s9953_s1 + $0x410] ss:$8 sps:$4 sm:$0xff]   ;;  %v6494_v26 = vld [vmem:[%s9953_s1 + $0x1a4] ss:$8 sps:$4 sm:$0xff]  }
 0x124   : > { %v6496_v27 = vld [vmem:[%s9953_s1 + $0x424] ss:$8 sps:$4 sm:$0xff]  }
 0x12a   : > { %1517 = vmatmul.mubr.bf16.gmra.mrb[40].mxu0 %v6402_v28  ;;  %1837 = vmatmul.mubr.bf16.gmra.mrb[40].mxu1 %v6403_v29  ;;  %v6498_v28 = vld [vmem:[%s9953_s1 + $0x1a0] ss:$8 sps:$4 sm:$0xff]  }
 0x12b   : > { %1524 = vmatprep.mubr.bf16.mxu0 %v6404_v30  ;;  %1844 = vmatprep.mubr.bf16.mxu1 %v6406_v31  ;;  %v6499_v29 = vld [vmem:[%s9953_s1 + $0x420] ss:$8 sps:$4 sm:$0xff]   ;;  %v6500_v30 = vld [vmem:[%s9953_s1 + $0x1b4] ss:$8 sps:$4 sm:$0xff]  }
 0x12c   : > { %v6502_v31 = vld [vmem:[%s9953_s1 + $0x434] ss:$8 sps:$4 sm:$0xff]  }
 0x132   : > { %1525 = vmatmul.mubr.bf16.gmra.mrb[44].mxu0 %v6408_v32  ;;  %1845 = vmatmul.mubr.bf16.gmra.mrb[44].mxu1 %v6409_v33 }
 0x133   : > { %1532 = vmatprep.mubr.bf16.mxu0 %v6410_v34  ;;  %1852 = vmatprep.mubr.bf16.mxu1 %v6412_v35  ;;  %v6504_v34 = vld [vmem:[%s9953_s1 + $0x1b0] ss:$8 sps:$4 sm:$0xff]  }
 0x134   : > { %v6505_v35 = vld [vmem:[%s9953_s1 + $0x430] ss:$8 sps:$4 sm:$0xff]  }
 0x13a   : > { %1533 = vmatmul.mubr.bf16.gmra.mrb[48].mxu0 %v6414_v36  ;;  %1853 = vmatmul.mubr.bf16.gmra.mrb[48].mxu1 %v6415_v37 }
 0x13b   : > { %1540 = vmatprep.mubr.bf16.mxu0 %v6416_v38  ;;  %1860 = vmatprep.mubr.bf16.mxu1 %v6418_v39 }
 0x142   : > { %1541 = vmatmul.mubr.bf16.gmra.mrb[52].mxu0 %v6420_v40  ;;  %1861 = vmatmul.mubr.bf16.gmra.mrb[52].mxu1 %v6421_v41 }
 0x143   : > { %1548 = vmatprep.mubr.bf16.mxu0 %v6422_v42  ;;  %1868 = vmatprep.mubr.bf16.mxu1 %v6424_v43  ;;  %v6506_v42 = vld [vmem:[%s9953_s1 + $0x1c4] ss:$8 sps:$4 sm:$0xff]  }
 0x144   : > { %v6508_v43 = vld [vmem:[%s9953_s1 + $0x444] ss:$8 sps:$4 sm:$0xff]  }
 0x14a   : > { %1549 = vmatmul.mubr.bf16.gmra.mrb[56].mxu0 %v6426_v44  ;;  %1869 = vmatmul.mubr.bf16.gmra.mrb[56].mxu1 %v6427_v45 }
 0x14b   : > { %1556 = vmatprep.mubr.bf16.mxu0 %v6428_v46  ;;  %1876 = vmatprep.mubr.bf16.mxu1 %v6430_v47 }
 0x152   : > { %1557 = vmatmul.mubr.bf16.gmra.mrb[60].mxu0 %v6432_v48  ;;  %1877 = vmatmul.mubr.bf16.gmra.mrb[60].mxu1 %v6433_v49 }
 0x153   : > { %1564 = vmatprep.mubr.bf16.mxu0 %v6434_v50  ;;  %1884 = vmatprep.mubr.bf16.mxu1 %v6436_v51  ;;  %v6510_v50 = vld [vmem:[%s9953_s1 + $0x1c0] ss:$8 sps:$4 sm:$0xff]  }
 0x154   : > { %v6511_v51 = vld [vmem:[%s9953_s1 + $0x440] ss:$8 sps:$4 sm:$0xff]  }
 0x15a   : > { %1565 = vmatmul.mubr.bf16.gmra.mrb[64].mxu0 %v6438_v52  ;;  %1885 = vmatmul.mubr.bf16.gmra.mrb[64].mxu1 %v6439_v53 }
 0x15b   : > { %1572 = vmatprep.mubr.bf16.mxu0 %v6440_v54  ;;  %1892 = vmatprep.mubr.bf16.mxu1 %v6442_v55 }
 0x162   : > { %1573 = vmatmul.mubr.bf16.gmra.mrb[68].mxu0 %v6444_v56  ;;  %1893 = vmatmul.mubr.bf16.gmra.mrb[68].mxu1 %v6445_v57 }
 0x163   : > { %1580 = vmatprep.mubr.bf16.mxu0 %v6446_v58  ;;  %1900 = vmatprep.mubr.bf16.mxu1 %v6448_v59  ;;  %v6512_v58 = vld [vmem:[%s9953_s1 + $0x1d4] ss:$8 sps:$4 sm:$0xff]  }
 0x164   : > { %v6514_v59 = vld [vmem:[%s9953_s1 + $0x454] ss:$8 sps:$4 sm:$0xff]  }
 0x16a   : > { %1581 = vmatmul.mubr.bf16.gmra.mrb[72].mxu0 %v6450_v60  ;;  %1901 = vmatmul.mubr.bf16.gmra.mrb[72].mxu1 %v6451_v61 }
 0x16b   : > { %1588 = vmatprep.mubr.bf16.mxu0 %v6452_v62  ;;  %1908 = vmatprep.mubr.bf16.mxu1 %v6454_v63 }
 0x172   : > { %1589 = vmatmul.mubr.bf16.gmra.mrb[76].mxu0 %v6456_v0  ;;  %1909 = vmatmul.mubr.bf16.gmra.mrb[76].mxu1 %v6457_v1 }
 0x173   : > { %1596 = vmatprep.mubr.bf16.mxu0 %v6458_v2  ;;  %1916 = vmatprep.mubr.bf16.mxu1 %v6460_v3 }
 0x17a   : > { %1597 = vmatmul.mubr.bf16.gmra.mrb[80].mxu0 %v6462_v4  ;;  %1917 = vmatmul.mubr.bf16.gmra.mrb[80].mxu1 %v6463_v5  ;;  %v6516_v5 = vld [vmem:[%s9953_s1 + $0x1d0] ss:$8 sps:$4 sm:$0xff]  }
 0x17b   : > { %1604 = vmatprep.mubr.bf16.mxu0 %v6464_v6  ;;  %1924 = vmatprep.mubr.bf16.mxu1 %v6466_v7 }
 0x182   : > { %1605 = vmatmul.mubr.bf16.gmra.mrb[84].mxu0 %v6468_v8  ;;  %1925 = vmatmul.mubr.bf16.gmra.mrb[84].mxu1 %v6469_v9 }
 0x183   : > { %1612 = vmatprep.mubr.bf16.mxu0 %v6470_v10  ;;  %1932 = vmatprep.mubr.bf16.mxu1 %v6472_v11  ;;  %v6517_v10 = vld [vmem:[%s9953_s1 + $0x450] ss:$8 sps:$4 sm:$0xff]  }
 0x18a   : > { %1613 = vmatmul.mubr.bf16.gmra.mrb[88].mxu0 %v6474_v12  ;;  %1933 = vmatmul.mubr.bf16.gmra.mrb[88].mxu1 %v6475_v13 }
 0x18b   : > { %1620 = vmatprep.mubr.bf16.mxu0 %v6476_v14  ;;  %1940 = vmatprep.mubr.bf16.mxu1 %v6478_v15 }
 0x192   : > { %1621 = vmatmul.mubr.bf16.gmra.mrb[92].mxu0 %v6480_v16  ;;  %1941 = vmatmul.mubr.bf16.gmra.mrb[92].mxu1 %v6481_v17  ;;  %v6518_v17 = vld [vmem:[%s9953_s1 + $0x1e4] ss:$8 sps:$4 sm:$0xff]  }
 0x193   : > { %1628 = vmatprep.mubr.bf16.mxu0 %v6482_v18  ;;  %1948 = vmatprep.mubr.bf16.mxu1 %v6484_v19  ;;  %v6520_v18 = vld [vmem:[%s9953_s1 + $0x464] ss:$8 sps:$4 sm:$0xff]  }
 0x19a   : > { %1629 = vmatmul.mubr.bf16.gmra.mrb[96].mxu0 %v6486_v20  ;;  %1949 = vmatmul.mubr.bf16.gmra.mrb[96].mxu1 %v6487_v21 }
 0x19b   : > { %1636 = vmatprep.mubr.bf16.mxu0 %v6488_v22  ;;  %1956 = vmatprep.mubr.bf16.mxu1 %v6490_v23 }
 0x1a2   : > { %1637 = vmatmul.mubr.bf16.gmra.mrb[100].mxu0 %v6492_v24  ;;  %1957 = vmatmul.mubr.bf16.gmra.mrb[100].mxu1 %v6493_v25 }
 0x1a3   : > { %1644 = vmatprep.mubr.bf16.mxu0 %v6494_v26  ;;  %1964 = vmatprep.mubr.bf16.mxu1 %v6496_v27 }
 0x1aa   : > { %1645 = vmatmul.mubr.bf16.gmra.mrb[104].mxu0 %v6498_v28  ;;  %1965 = vmatmul.mubr.bf16.gmra.mrb[104].mxu1 %v6499_v29  ;;  %v6522_v29 = vld [vmem:[%s9953_s1 + $0x1e0] ss:$8 sps:$4 sm:$0xff]  }
 0x1ab   : > { %1652 = vmatprep.mubr.bf16.mxu0 %v6500_v30  ;;  %1972 = vmatprep.mubr.bf16.mxu1 %v6502_v31 }
 0x1ad   : > { %v8279_v32 = vpop.f32.mrb[0].mxu0  ;;  %v8281_v33 = vpop.f32.mrb[0].mxu1 }
 0x1ae   : > { %v6034_v36 = vmul.f32 -1.442695, %v8279_v32  ;;  %v6114_v37 = vmul.f32 -1.442695, %v8281_v33  ;;  %v1440_v38 = vpop.f32.mrb[1].mxu0  ;;  %v1760_v39 = vpop.f32.mrb[1].mxu1 }
 0x1af   : > { %v8291_v40 = vpop.f32.mrb[2].mxu0  ;;  %v8293_v41 = vpop.f32.mrb[2].mxu1 }
 0x1b0   : > { %6578 = vpow2.f32 %v6034_v36  ;;  %v6035_v44 = vmul.f32 -1.442695, %v8291_v40  ;;  %v6115_v45 = vmul.f32 -1.442695, %v8293_v41  ;;  %v1443_v46 = vpop.f32.mrb[3].mxu0  ;;  %v1763_v47 = vpop.f32.mrb[3].mxu1 }
 0x1b1   : > { %6580 = vpow2.f32 %v6114_v37  ;;  %v6523_v36 = vld [vmem:[%s9953_s1 + $0x460] ss:$8 sps:$4 sm:$0xff]   ;;  %v6524_v46 = vld [vmem:[%s9953_s1 + $0x1f4] ss:$8 sps:$4 sm:$0xff]  }
 0x1b2   : > { %6582 = vpow2.f32 %v6035_v44  ;;  %1653 = vmatmul.mubr.bf16.gmra.mrb[108].mxu0 %v6504_v34  ;;  %1973 = vmatmul.mubr.bf16.gmra.mrb[108].mxu1 %v6505_v35 }
 0x1b3   : > { %6584 = vpow2.f32 %v6115_v45  ;;  %1660 = vmatprep.mubr.bf16.mxu0 %v6506_v42  ;;  %1980 = vmatprep.mubr.bf16.mxu1 %v6508_v43 }
 0x1b5   : > { %v8303_v48 = vpop.f32.mrb[4].mxu0  ;;  %v8305_v49 = vpop.f32.mrb[4].mxu1 }
 0x1b6   : > { %v6036_v52 = vmul.f32 -1.442695, %v8303_v48  ;;  %v6116_v53 = vmul.f32 -1.442695, %v8305_v49  ;;  %v1448_v54 = vpop.f32.mrb[5].mxu0  ;;  %v1768_v55 = vpop.f32.mrb[5].mxu1 }
 0x1b7   : > { %v8315_v56 = vpop.f32.mrb[6].mxu0  ;;  %v8317_v57 = vpop.f32.mrb[6].mxu1  ;;  %v6526_v54 = vld [vmem:[%s9953_s1 + $0x474] ss:$8 sps:$4 sm:$0xff]  }
 0x1b8   : > { %6586 = vpow2.f32 %v6036_v52  ;;  %v6037_v60 = vmul.f32 -1.442695, %v8315_v56  ;;  %v6117_v61 = vmul.f32 -1.442695, %v8317_v57  ;;  %v1451_v62 = vpop.f32.mrb[7].mxu0  ;;  %v1771_v63 = vpop.f32.mrb[7].mxu1 }
 0x1b9   : > { %6588 = vpow2.f32 %v6116_v53 }
 0x1ba   : > { %v6579_v0 = vpop.eup %6578  ;;  %6590 = vpow2.f32 %v6037_v60  ;;  %1661 = vmatmul.mubr.bf16.gmra.mrb[112].mxu0 %v6510_v50  ;;  %1981 = vmatmul.mubr.bf16.gmra.mrb[112].mxu1 %v6511_v51 }
 0x1bb   : > { %v6581_v1 = vpop.eup %6580  ;;  %v2557_v2 = vadd.f32 1.0, %v6579_v0  ;;  %6592 = vpow2.f32 %v6117_v61  ;;  %1668 = vmatprep.mubr.bf16.mxu0 %v6512_v58  ;;  %1988 = vmatprep.mubr.bf16.mxu1 %v6514_v59 }
 0x1bc   : > { %v6583_v3 = vpop.eup %6582  ;;  %v2637_v4 = vadd.f32 1.0, %v6581_v1 }
 0x1bd   : > { %v6585_v6 = vpop.eup %6584  ;;  %6594 = vrcp.f32 %v2557_v2  ;;  %v2558_v7 = vadd.f32 1.0, %v6583_v3  ;;  %v8330_v8 = vpop.f32.mrb[8].mxu0 }
 0x1be   : > { %v8332_v9 = vpop.f32.mrb[8].mxu1  ;;  %6596 = vrcp.f32 %v2637_v4  ;;  %v2638_v11 = vadd.f32 1.0, %v6585_v6  ;;  %v6038_v12 = vmul.f32 -1.442695, %v8330_v8  ;;  %v1456_v14 = vpop.f32.mrb[9].mxu0 }
 0x1bf   : > { %v6118_v13 = vmul.f32 -1.442695, %v8332_v9  ;;  %6598 = vrcp.f32 %v2558_v7  ;;  %v1776_v15 = vpop.f32.mrb[9].mxu1  ;;  %v8339_v16 = vpop.f32.mrb[10].mxu0 }
 0x1c0   : > { %6600 = vrcp.f32 %v2638_v11  ;;  %v6039_v19 = vmul.f32 -1.442695, %v8339_v16  ;;  %v8348_v20 = vpop.f32.mrb[10].mxu1  ;;  %v1459_v21 = vpop.f32.mrb[11].mxu0  ;;  %v6529_v11 = vld [vmem:[%s9953_s1 + $0x470] ss:$8 sps:$4 sm:$0xff]  }
 0x1c1   : > { %6602 = vpow2.f32 %v6038_v12  ;;  %v6119_v22 = vmul.f32 -1.442695, %v8348_v20  ;;  %v1779_v23 = vpop.f32.mrb[11].mxu1 }
 0x1c2   : > { %v6587_v24 = vpop.eup %6586  ;;  %6604 = vpow2.f32 %v6118_v13  ;;  %1669 = vmatmul.mubr.bf16.gmra.mrb[116].mxu0 %v6516_v5  ;;  %1989 = vmatmul.mubr.bf16.gmra.mrb[116].mxu1 %v6517_v10  ;;  %v6528_v5 = vld [vmem:[%s9953_s1 + $0x1f0] ss:$8 sps:$4 sm:$0xff]   ;;  %v6532_v23 = vld [vmem:[%s9953_s1 + $0x484] ss:$8 sps:$4 sm:$0xff]  }
 0x1c3   : > { %v6589_v25 = vpop.eup %6588  ;;  %v2559_v26 = vadd.f32 1.0, %v6587_v24  ;;  %6606 = vpow2.f32 %v6039_v19  ;;  %1676 = vmatprep.mubr.bf16.mxu0 %v6518_v17  ;;  %1996 = vmatprep.mubr.bf16.mxu1 %v6520_v18 }
 0x1c4   : > { %v6591_v27 = vpop.eup %6590  ;;  %v2639_v28 = vadd.f32 1.0, %v6589_v25  ;;  %6608 = vpow2.f32 %v6119_v22  ;;  %v6530_v22 = vld [vmem:[%s9953_s1 + $0x204] ss:$8 sps:$4 sm:$0xff]  }
 0x1c5   : > { %v6593_v30 = vpop.eup %6592  ;;  %6610 = vrcp.f32 %v2559_v26  ;;  %v2560_v31 = vadd.f32 1.0, %v6591_v27  ;;  %v8354_v34 = vpop.f32.mrb[12].mxu0 }
 0x1c6   : > { %v8356_v35 = vpop.f32.mrb[12].mxu1  ;;  %6612 = vrcp.f32 %v2639_v28  ;;  %v2640_v37 = vadd.f32 1.0, %v6593_v30  ;;  %v6040_v38 = vmul.f32 -1.442695, %v8354_v34  ;;  %v1464_v42 = vpop.f32.mrb[13].mxu0 }
 0x1c7   : > { %v6120_v39 = vmul.f32 -1.442695, %v8356_v35  ;;  %v6595_v43 = vpop.eup %6594  ;;  %6614 = vrcp.f32 %v2560_v31  ;;  %v1784_v44 = vpop.f32.mrb[13].mxu1 }
 0x1c8   : > { %v8363_v45 = vpop.f32.mrb[14].mxu0  ;;  %v6597_v47 = vpop.eup %6596  ;;  %6616 = vrcp.f32 %v2640_v37  ;;  %v3037_v53 = vmul.f32 %v6595_v43, %v8279_v32  ;;  %v6534_v43 = vld [vmem:[%s9953_s1 + $0x200] ss:$8 sps:$4 sm:$0xff]  }
 0x1c9   : > { %v6041_v50 = vmul.f32 -1.442695, %v8363_v45  ;;  %v8369_v51 = vpop.f32.mrb[14].mxu1  ;;  %v1467_v52 = vpop.f32.mrb[15].mxu0  ;;  %6618 = vpow2.f32 %v6040_v38  ;;  %v3117_v4 = vmul.f32 %v6597_v47, %v8281_v33 }
 0x1ca   : > { %v6599_v55 = vpop.eup %6598  ;;  %v6121_v58 = vmul.f32 -1.442695, %v8369_v51  ;;  %v1787_v59 = vpop.f32.mrb[15].mxu1  ;;  %6620 = vpow2.f32 %v6120_v39  ;;  %1677 = vmatmul.mubr.bf16.gmra.mrb[120].mxu0 %v6522_v29  ;;  %1997 = vmatmul.mubr.bf16.gmra.mrb[120].mxu1 %v6523_v36  ;;  %v6535_v52 = vld [vmem:[%s9953_s1 + $0x480] ss:$8 sps:$4 sm:$0xff]  }
 0x1cb   : > { %v6601_v60 = vpop.eup %6600  ;;  %6622 = vpow2.f32 %v6041_v50  ;;  %3357 = vadd.xlane.f32.xlu0 %v3037_v53  ;;  %1684 = vmatprep.mubr.bf16.mxu0 %v6524_v46  ;;  %v3038_v28 = vmul.f32 %v6599_v55, %v8291_v40 }
 0x1cc   : > { %v6603_v61 = vpop.eup %6602  ;;  %v3118_v62 = vmul.f32 %v6601_v60, %v8293_v41  ;;  %6624 = vpow2.f32 %v6121_v58  ;;  %2004 = vmatprep.mubr.bf16.mxu1 %v6526_v54 }
 0x1cd   : > { %v6605_v32 = vpop.eup %6604  ;;  %v2561_v63 = vadd.f32 1.0, %v6603_v61  ;;  %v8377_v2 = vpop.f32.mrb[16].mxu0  ;;  %v6536_v61 = vld [vmem:[%s9953_s1 + $0x214] ss:$8 sps:$4 sm:$0xff]  }
 0x1ce   : > { %v6607_v0 = vpop.eup %6606  ;;  %v2641_v1 = vadd.f32 1.0, %v6605_v32  ;;  %3519 = vadd.xlane.f32.xlu1 %v3118_v62  ;;  %v8379_v3 = vpop.f32.mrb[16].mxu1  ;;  %v6042_v7 = vmul.f32 -1.442695, %v8377_v2  ;;  %v6538_v62 = vld [vmem:[%s9953_s1 + $0x494] ss:$8 sps:$4 sm:$0xff]  }
 0x1cf   : > { %v6609_v6 = vpop.eup %6608  ;;  %6626 = vrcp.f32 %v2561_v63  ;;  %v2562_v41 = vadd.f32 1.0, %v6607_v0  ;;  %v1792_v10 = vpop.f32.mrb[17].mxu1  ;;  %v6122_v14 = vmul.f32 -1.442695, %v8379_v3  ;;  %3517 = vadd.xlane.f32.xlu0 %v3117_v4 }
 0x1d0   : > { %v6611_v12 = vpop.eup %6610  ;;  %6628 = vrcp.f32 %v2641_v1  ;;  %v2642_v13 = vadd.f32 1.0, %v6609_v6  ;;  %v1472_v33 = vpop.f32.mrb[17].mxu0 }
 0x1d1   : > { %v8390_v15 = vpop.f32.mrb[18].mxu1  ;;  %v6613_v17 = vpop.eup %6612  ;;  %6630 = vrcp.f32 %v2562_v41  ;;  %v3039_v19 = vmul.f32 %v6611_v12, %v8303_v48  ;;  %v6540_v41 = vld [vmem:[%s9953_s1 + $0x210] ss:$8 sps:$4 sm:$0xff]  }
 0x1d2   : > { %v8392_v18 = vpop.f32.mrb[18].mxu0  ;;  %v1795_v21 = vpop.f32.mrb[19].mxu1  ;;  %6632 = vrcp.f32 %v2642_v13  ;;  %v6123_v26 = vmul.f32 -1.442695, %v8390_v15  ;;  %1685 = vmatmul.mubr.bf16.gmra.mrb[124].mxu0 %v6528_v5  ;;  %2005 = vmatmul.mubr.bf16.gmra.mrb[124].mxu1 %v6529_v11  ;;  %v3119_v40 = vmul.f32 %v6613_v17, %v8305_v49 }
 0x1d3   : > { %v6615_v24 = vpop.eup %6614  ;;  %v6043_v25 = vmul.f32 -1.442695, %v8392_v18  ;;  %v1475_v27 = vpop.f32.mrb[19].mxu0  ;;  %6634 = vpow2.f32 %v6042_v7  ;;  %3359 = vadd.xlane.f32.xlu0 %v3038_v28  ;;  %3361 = vadd.xlane.f32.xlu1 %v3039_v19  ;;  %v6542_v21 = vld [vmem:[%s9953_s1 + $0x224] ss:$8 sps:$4 sm:$0xff]  }
 0x1d4   : > { %v6617_v29 = vpop.eup %6616  ;;  %6636 = vpow2.f32 %v6122_v14  ;;  %1692 = vmatprep.mubr.bf16.mxu0 %v6530_v22  ;;  %2012 = vmatprep.mubr.bf16.mxu1 %v6532_v23  ;;  %v3040_v42 = vmul.f32 %v6615_v24, %v8315_v56  ;;  %v6541_v14 = vld [vmem:[%s9953_s1 + $0x490] ss:$8 sps:$4 sm:$0xff]   ;;  %v6544_v22 = vld [vmem:[%s9953_s1 + $0x4a4] ss:$8 sps:$4 sm:$0xff]  }
 0x1d5   : > { %v6619_v48 = vpop.eup %6618  ;;  %6638 = vpow2.f32 %v6043_v25  ;;  %v8404_v38 = vpop.f32.mrb[20].mxu0  ;;  %v3120_v59 = vmul.f32 %v6617_v29, %v8317_v57 }
 0x1d6   : > { %v6621_v30 = vpop.eup %6620  ;;  %v2563_v31 = vadd.f32 1.0, %v6619_v48  ;;  %6640 = vpow2.f32 %v6123_v26  ;;  %v8406_v39 = vpop.f32.mrb[20].mxu1  ;;  %v6044_v47 = vmul.f32 -1.442695, %v8404_v38 }
 0x1d7   : > { %v6623_v36 = vpop.eup %6622  ;;  %v2643_v37 = vadd.f32 1.0, %v6621_v30  ;;  %v1800_v50 = vpop.f32.mrb[21].mxu1  ;;  %v6124_v49 = vmul.f32 -1.442695, %v8406_v39  ;;  %3521 = vadd.xlane.f32.xlu0 %v3119_v40  ;;  %3363 = vadd.xlane.f32.xlu1 %v3040_v42 }
 0x1d8   : > { %v6625_v44 = vpop.eup %6624  ;;  %6642 = vrcp.f32 %v2563_v31  ;;  %v2564_v46 = vadd.f32 1.0, %v6623_v36  ;;  %v1480_v56 = vpop.f32.mrb[21].mxu0 }
 0x1d9   : > { %6644 = vrcp.f32 %v2643_v37  ;;  %v2644_v53 = vadd.f32 1.0, %v6625_v44  ;;  %v8418_v54 = vpop.f32.mrb[22].mxu1  ;;  %v6627_v55 = vpop.eup %6626  ;;  %v6547_v56 = vld [vmem:[%s9953_s1 + $0x4a0] ss:$8 sps:$4 sm:$0xff]  }
 0x1da   : > { %6646 = vrcp.f32 %v2564_v46  ;;  %v8420_v58 = vpop.f32.mrb[22].mxu0  ;;  %v1803_v60 = vpop.f32.mrb[23].mxu1  ;;  %v6125_v0 = vmul.f32 -1.442695, %v8418_v54  ;;  %v3041_v4 = vmul.f32 %v6627_v55, %v8330_v8  ;;  %1693 = vmatmul.mubr.bf16.gmra.mrb[128].mxu0 %v6534_v43  ;;  %2013 = vmatmul.mubr.bf16.gmra.mrb[128].mxu1 %v6535_v52 }
 0x1db   : > { %v6629_v32 = vpop.eup %6628  ;;  %6648 = vrcp.f32 %v2644_v53  ;;  %v6045_v63 = vmul.f32 -1.442695, %v8420_v58  ;;  %v1483_v1 = vpop.f32.mrb[23].mxu0  ;;  %3523 = vadd.xlane.f32.xlu1 %v3120_v59  ;;  %1700 = vmatprep.mubr.bf16.mxu0 %v6536_v61  ;;  %v6548_v61 = vld [vmem:[%s9953_s1 + $0x234] ss:$8 sps:$4 sm:$0xff]  }
 0x1dc   : > { %v6631_v5 = vpop.eup %6630  ;;  %6650 = vpow2.f32 %v6044_v47  ;;  %3365 = vadd.xlane.f32.xlu0 %v3041_v4  ;;  %2020 = vmatprep.mubr.bf16.mxu1 %v6538_v62  ;;  %v3121_v12 = vmul.f32 %v6629_v32, %v8332_v9  ;;  %v6550_v62 = vld [vmem:[%s9953_s1 + $0x4b4] ss:$8 sps:$4 sm:$0xff]  }
 0x1dd   : > { %v6633_v57 = vpop.eup %6632  ;;  %6652 = vpow2.f32 %v6124_v49  ;;  %v8435_v8 = vpop.f32.mrb[24].mxu0  ;;  %v3042_v13 = vmul.f32 %v6631_v5, %v8339_v16 }
 0x1de   : > { %v6635_v6 = vpop.eup %6634  ;;  %6654 = vpow2.f32 %v6045_v63  ;;  %v8437_v11 = vpop.f32.mrb[24].mxu1  ;;  %v6046_v16 = vmul.f32 -1.442695, %v8435_v8  ;;  %v3122_v37 = vmul.f32 %v6633_v57, %v8348_v20  ;;  %v6546_v20 = vld [vmem:[%s9953_s1 + $0x220] ss:$8 sps:$4 sm:$0xff]  }
 0x1df   : > { %v6637_v7 = vpop.eup %6636  ;;  %v2565_v10 = vadd.f32 1.0, %v6635_v6  ;;  %6656 = vpow2.f32 %v6125_v0  ;;  %v1808_v19 = vpop.f32.mrb[25].mxu1  ;;  %3367 = vadd.xlane.f32.xlu1 %v3042_v13  ;;  %v6126_v28 = vmul.f32 -1.442695, %v8437_v11 }
 0x1e0   : > { %v6639_v33 = vpop.eup %6638  ;;  %v2645_v17 = vadd.f32 1.0, %v6637_v7  ;;  %3525 = vadd.xlane.f32.xlu0 %v3121_v12  ;;  %v1488_v24 = vpop.f32.mrb[25].mxu0 }
 0x1e1   : > { %v6641_v23 = vpop.eup %6640  ;;  %6658 = vrcp.f32 %v2565_v10  ;;  %v2566_v9 = vadd.f32 1.0, %v6639_v33  ;;  %v8451_v25 = vpop.f32.mrb[26].mxu1 }
 0x1e2   : > { %v6643_v26 = vpop.eup %6642  ;;  %6660 = vrcp.f32 %v2645_v17  ;;  %v2646_v27 = vadd.f32 1.0, %v6641_v23  ;;  %v8454_v29 = vpop.f32.mrb[26].mxu0  ;;  %v6127_v43 = vmul.f32 -1.442695, %v8451_v25  ;;  %1701 = vmatmul.mubr.bf16.gmra.mrb[132].mxu0 %v6540_v41  ;;  %2021 = vmatmul.mubr.bf16.gmra.mrb[132].mxu1 %v6541_v14 }
 0x1e3   : > { %v1811_v48 = vpop.f32.mrb[27].mxu1  ;;  %v6645_v30 = vpop.eup %6644  ;;  %6662 = vrcp.f32 %v2566_v9  ;;  %v6047_v31 = vmul.f32 -1.442695, %v8454_v29  ;;  %v3043_v40 = vmul.f32 %v6643_v26, %v8354_v34  ;;  %3527 = vadd.xlane.f32.xlu1 %v3122_v37  ;;  %1708 = vmatprep.mubr.bf16.mxu0 %v6542_v21  ;;  %v6553_v26 = vld [vmem:[%s9953_s1 + $0x4b0] ss:$8 sps:$4 sm:$0xff]  }
 0x1e4   : > { %v1491_v36 = vpop.f32.mrb[27].mxu0  ;;  %v6647_v42 = vpop.eup %6646  ;;  %6664 = vrcp.f32 %v2646_v27  ;;  %2028 = vmatprep.mubr.bf16.mxu1 %v6544_v22  ;;  %v3123_v53 = vmul.f32 %v6645_v30, %v8356_v35  ;;  %v6554_v27 = vld [vmem:[%s9953_s1 + $0x244] ss:$8 sps:$4 sm:$0xff]  }
 0x1e5   : > { %v6649_v44 = vpop.eup %6648  ;;  %6666 = vpow2.f32 %v6046_v16  ;;  %3369 = vadd.xlane.f32.xlu0 %v3043_v40  ;;  %v8463_v50 = vpop.f32.mrb[28].mxu0  ;;  %v3044_v49 = vmul.f32 %v6647_v42, %v8363_v45 }
 0x1e6   : > { %v6651_v46 = vpop.eup %6650  ;;  %6668 = vpow2.f32 %v6126_v28  ;;  %v8465_v52 = vpop.f32.mrb[28].mxu1  ;;  %v6048_v45 = vmul.f32 -1.442695, %v8463_v50  ;;  %v3124_v10 = vmul.f32 %v6649_v44, %v8369_v51 }
 0x1e7   : > { %v6653_v47 = vpop.eup %6652  ;;  %v2567_v34 = vadd.f32 1.0, %v6651_v46  ;;  %6670 = vpow2.f32 %v6047_v31  ;;  %v1816_v60 = vpop.f32.mrb[29].mxu1  ;;  %3371 = vadd.xlane.f32.xlu1 %v3044_v49  ;;  %v6128_v4 = vmul.f32 -1.442695, %v8465_v52  ;;  %v6556_v31 = vld [vmem:[%s9953_s1 + $0x4c4] ss:$8 sps:$4 sm:$0xff]  }
 0x1e8   : > { %v6655_v55 = vpop.eup %6654  ;;  %v2647_v59 = vadd.f32 1.0, %v6653_v47  ;;  %6672 = vpow2.f32 %v6127_v43  ;;  %v1496_v63 = vpop.f32.mrb[29].mxu0 }
 0x1e9   : > { %v6657_v32 = vpop.eup %6656  ;;  %6674 = vrcp.f32 %v2567_v34  ;;  %v2568_v35 = vadd.f32 1.0, %v6655_v55  ;;  %3529 = vadd.xlane.f32.xlu0 %v3123_v53  ;;  %v8479_v0 = vpop.f32.mrb[30].mxu1 }
 0x1ea   : > { %6676 = vrcp.f32 %v2647_v59  ;;  %v2648_v1 = vadd.f32 1.0, %v6657_v32  ;;  %v8482_v5 = vpop.f32.mrb[30].mxu0  ;;  %v1819_v57 = vpop.f32.mrb[31].mxu1  ;;  %v6129_v13 = vmul.f32 -1.442695, %v8479_v0  ;;  %1709 = vmatmul.mubr.bf16.gmra.mrb[136].mxu0 %v6546_v20  ;;  %2029 = vmatmul.mubr.bf16.gmra.mrb[136].mxu1 %v6547_v56 }
 0x1eb   : > { %v6659_v6 = vpop.eup %6658  ;;  %6678 = vrcp.f32 %v2568_v35  ;;  %v6049_v41 = vmul.f32 -1.442695, %v8482_v5  ;;  %v1499_v7 = vpop.f32.mrb[31].mxu0  ;;  %3531 = vadd.xlane.f32.xlu1 %v3124_v10  ;;  %1716 = vmatprep.mubr.bf16.mxu0 %v6548_v61 }
 0x1ec   : > { %v6661_v12 = vpop.eup %6660  ;;  %6680 = vrcp.f32 %v2648_v1  ;;  %v3045_v14 = vmul.f32 %v6659_v6, %v8377_v2  ;;  %2036 = vmatprep.mubr.bf16.mxu1 %v6550_v62  ;;  %v6552_v2 = vld [vmem:[%s9953_s1 + $0x230] ss:$8 sps:$4 sm:$0xff]   ;;  %v6559_v1 = vld [vmem:[%s9953_s1 + $0x4c0] ss:$8 sps:$4 sm:$0xff]   ;;  %v6562_v7 = vld [vmem:[%s9953_s1 + $0x4d4] ss:$8 sps:$4 sm:$0xff]  }
 0x1ed   : > { %v6663_v33 = vpop.eup %6662  ;;  %6682 = vpow2.f32 %v6048_v45  ;;  %v8488_v21 = vpop.f32.mrb[32].mxu0  ;;  %v3125_v24 = vmul.f32 %v6661_v12, %v8379_v3 }
 0x1ee   : > { %v6665_v17 = vpop.eup %6664  ;;  %6684 = vpow2.f32 %v6128_v4  ;;  %3373 = vadd.xlane.f32.xlu0 %v3045_v14  ;;  %v8490_v51 = vpop.f32.mrb[32].mxu1  ;;  %v3046_v22 = vmul.f32 %v6663_v33, %v8392_v18  ;;  %v6050_v37 = vmul.f32 -1.442695, %v8488_v21  ;;  %v6560_v4 = vld [vmem:[%s9953_s1 + $0x254] ss:$8 sps:$4 sm:$0xff]  }
 0x1ef   : > { %v6667_v19 = vpop.eup %6666  ;;  %6686 = vpow2.f32 %v6049_v41  ;;  %v1824_v16 = vpop.f32.mrb[33].mxu1  ;;  %v6130_v46 = vmul.f32 -1.442695, %v8490_v51  ;;  %v3126_v47 = vmul.f32 %v6665_v17, %v8390_v15 }
 0x1f0   : > { %v6669_v23 = vpop.eup %6668  ;;  %v2569_v9 = vadd.f32 1.0, %v6667_v19  ;;  %6688 = vpow2.f32 %v6129_v13  ;;  %3375 = vadd.xlane.f32.xlu1 %v3046_v22  ;;  %v1504_v48 = vpop.f32.mrb[33].mxu0 }
 0x1f1   : > { %v6671_v28 = vpop.eup %6670  ;;  %v2649_v18 = vadd.f32 1.0, %v6669_v23  ;;  %v8503_v30 = vpop.f32.mrb[34].mxu1  ;;  %v6564_v48 = vld [vmem:[%s9953_s1 + $0x250] ss:$8 sps:$4 sm:$0xff]  }
 0x1f2   : > { %v6673_v36 = vpop.eup %6672  ;;  %6690 = vrcp.f32 %v2569_v9  ;;  %v2570_v3 = vadd.f32 1.0, %v6671_v28  ;;  %3533 = vadd.xlane.f32.xlu0 %v3125_v24  ;;  %v8509_v40 = vpop.f32.mrb[34].mxu0  ;;  %1717 = vmatmul.mubr.bf16.gmra.mrb[140].mxu0 %v6552_v2  ;;  %v6131_v55 = vmul.f32 -1.442695, %v8503_v30 }
 0x1f3   : > { %v1827_v42 = vpop.f32.mrb[35].mxu1  ;;  %v6675_v43 = vpop.eup %6674  ;;  %6692 = vrcp.f32 %v2649_v18  ;;  %v2650_v44 = vadd.f32 1.0, %v6673_v36  ;;  %v6051_v53 = vmul.f32 -1.442695, %v8509_v40  ;;  %2037 = vmatmul.mubr.bf16.gmra.mrb[140].mxu1 %v6553_v26  ;;  %1724 = vmatprep.mubr.bf16.mxu0 %v6554_v27 }
 0x1f4   : > { %v1507_v20 = vpop.f32.mrb[35].mxu0  ;;  %v6677_v34 = vpop.eup %6676  ;;  %6694 = vrcp.f32 %v2570_v3  ;;  %v3047_v49 = vmul.f32 %v6675_v43, %v8404_v38  ;;  %3535 = vadd.xlane.f32.xlu1 %v3126_v47  ;;  %2044 = vmatprep.mubr.bf16.mxu1 %v6556_v31  ;;  %v6558_v38 = vld [vmem:[%s9953_s1 + $0x240] ss:$8 sps:$4 sm:$0xff]  }
 0x1f5   : > { %v6679_v56 = vpop.eup %6678  ;;  %6696 = vrcp.f32 %v2650_v44  ;;  %v8516_v15 = vpop.f32.mrb[36].mxu0  ;;  %v3127_v63 = vmul.f32 %v6677_v34, %v8406_v39  ;;  %v6566_v20 = vld [vmem:[%s9953_s1 + $0x264] ss:$8 sps:$4 sm:$0xff]  }
 0x1f6   : > { %v6681_v59 = vpop.eup %6680  ;;  %6698 = vpow2.f32 %v6050_v37  ;;  %3377 = vadd.xlane.f32.xlu0 %v3047_v49  ;;  %v8518_v61 = vpop.f32.mrb[36].mxu1  ;;  %v3048_v62 = vmul.f32 %v6679_v56, %v8420_v58  ;;  %v6052_v12 = vmul.f32 -1.442695, %v8516_v15  ;;  %v6565_v37 = vld [vmem:[%s9953_s1 + $0x4d0] ss:$8 sps:$4 sm:$0xff]  }
 0x1f7   : > { %v6683_v60 = vpop.eup %6682  ;;  %6700 = vpow2.f32 %v6130_v46  ;;  %v1832_v45 = vpop.f32.mrb[37].mxu1  ;;  %v6132_v17 = vmul.f32 -1.442695, %v8518_v61  ;;  %v3128_v22 = vmul.f32 %v6681_v59, %v8418_v54  ;;  %v6568_v49 = vld [vmem:[%s9953_s1 + $0x4e4] ss:$8 sps:$4 sm:$0xff]  }
 0x1f8   : > { %v6685_v32 = vpop.eup %6684  ;;  %v2571_v35 = vadd.f32 1.0, %v6683_v60  ;;  %6702 = vpow2.f32 %v6051_v53  ;;  %3379 = vadd.xlane.f32.xlu1 %v3048_v62  ;;  %v1512_v6 = vpop.f32.mrb[37].mxu0 }
 0x1f9   : > { %v6687_v57 = vpop.eup %6686  ;;  %v2651_v58 = vadd.f32 1.0, %v6685_v32  ;;  %6704 = vpow2.f32 %v6131_v55  ;;  %v8531_v41 = vpop.f32.mrb[38].mxu1  ;;  %v6570_v6 = vld [vmem:[%s9953_s1 + $0x260] ss:$8 sps:$4 sm:$0xff]  }
 0x1fa   : > { %v6689_v39 = vpop.eup %6688  ;;  %6706 = vrcp.f32 %v2571_v35  ;;  %v2572_v10 = vadd.f32 1.0, %v6687_v57  ;;  %3537 = vadd.xlane.f32.xlu0 %v3127_v63  ;;  %v8537_v13 = vpop.f32.mrb[38].mxu0  ;;  %1725 = vmatmul.mubr.bf16.gmra.mrb[144].mxu0 %v6558_v38  ;;  %v6133_v16 = vmul.f32 -1.442695, %v8531_v41 }
 0x1fb   : > { %v1835_v14 = vpop.f32.mrb[39].mxu1  ;;  %6708 = vrcp.f32 %v2651_v58  ;;  %v2652_v33 = vadd.f32 1.0, %v6689_v39  ;;  %v1515_v19 = vpop.f32.mrb[39].mxu0  ;;  %v6053_v23 = vmul.f32 -1.442695, %v8537_v13  ;;  %2045 = vmatmul.mubr.bf16.gmra.mrb[144].mxu1 %v6559_v1  ;;  %1732 = vmatprep.mubr.bf16.mxu0 %v6560_v4 }
 0x1fc   : > { %v6691_v2 = vpop.eup %6690  ;;  %6710 = vrcp.f32 %v2572_v10  ;;  %3539 = vadd.xlane.f32.xlu1 %v3128_v22  ;;  %2052 = vmatprep.mubr.bf16.mxu1 %v6562_v7  ;;  %v6572_v22 = vld [vmem:[%s9953_s1 + $0x274] ss:$8 sps:$4 sm:$0xff]  }
 0x1fd   : > { %v6693_v9 = vpop.eup %6692  ;;  %6712 = vrcp.f32 %v2652_v33  ;;  %v3049_v24 = vmul.f32 %v6691_v2, %v8435_v8  ;;  %v8544_v54 = vpop.f32.mrb[40].mxu0 }
 0x1fe   : > { %v6695_v26 = vpop.eup %6694  ;;  %6714 = vpow2.f32 %v6052_v12  ;;  %v8546_v28 = vpop.f32.mrb[40].mxu1  ;;  %v6054_v8 = vmul.f32 -1.442695, %v8544_v54  ;;  %v3129_v44 = vmul.f32 %v6693_v9, %v8437_v11  ;;  %v6571_v12 = vld [vmem:[%s9953_s1 + $0x4e0] ss:$8 sps:$4 sm:$0xff]  }
 0x1ff   : > { %v6697_v27 = vpop.eup %6696  ;;  %6716 = vpow2.f32 %v6132_v17  ;;  %3381 = vadd.xlane.f32.xlu0 %v3049_v24  ;;  %v3050_v18 = vmul.f32 %v6695_v26, %v8454_v29  ;;  %v1840_v36 = vpop.f32.mrb[41].mxu1  ;;  %v6134_v55 = vmul.f32 -1.442695, %v8546_v28 }
 0x200   : > { %v6699_v31 = vpop.eup %6698  ;;  %6718 = vpow2.f32 %v6053_v23  ;;  %v1520_v3 = vpop.f32.mrb[41].mxu0  ;;  %v3130_v59 = vmul.f32 %v6697_v27, %v8451_v25 }
 0x201   : > { %v6701_v42 = vpop.eup %6700  ;;  %v2573_v43 = vadd.f32 1.0, %v6699_v31  ;;  %6720 = vpow2.f32 %v6133_v16  ;;  %3383 = vadd.xlane.f32.xlu1 %v3050_v18  ;;  %v8557_v29 = vpop.f32.mrb[42].mxu0  ;;  %v6574_v16 = vld [vmem:[%s9953_s1 + $0x4f4] ss:$8 sps:$4 sm:$0xff]  }
 0x202   : > { %v8559_v46 = vpop.f32.mrb[42].mxu1  ;;  %v6703_v47 = vpop.eup %6702  ;;  %v2653_v34 = vadd.f32 1.0, %v6701_v42  ;;  %6722 = vpow2.f32 %v6054_v8  ;;  %v6055_v32 = vmul.f32 -1.442695, %v8557_v29  ;;  %1733 = vmatmul.mubr.bf16.gmra.mrb[148].mxu0 %v6564_v48 }
 0x203   : > { %v1523_v53 = vpop.f32.mrb[43].mxu0  ;;  %v6705_v56 = vpop.eup %6704  ;;  %6724 = vrcp.f32 %v2573_v43  ;;  %v2574_v11 = vadd.f32 1.0, %v6703_v47  ;;  %3541 = vadd.xlane.f32.xlu0 %v3129_v44  ;;  %2053 = vmatmul.mubr.bf16.gmra.mrb[148].mxu1 %v6565_v37  ;;  %v6135_v45 = vmul.f32 -1.442695, %v8559_v46 }
 0x204   : > { %v1843_v60 = vpop.f32.mrb[43].mxu1  ;;  %v6707_v62 = vpop.eup %6706  ;;  %6726 = vrcp.f32 %v2653_v34  ;;  %v2654_v38 = vadd.f32 1.0, %v6705_v56  ;;  %1740 = vmatprep.mubr.bf16.mxu0 %v6566_v20  ;;  %2060 = vmatprep.mubr.bf16.mxu1 %v6568_v49 }
 0x205   : > { %v6709_v35 = vpop.eup %6708  ;;  %6728 = vrcp.f32 %v2574_v11  ;;  %3543 = vadd.xlane.f32.xlu1 %v3130_v59  ;;  %v3051_v63 = vmul.f32 %v6707_v62, %v8463_v50  ;;  %v8572_v4 = vpop.f32.mrb[44].mxu0  ;;  %v6577_v60 = vld [vmem:[%s9953_s1 + $0x4f0] ss:$8 sps:$4 sm:$0xff]  }
 0x206   : > { %v6711_v1 = vpop.eup %6710  ;;  %6730 = vrcp.f32 %v2654_v38  ;;  %v8574_v57 = vpop.f32.mrb[44].mxu1  ;;  %v6056_v50 = vmul.f32 -1.442695, %v8572_v4  ;;  %v3131_v17 = vmul.f32 %v6709_v35, %v8465_v52 }
 0x207   : > { %v6713_v25 = vpop.eup %6712  ;;  %6732 = vpow2.f32 %v6134_v55  ;;  %3385 = vadd.xlane.f32.xlu0 %v3051_v63  ;;  %v3052_v58 = vmul.f32 %v6711_v1, %v8482_v5  ;;  %v1848_v39 = vpop.f32.mrb[45].mxu1  ;;  %v6136_v31 = vmul.f32 -1.442695, %v8574_v57 }
 0x208   : > { %v6715_v7 = vpop.eup %6714  ;;  %6734 = vpow2.f32 %v6055_v32  ;;  %v1528_v10 = vpop.f32.mrb[45].mxu0  ;;  %v3132_v26 = vmul.f32 %v6713_v25, %v8479_v0 }
 0x209   : > { %v6717_v14 = vpop.eup %6716  ;;  %v2575_v33 = vadd.f32 1.0, %v6715_v7  ;;  %6736 = vpow2.f32 %v6135_v45  ;;  %3387 = vadd.xlane.f32.xlu1 %v3052_v58  ;;  %v8585_v5 = vpop.f32.mrb[46].mxu0 }
 0x20a   : > { %v8587_v19 = vpop.f32.mrb[46].mxu1  ;;  %v6719_v2 = vpop.eup %6718  ;;  %v2655_v23 = vadd.f32 1.0, %v6717_v14  ;;  %6738 = vpow2.f32 %v6056_v50  ;;  %1741 = vmatmul.mubr.bf16.gmra.mrb[152].mxu0 %v6570_v6  ;;  %v6057_v3 = vmul.f32 -1.442695, %v8585_v5 }
 0x20b   : > { %v1531_v9 = vpop.f32.mrb[47].mxu0  ;;  %v6721_v24 = vpop.eup %6720  ;;  %6740 = vrcp.f32 %v2575_v33  ;;  %v2576_v52 = vadd.f32 1.0, %v6719_v2  ;;  %3545 = vadd.xlane.f32.xlu0 %v3131_v17  ;;  %2061 = vmatmul.mubr.bf16.gmra.mrb[152].mxu1 %v6571_v12  ;;  %v6137_v42 = vmul.f32 -1.442695, %v8587_v19 }
 0x20c   : > { %v1851_v27 = vpop.f32.mrb[47].mxu1  ;;  %v6723_v18 = vpop.eup %6722  ;;  %6742 = vrcp.f32 %v2655_v23  ;;  %v2656_v48 = vadd.f32 1.0, %v6721_v24  ;;  %1748 = vmatprep.mubr.bf16.mxu0 %v6572_v22  ;;  %2068 = vmatprep.mubr.bf16.mxu1 %v6574_v16 }
 0x20d   : > { %v6725_v8 = vpop.eup %6724  ;;  %6744 = vrcp.f32 %v2576_v52  ;;  %v2577_v36 = vadd.f32 1.0, %v6723_v18  ;;  %3547 = vadd.xlane.f32.xlu1 %v3132_v26  ;;  %v8600_v44 = vpop.f32.mrb[48].mxu0 }
 0x20e   : > { %v6727_v37 = vpop.eup %6726  ;;  %6746 = vrcp.f32 %v2656_v48  ;;  %v3053_v0 = vmul.f32 %v6725_v8, %v8488_v21  ;;  %v8602_v20 = vpop.f32.mrb[48].mxu1  ;;  %v6058_v34 = vmul.f32 -1.442695, %v8600_v44  ;;  %v6576_v21 = vld [vmem:[%s9953_s1 + $0x270] ss:$8 sps:$4 sm:$0xff]  }
 0x20f   : > { %v6729_v43 = vpop.eup %6728  ;;  %6748 = vrcp.f32 %v2577_v36  ;;  %v1856_v53 = vpop.f32.mrb[49].mxu1  ;;  %v6138_v58 = vmul.f32 -1.442695, %v8602_v20 }
 0x210   : > { %v6731_v47 = vpop.eup %6730  ;;  %6750 = vpow2.f32 %v6136_v31  ;;  %3389 = vadd.xlane.f32.xlu0 %v3053_v0  ;;  %v3054_v49 = vmul.f32 %v6729_v43, %v8509_v40  ;;  %v1536_v56 = vpop.f32.mrb[49].mxu0  ;;  %v3133_v40 = vmul.f32 %v6727_v37, %v8490_v51 }
 0x211   : > { %v6733_v11 = vpop.eup %6732  ;;  %6752 = vpow2.f32 %v6057_v3  ;;  %v8609_v55 = vpop.f32.mrb[50].mxu0  ;;  %v3134_v6 = vmul.f32 %v6731_v47, %v8503_v30 }
 0x212   : > { %v8611_v59 = vpop.f32.mrb[50].mxu1  ;;  %v6735_v62 = vpop.eup %6734  ;;  %v2657_v38 = vadd.f32 1.0, %v6733_v11  ;;  %6754 = vpow2.f32 %v6137_v42  ;;  %3391 = vadd.xlane.f32.xlu1 %v3054_v49  ;;  %1749 = vmatmul.mubr.bf16.gmra.mrb[156].mxu0 %v6576_v21  ;;  %v6059_v51 = vmul.f32 -1.442695, %v8609_v55 }
 0x213   : > { %v1539_v32 = vpop.f32.mrb[51].mxu0  ;;  %v6737_v35 = vpop.eup %6736  ;;  %v2578_v45 = vadd.f32 1.0, %v6735_v62  ;;  %6756 = vpow2.f32 %v6058_v34  ;;  %2069 = vmatmul.mubr.bf16.gmra.mrb[156].mxu1 %v6577_v60  ;;  %v6139_v10 = vmul.f32 -1.442695, %v8611_v59 }
 0x214   : > { %v1859_v63 = vpop.f32.mrb[51].mxu1  ;;  %v6739_v1 = vpop.eup %6738  ;;  %6758 = vrcp.f32 %v2657_v38  ;;  %v2658_v25 = vadd.f32 1.0, %v6737_v35  ;;  %3549 = vadd.xlane.f32.xlu0 %v3133_v40 }
 0x215   : > { %v6741_v7 = vpop.eup %6740  ;;  %6760 = vrcp.f32 %v2578_v45  ;;  %v2579_v50 = vadd.f32 1.0, %v6739_v1  ;;  %v8622_v33 = vpop.f32.mrb[52].mxu0 }
 0x216   : > { %v6743_v39 = vpop.eup %6742  ;;  %6762 = vrcp.f32 %v2658_v25  ;;  %3551 = vadd.xlane.f32.xlu1 %v3134_v6  ;;  %v3055_v12 = vmul.f32 %v6741_v7, %v8516_v15  ;;  %v8624_v17 = vpop.f32.mrb[52].mxu1  ;;  %v6060_v22 = vmul.f32 -1.442695, %v8622_v33 }
 0x217   : > { %v6745_v14 = vpop.eup %6744  ;;  %6764 = vrcp.f32 %v2579_v50  ;;  %v6140_v2 = vmul.f32 -1.442695, %v8624_v17  ;;  %v1864_v23 = vpop.f32.mrb[53].mxu1  ;;  %v3135_v27 = vmul.f32 %v6743_v39, %v8518_v61 }
 0x218   : > { %v6747_v30 = vpop.eup %6746  ;;  %6766 = vpow2.f32 %v6138_v58  ;;  %3393 = vadd.xlane.f32.xlu0 %v3055_v12  ;;  %v3056_v9 = vmul.f32 %v6745_v14, %v8537_v13  ;;  %v1544_v16 = vpop.f32.mrb[53].mxu0 }
 0x219   : > { %v6749_v24 = vpop.eup %6748  ;;  %6768 = vpow2.f32 %v6059_v51  ;;  %v8629_v15 = vpop.f32.mrb[54].mxu0  ;;  %v3136_v13 = vmul.f32 %v6747_v30, %v8531_v41 }
 0x21a   : > { %v8631_v52 = vpop.f32.mrb[54].mxu1  ;;  %v6751_v26 = vpop.eup %6750  ;;  %6770 = vpow2.f32 %v6139_v10  ;;  %3395 = vadd.xlane.f32.xlu1 %v3056_v9  ;;  %v3057_v37 = vmul.f32 %v6749_v24, %v8544_v54  ;;  %v6061_v43 = vmul.f32 -1.442695, %v8629_v15 }
 0x21b   : > { %v1547_v18 = vpop.f32.mrb[55].mxu0  ;;  %v1867_v48 = vpop.f32.mrb[55].mxu1  ;;  %v2659_v8 = vadd.f32 1.0, %v6751_v26  ;;  %6772 = vpow2.f32 %v6060_v22  ;;  %v6141_v34 = vmul.f32 -1.442695, %v8631_v52 }
 0x21c   : > { %v6753_v31 = vpop.eup %6752  ;;  %6774 = vpow2.f32 %v6140_v2  ;;  %3553 = vadd.xlane.f32.xlu0 %v3135_v27 }
 0x21d   : > { %v6755_v36 = vpop.eup %6754  ;;  %v2580_v3 = vadd.f32 1.0, %v6753_v31  ;;  %6776 = vrcp.f32 %v2659_v8  ;;  %v8638_v49 = vpop.f32.mrb[56].mxu0 }
 0x21e   : > { %v6757_v42 = vpop.eup %6756  ;;  %v2660_v0 = vadd.f32 1.0, %v6755_v36  ;;  %3555 = vadd.xlane.f32.xlu1 %v3136_v13  ;;  %v8640_v56 = vpop.f32.mrb[56].mxu1  ;;  %v6062_v54 = vmul.f32 -1.442695, %v8638_v49 }
 0x21f   : > { %v6759_v61 = vpop.eup %6758  ;;  %6778 = vrcp.f32 %v2580_v3  ;;  %v2581_v47 = vadd.f32 1.0, %v6757_v42  ;;  %v6142_v21 = vmul.f32 -1.442695, %v8640_v56  ;;  %v1872_v11 = vpop.f32.mrb[57].mxu1 }
 0x220   : > { %v6761_v53 = vpop.eup %6760  ;;  %6780 = vrcp.f32 %v2660_v0  ;;  %3397 = vadd.xlane.f32.xlu0 %v3057_v37  ;;  %v1552_v62 = vpop.f32.mrb[57].mxu0  ;;  %v3137_v45 = vmul.f32 %v6759_v61, %v8546_v28 }
 0x221   : > { %v6763_v41 = vpop.eup %6762  ;;  %6782 = vrcp.f32 %v2581_v47  ;;  %v3058_v60 = vmul.f32 %v6761_v53, %v8557_v29  ;;  %v8645_v40 = vpop.f32.mrb[58].mxu0 }
 0x222   : > { %v6765_v38 = vpop.eup %6764  ;;  %6784 = vpow2.f32 %v6061_v43  ;;  %v8647_v32 = vpop.f32.mrb[58].mxu1  ;;  %v3138_v29 = vmul.f32 %v6763_v41, %v8559_v46  ;;  %v6063_v12 = vmul.f32 -1.442695, %v8645_v40 }
 0x223   : > { %v6767_v35 = vpop.eup %6766  ;;  %6786 = vpow2.f32 %v6141_v34  ;;  %3399 = vadd.xlane.f32.xlu1 %v3058_v60  ;;  %v1555_v63 = vpop.f32.mrb[59].mxu0  ;;  %v3059_v50 = vmul.f32 %v6765_v38, %v8572_v4  ;;  %v6143_v22 = vmul.f32 -1.442695, %v8647_v32 }
 0x224   : > { %v1875_v1 = vpop.f32.mrb[59].mxu1  ;;  %v6769_v25 = vpop.eup %6768  ;;  %v2661_v58 = vadd.f32 1.0, %v6767_v35  ;;  %6788 = vpow2.f32 %v6062_v54  ;;  %3557 = vadd.xlane.f32.xlu0 %v3137_v45 }
 0x225   : > { %v6771_v6 = vpop.eup %6770  ;;  %v2582_v7 = vadd.f32 1.0, %v6769_v25  ;;  %6790 = vpow2.f32 %v6142_v21  ;;  %v8654_v2 = vpop.f32.mrb[60].mxu0 }
 0x226   : > { %v6773_v51 = vpop.eup %6772  ;;  %6792 = vrcp.f32 %v2661_v58  ;;  %v2662_v39 = vadd.f32 1.0, %v6771_v6  ;;  %v8656_v23 = vpop.f32.mrb[60].mxu1  ;;  %v6064_v4 = vmul.f32 -1.442695, %v8654_v2 }
 0x227   : > { %v6775_v10 = vpop.eup %6774  ;;  %6794 = vrcp.f32 %v2582_v7  ;;  %v2583_v28 = vadd.f32 1.0, %v6773_v51  ;;  %3559 = vadd.xlane.f32.xlu1 %v3138_v29  ;;  %v1880_v9 = vpop.f32.mrb[61].mxu1  ;;  %v6144_v26 = vmul.f32 -1.442695, %v8656_v23 }
 0x228   : > { %v6777_v14 = vpop.eup %6776  ;;  %6796 = vrcp.f32 %v2662_v39  ;;  %v2663_v30 = vadd.f32 1.0, %v6775_v10  ;;  %3401 = vadd.xlane.f32.xlu0 %v3059_v50  ;;  %v1560_v16 = vpop.f32.mrb[61].mxu0 }
 0x229   : > { %v6779_v46 = vpop.eup %6778  ;;  %6798 = vrcp.f32 %v2583_v28  ;;  %v8661_v18 = vpop.f32.mrb[62].mxu0  ;;  %v3139_v8 = vmul.f32 %v6777_v14, %v8574_v57 }
 0x22a   : > { %v6781_v24 = vpop.eup %6780  ;;  %6800 = vrcp.f32 %v2663_v30  ;;  %v3060_v27 = vmul.f32 %v6779_v46, %v8585_v5  ;;  %v8663_v48 = vpop.f32.mrb[62].mxu1  ;;  %v6065_v57 = vmul.f32 -1.442695, %v8661_v18 }
 0x22b   : > { %v6783_v31 = vpop.eup %6782  ;;  %6802 = vpow2.f32 %v6063_v12  ;;  %v1563_v36 = vpop.f32.mrb[63].mxu0  ;;  %v3140_v61 = vmul.f32 %v6781_v24, %v8587_v19  ;;  %v6145_v54 = vmul.f32 -1.442695, %v8663_v48 }
 0x22c   : > { %v1883_v3 = vpop.f32.mrb[63].mxu1  ;;  %v6785_v13 = vpop.eup %6784  ;;  %6804 = vpow2.f32 %v6143_v22  ;;  %3403 = vadd.xlane.f32.xlu1 %v3060_v27  ;;  %3561 = vadd.xlane.f32.xlu0 %v3139_v8  ;;  %v3061_v0 = vmul.f32 %v6783_v31, %v8600_v44 }
 0x22d   : > { %v6787_v37 = vpop.eup %6786  ;;  %v2584_v42 = vadd.f32 1.0, %v6785_v13  ;;  %6806 = vpow2.f32 %v6064_v4  ;;  %v8670_v21 = vpop.f32.mrb[64].mxu0 }
 0x22e   : > { %v6789_v5 = vpop.eup %6788  ;;  %v2664_v43 = vadd.f32 1.0, %v6787_v37  ;;  %6808 = vpow2.f32 %v6144_v26  ;;  %v8672_v11 = vpop.f32.mrb[64].mxu1  ;;  %v6066_v19 = vmul.f32 -1.442695, %v8670_v21 }
 0x22f   : > { %v6791_v47 = vpop.eup %6790  ;;  %6810 = vrcp.f32 %v2584_v42  ;;  %v2585_v34 = vadd.f32 1.0, %v6789_v5  ;;  %v1888_v60 = vpop.f32.mrb[65].mxu1  ;;  %v6146_v35 = vmul.f32 -1.442695, %v8672_v11 }
 0x230   : > { %v6793_v53 = vpop.eup %6792  ;;  %6812 = vrcp.f32 %v2664_v43  ;;  %v2665_v41 = vadd.f32 1.0, %v6791_v47  ;;  %3563 = vadd.xlane.f32.xlu1 %v3140_v61  ;;  %3405 = vadd.xlane.f32.xlu0 %v3061_v0  ;;  %v1568_v62 = vpop.f32.mrb[65].mxu0 }
 0x231   : > { %v6795_v44 = vpop.eup %6794  ;;  %6814 = vrcp.f32 %v2585_v34  ;;  %v8677_v63 = vpop.f32.mrb[66].mxu0  ;;  %v3141_v58 = vmul.f32 %v6793_v53, %v8602_v20 }
 0x232   : > { %v6797_v38 = vpop.eup %6796  ;;  %6816 = vrcp.f32 %v2665_v41  ;;  %v3062_v45 = vmul.f32 %v6795_v44, %v8609_v55  ;;  %v8679_v1 = vpop.f32.mrb[66].mxu1  ;;  %v6067_v6 = vmul.f32 -1.442695, %v8677_v63 }
 0x233   : > { %v6799_v25 = vpop.eup %6798  ;;  %6818 = vpow2.f32 %v6065_v57  ;;  %v1571_v7 = vpop.f32.mrb[67].mxu0  ;;  %v3142_v28 = vmul.f32 %v6797_v38, %v8611_v59  ;;  %v6147_v22 = vmul.f32 -1.442695, %v8679_v1 }
 0x234   : > { %v1891_v29 = vpop.f32.mrb[67].mxu1  ;;  %v6801_v50 = vpop.eup %6800  ;;  %6820 = vpow2.f32 %v6145_v54  ;;  %3407 = vadd.xlane.f32.xlu1 %v3062_v45  ;;  %3565 = vadd.xlane.f32.xlu0 %v3141_v58  ;;  %v3063_v55 = vmul.f32 %v6799_v25, %v8622_v33 }
 0x235   : > { %v6803_v51 = vpop.eup %6802  ;;  %6822 = vpow2.f32 %v6066_v19  ;;  %v8686_v46 = vpop.f32.mrb[68].mxu0  ;;  %v3143_v3 = vmul.f32 %v6801_v50, %v8624_v17 }
 0x236   : > { %v6805_v39 = vpop.eup %6804  ;;  %v2586_v10 = vadd.f32 1.0, %v6803_v51  ;;  %6824 = vpow2.f32 %v6146_v35  ;;  %v8688_v4 = vpop.f32.mrb[68].mxu1  ;;  %v6068_v16 = vmul.f32 -1.442695, %v8686_v46 }
 0x237   : > { %v6807_v12 = vpop.eup %6806  ;;  %v2666_v14 = vadd.f32 1.0, %v6805_v39  ;;  %6826 = vpow2.f32 %v6067_v6  ;;  %v1896_v59 = vpop.f32.mrb[69].mxu1  ;;  %v6148_v26 = vmul.f32 -1.442695, %v8688_v4 }
 0x238   : > { %v6809_v20 = vpop.eup %6808  ;;  %6828 = vrcp.f32 %v2586_v10  ;;  %v2587_v30 = vadd.f32 1.0, %v6807_v12  ;;  %3567 = vadd.xlane.f32.xlu1 %v3142_v28  ;;  %3409 = vadd.xlane.f32.xlu0 %v3063_v55  ;;  %v1576_v31 = vpop.f32.mrb[69].mxu0 }
 0x239   : > { %v6811_v9 = vpop.eup %6810  ;;  %6830 = vrcp.f32 %v2666_v14  ;;  %v2667_v33 = vadd.f32 1.0, %v6809_v20  ;;  %v8693_v8 = vpop.f32.mrb[70].mxu1 }
 0x23a   : > { %v6813_v24 = vpop.eup %6812  ;;  %6832 = vrcp.f32 %v2587_v30  ;;  %v3064_v27 = vmul.f32 %v6811_v9, %v8629_v15  ;;  %v8696_v13 = vpop.f32.mrb[70].mxu0 }
 0x23b   : > { %v6815_v36 = vpop.eup %6814  ;;  %6834 = vrcp.f32 %v2667_v33  ;;  %v1899_v37 = vpop.f32.mrb[71].mxu1  ;;  %v6069_v0 = vmul.f32 -1.442695, %v8696_v13  ;;  %v3144_v34 = vmul.f32 %v6813_v24, %v8631_v52 }
 0x23c   : > { %v6817_v42 = vpop.eup %6816  ;;  %6836 = vpow2.f32 %v6147_v22  ;;  %3411 = vadd.xlane.f32.xlu1 %v3064_v27  ;;  %v1579_v5 = vpop.f32.mrb[71].mxu0  ;;  %3569 = vadd.xlane.f32.xlu0 %v3143_v3  ;;  %v3065_v15 = vmul.f32 %v6815_v36, %v8638_v49  ;;  %v6149_v49 = vmul.f32 -1.442695, %v8693_v8 }
 0x23d   : > { %v6819_v43 = vpop.eup %6818  ;;  %6838 = vpow2.f32 %v6068_v16  ;;  %v8701_v54 = vpop.f32.mrb[72].mxu0  ;;  %v3145_v7 = vmul.f32 %v6817_v42, %v8640_v56 }
 0x23e   : > { %v6821_v61 = vpop.eup %6820  ;;  %v2588_v47 = vadd.f32 1.0, %v6819_v43  ;;  %6840 = vpow2.f32 %v6148_v26  ;;  %v8703_v44 = vpop.f32.mrb[72].mxu1  ;;  %v6070_v35 = vmul.f32 -1.442695, %v8701_v54 }
 0x23f   : > { %v6823_v17 = vpop.eup %6822  ;;  %v2668_v57 = vadd.f32 1.0, %v6821_v61  ;;  %6842 = vpow2.f32 %v6069_v0  ;;  %v1904_v62 = vpop.f32.mrb[73].mxu1  ;;  %v6150_v6 = vmul.f32 -1.442695, %v8703_v44 }
 0x240   : > { %v6825_v53 = vpop.eup %6824  ;;  %6844 = vrcp.f32 %v2588_v47  ;;  %v2589_v41 = vadd.f32 1.0, %v6823_v17  ;;  %3571 = vadd.xlane.f32.xlu1 %v3144_v34  ;;  %3413 = vadd.xlane.f32.xlu0 %v3065_v15  ;;  %v1584_v45 = vpop.f32.mrb[73].mxu0 }
 0x241   : > { %v6827_v19 = vpop.eup %6826  ;;  %6846 = vrcp.f32 %v2668_v57  ;;  %v2669_v60 = vadd.f32 1.0, %v6825_v53  ;;  %v8707_v25 = vpop.f32.mrb[74].mxu1 }
 0x242   : > { %v6829_v38 = vpop.eup %6828  ;;  %6848 = vrcp.f32 %v2589_v41  ;;  %v2590_v52 = vadd.f32 1.0, %v6827_v19  ;;  %v8712_v50 = vpop.f32.mrb[74].mxu0  ;;  %v6151_v24 = vmul.f32 -1.442695, %v8707_v25 }
 0x243   : > { %v6831_v58 = vpop.eup %6830  ;;  %6850 = vrcp.f32 %v2669_v60  ;;  %v3066_v29 = vmul.f32 %v6829_v38, %v8645_v40  ;;  %v1907_v51 = vpop.f32.mrb[75].mxu1  ;;  %v6071_v39 = vmul.f32 -1.442695, %v8712_v50 }
 0x244   : > { %v6833_v55 = vpop.eup %6832  ;;  %6852 = vrcp.f32 %v2590_v52  ;;  %v1587_v10 = vpop.f32.mrb[75].mxu0  ;;  %3573 = vadd.xlane.f32.xlu0 %v3145_v7  ;;  %v3146_v40 = vmul.f32 %v6831_v58, %v8647_v32 }
 0x245   : > { %v6835_v28 = vpop.eup %6834  ;;  %6854 = vpow2.f32 %v6149_v49  ;;  %3415 = vadd.xlane.f32.xlu1 %v3066_v29  ;;  %v3067_v12 = vmul.f32 %v6833_v55, %v8654_v2  ;;  %v8717_v9 = vpop.f32.mrb[76].mxu0 }
 0x246   : > { %v6837_v14 = vpop.eup %6836  ;;  %6856 = vpow2.f32 %v6070_v35  ;;  %v8719_v33 = vpop.f32.mrb[76].mxu1  ;;  %v6072_v32 = vmul.f32 -1.442695, %v8717_v9  ;;  %v3147_v42 = vmul.f32 %v6835_v28, %v8656_v23 }
 0x247   : > { %v6839_v20 = vpop.eup %6838  ;;  %v2670_v56 = vadd.f32 1.0, %v6837_v14  ;;  %6858 = vpow2.f32 %v6150_v6  ;;  %v1912_v2 = vpop.f32.mrb[77].mxu1  ;;  %v6152_v37 = vmul.f32 -1.442695, %v8719_v33 }
 0x248   : > { %v6841_v30 = vpop.eup %6840  ;;  %v2591_v22 = vadd.f32 1.0, %v6839_v20  ;;  %6860 = vpow2.f32 %v6071_v39  ;;  %3417 = vadd.xlane.f32.xlu0 %v3067_v12  ;;  %v1592_v31 = vpop.f32.mrb[77].mxu0 }
 0x249   : > { %v6843_v16 = vpop.eup %6842  ;;  %6862 = vrcp.f32 %v2670_v56  ;;  %v2671_v59 = vadd.f32 1.0, %v6841_v30  ;;  %3575 = vadd.xlane.f32.xlu1 %v3146_v40  ;;  %v8723_v36 = vpop.f32.mrb[78].mxu1 }
 0x24a   : > { %v6845_v26 = vpop.eup %6844  ;;  %6864 = vrcp.f32 %v2591_v22  ;;  %v2592_v27 = vadd.f32 1.0, %v6843_v16  ;;  %v8728_v5 = vpop.f32.mrb[78].mxu0  ;;  %v6153_v17 = vmul.f32 -1.442695, %v8723_v36 }
 0x24b   : > { %v6847_v3 = vpop.eup %6846  ;;  %6866 = vrcp.f32 %v2671_v59  ;;  %v3068_v0 = vmul.f32 %v6845_v26, %v8661_v18  ;;  %v1915_v43 = vpop.f32.mrb[79].mxu1  ;;  %v6073_v61 = vmul.f32 -1.442695, %v8728_v5 }
 0x24c   : > { %v6849_v15 = vpop.eup %6848  ;;  %6868 = vrcp.f32 %v2592_v27  ;;  %v1595_v47 = vpop.f32.mrb[79].mxu0  ;;  %3577 = vadd.xlane.f32.xlu0 %v3147_v42  ;;  %v3148_v18 = vmul.f32 %v6847_v3, %v8663_v48 }
 0x24d   : > { %v6851_v34 = vpop.eup %6850  ;;  %6870 = vpow2.f32 %v6151_v24  ;;  %3419 = vadd.xlane.f32.xlu1 %v3068_v0  ;;  %v3069_v57 = vmul.f32 %v6849_v15, %v8670_v21  ;;  %v8734_v60 = vpop.f32.mrb[80].mxu0 }
 0x24e   : > { %v6853_v53 = vpop.eup %6852  ;;  %6872 = vpow2.f32 %v6072_v32  ;;  %v8736_v49 = vpop.f32.mrb[80].mxu1  ;;  %v6074_v45 = vmul.f32 -1.442695, %v8734_v60  ;;  %v3149_v48 = vmul.f32 %v6851_v34, %v8672_v11  ;;  %v3278_v34 = vld [vmem:[#allocation2 + $0x288] sm:$0xff] }
 0x24f   : > { %v6855_v23 = vpop.eup %6854  ;;  %6874 = vpow2.f32 %v6152_v37  ;;  %v1920_v52 = vpop.f32.mrb[81].mxu1  ;;  %v6154_v51 = vmul.f32 -1.442695, %v8736_v49  ;;  %v3070_v55 = vmul.f32 %v6853_v53, %v8677_v63 }
 0x250   : > { %v6857_v41 = vpop.eup %6856  ;;  %v2672_v19 = vadd.f32 1.0, %v6855_v23  ;;  %6876 = vpow2.f32 %v6073_v61  ;;  %3421 = vadd.xlane.f32.xlu0 %v3069_v57  ;;  %v1600_v58 = vpop.f32.mrb[81].mxu0 }
 0x251   : > { %v6859_v62 = vpop.eup %6858  ;;  %v2593_v38 = vadd.f32 1.0, %v6857_v41  ;;  %6878 = vpow2.f32 %v6153_v17  ;;  %3579 = vadd.xlane.f32.xlu1 %v3148_v18  ;;  %v8740_v6 = vpop.f32.mrb[82].mxu1 }
 0x252   : > { %v6861_v21 = vpop.eup %6860  ;;  %6880 = vrcp.f32 %v2672_v19  ;;  %v2673_v35 = vadd.f32 1.0, %v6859_v62  ;;  %v8744_v39 = vpop.f32.mrb[82].mxu0  ;;  %v6155_v11 = vmul.f32 -1.442695, %v8740_v6 }
 0x253   : > { %v6863_v7 = vpop.eup %6862  ;;  %6882 = vrcp.f32 %v2593_v38  ;;  %v2594_v29 = vadd.f32 1.0, %v6861_v21  ;;  %v1923_v10 = vpop.f32.mrb[83].mxu1  ;;  %v6075_v12 = vmul.f32 -1.442695, %v8744_v39 }
 0x254   : > { %v6865_v28 = vpop.eup %6864  ;;  %6884 = vrcp.f32 %v2673_v35  ;;  %v1603_v14 = vpop.f32.mrb[83].mxu0  ;;  %3581 = vadd.xlane.f32.xlu0 %v3149_v48  ;;  %v3150_v63 = vmul.f32 %v6863_v7, %v8679_v1 }
 0x255   : > { %v6867_v20 = vpop.eup %6866  ;;  %6886 = vrcp.f32 %v2594_v29  ;;  %3423 = vadd.xlane.f32.xlu1 %v3070_v55  ;;  %v3071_v56 = vmul.f32 %v6865_v28, %v8686_v46  ;;  %v8750_v59 = vpop.f32.mrb[84].mxu0  ;;  %v3197_v46 = vld [vmem:[#allocation2] sm:$0xff]  ;;  %v3199_v14 = vld [vmem:[#allocation2 + $0x10] sm:$0xff] }
 0x256   : > { %v6869_v40 = vpop.eup %6868  ;;  %6888 = vpow2.f32 %v6074_v45  ;;  %v8752_v24 = vpop.f32.mrb[84].mxu1  ;;  %v3151_v3 = vmul.f32 %v6867_v20, %v8688_v4  ;;  %v6076_v43 = vmul.f32 -1.442695, %v8750_v59 }
 0x257   : > { %v6871_v30 = vpop.eup %6870  ;;  %6890 = vpow2.f32 %v6154_v51  ;;  %v1928_v27 = vpop.f32.mrb[85].mxu1  ;;  %v3072_v15 = vmul.f32 %v6869_v40, %v8696_v13  ;;  %v6156_v4 = vmul.f32 -1.442695, %v8752_v24  ;;  %v3277_v13 = vld [vmem:[#allocation2 + $0x280] sm:$0xff] }
 0x258   : > { %v6873_v22 = vpop.eup %6872  ;;  %v2674_v16 = vadd.f32 1.0, %v6871_v30  ;;  %6892 = vpow2.f32 %v6075_v12  ;;  %3425 = vadd.xlane.f32.xlu0 %v3071_v56  ;;  %v1608_v1 = vpop.f32.mrb[85].mxu0  ;;  %v3198_v12 = vld [vmem:[#allocation2 + $0x8] sm:$0xff] }
 0x259   : > { %v6875_v2 = vpop.eup %6874  ;;  %v2595_v26 = vadd.f32 1.0, %v6873_v22  ;;  %6894 = vpow2.f32 %v6155_v11  ;;  %3583 = vadd.xlane.f32.xlu1 %v3150_v63  ;;  %v8755_v37 = vpop.f32.mrb[86].mxu1 }
 0x25a   : > { %v6877_v32 = vpop.eup %6876  ;;  %6896 = vrcp.f32 %v2674_v16  ;;  %v2675_v31 = vadd.f32 1.0, %v6875_v2  ;;  %v3358_v61 = vpop.xlane.xlu0 %3357  ;;  %v6157_v19 = vmul.f32 -1.442695, %v8755_v37 }
 0x25b   : > { %v6879_v42 = vpop.eup %6878  ;;  %6898 = vrcp.f32 %v2595_v26  ;;  %v2596_v0 = vadd.f32 1.0, %v6877_v32  ;;  %v8759_v47 = vpop.f32.mrb[86].mxu0  ;;  %v3677_v53 = vadd.f32 %v3358_v61, %v3197_v46 }
 0x25c   : > { %v6881_v17 = vpop.eup %6880  ;;  %6900 = vrcp.f32 %v2675_v31  ;;  %v2676_v57 = vadd.f32 1.0, %v6879_v42  ;;  %v1611_v23 = vpop.f32.mrb[87].mxu0  ;;  %3585 = vadd.xlane.f32.xlu0 %v3151_v3  ;;  %v6077_v52 = vmul.f32 -1.442695, %v8759_v47 }
 0x25d   : > { %v1931_v18 = vpop.f32.mrb[87].mxu1  ;;  %v6883_v41 = vpop.eup %6882  ;;  %6902 = vrcp.f32 %v2596_v0  ;;  %3427 = vadd.xlane.f32.xlu1 %v3072_v15  ;;  %3838 = vst.msk [vmem:[#allocation2] sm:$0xff] %vm3837_vm1, %v3677_v53  ;;  %v3152_v48 = vmul.f32 %v6881_v17, %v8693_v8  ;;  %v3200_v15 = vld [vmem:[#allocation2 + $0x18] sm:$0xff] }
 0x25e   : > { %v3520_v62 = vpop.xlane.xlu1 %3519  ;;  %v6885_v38 = vpop.eup %6884  ;;  %6904 = vrcp.f32 %v2676_v57  ;;  %v3073_v35 = vmul.f32 %v6883_v41, %v8701_v54 }
 0x25f   : > { %v3758_v21 = vadd.f32 %v3520_v62, %v3278_v34  ;;  %v6887_v45 = vpop.eup %6886  ;;  %6906 = vpow2.f32 %v6076_v43  ;;  %v3518_v58 = vpop.xlane.xlu0 %3517  ;;  %v3153_v11 = vmul.f32 %v6885_v38, %v8703_v44  ;;  %v3279_v43 = vld [vmem:[#allocation2 + $0x290] sm:$0xff] }
 0x260   : > { %v6889_v7 = vpop.eup %6888  ;;  %6908 = vpow2.f32 %v6156_v4  ;;  %v3757_v29 = vadd.f32 %v3518_v58, %v3277_v13  ;;  %v8768_v51 = vpop.f32.mrb[88].mxu0  ;;  %3429 = vadd.xlane.f32.xlu0 %v3073_v35  ;;  %v3074_v56 = vmul.f32 %v6887_v45, %v8712_v50  ;;  %v3280_v35 = vld [vmem:[#allocation2 + $0x298] sm:$0xff] }
 0x261   : > { %3919 = vst.msk [vmem:[#allocation2 + $0x288] sm:$0xff] %vm3837_vm1, %v3758_v21  ;;  %v8770_v55 = vpop.f32.mrb[88].mxu1  ;;  %v6891_v10 = vpop.eup %6890  ;;  %v2597_v28 = vadd.f32 1.0, %v6889_v7  ;;  %6910 = vpow2.f32 %v6157_v19  ;;  %3587 = vadd.xlane.f32.xlu1 %v3152_v48  ;;  %v6078_v16 = vmul.f32 -1.442695, %v8768_v51 }
 0x262   : > { %v1936_v54 = vpop.f32.mrb[89].mxu1  ;;  %v6893_v20 = vpop.eup %6892  ;;  %v2677_v8 = vadd.f32 1.0, %v6891_v10  ;;  %6912 = vpow2.f32 %v6077_v52  ;;  %3918 = vst.msk [vmem:[#allocation2 + $0x280] sm:$0xff] %vm3837_vm1, %v3757_v29  ;;  %v6158_v2 = vmul.f32 -1.442695, %v8770_v55 }
 0x263   : > { %v1616_v40 = vpop.f32.mrb[89].mxu0  ;;  %v8775_v30 = vpop.f32.mrb[90].mxu1  ;;  %6914 = vrcp.f32 %v2597_v28  ;;  %v2598_v22 = vadd.f32 1.0, %v6893_v20 }
 0x264   : > { %v6895_v63 = vpop.eup %6894  ;;  %v3360_v26 = vpop.xlane.xlu0 %3359  ;;  %6916 = vrcp.f32 %v2677_v8  ;;  %3589 = vadd.xlane.f32.xlu0 %v3153_v11  ;;  %v6159_v42 = vmul.f32 -1.442695, %v8775_v30 }
 0x265   : > { %v3362_v27 = vpop.xlane.xlu1 %3361  ;;  %v6897_v46 = vpop.eup %6896  ;;  %v2678_v32 = vadd.f32 1.0, %v6895_v63  ;;  %v3678_v31 = vadd.f32 %v3360_v26, %v3198_v12  ;;  %6918 = vrcp.f32 %v2598_v22  ;;  %3431 = vadd.xlane.f32.xlu1 %v3074_v56  ;;  %v3281_v26 = vld [vmem:[#allocation2 + $0x2a0] sm:$0xff] }
 0x266   : > { %v3679_v3 = vadd.f32 %v3362_v27, %v3199_v14  ;;  %v8779_v44 = vpop.f32.mrb[90].mxu0  ;;  %v1939_v50 = vpop.f32.mrb[91].mxu1  ;;  %v3154_v4 = vmul.f32 %v6897_v46, %v8707_v25  ;;  %v3201_v25 = vld [vmem:[#allocation2 + $0x20] sm:$0xff]  ;;  %v3202_v27 = vld [vmem:[#allocation2 + $0x28] sm:$0xff] }
 0x267   : > { %v6899_v1 = vpop.eup %6898  ;;  %v1619_v0 = vpop.f32.mrb[91].mxu0  ;;  %6920 = vrcp.f32 %v2678_v32  ;;  %3839 = vst.msk [vmem:[#allocation2 + $0x8] sm:$0xff] %vm3837_vm1, %v3678_v31  ;;  %v6079_v34 = vmul.f32 -1.442695, %v8779_v44 }
 0x268   : > { %v6901_v61 = vpop.eup %6900  ;;  %3840 = vst.msk [vmem:[#allocation2 + $0x10] sm:$0xff] %vm3837_vm1, %v3679_v3  ;;  %v3075_v17 = vmul.f32 %v6899_v1, %v8717_v9  ;;  %6922 = vpow2.f32 %v6078_v16  ;;  %v3522_v53 = vpop.xlane.xlu0 %3521 }
 0x269   : > { %v6903_v57 = vpop.eup %6902  ;;  %v3364_v23 = vpop.xlane.xlu1 %3363  ;;  %6924 = vpow2.f32 %v6158_v2  ;;  %v3759_v41 = vadd.f32 %v3522_v53, %v3279_v43  ;;  %3591 = vadd.xlane.f32.xlu1 %v3154_v4  ;;  %v3155_v58 = vmul.f32 %v6901_v61, %v8719_v33  ;;  %v3282_v4 = vld [vmem:[#allocation2 + $0x2a8] sm:$0xff] }
 0x26a   : > { %v6905_v18 = vpop.eup %6904  ;;  %v3680_v19 = vadd.f32 %v3364_v23, %v3200_v15  ;;  %v8787_v62 = vpop.f32.mrb[92].mxu0  ;;  %6926 = vpow2.f32 %v6159_v42  ;;  %3433 = vadd.xlane.f32.xlu0 %v3075_v17  ;;  %v3076_v12 = vmul.f32 %v6903_v57, %v8728_v5 }
 0x26b   : > { %v8789_v13 = vpop.f32.mrb[92].mxu1  ;;  %v6907_v38 = vpop.eup %6906  ;;  %v6080_v9 = vmul.f32 -1.442695, %v8787_v62  ;;  %6928 = vpow2.f32 %v6079_v34  ;;  %3920 = vst.msk [vmem:[#allocation2 + $0x290] sm:$0xff] %vm3837_vm1, %v3759_v41  ;;  %v3156_v3 = vmul.f32 %v6905_v18, %v8723_v36  ;;  %v3203_v36 = vld [vmem:[#allocation2 + $0x30] sm:$0xff] }
 0x26c   : > { %v1944_v52 = vpop.f32.mrb[93].mxu1  ;;  %v1624_v21 = vpop.f32.mrb[93].mxu0  ;;  %v2599_v48 = vadd.f32 1.0, %v6907_v38  ;;  %3841 = vst.msk [vmem:[#allocation2 + $0x18] sm:$0xff] %vm3837_vm1, %v3680_v19  ;;  %v6160_v54 = vmul.f32 -1.442695, %v8789_v13 }
 0x26d   : > { %v6909_v45 = vpop.eup %6908  ;;  %v8795_v7 = vpop.f32.mrb[94].mxu1  ;;  %6930 = vpow2.f32 %v6080_v9  ;;  %3435 = vadd.xlane.f32.xlu1 %v3076_v12 }
 0x26e   : > { %v8797_v29 = vpop.f32.mrb[94].mxu0  ;;  %v6911_v10 = vpop.eup %6910  ;;  %v2679_v28 = vadd.f32 1.0, %v6909_v45  ;;  %6932 = vrcp.f32 %v2599_v48  ;;  %3593 = vadd.xlane.f32.xlu0 %v3155_v58  ;;  %v6161_v2 = vmul.f32 -1.442695, %v8795_v7 }
 0x26f   : > { %v3524_v14 = vpop.xlane.xlu1 %3523  ;;  %v3366_v20 = vpop.xlane.xlu0 %3365  ;;  %v2680_v11 = vadd.f32 1.0, %v6911_v10  ;;  %v6081_v5 = vmul.f32 -1.442695, %v8797_v29 }
 0x270   : > { %v6913_v8 = vpop.eup %6912  ;;  %v3760_v56 = vadd.f32 %v3524_v14, %v3280_v35  ;;  %v3681_v40 = vadd.f32 %v3366_v20, %v3201_v25  ;;  %v1627_v63 = vpop.f32.mrb[95].mxu0  ;;  %6934 = vrcp.f32 %v2679_v28  ;;  %v3283_v20 = vld [vmem:[#allocation2 + $0x2b0] sm:$0xff] }
 0x271   : > { %v1947_v33 = vpop.f32.mrb[95].mxu1  ;;  %v6915_v22 = vpop.eup %6914  ;;  %v2600_v16 = vadd.f32 1.0, %v6913_v8  ;;  %6936 = vrcp.f32 %v2680_v11  ;;  %3595 = vadd.xlane.f32.xlu1 %v3156_v3 }
 0x272   : > { %v6917_v46 = vpop.eup %6916  ;;  %3921 = vst.msk [vmem:[#allocation2 + $0x298] sm:$0xff] %vm3837_vm1, %v3760_v56  ;;  %3842 = vst.msk [vmem:[#allocation2 + $0x20] sm:$0xff] %vm3837_vm1, %v3681_v40  ;;  %v3077_v32 = vmul.f32 %v6915_v22, %v8734_v60  ;;  %v8807_v15 = vpop.f32.mrb[96].mxu0 }
 0x273   : > { %v6919_v31 = vpop.eup %6918  ;;  %6938 = vrcp.f32 %v2600_v16  ;;  %v3526_v50 = vpop.xlane.xlu0 %3525  ;;  %v6082_v60 = vmul.f32 -1.442695, %v8807_v15  ;;  %v3157_v9 = vmul.f32 %v6917_v46, %v8736_v49  ;;  %v3204_v49 = vld [vmem:[#allocation2 + $0x38] sm:$0xff] }
 0x274   : > { %v3368_v1 = vpop.xlane.xlu1 %3367  ;;  %v6921_v42 = vpop.eup %6920  ;;  %6940 = vpow2.f32 %v6160_v54  ;;  %v3761_v0 = vadd.f32 %v3526_v50, %v3281_v26  ;;  %3437 = vadd.xlane.f32.xlu0 %v3077_v32  ;;  %v3078_v52 = vmul.f32 %v6919_v31, %v8744_v39  ;;  %v3284_v50 = vld [vmem:[#allocation2 + $0x2b8] sm:$0xff] }
 0x275   : > { %v3682_v43 = vadd.f32 %v3368_v1, %v3202_v27  ;;  %v8809_v61 = vpop.f32.mrb[96].mxu1  ;;  %v6923_v34 = vpop.eup %6922  ;;  %6942 = vpow2.f32 %v6161_v2  ;;  %v3158_v63 = vmul.f32 %v6921_v42, %v8740_v6  ;;  %v3205_v42 = vld [vmem:[#allocation2 + $0x40] sm:$0xff] }
 0x276   : > { %v1952_v17 = vpop.f32.mrb[97].mxu1  ;;  %v1632_v57 = vpop.f32.mrb[97].mxu0  ;;  %v2601_v23 = vadd.f32 1.0, %v6923_v34  ;;  %6944 = vpow2.f32 %v6081_v5  ;;  %3922 = vst.msk [vmem:[#allocation2 + $0x2a0] sm:$0xff] %vm3837_vm1, %v3761_v0  ;;  %v6162_v14 = vmul.f32 -1.442695, %v8809_v61  ;;  %3439 = vadd.xlane.f32.xlu1 %v3078_v52 }
 0x277   : > { %v6925_v53 = vpop.eup %6924  ;;  %3843 = vst.msk [vmem:[#allocation2 + $0x28] sm:$0xff] %vm3837_vm1, %v3682_v43  ;;  %v8814_v18 = vpop.f32.mrb[98].mxu1  ;;  %6946 = vpow2.f32 %v6082_v60 }
 0x278   : > { %v8816_v41 = vpop.f32.mrb[98].mxu0  ;;  %v6927_v19 = vpop.eup %6926  ;;  %v2681_v38 = vadd.f32 1.0, %v6925_v53  ;;  %6948 = vrcp.f32 %v2601_v23  ;;  %3597 = vadd.xlane.f32.xlu0 %v3157_v9  ;;  %v6163_v11 = vmul.f32 -1.442695, %v8814_v18 }
 0x279   : > { %v3528_v21 = vpop.xlane.xlu1 %3527  ;;  %v3370_v35 = vpop.xlane.xlu0 %3369  ;;  %v2682_v45 = vadd.f32 1.0, %v6927_v19  ;;  %v6083_v40 = vmul.f32 -1.442695, %v8816_v41 }
 0x27a   : > { %v6929_v25 = vpop.eup %6928  ;;  %v3762_v48 = vadd.f32 %v3528_v21, %v3282_v4  ;;  %v3683_v58 = vadd.f32 %v3370_v35, %v3203_v36  ;;  %v1635_v10 = vpop.f32.mrb[99].mxu0  ;;  %6950 = vrcp.f32 %v2681_v38  ;;  %3599 = vadd.xlane.f32.xlu1 %v3158_v63 }
 0x27b   : > { %v1955_v28 = vpop.f32.mrb[99].mxu1  ;;  %v6931_v54 = vpop.eup %6930  ;;  %v2602_v12 = vadd.f32 1.0, %v6929_v25  ;;  %6952 = vrcp.f32 %v2682_v45  ;;  %v3206_v25 = vld [vmem:[#allocation2 + $0x48] sm:$0xff] }
 0x27c   : > { %v6933_v8 = vpop.eup %6932  ;;  %v2603_v39 = vadd.f32 1.0, %v6931_v54  ;;  %3923 = vst.msk [vmem:[#allocation2 + $0x2a8] sm:$0xff] %vm3837_vm1, %v3762_v48  ;;  %3844 = vst.msk [vmem:[#allocation2 + $0x30] sm:$0xff] %vm3837_vm1, %v3683_v58  ;;  %v8827_v46 = vpop.f32.mrb[100].mxu0  ;;  %v3285_v48 = vld [vmem:[#allocation2 + $0x2c0] sm:$0xff] }
 0x27d   : > { %v6935_v56 = vpop.eup %6934  ;;  %6954 = vrcp.f32 %v2602_v12  ;;  %v3079_v33 = vmul.f32 %v6933_v8, %v8750_v59  ;;  %v3530_v22 = vpop.xlane.xlu0 %3529  ;;  %v6084_v31 = vmul.f32 -1.442695, %v8827_v46 }
 0x27e   : > { %v3372_v16 = vpop.xlane.xlu1 %3371  ;;  %v6937_v2 = vpop.eup %6936  ;;  %6956 = vrcp.f32 %v2603_v39  ;;  %v3763_v26 = vadd.f32 %v3530_v22, %v3283_v20  ;;  %v3159_v60 = vmul.f32 %v6935_v56, %v8752_v24 }
 0x27f   : > { %v3684_v27 = vadd.f32 %v3372_v16, %v3204_v49  ;;  %v8829_v5 = vpop.f32.mrb[100].mxu1  ;;  %v6939_v32 = vpop.eup %6938  ;;  %6958 = vpow2.f32 %v6162_v14  ;;  %3441 = vadd.xlane.f32.xlu0 %v3079_v33  ;;  %v3160_v28 = vmul.f32 %v6937_v2, %v8755_v37  ;;  %v3286_v37 = vld [vmem:[#allocation2 + $0x2c8] sm:$0xff]  ;;  %v3207_v16 = vld [vmem:[#allocation2 + $0x50] sm:$0xff] }
 0x280   : > { %v1960_v3 = vpop.f32.mrb[101].mxu1  ;;  %v1640_v6 = vpop.f32.mrb[101].mxu0  ;;  %6960 = vpow2.f32 %v6163_v11  ;;  %3924 = vst.msk [vmem:[#allocation2 + $0x2b0] sm:$0xff] %vm3837_vm1, %v3763_v26  ;;  %v3080_v17 = vmul.f32 %v6939_v32, %v8759_v47  ;;  %v6164_v21 = vmul.f32 -1.442695, %v8829_v5 }
 0x281   : > { %v6941_v59 = vpop.eup %6940  ;;  %3845 = vst.msk [vmem:[#allocation2 + $0x38] sm:$0xff] %vm3837_vm1, %v3684_v27  ;;  %v8834_v1 = vpop.f32.mrb[102].mxu1  ;;  %6962 = vpow2.f32 %v6083_v40 }
 0x282   : > { %v8836_v0 = vpop.f32.mrb[102].mxu0  ;;  %v6943_v43 = vpop.eup %6942  ;;  %v2683_v34 = vadd.f32 1.0, %v6941_v59  ;;  %6964 = vpow2.f32 %v6084_v31  ;;  %3443 = vadd.xlane.f32.xlu1 %v3080_v17  ;;  %v6165_v45 = vmul.f32 -1.442695, %v8834_v1 }
 0x283   : > { %v3532_v57 = vpop.xlane.xlu1 %3531  ;;  %v1643_v4 = vpop.f32.mrb[103].mxu0  ;;  %v2684_v53 = vadd.f32 1.0, %v6943_v43  ;;  %3601 = vadd.xlane.f32.xlu0 %v3159_v60  ;;  %v6085_v10 = vmul.f32 -1.442695, %v8836_v0 }
 0x284   : > { %v6945_v36 = vpop.eup %6944  ;;  %v3764_v23 = vadd.f32 %v3532_v57, %v3284_v50  ;;  %v3374_v19 = vpop.xlane.xlu0 %3373  ;;  %6966 = vrcp.f32 %v2683_v34  ;;  %v3208_v4 = vld [vmem:[#allocation2 + $0x58] sm:$0xff] }
 0x285   : > { %v1963_v38 = vpop.f32.mrb[103].mxu1  ;;  %v6947_v9 = vpop.eup %6946  ;;  %v2604_v52 = vadd.f32 1.0, %v6945_v36  ;;  %v3685_v35 = vadd.f32 %v3374_v19, %v3205_v42  ;;  %6968 = vrcp.f32 %v2684_v53 }
 0x286   : > { %v6949_v24 = vpop.eup %6948  ;;  %v2605_v47 = vadd.f32 1.0, %v6947_v9  ;;  %3925 = vst.msk [vmem:[#allocation2 + $0x2b8] sm:$0xff] %vm3837_vm1, %v3764_v23  ;;  %v8847_v8 = vpop.f32.mrb[104].mxu0  ;;  %3603 = vadd.xlane.f32.xlu1 %v3160_v28  ;;  %v3287_v23 = vld [vmem:[#allocation2 + $0x2d0] sm:$0xff]  ;;  %v3288_v28 = vld [vmem:[#allocation2 + $0x2d8] sm:$0xff] }
 0x287   : > { %v6951_v58 = vpop.eup %6950  ;;  %6970 = vrcp.f32 %v2604_v52  ;;  %3846 = vst.msk [vmem:[#allocation2 + $0x40] sm:$0xff] %vm3837_vm1, %v3685_v35  ;;  %v3081_v54 = vmul.f32 %v6949_v24, %v8768_v51  ;;  %v3376_v12 = vpop.xlane.xlu1 %3375  ;;  %v6086_v56 = vmul.f32 -1.442695, %v8847_v8 }
 0x288   : > { %v6953_v14 = vpop.eup %6952  ;;  %6972 = vrcp.f32 %v2605_v47  ;;  %v3534_v20 = vpop.xlane.xlu0 %3533  ;;  %v3686_v49 = vadd.f32 %v3376_v12, %v3206_v25  ;;  %v3161_v27 = vmul.f32 %v6951_v58, %v8770_v55 }
 0x289   : > { %v6955_v39 = vpop.eup %6954  ;;  %6974 = vpow2.f32 %v6164_v21  ;;  %3445 = vadd.xlane.f32.xlu0 %v3081_v54  ;;  %v3765_v11 = vadd.f32 %v3534_v20, %v3285_v48  ;;  %v8850_v40 = vpop.f32.mrb[104].mxu1  ;;  %v3162_v52 = vmul.f32 %v6953_v14, %v8775_v30 }
 0x28a   : > { %v1648_v63 = vpop.f32.mrb[105].mxu0  ;;  %v6957_v33 = vpop.eup %6956  ;;  %6976 = vpow2.f32 %v6165_v45  ;;  %3847 = vst.msk [vmem:[#allocation2 + $0x48] sm:$0xff] %vm3837_vm1, %v3686_v49  ;;  %v6166_v51 = vmul.f32 -1.442695, %v8850_v40  ;;  %v3082_v32 = vmul.f32 %v6955_v39, %v8779_v44 }
 0x28b   : > { %v1968_v22 = vpop.f32.mrb[105].mxu1  ;;  %v8854_v2 = vpop.f32.mrb[106].mxu0  ;;  %6978 = vpow2.f32 %v6085_v10  ;;  %3926 = vst.msk [vmem:[#allocation2 + $0x2c0] sm:$0xff] %vm3837_vm1, %v3765_v11  ;;  %v3083_v57 = vmul.f32 %v6957_v33, %v8787_v62  ;;  %v3209_v63 = vld [vmem:[#allocation2 + $0x60] sm:$0xff] }
 0x28c   : > { %v6959_v26 = vpop.eup %6958  ;;  %v8859_v31 = vpop.f32.mrb[106].mxu1  ;;  %6980 = vpow2.f32 %v6086_v56  ;;  %3447 = vadd.xlane.f32.xlu1 %v3082_v32  ;;  %v6087_v9 = vmul.f32 -1.442695, %v8854_v2 }
 0x28d   : > { %v3536_v3 = vpop.xlane.xlu1 %3535  ;;  %v6961_v6 = vpop.eup %6960  ;;  %v2685_v50 = vadd.f32 1.0, %v6959_v26  ;;  %6982 = vpow2.f32 %v6166_v51  ;;  %3605 = vadd.xlane.f32.xlu0 %v3161_v27  ;;  %v6167_v53 = vmul.f32 -1.442695, %v8859_v31 }
 0x28e   : > { %v3766_v59 = vadd.f32 %v3536_v3, %v3286_v37  ;;  %v3378_v42 = vpop.xlane.xlu0 %3377  ;;  %v1651_v43 = vpop.f32.mrb[107].mxu0  ;;  %v2686_v60 = vadd.f32 1.0, %v6961_v6  ;;  %v3210_v3 = vld [vmem:[#allocation2 + $0x68] sm:$0xff] }
 0x28f   : > { %v6963_v34 = vpop.eup %6962  ;;  %v3687_v17 = vadd.f32 %v3378_v42, %v3207_v16  ;;  %v1971_v55 = vpop.f32.mrb[107].mxu1  ;;  %6984 = vrcp.f32 %v2685_v50 }
 0x290   : > { %v6965_v44 = vpop.eup %6964  ;;  %v2606_v36 = vadd.f32 1.0, %v6963_v34  ;;  %3927 = vst.msk [vmem:[#allocation2 + $0x2c8] sm:$0xff] %vm3837_vm1, %v3766_v59  ;;  %6986 = vrcp.f32 %v2686_v60  ;;  %v8867_v24 = vpop.f32.mrb[108].mxu0  ;;  %3607 = vadd.xlane.f32.xlu1 %v3162_v52  ;;  %v3289_v60 = vld [vmem:[#allocation2 + $0x2e0] sm:$0xff] }
 0x291   : > { %v6967_v19 = vpop.eup %6966  ;;  %v2607_v38 = vadd.f32 1.0, %v6965_v44  ;;  %3848 = vst.msk [vmem:[#allocation2 + $0x50] sm:$0xff] %vm3837_vm1, %v3687_v17  ;;  %v3380_v62 = vpop.xlane.xlu1 %3379  ;;  %3449 = vadd.xlane.f32.xlu0 %v3083_v57  ;;  %v6088_v48 = vmul.f32 -1.442695, %v8867_v24 }
 0x292   : > { %v6969_v21 = vpop.eup %6968  ;;  %6988 = vrcp.f32 %v2606_v36  ;;  %v3538_v35 = vpop.xlane.xlu0 %3537  ;;  %v3688_v25 = vadd.f32 %v3380_v62, %v3208_v4  ;;  %v3163_v49 = vmul.f32 %v6967_v19, %v8789_v13 }
 0x293   : > { %v6971_v47 = vpop.eup %6970  ;;  %6990 = vrcp.f32 %v2607_v38  ;;  %v3767_v45 = vadd.f32 %v3538_v35, %v3287_v23  ;;  %v8870_v58 = vpop.f32.mrb[108].mxu1  ;;  %v3164_v34 = vmul.f32 %v6969_v21, %v8795_v7  ;;  %v3290_v38 = vld [vmem:[#allocation2 + $0x2e8] sm:$0xff] }
 0x294   : > { %v1656_v10 = vpop.f32.mrb[109].mxu0  ;;  %v6973_v54 = vpop.eup %6972  ;;  %6992 = vpow2.f32 %v6167_v53  ;;  %3849 = vst.msk [vmem:[#allocation2 + $0x58] sm:$0xff] %vm3837_vm1, %v3688_v25  ;;  %v6168_v30 = vmul.f32 -1.442695, %v8870_v58  ;;  %v3084_v39 = vmul.f32 %v6971_v47, %v8797_v29 }
 0x295   : > { %v1976_v12 = vpop.f32.mrb[109].mxu1  ;;  %v8874_v14 = vpop.f32.mrb[110].mxu0  ;;  %6994 = vpow2.f32 %v6087_v9  ;;  %3928 = vst.msk [vmem:[#allocation2 + $0x2d0] sm:$0xff] %vm3837_vm1, %v3767_v45  ;;  %3609 = vadd.xlane.f32.xlu0 %v3163_v49  ;;  %v3085_v13 = vmul.f32 %v6973_v54, %v8807_v15  ;;  %v3211_v10 = vld [vmem:[#allocation2 + $0x70] sm:$0xff] }
 0x296   : > { %v6975_v20 = vpop.eup %6974  ;;  %v8879_v11 = vpop.f32.mrb[110].mxu1  ;;  %6996 = vpow2.f32 %v6088_v48  ;;  %3451 = vadd.xlane.f32.xlu1 %v3084_v39  ;;  %v6089_v15 = vmul.f32 -1.442695, %v8874_v14 }
 0x297   : > { %v3540_v56 = vpop.xlane.xlu1 %3539  ;;  %v6977_v37 = vpop.eup %6976  ;;  %v2687_v33 = vadd.f32 1.0, %v6975_v20  ;;  %6998 = vpow2.f32 %v6168_v30  ;;  %v6169_v43 = vmul.f32 -1.442695, %v8879_v11 }
 0x298   : > { %v3768_v51 = vadd.f32 %v3540_v56, %v3288_v28  ;;  %v1659_v22 = vpop.f32.mrb[111].mxu0  ;;  %v1979_v16 = vpop.f32.mrb[111].mxu1  ;;  %v2688_v27 = vadd.f32 1.0, %v6977_v37 }
 0x299   : > { %v6979_v26 = vpop.eup %6978  ;;  %v3382_v32 = vpop.xlane.xlu0 %3381  ;;  %7000 = vrcp.f32 %v2687_v33  ;;  %3453 = vadd.xlane.f32.xlu0 %v3085_v13 }
 0x29a   : > { %v6981_v29 = vpop.eup %6980  ;;  %v2608_v6 = vadd.f32 1.0, %v6979_v26  ;;  %3929 = vst.msk [vmem:[#allocation2 + $0x2d8] sm:$0xff] %vm3837_vm1, %v3768_v51  ;;  %v3689_v50 = vadd.f32 %v3382_v32, %v3209_v63  ;;  %7002 = vrcp.f32 %v2688_v27  ;;  %v8887_v44 = vpop.f32.mrb[112].mxu0  ;;  %3611 = vadd.xlane.f32.xlu1 %v3164_v34  ;;  %v3292_v34 = vld [vmem:[#allocation2 + $0x2f8] sm:$0xff] }
 0x29b   : > { %v6983_v59 = vpop.eup %6982  ;;  %v2609_v42 = vadd.f32 1.0, %v6981_v29  ;;  %v3384_v17 = vpop.xlane.xlu1 %3383  ;;  %v6090_v7 = vmul.f32 -1.442695, %v8887_v44 }
 0x29c   : > { %v6985_v57 = vpop.eup %6984  ;;  %7004 = vrcp.f32 %v2608_v6  ;;  %v2689_v55 = vadd.f32 1.0, %v6983_v59  ;;  %3850 = vst.msk [vmem:[#allocation2 + $0x60] sm:$0xff] %vm3837_vm1, %v3689_v50  ;;  %v3690_v4 = vadd.f32 %v3384_v17, %v3210_v3  ;;  %v8889_v36 = vpop.f32.mrb[112].mxu1 }
 0x29d   : > { %v6987_v53 = vpop.eup %6986  ;;  %7006 = vrcp.f32 %v2609_v42  ;;  %v3542_v23 = vpop.xlane.xlu0 %3541  ;;  %v6170_v62 = vmul.f32 -1.442695, %v8889_v36  ;;  %v3165_v47 = vmul.f32 %v6985_v57, %v8809_v61 }
 0x29e   : > { %v1984_v19 = vpop.f32.mrb[113].mxu1  ;;  %v6989_v9 = vpop.eup %6988  ;;  %7008 = vrcp.f32 %v2689_v55  ;;  %v3769_v52 = vadd.f32 %v3542_v23, %v3289_v60  ;;  %3851 = vst.msk [vmem:[#allocation2 + $0x68] sm:$0xff] %vm3837_vm1, %v3690_v4  ;;  %v3166_v22 = vmul.f32 %v6987_v53, %v8814_v18 }
 0x29f   : > { %v1664_v21 = vpop.f32.mrb[113].mxu0  ;;  %v8894_v35 = vpop.f32.mrb[114].mxu1  ;;  %7010 = vpow2.f32 %v6169_v43  ;;  %v3086_v45 = vmul.f32 %v6989_v9, %v8816_v41  ;;  %3613 = vadd.xlane.f32.xlu0 %v3165_v47  ;;  %v3212_v41 = vld [vmem:[#allocation2 + $0x78] sm:$0xff] }
 0x2a0   : > { %v6991_v25 = vpop.eup %6990  ;;  %v3544_v48 = vpop.xlane.xlu1 %3543  ;;  %7012 = vpow2.f32 %v6089_v15  ;;  %3930 = vst.msk [vmem:[#allocation2 + $0x2e0] sm:$0xff] %vm3837_vm1, %v3769_v52  ;;  %v6171_v26 = vmul.f32 -1.442695, %v8894_v35 }
 0x2a1   : > { %v8898_v28 = vpop.f32.mrb[114].mxu0  ;;  %v6993_v54 = vpop.eup %6992  ;;  %v3770_v30 = vadd.f32 %v3544_v48, %v3290_v38  ;;  %v3087_v39 = vmul.f32 %v6991_v25, %v8827_v46  ;;  %7014 = vpow2.f32 %v6090_v7  ;;  %3455 = vadd.xlane.f32.xlu1 %v3086_v45  ;;  %v3291_v46 = vld [vmem:[#allocation2 + $0x2f0] sm:$0xff] }
 0x2a2   : > { %v1667_v12 = vpop.f32.mrb[115].mxu0  ;;  %v1987_v20 = vpop.f32.mrb[115].mxu1  ;;  %v2690_v56 = vadd.f32 1.0, %v6993_v54  ;;  %7016 = vpow2.f32 %v6170_v62  ;;  %v6091_v3 = vmul.f32 -1.442695, %v8898_v28  ;;  %v3213_v62 = vld [vmem:[#allocation2 + $0x80] sm:$0xff] }
 0x2a3   : > { %v6995_v49 = vpop.eup %6994  ;;  %v3386_v61 = vpop.xlane.xlu0 %3385  ;;  %3931 = vst.msk [vmem:[#allocation2 + $0x2e8] sm:$0xff] %vm3837_vm1, %v3770_v30  ;;  %3457 = vadd.xlane.f32.xlu0 %v3087_v39 }
 0x2a4   : > { %v6997_v63 = vpop.eup %6996  ;;  %v2610_v37 = vadd.f32 1.0, %v6995_v49  ;;  %v3691_v33 = vadd.f32 %v3386_v61, %v3211_v10  ;;  %7018 = vrcp.f32 %v2690_v56  ;;  %v3388_v27 = vpop.xlane.xlu1 %3387  ;;  %v3214_v10 = vld [vmem:[#allocation2 + $0x88] sm:$0xff]  ;;  %v3293_v56 = vld [vmem:[#allocation2 + $0x300] sm:$0xff] }
 0x2a5   : > { %v6999_v51 = vpop.eup %6998  ;;  %v2611_v16 = vadd.f32 1.0, %v6997_v63  ;;  %v3692_v29 = vadd.f32 %v3388_v27, %v3212_v41  ;;  %v8907_v6 = vpop.f32.mrb[116].mxu0  ;;  %3615 = vadd.xlane.f32.xlu1 %v3166_v22 }
 0x2a6   : > { %v7001_v32 = vpop.eup %7000  ;;  %7020 = vrcp.f32 %v2610_v37  ;;  %v2691_v13 = vadd.f32 1.0, %v6999_v51  ;;  %3852 = vst.msk [vmem:[#allocation2 + $0x70] sm:$0xff] %vm3837_vm1, %v3691_v33  ;;  %v8909_v50 = vpop.f32.mrb[116].mxu1  ;;  %v6092_v42 = vmul.f32 -1.442695, %v8907_v6 }
 0x2a7   : > { %v7003_v59 = vpop.eup %7002  ;;  %7022 = vrcp.f32 %v2611_v16  ;;  %v3546_v18 = vpop.xlane.xlu0 %3545  ;;  %3853 = vst.msk [vmem:[#allocation2 + $0x78] sm:$0xff] %vm3837_vm1, %v3692_v29  ;;  %v6172_v57 = vmul.f32 -1.442695, %v8909_v50  ;;  %v3167_v53 = vmul.f32 %v7001_v32, %v8829_v5  ;;  %v3294_v32 = vld [vmem:[#allocation2 + $0x308] sm:$0xff] }
 0x2a8   : > { %v1992_v43 = vpop.f32.mrb[117].mxu1  ;;  %v7005_v60 = vpop.eup %7004  ;;  %7024 = vrcp.f32 %v2691_v13  ;;  %v3771_v17 = vadd.f32 %v3546_v18, %v3291_v46  ;;  %v3168_v30 = vmul.f32 %v7003_v59, %v8834_v1 }
 0x2a9   : > { %v1672_v55 = vpop.f32.mrb[117].mxu0  ;;  %v8914_v15 = vpop.f32.mrb[118].mxu1  ;;  %v3088_v23 = vmul.f32 %v7005_v60, %v8836_v0  ;;  %7026 = vpow2.f32 %v6171_v26  ;;  %3617 = vadd.xlane.f32.xlu0 %v3167_v53 }
 0x2aa   : > { %v7007_v4 = vpop.eup %7006  ;;  %v6173_v7 = vmul.f32 -1.442695, %v8914_v15  ;;  %v3548_v19 = vpop.xlane.xlu1 %3547  ;;  %7028 = vpow2.f32 %v6091_v3  ;;  %3932 = vst.msk [vmem:[#allocation2 + $0x2f0] sm:$0xff] %vm3837_vm1, %v3771_v17  ;;  %v3215_v17 = vld [vmem:[#allocation2 + $0x90] sm:$0xff] }
 0x2ab   : > { %v8919_v38 = vpop.f32.mrb[118].mxu0  ;;  %v7009_v9 = vpop.eup %7008  ;;  %v3772_v52 = vadd.f32 %v3548_v19, %v3292_v34  ;;  %v3089_v45 = vmul.f32 %v7007_v4, %v8847_v8  ;;  %7030 = vpow2.f32 %v6092_v42  ;;  %3459 = vadd.xlane.f32.xlu1 %v3088_v23  ;;  %v3216_v19 = vld [vmem:[#allocation2 + $0x98] sm:$0xff] }
 0x2ac   : > { %v1675_v21 = vpop.f32.mrb[119].mxu0  ;;  %v1995_v25 = vpop.f32.mrb[119].mxu1  ;;  %7032 = vpow2.f32 %v6172_v57  ;;  %v6093_v8 = vmul.f32 -1.442695, %v8919_v38  ;;  %v3169_v3 = vmul.f32 %v7009_v9, %v8850_v40 }
 0x2ad   : > { %v7011_v47 = vpop.eup %7010  ;;  %3933 = vst.msk [vmem:[#allocation2 + $0x2f8] sm:$0xff] %vm3837_vm1, %v3772_v52  ;;  %v3390_v48 = vpop.xlane.xlu0 %3389  ;;  %7034 = vpow2.f32 %v6173_v7  ;;  %3461 = vadd.xlane.f32.xlu0 %v3089_v45 }
 0x2ae   : > { %v7013_v5 = vpop.eup %7012  ;;  %v2692_v0 = vadd.f32 1.0, %v7011_v47  ;;  %v3693_v20 = vadd.f32 %v3390_v48, %v3213_v62  ;;  %v3392_v61 = vpop.xlane.xlu1 %3391  ;;  %v3295_v47 = vld [vmem:[#allocation2 + $0x310] sm:$0xff] }
 0x2af   : > { %v7015_v54 = vpop.eup %7014  ;;  %v2612_v12 = vadd.f32 1.0, %v7013_v5  ;;  %v8926_v41 = vpop.f32.mrb[120].mxu0  ;;  %3619 = vadd.xlane.f32.xlu1 %v3168_v30  ;;  %v3694_v1 = vadd.f32 %v3392_v61, %v3214_v10 }
 0x2b0   : > { %v7017_v49 = vpop.eup %7016  ;;  %7036 = vrcp.f32 %v2692_v0  ;;  %v2613_v39 = vadd.f32 1.0, %v7015_v54  ;;  %3854 = vst.msk [vmem:[#allocation2 + $0x80] sm:$0xff] %vm3837_vm1, %v3693_v20  ;;  %v6094_v33 = vmul.f32 -1.442695, %v8926_v41  ;;  %v8930_v51 = vpop.f32.mrb[120].mxu1 }
 0x2b1   : > { %v7019_v63 = vpop.eup %7018  ;;  %7038 = vrcp.f32 %v2612_v12  ;;  %v2693_v37 = vadd.f32 1.0, %v7017_v49  ;;  %v1680_v22 = vpop.f32.mrb[121].mxu0  ;;  %v6174_v46 = vmul.f32 -1.442695, %v8930_v51  ;;  %3855 = vst.msk [vmem:[#allocation2 + $0x88] sm:$0xff] %vm3837_vm1, %v3694_v1  ;;  %3621 = vadd.xlane.f32.xlu0 %v3169_v3 }
 0x2b2   : > { %v7021_v16 = vpop.eup %7020  ;;  %7040 = vrcp.f32 %v2613_v39  ;;  %v3550_v26 = vpop.xlane.xlu0 %3549  ;;  %v3170_v52 = vmul.f32 %v7019_v63, %v8859_v31 }
 0x2b3   : > { %v2000_v27 = vpop.f32.mrb[121].mxu1  ;;  %v7023_v13 = vpop.eup %7022  ;;  %v3090_v29 = vmul.f32 %v7021_v16, %v8854_v2  ;;  %7042 = vrcp.f32 %v2693_v37  ;;  %v3773_v59 = vadd.f32 %v3550_v26, %v3293_v56  ;;  %v3296_v56 = vld [vmem:[#allocation2 + $0x318] sm:$0xff] }
 0x2b4   : > { %v8936_v18 = vpop.f32.mrb[122].mxu1  ;;  %v8938_v42 = vpop.f32.mrb[122].mxu0  ;;  %7044 = vpow2.f32 %v6093_v8  ;;  %v3091_v40 = vmul.f32 %v7023_v13, %v8867_v24 }
 0x2b5   : > { %v7025_v43 = vpop.eup %7024  ;;  %v6175_v34 = vmul.f32 -1.442695, %v8936_v18  ;;  %v3552_v60 = vpop.xlane.xlu1 %3551  ;;  %3934 = vst.msk [vmem:[#allocation2 + $0x300] sm:$0xff] %vm3837_vm1, %v3773_v59  ;;  %7046 = vpow2.f32 %v6094_v33  ;;  %3463 = vadd.xlane.f32.xlu1 %v3090_v29  ;;  %v6095_v10 = vmul.f32 -1.442695, %v8938_v42 }
 0x2b6   : > { %v1683_v57 = vpop.f32.mrb[123].mxu0  ;;  %v7027_v55 = vpop.eup %7026  ;;  %v3774_v2 = vadd.f32 %v3552_v60, %v3294_v32  ;;  %7048 = vpow2.f32 %v6174_v46  ;;  %3465 = vadd.xlane.f32.xlu0 %v3091_v40  ;;  %v3171_v63 = vmul.f32 %v7025_v43, %v8870_v58  ;;  %v3217_v32 = vld [vmem:[#allocation2 + $0xa0] sm:$0xff] }
 0x2b7   : > { %v2003_v4 = vpop.f32.mrb[123].mxu1  ;;  %v7029_v53 = vpop.eup %7028  ;;  %v2694_v23 = vadd.f32 1.0, %v7027_v55  ;;  %7050 = vpow2.f32 %v6175_v34 }
 0x2b8   : > { %v3394_v7 = vpop.xlane.xlu0 %3393  ;;  %v7031_v9 = vpop.eup %7030  ;;  %v2614_v62 = vadd.f32 1.0, %v7029_v53  ;;  %3935 = vst.msk [vmem:[#allocation2 + $0x308] sm:$0xff] %vm3837_vm1, %v3774_v2  ;;  %v3297_v2 = vld [vmem:[#allocation2 + $0x320] sm:$0xff] }
 0x2b9   : > { %v3695_v24 = vadd.f32 %v3394_v7, %v3215_v17  ;;  %v7033_v21 = vpop.eup %7032  ;;  %7052 = vrcp.f32 %v2694_v23  ;;  %v2615_v25 = vadd.f32 1.0, %v7031_v9  ;;  %v3396_v45 = vpop.xlane.xlu1 %3395  ;;  %3623 = vadd.xlane.f32.xlu1 %v3170_v52 }
 0x2ba   : > { %v8945_v5 = vpop.f32.mrb[124].mxu0  ;;  %v7035_v0 = vpop.eup %7034  ;;  %7054 = vrcp.f32 %v2614_v62  ;;  %v2695_v48 = vadd.f32 1.0, %v7033_v21  ;;  %v3696_v31 = vadd.f32 %v3396_v45, %v3216_v19  ;;  %3625 = vadd.xlane.f32.xlu0 %v3171_v63  ;;  %v3298_v45 = vld [vmem:[#allocation2 + $0x328] sm:$0xff] }
 0x2bb   : > { %3856 = vst.msk [vmem:[#allocation2 + $0x90] sm:$0xff] %vm3837_vm1, %v3695_v24  ;;  %v8949_v54 = vpop.f32.mrb[124].mxu1  ;;  %v1688_v30 = vpop.f32.mrb[125].mxu0  ;;  %7056 = vrcp.f32 %v2615_v25  ;;  %v2696_v20 = vadd.f32 1.0, %v7035_v0  ;;  %v6096_v39 = vmul.f32 -1.442695, %v8945_v5 }
 0x2bc   : > { %v7037_v12 = vpop.eup %7036  ;;  %v3554_v49 = vpop.xlane.xlu0 %3553  ;;  %7058 = vrcp.f32 %v2695_v48  ;;  %3857 = vst.msk [vmem:[#allocation2 + $0x98] sm:$0xff] %vm3837_vm1, %v3696_v31  ;;  %v6176_v1 = vmul.f32 -1.442695, %v8949_v54 }
 0x2bd   : > { %v2008_v8 = vpop.f32.mrb[125].mxu1  ;;  %v7039_v61 = vpop.eup %7038  ;;  %v3775_v37 = vadd.f32 %v3554_v49, %v3295_v47  ;;  %7060 = vrcp.f32 %v2696_v20 }
 0x2be   : > { %v8955_v33 = vpop.f32.mrb[126].mxu1  ;;  %v8957_v22 = vpop.f32.mrb[126].mxu0  ;;  %v3092_v26 = vmul.f32 %v7039_v61, %v8874_v14  ;;  %7062 = vpow2.f32 %v6095_v10  ;;  %v3218_v14 = vld [vmem:[#allocation2 + $0xa8] sm:$0xff] }
 0x2bf   : > { %v7041_v16 = vpop.eup %7040  ;;  %v6177_v46 = vmul.f32 -1.442695, %v8955_v33  ;;  %v3556_v27 = vpop.xlane.xlu1 %3555  ;;  %3936 = vst.msk [vmem:[#allocation2 + $0x310] sm:$0xff] %vm3837_vm1, %v3775_v37  ;;  %7064 = vpow2.f32 %v6096_v39  ;;  %v6097_v19 = vmul.f32 -1.442695, %v8957_v22 }
 0x2c0   : > { %v1691_v13 = vpop.f32.mrb[127].mxu0  ;;  %v7043_v58 = vpop.eup %7042  ;;  %v3093_v3 = vmul.f32 %v7041_v16, %v8887_v44  ;;  %v3776_v29 = vadd.f32 %v3556_v27, %v3296_v56  ;;  %3467 = vadd.xlane.f32.xlu1 %v3092_v26  ;;  %7066 = vpow2.f32 %v6176_v1  ;;  %v3172_v44 = vmul.f32 %v7037_v12, %v8879_v11  ;;  %v3219_v56 = vld [vmem:[#allocation2 + $0xb0] sm:$0xff] }
 0x2c1   : > { %v2011_v59 = vpop.f32.mrb[127].mxu1  ;;  %v7045_v43 = vpop.eup %7044  ;;  %7068 = vpow2.f32 %v6177_v46  ;;  %v3173_v48 = vmul.f32 %v7043_v58, %v8889_v36 }
 0x2c2   : > { %v3398_v34 = vpop.xlane.xlu0 %3397  ;;  %v7047_v60 = vpop.eup %7046  ;;  %v2616_v17 = vadd.f32 1.0, %v7045_v43  ;;  %3937 = vst.msk [vmem:[#allocation2 + $0x318] sm:$0xff] %vm3837_vm1, %v3776_v29  ;;  %3469 = vadd.xlane.f32.xlu0 %v3093_v3  ;;  %v3299_v3 = vld [vmem:[#allocation2 + $0x330] sm:$0xff] }
 0x2c3   : > { %v3697_v57 = vadd.f32 %v3398_v34, %v3217_v32  ;;  %v7049_v55 = vpop.eup %7048  ;;  %v2617_v40 = vadd.f32 1.0, %v7047_v60  ;;  %v3400_v4 = vpop.xlane.xlu1 %3399  ;;  %v3220_v32 = vld [vmem:[#allocation2 + $0xb8] sm:$0xff] }
 0x2c4   : > { %v8965_v53 = vpop.f32.mrb[128].mxu0  ;;  %v7051_v23 = vpop.eup %7050  ;;  %7070 = vrcp.f32 %v2616_v17  ;;  %v2697_v7 = vadd.f32 1.0, %v7049_v55  ;;  %v3698_v9 = vadd.f32 %v3400_v4, %v3218_v14  ;;  %3627 = vadd.xlane.f32.xlu1 %v3172_v44 }
 0x2c5   : > { %3858 = vst.msk [vmem:[#allocation2 + $0xa0] sm:$0xff] %vm3837_vm1, %v3697_v57  ;;  %v8969_v52 = vpop.f32.mrb[128].mxu1  ;;  %v1696_v62 = vpop.f32.mrb[129].mxu0  ;;  %7072 = vrcp.f32 %v2617_v40  ;;  %v2698_v11 = vadd.f32 1.0, %v7051_v23  ;;  %v6098_v25 = vmul.f32 -1.442695, %v8965_v53 }
 0x2c6   : > { %v7053_v24 = vpop.eup %7052  ;;  %v3558_v21 = vpop.xlane.xlu0 %3557  ;;  %7074 = vrcp.f32 %v2697_v7  ;;  %3859 = vst.msk [vmem:[#allocation2 + $0xa8] sm:$0xff] %vm3837_vm1, %v3698_v9  ;;  %v6178_v31 = vmul.f32 -1.442695, %v8969_v52  ;;  %3629 = vadd.xlane.f32.xlu0 %v3173_v48  ;;  %v3300_v9 = vld [vmem:[#allocation2 + $0x338] sm:$0xff] }
 0x2c7   : > { %v2016_v47 = vpop.f32.mrb[129].mxu1  ;;  %v7055_v0 = vpop.eup %7054  ;;  %v3777_v10 = vadd.f32 %v3558_v21, %v3297_v2  ;;  %7076 = vrcp.f32 %v2698_v11  ;;  %v3174_v13 = vmul.f32 %v7053_v24, %v8894_v35 }
 0x2c8   : > { %v8975_v30 = vpop.f32.mrb[130].mxu1  ;;  %v8977_v12 = vpop.f32.mrb[130].mxu0  ;;  %v3094_v49 = vmul.f32 %v7055_v0, %v8898_v28  ;;  %7078 = vpow2.f32 %v6097_v19 }
 0x2c9   : > { %v7057_v20 = vpop.eup %7056  ;;  %v6179_v39 = vmul.f32 -1.442695, %v8975_v30  ;;  %v3560_v8 = vpop.xlane.xlu1 %3559  ;;  %3938 = vst.msk [vmem:[#allocation2 + $0x320] sm:$0xff] %vm3837_vm1, %v3777_v10  ;;  %v6099_v1 = vmul.f32 -1.442695, %v8977_v12  ;;  %7080 = vpow2.f32 %v6098_v25  ;;  %v3221_v25 = vld [vmem:[#allocation2 + $0xc0] sm:$0xff] }
 0x2ca   : > { %v1699_v61 = vpop.f32.mrb[131].mxu0  ;;  %v7059_v36 = vpop.eup %7058  ;;  %v3095_v63 = vmul.f32 %v7057_v20, %v8907_v6  ;;  %v3778_v37 = vadd.f32 %v3560_v8, %v3298_v45  ;;  %3471 = vadd.xlane.f32.xlu1 %v3094_v49  ;;  %7082 = vpow2.f32 %v6178_v31 }
 0x2cb   : > { %v2019_v16 = vpop.f32.mrb[131].mxu1  ;;  %v8984_v26 = vpop.eup %7060  ;;  %7084 = vpow2.f32 %v6179_v39  ;;  %v3175_v34 = vmul.f32 %v7059_v36, %v8909_v50 }
 0x2cc   : > { %v3402_v28 = vpop.xlane.xlu0 %3401  ;;  %v7063_v46 = vpop.eup %7062  ;;  %3939 = vst.msk [vmem:[#allocation2 + $0x328] sm:$0xff] %vm3837_vm1, %v3778_v37  ;;  %7086 = vpow2.f32 %v6099_v1  ;;  %3473 = vadd.xlane.f32.xlu0 %v3095_v63  ;;  %v3301_v63 = vld [vmem:[#allocation2 + $0x340] sm:$0xff] }
 0x2cd   : > { %v3699_v27 = vadd.f32 %v3402_v28, %v3219_v56  ;;  %v7065_v6 = vpop.eup %7064  ;;  %v2618_v58 = vadd.f32 1.0, %v7063_v46  ;;  %v8988_v29 = vpop.f32.mrb[132].mxu0  ;;  %v3222_v56 = vld [vmem:[#allocation2 + $0xc8] sm:$0xff] }
 0x2ce   : > { %v8990_v59 = vpop.f32.mrb[132].mxu1  ;;  %v7067_v43 = vpop.eup %7066  ;;  %v2619_v14 = vadd.f32 1.0, %v7065_v6  ;;  %3631 = vadd.xlane.f32.xlu1 %v3174_v13  ;;  %v6100_v40 = vmul.f32 -1.442695, %v8988_v29 }
 0x2cf   : > { %3860 = vst.msk [vmem:[#allocation2 + $0xb0] sm:$0xff] %vm3837_vm1, %v3699_v27  ;;  %v3404_v60 = vpop.xlane.xlu1 %3403  ;;  %v2024_v17 = vpop.f32.mrb[133].mxu1  ;;  %7088 = vrcp.f32 %v2618_v58  ;;  %v2699_v35 = vadd.f32 1.0, %v7067_v43  ;;  %v6180_v7 = vmul.f32 -1.442695, %v8990_v59 }
 0x2d0   : > { %v7069_v57 = vpop.eup %7068  ;;  %v3562_v55 = vpop.xlane.xlu0 %3561  ;;  %v3700_v44 = vadd.f32 %v3404_v60, %v3220_v32  ;;  %7090 = vrcp.f32 %v2619_v14  ;;  %3633 = vadd.xlane.f32.xlu0 %v3175_v34  ;;  %v3302_v17 = vld [vmem:[#allocation2 + $0x348] sm:$0xff] }
 0x2d1   : > { %v1704_v2 = vpop.f32.mrb[133].mxu0  ;;  %v7071_v4 = vpop.eup %7070  ;;  %v2700_v23 = vadd.f32 1.0, %v7069_v57  ;;  %v3779_v50 = vadd.f32 %v3562_v55, %v3299_v3  ;;  %7092 = vrcp.f32 %v2699_v35 }
 0x2d2   : > { %v8996_v19 = vpop.f32.mrb[134].mxu1  ;;  %v8998_v62 = vpop.f32.mrb[134].mxu0  ;;  %v3096_v11 = vmul.f32 %v7071_v4, %v8919_v38  ;;  %3861 = vst.msk [vmem:[#allocation2 + $0xb8] sm:$0xff] %vm3837_vm1, %v3700_v44  ;;  %v3223_v44 = vld [vmem:[#allocation2 + $0xd0] sm:$0xff] }
 0x2d3   : > { %v7073_v24 = vpop.eup %7072  ;;  %v6181_v21 = vmul.f32 -1.442695, %v8996_v19  ;;  %v1707_v47 = vpop.f32.mrb[135].mxu0  ;;  %7094 = vrcp.f32 %v2700_v23  ;;  %3940 = vst.msk [vmem:[#allocation2 + $0x330] sm:$0xff] %vm3837_vm1, %v3779_v50  ;;  %v6101_v31 = vmul.f32 -1.442695, %v8998_v62 }
 0x2d4   : > { %v2027_v45 = vpop.f32.mrb[135].mxu1  ;;  %v7075_v0 = vpop.eup %7074  ;;  %v3097_v48 = vmul.f32 %v7073_v24, %v8926_v41  ;;  %7096 = vpow2.f32 %v6100_v40  ;;  %3475 = vadd.xlane.f32.xlu1 %v3096_v11  ;;  %v3176_v41 = vmul.f32 %v8984_v26, %v8914_v15 }
 0x2d5   : > { %v3564_v10 = vpop.xlane.xlu1 %3563  ;;  %v9006_v20 = vpop.eup %7076  ;;  %7098 = vpow2.f32 %v6180_v7  ;;  %v3177_v15 = vmul.f32 %v7075_v0, %v8930_v51  ;;  %v3224_v45 = vld [vmem:[#allocation2 + $0xd8] sm:$0xff] }
 0x2d6   : > { %v3780_v38 = vadd.f32 %v3564_v10, %v3300_v9  ;;  %v3406_v49 = vpop.xlane.xlu0 %3405  ;;  %v7079_v39 = vpop.eup %7078  ;;  %7100 = vpow2.f32 %v6181_v21  ;;  %3477 = vadd.xlane.f32.xlu0 %v3097_v48  ;;  %v3303_v48 = vld [vmem:[#allocation2 + $0x350] sm:$0xff] }
 0x2d7   : > { %v3701_v8 = vadd.f32 %v3406_v49, %v3221_v25  ;;  %v7081_v61 = vpop.eup %7080  ;;  %v2620_v36 = vadd.f32 1.0, %v7079_v39  ;;  %v9011_v37 = vpop.f32.mrb[136].mxu0  ;;  %7102 = vpow2.f32 %v6101_v31 }
 0x2d8   : > { %3941 = vst.msk [vmem:[#allocation2 + $0x338] sm:$0xff] %vm3837_vm1, %v3780_v38  ;;  %v9013_v1 = vpop.f32.mrb[136].mxu1  ;;  %v7083_v16 = vpop.eup %7082  ;;  %v2621_v28 = vadd.f32 1.0, %v7081_v61  ;;  %3635 = vadd.xlane.f32.xlu1 %v3176_v41  ;;  %v6102_v14 = vmul.f32 -1.442695, %v9011_v37  ;;  %v3178_v38 = vmul.f32 %v9006_v20, %v8936_v18 }
 0x2d9   : > { %3862 = vst.msk [vmem:[#allocation2 + $0xc0] sm:$0xff] %vm3837_vm1, %v3701_v8  ;;  %v3408_v46 = vpop.xlane.xlu1 %3407  ;;  %v2032_v27 = vpop.f32.mrb[137].mxu1  ;;  %7104 = vrcp.f32 %v2620_v36  ;;  %v2701_v26 = vadd.f32 1.0, %v7083_v16  ;;  %v6182_v55 = vmul.f32 -1.442695, %v9013_v1 }
 0x2da   : > { %v7085_v32 = vpop.eup %7084  ;;  %v3566_v6 = vpop.xlane.xlu0 %3565  ;;  %v3702_v13 = vadd.f32 %v3408_v46, %v3222_v56  ;;  %7106 = vrcp.f32 %v2621_v28  ;;  %3637 = vadd.xlane.f32.xlu0 %v3177_v15 }
 0x2db   : > { %v1712_v58 = vpop.f32.mrb[137].mxu0  ;;  %v7087_v3 = vpop.eup %7086  ;;  %v2702_v43 = vadd.f32 1.0, %v7085_v32  ;;  %v3781_v34 = vadd.f32 %v3566_v6, %v3301_v63  ;;  %7108 = vrcp.f32 %v2701_v26  ;;  %v3304_v32 = vld [vmem:[#allocation2 + $0x358] sm:$0xff] }
 0x2dc   : > { %v9018_v60 = vpop.f32.mrb[138].mxu1  ;;  %v9020_v57 = vpop.f32.mrb[138].mxu0  ;;  %v2622_v51 = vadd.f32 1.0, %v7087_v3  ;;  %3863 = vst.msk [vmem:[#allocation2 + $0xc8] sm:$0xff] %vm3837_vm1, %v3702_v13  ;;  %v3225_v13 = vld [vmem:[#allocation2 + $0xe0] sm:$0xff] }
 0x2dd   : > { %v7089_v35 = vpop.eup %7088  ;;  %v1715_v40 = vpop.f32.mrb[139].mxu0  ;;  %7110 = vrcp.f32 %v2702_v43  ;;  %3942 = vst.msk [vmem:[#allocation2 + $0x340] sm:$0xff] %vm3837_vm1, %v3781_v34  ;;  %v6183_v23 = vmul.f32 -1.442695, %v9018_v60  ;;  %v6103_v25 = vmul.f32 -1.442695, %v9020_v57 }
 0x2de   : > { %v7091_v2 = vpop.eup %7090  ;;  %v3098_v4 = vmul.f32 %v7089_v35, %v8938_v42  ;;  %v3568_v50 = vpop.xlane.xlu1 %3567  ;;  %7112 = vrcp.f32 %v2622_v51 }
 0x2df   : > { %v2035_v7 = vpop.f32.mrb[139].mxu1  ;;  %v7093_v9 = vpop.eup %7092  ;;  %v3099_v24 = vmul.f32 %v7091_v2, %v8945_v5  ;;  %v3782_v11 = vadd.f32 %v3568_v50, %v3302_v17  ;;  %7114 = vpow2.f32 %v6102_v14  ;;  %v3226_v50 = vld [vmem:[#allocation2 + $0xe8] sm:$0xff] }
 0x2e0   : > { %v3410_v21 = vpop.xlane.xlu0 %3409  ;;  %v9029_v47 = vpop.eup %7094  ;;  %3479 = vadd.xlane.f32.xlu1 %v3098_v4  ;;  %7116 = vpow2.f32 %v6182_v55  ;;  %v3179_v61 = vmul.f32 %v7093_v9, %v8949_v54 }
 0x2e1   : > { %v3703_v42 = vadd.f32 %v3410_v21, %v3223_v44  ;;  %v7097_v0 = vpop.eup %7096  ;;  %3943 = vst.msk [vmem:[#allocation2 + $0x348] sm:$0xff] %vm3837_vm1, %v3782_v11  ;;  %v9032_v10 = vpop.f32.mrb[140].mxu0  ;;  %7118 = vpow2.f32 %v6183_v23  ;;  %3481 = vadd.xlane.f32.xlu0 %v3099_v24  ;;  %v3305_v23 = vld [vmem:[#allocation2 + $0x360] sm:$0xff]  ;;  %v3180_v24 = vmul.f32 %v9029_v47, %v8955_v33 }
 0x2e2   : > { %v9034_v31 = vpop.f32.mrb[140].mxu1  ;;  %v7099_v5 = vpop.eup %7098  ;;  %v2623_v49 = vadd.f32 1.0, %v7097_v0  ;;  %7120 = vpow2.f32 %v6103_v25  ;;  %v6104_v20 = vmul.f32 -1.442695, %v9032_v10 }
 0x2e3   : > { %3864 = vst.msk [vmem:[#allocation2 + $0xd0] sm:$0xff] %vm3837_vm1, %v3703_v42  ;;  %v3412_v39 = vpop.xlane.xlu1 %3411  ;;  %v2040_v8 = vpop.f32.mrb[141].mxu1  ;;  %v2703_v41 = vadd.f32 1.0, %v7099_v5  ;;  %v6184_v6 = vmul.f32 -1.442695, %v9034_v31 }
 0x2e4   : > { %v7101_v56 = vpop.eup %7100  ;;  %v3570_v36 = vpop.xlane.xlu0 %3569  ;;  %v3704_v63 = vadd.f32 %v3412_v39, %v3224_v45  ;;  %7122 = vrcp.f32 %v2623_v49  ;;  %3639 = vadd.xlane.f32.xlu1 %v3178_v38 }
 0x2e5   : > { %v1720_v16 = vpop.f32.mrb[141].mxu0  ;;  %v7103_v28 = vpop.eup %7102  ;;  %v2704_v46 = vadd.f32 1.0, %v7101_v56  ;;  %v3783_v18 = vadd.f32 %v3570_v36, %v3303_v48  ;;  %7124 = vrcp.f32 %v2703_v41  ;;  %3641 = vadd.xlane.f32.xlu0 %v3179_v61  ;;  %v3227_v36 = vld [vmem:[#allocation2 + $0xf0] sm:$0xff] }
 0x2e6   : > { %v9041_v27 = vpop.f32.mrb[142].mxu1  ;;  %v9043_v15 = vpop.f32.mrb[142].mxu0  ;;  %v2624_v54 = vadd.f32 1.0, %v7103_v28  ;;  %3865 = vst.msk [vmem:[#allocation2 + $0xd8] sm:$0xff] %vm3837_vm1, %v3704_v63 }
 0x2e7   : > { %v7105_v26 = vpop.eup %7104  ;;  %v1723_v58 = vpop.f32.mrb[143].mxu0  ;;  %7126 = vrcp.f32 %v2704_v46  ;;  %3944 = vst.msk [vmem:[#allocation2 + $0x350] sm:$0xff] %vm3837_vm1, %v3783_v18  ;;  %v6185_v34 = vmul.f32 -1.442695, %v9041_v27  ;;  %v6105_v40 = vmul.f32 -1.442695, %v9043_v15 }
 0x2e8   : > { %v7107_v3 = vpop.eup %7106  ;;  %v3100_v43 = vmul.f32 %v7105_v26, %v8957_v22  ;;  %v3572_v14 = vpop.xlane.xlu1 %3571  ;;  %7128 = vrcp.f32 %v2624_v54 }
 0x2e9   : > { %v2043_v17 = vpop.f32.mrb[143].mxu1  ;;  %v7109_v35 = vpop.eup %7108  ;;  %v3101_v51 = vmul.f32 %v7107_v3, %v8965_v53  ;;  %v3784_v55 = vadd.f32 %v3572_v14, %v3304_v32  ;;  %7130 = vpow2.f32 %v6104_v20  ;;  %v3228_v14 = vld [vmem:[#allocation2 + $0xf8] sm:$0xff] }
 0x2ea   : > { %v3414_v44 = vpop.xlane.xlu0 %3413  ;;  %v9052_v2 = vpop.eup %7110  ;;  %3483 = vadd.xlane.f32.xlu1 %v3100_v43  ;;  %7132 = vpow2.f32 %v6184_v6  ;;  %v3181_v45 = vmul.f32 %v7109_v35, %v8969_v52  ;;  %v3306_v52 = vld [vmem:[#allocation2 + $0x368] sm:$0xff] }
 0x2eb   : > { %v3705_v22 = vadd.f32 %v3414_v44, %v3225_v13  ;;  %v7113_v4 = vpop.eup %7112  ;;  %3945 = vst.msk [vmem:[#allocation2 + $0x358] sm:$0xff] %vm3837_vm1, %v3784_v55  ;;  %v9055_v7 = vpop.f32.mrb[144].mxu0  ;;  %7134 = vpow2.f32 %v6185_v34  ;;  %3485 = vadd.xlane.f32.xlu0 %v3101_v51  ;;  %v3307_v34 = vld [vmem:[#allocation2 + $0x370] sm:$0xff]  ;;  %v3182_v51 = vmul.f32 %v9052_v2, %v8975_v30 }
 0x2ec   : > { %v9057_v9 = vpop.f32.mrb[144].mxu1  ;;  %v7115_v53 = vpop.eup %7114  ;;  %v6106_v11 = vmul.f32 -1.442695, %v9055_v7  ;;  %7136 = vpow2.f32 %v6105_v40  ;;  %v3102_v28 = vmul.f32 %v7113_v4, %v8977_v12 }
 0x2ed   : > { %3866 = vst.msk [vmem:[#allocation2 + $0xe0] sm:$0xff] %vm3837_vm1, %v3705_v22  ;;  %v2048_v21 = vpop.f32.mrb[145].mxu1  ;;  %v1728_v25 = vpop.f32.mrb[145].mxu0  ;;  %v2625_v0 = vadd.f32 1.0, %v7115_v53  ;;  %v6186_v41 = vmul.f32 -1.442695, %v9057_v9 }
 0x2ee   : > { %v7117_v42 = vpop.eup %7116  ;;  %v3574_v48 = vpop.xlane.xlu0 %3573  ;;  %3643 = vadd.xlane.f32.xlu1 %v3180_v24  ;;  %7138 = vpow2.f32 %v6106_v11 }
 0x2ef   : > { %v3416_v5 = vpop.xlane.xlu1 %3415  ;;  %v7119_v38 = vpop.eup %7118  ;;  %v2705_v49 = vadd.f32 1.0, %v7117_v42  ;;  %v3785_v39 = vadd.f32 %v3574_v48, %v3305_v23  ;;  %7140 = vrcp.f32 %v2625_v0  ;;  %3645 = vadd.xlane.f32.xlu0 %v3181_v45  ;;  %v3308_v0 = vld [vmem:[#allocation2 + $0x378] sm:$0xff]  ;;  %v3229_v48 = vld [vmem:[#allocation2 + $0x100] sm:$0xff] }
 0x2f0   : > { %v3706_v33 = vadd.f32 %v3416_v5, %v3226_v50  ;;  %v9064_v47 = vpop.f32.mrb[146].mxu1  ;;  %v9066_v8 = vpop.f32.mrb[146].mxu0  ;;  %v2706_v61 = vadd.f32 1.0, %v7119_v38 }
 0x2f1   : > { %v7121_v56 = vpop.eup %7120  ;;  %v1731_v63 = vpop.f32.mrb[147].mxu0  ;;  %7142 = vrcp.f32 %v2705_v49  ;;  %3946 = vst.msk [vmem:[#allocation2 + $0x360] sm:$0xff] %vm3837_vm1, %v3785_v39  ;;  %v6187_v18 = vmul.f32 -1.442695, %v9064_v47  ;;  %v6107_v13 = vmul.f32 -1.442695, %v9066_v8 }
 0x2f2   : > { %v7123_v16 = vpop.eup %7122  ;;  %v2626_v46 = vadd.f32 1.0, %v7121_v56  ;;  %3867 = vst.msk [vmem:[#allocation2 + $0xe8] sm:$0xff] %vm3837_vm1, %v3706_v33  ;;  %v2051_v20 = vpop.f32.mrb[147].mxu1  ;;  %7144 = vrcp.f32 %v2706_v61  ;;  %3487 = vadd.xlane.f32.xlu1 %v3102_v28 }
 0x2f3   : > { %v7125_v32 = vpop.eup %7124  ;;  %v3103_v26 = vmul.f32 %v7123_v16, %v8988_v29  ;;  %v3576_v54 = vpop.xlane.xlu1 %3575  ;;  %v3309_v20 = vld [vmem:[#allocation2 + $0x380] sm:$0xff] }
 0x2f4   : > { %v3418_v6 = vpop.xlane.xlu0 %3417  ;;  %v9075_v58 = vpop.eup %7126  ;;  %7146 = vrcp.f32 %v2626_v46  ;;  %v3786_v12 = vadd.f32 %v3576_v54, %v3306_v52  ;;  %v3183_v4 = vmul.f32 %v7125_v32, %v8990_v59  ;;  %v3230_v32 = vld [vmem:[#allocation2 + $0x108] sm:$0xff] }
 0x2f5   : > { %v3707_v3 = vadd.f32 %v3418_v6, %v3227_v36  ;;  %v7129_v43 = vpop.eup %7128  ;;  %7148 = vpow2.f32 %v6186_v41  ;;  %v9077_v17 = vpop.f32.mrb[148].mxu0  ;;  %3489 = vadd.xlane.f32.xlu0 %v3103_v26 }
 0x2f6   : > { %v9079_v35 = vpop.f32.mrb[148].mxu1  ;;  %v7131_v29 = vpop.eup %7130  ;;  %7150 = vpow2.f32 %v6187_v18  ;;  %3947 = vst.msk [vmem:[#allocation2 + $0x368] sm:$0xff] %vm3837_vm1, %v3786_v12  ;;  %v6108_v55 = vmul.f32 -1.442695, %v9077_v17  ;;  %3647 = vadd.xlane.f32.xlu1 %v3182_v51  ;;  %v3104_v38 = vmul.f32 %v7129_v43, %v8998_v62 }
 0x2f7   : > { %3868 = vst.msk [vmem:[#allocation2 + $0xf0] sm:$0xff] %vm3837_vm1, %v3707_v3  ;;  %v2056_v44 = vpop.f32.mrb[149].mxu1  ;;  %v1736_v40 = vpop.f32.mrb[149].mxu0  ;;  %v2627_v23 = vadd.f32 1.0, %v7131_v29  ;;  %7152 = vpow2.f32 %v6107_v13  ;;  %v6188_v39 = vmul.f32 -1.442695, %v9079_v35  ;;  %v3184_v13 = vmul.f32 %v9075_v58, %v8996_v19 }
 0x2f8   : > { %v7133_v22 = vpop.eup %7132  ;;  %v3578_v50 = vpop.xlane.xlu0 %3577  ;;  %7154 = vpow2.f32 %v6108_v55 }
 0x2f9   : > { %v3420_v53 = vpop.xlane.xlu1 %3419  ;;  %v7135_v24 = vpop.eup %7134  ;;  %v2707_v11 = vadd.f32 1.0, %v7133_v22  ;;  %v3787_v30 = vadd.f32 %v3578_v50, %v3307_v34  ;;  %7156 = vrcp.f32 %v2627_v23  ;;  %3649 = vadd.xlane.f32.xlu0 %v3183_v4  ;;  %v3310_v23 = vld [vmem:[#allocation2 + $0x388] sm:$0xff]  ;;  %v3231_v50 = vld [vmem:[#allocation2 + $0x110] sm:$0xff] }
 0x2fa   : > { %v3708_v2 = vadd.f32 %v3420_v53, %v3228_v14  ;;  %v9087_v21 = vpop.f32.mrb[150].mxu1  ;;  %v9089_v25 = vpop.f32.mrb[150].mxu0  ;;  %v2708_v45 = vadd.f32 1.0, %v7135_v24  ;;  %3491 = vadd.xlane.f32.xlu1 %v3104_v38 }
 0x2fb   : > { %v7137_v42 = vpop.eup %7136  ;;  %v1739_v59 = vpop.f32.mrb[151].mxu0  ;;  %7158 = vrcp.f32 %v2707_v11  ;;  %3948 = vst.msk [vmem:[#allocation2 + $0x370] sm:$0xff] %vm3837_vm1, %v3787_v30  ;;  %v6189_v41 = vmul.f32 -1.442695, %v9087_v21  ;;  %v6109_v63 = vmul.f32 -1.442695, %v9089_v25 }
 0x2fc   : > { %v7139_v5 = vpop.eup %7138  ;;  %v2628_v49 = vadd.f32 1.0, %v7137_v42  ;;  %3869 = vst.msk [vmem:[#allocation2 + $0xf8] sm:$0xff] %vm3837_vm1, %v3708_v2  ;;  %v2059_v33 = vpop.f32.mrb[151].mxu1  ;;  %7160 = vrcp.f32 %v2708_v45 }
 0x2fd   : > { %v7141_v56 = vpop.eup %7140  ;;  %v2629_v61 = vadd.f32 1.0, %v7139_v5  ;;  %v3580_v52 = vpop.xlane.xlu1 %3579 }
 0x2fe   : > { %v3422_v36 = vpop.xlane.xlu0 %3421  ;;  %v7143_v62 = vpop.eup %7142  ;;  %v3105_v16 = vmul.f32 %v7141_v56, %v9011_v37  ;;  %7162 = vrcp.f32 %v2628_v49  ;;  %v3788_v28 = vadd.f32 %v3580_v52, %v3308_v0  ;;  %3651 = vadd.xlane.f32.xlu1 %v3184_v13  ;;  %v3311_v56 = vld [vmem:[#allocation2 + $0x390] sm:$0xff] }
 0x2ff   : > { %v3709_v46 = vadd.f32 %v3422_v36, %v3229_v48  ;;  %v7145_v18 = vpop.eup %7144  ;;  %7164 = vrcp.f32 %v2629_v61  ;;  %v9098_v26 = vpop.f32.mrb[152].mxu0  ;;  %v3185_v34 = vmul.f32 %v7143_v62, %v9013_v1  ;;  %v3232_v61 = vld [vmem:[#allocation2 + $0x118] sm:$0xff] }
 0x300   : > { %v9100_v54 = vpop.f32.mrb[152].mxu1  ;;  %v7147_v6 = vpop.eup %7146  ;;  %7166 = vpow2.f32 %v6188_v39  ;;  %3949 = vst.msk [vmem:[#allocation2 + $0x378] sm:$0xff] %vm3837_vm1, %v3788_v28  ;;  %3493 = vadd.xlane.f32.xlu0 %v3105_v16  ;;  %v6110_v37 = vmul.f32 -1.442695, %v9098_v26  ;;  %v3186_v36 = vmul.f32 %v7145_v18, %v9018_v60 }
 0x301   : > { %3870 = vst.msk [vmem:[#allocation2 + $0x100] sm:$0xff] %vm3837_vm1, %v3709_v46  ;;  %v2064_v12 = vpop.f32.mrb[153].mxu1  ;;  %v1744_v3 = vpop.f32.mrb[153].mxu0  ;;  %7168 = vpow2.f32 %v6189_v41  ;;  %v3106_v24 = vmul.f32 %v7147_v6, %v9020_v57  ;;  %v6190_v30 = vmul.f32 -1.442695, %v9100_v54 }
 0x302   : > { %v7149_v43 = vpop.eup %7148  ;;  %v3582_v14 = vpop.xlane.xlu0 %3581  ;;  %7170 = vpow2.f32 %v6109_v63 }
 0x303   : > { %v3424_v29 = vpop.xlane.xlu1 %3423  ;;  %v7151_v51 = vpop.eup %7150  ;;  %v2709_v55 = vadd.f32 1.0, %v7149_v43  ;;  %v3789_v19 = vadd.f32 %v3582_v14, %v3309_v20  ;;  %7172 = vpow2.f32 %v6110_v37  ;;  %3495 = vadd.xlane.f32.xlu1 %v3106_v24  ;;  %v3233_v14 = vld [vmem:[#allocation2 + $0x120] sm:$0xff] }
 0x304   : > { %v3710_v58 = vadd.f32 %v3424_v29, %v3230_v32  ;;  %v9108_v44 = vpop.f32.mrb[154].mxu1  ;;  %v9110_v40 = vpop.f32.mrb[154].mxu0  ;;  %v2710_v4 = vadd.f32 1.0, %v7151_v51  ;;  %3653 = vadd.xlane.f32.xlu0 %v3185_v34  ;;  %v3312_v34 = vld [vmem:[#allocation2 + $0x398] sm:$0xff] }
 0x305   : > { %v7153_v22 = vpop.eup %7152  ;;  %v1747_v53 = vpop.f32.mrb[155].mxu0  ;;  %7174 = vrcp.f32 %v2709_v55  ;;  %3950 = vst.msk [vmem:[#allocation2 + $0x380] sm:$0xff] %vm3837_vm1, %v3789_v19  ;;  %v6191_v0 = vmul.f32 -1.442695, %v9108_v44  ;;  %v6111_v5 = vmul.f32 -1.442695, %v9110_v40 }
 0x306   : > { %v7155_v1 = vpop.eup %7154  ;;  %v2630_v11 = vadd.f32 1.0, %v7153_v22  ;;  %3871 = vst.msk [vmem:[#allocation2 + $0x108] sm:$0xff] %vm3837_vm1, %v3710_v58  ;;  %v2067_v2 = vpop.f32.mrb[155].mxu1  ;;  %7176 = vrcp.f32 %v2710_v4 }
 0x307   : > { %v7157_v42 = vpop.eup %7156  ;;  %v2631_v45 = vadd.f32 1.0, %v7155_v1  ;;  %v3584_v48 = vpop.xlane.xlu1 %3583  ;;  %3655 = vadd.xlane.f32.xlu1 %v3186_v36  ;;  %v3313_v2 = vld [vmem:[#allocation2 + $0x3a0] sm:$0xff] }
 0x308   : > { %v3426_v59 = vpop.xlane.xlu0 %3425  ;;  %v7159_v57 = vpop.eup %7158  ;;  %v3107_v38 = vmul.f32 %v7157_v42, %v9032_v10  ;;  %7178 = vrcp.f32 %v2630_v11  ;;  %v3790_v49 = vadd.f32 %v3584_v48, %v3310_v23  ;;  %v3234_v42 = vld [vmem:[#allocation2 + $0x128] sm:$0xff] }
 0x309   : > { %v3711_v39 = vadd.f32 %v3426_v59, %v3231_v50  ;;  %v7161_v33 = vpop.eup %7160  ;;  %7180 = vrcp.f32 %v2631_v45  ;;  %v9119_v41 = vpop.f32.mrb[156].mxu0  ;;  %v3187_v60 = vmul.f32 %v7159_v57, %v9034_v31 }
 0x30a   : > { %v7163_v52 = vpop.eup %7162  ;;  %7182 = vpow2.f32 %v6190_v30  ;;  %3951 = vst.msk [vmem:[#allocation2 + $0x388] sm:$0xff] %vm3837_vm1, %v3790_v49  ;;  %3497 = vadd.xlane.f32.xlu0 %v3107_v38  ;;  %v6112_v10 = vmul.f32 -1.442695, %v9119_v41  ;;  %v9125_v63 = vpop.f32.mrb[156].mxu1 }
 0x30b   : > { %3872 = vst.msk [vmem:[#allocation2 + $0x110] sm:$0xff] %vm3837_vm1, %v3711_v39  ;;  %v1752_v62 = vpop.f32.mrb[157].mxu0  ;;  %v7165_v16 = vpop.eup %7164  ;;  %7184 = vpow2.f32 %v6191_v0  ;;  %v6192_v20 = vmul.f32 -1.442695, %v9125_v63  ;;  %v3108_v55 = vmul.f32 %v7163_v52, %v9043_v15  ;;  %v3188_v0 = vmul.f32 %v7161_v33, %v9041_v27  ;;  %v3314_v33 = vld [vmem:[#allocation2 + $0x3a8] sm:$0xff] }
 0x30c   : > { %v3586_v28 = vpop.xlane.xlu0 %3585  ;;  %v3428_v46 = vpop.xlane.xlu1 %3427  ;;  %7186 = vpow2.f32 %v6111_v5  ;;  %v3109_v31 = vmul.f32 %v7165_v16, %v9055_v7 }
 0x30d   : > { %v7167_v32 = vpop.eup %7166  ;;  %v3791_v18 = vadd.f32 %v3586_v28, %v3311_v56  ;;  %v3712_v6 = vadd.f32 %v3428_v46, %v3232_v61  ;;  %v2072_v13 = vpop.f32.mrb[157].mxu1  ;;  %7188 = vpow2.f32 %v6112_v10  ;;  %3499 = vadd.xlane.f32.xlu1 %v3108_v55  ;;  %v3235_v61 = vld [vmem:[#allocation2 + $0x130] sm:$0xff] }
 0x30e   : > { %v9129_v37 = vpop.f32.mrb[158].mxu0  ;;  %v7169_v12 = vpop.eup %7168  ;;  %v2711_v3 = vadd.f32 1.0, %v7167_v32  ;;  %7190 = vpow2.f32 %v6192_v20  ;;  %3657 = vadd.xlane.f32.xlu0 %v3187_v60 }
 0x30f   : > { %v9131_v43 = vpop.f32.mrb[158].mxu1  ;;  %v1755_v29 = vpop.f32.mrb[159].mxu0  ;;  %3952 = vst.msk [vmem:[#allocation2 + $0x390] sm:$0xff] %vm3837_vm1, %v3791_v18  ;;  %3873 = vst.msk [vmem:[#allocation2 + $0x118] sm:$0xff] %vm3837_vm1, %v3712_v6  ;;  %v6113_v7 = vmul.f32 -1.442695, %v9129_v37 }
 0x310   : > { %v7171_v51 = vpop.eup %7170  ;;  %v2075_v19 = vpop.f32.mrb[159].mxu1  ;;  %7192 = vrcp.f32 %v2711_v3  ;;  %v6193_v4 = vmul.f32 -1.442695, %v9131_v43  ;;  %v2712_v30 = vadd.f32 1.0, %v7169_v12 }
 0x311   : > { %v7173_v58 = vpop.eup %7172  ;;  %v2632_v22 = vadd.f32 1.0, %v7171_v51  ;;  %v3588_v23 = vpop.xlane.xlu1 %3587  ;;  %3659 = vadd.xlane.f32.xlu1 %v3188_v0 }
 0x312   : > { %v3430_v50 = vpop.xlane.xlu0 %3429  ;;  %v7175_v53 = vpop.eup %7174  ;;  %v2633_v1 = vadd.f32 1.0, %v7173_v58  ;;  %v3792_v15 = vadd.f32 %v3588_v23, %v3312_v34  ;;  %3501 = vadd.xlane.f32.xlu0 %v3109_v31  ;;  %v3316_v58 = vld [vmem:[#allocation2 + $0x3b8] sm:$0xff] }
 0x313   : > { %v3713_v24 = vadd.f32 %v3430_v50, %v3233_v14  ;;  %v7177_v11 = vpop.eup %7176  ;;  %7194 = vrcp.f32 %v2632_v22  ;;  %v3189_v38 = vmul.f32 %v7175_v53, %v9057_v9 }
 0x314   : > { %v7179_v45 = vpop.eup %7178  ;;  %7196 = vrcp.f32 %v2633_v1  ;;  %3953 = vst.msk [vmem:[#allocation2 + $0x398] sm:$0xff] %vm3837_vm1, %v3792_v15  ;;  %v3190_v13 = vmul.f32 %v7177_v11, %v9064_v47  ;;  %v3237_v47 = vld [vmem:[#allocation2 + $0x140] sm:$0xff] }
 0x315   : > { %3874 = vst.msk [vmem:[#allocation2 + $0x120] sm:$0xff] %vm3837_vm1, %v3713_v24  ;;  %v7181_v48 = vpop.eup %7180  ;;  %7198 = vpow2.f32 %v6193_v4  ;;  %v3432_v5 = vpop.xlane.xlu1 %3431  ;;  %v3110_v36 = vmul.f32 %v7179_v45, %v9066_v8  ;;  %v3315_v8 = vld [vmem:[#allocation2 + $0x3b0] sm:$0xff] }
 0x316   : > { %v3590_v59 = vpop.xlane.xlu0 %3589  ;;  %v7183_v57 = vpop.eup %7182  ;;  %7200 = vpow2.f32 %v6113_v7  ;;  %v3714_v39 = vadd.f32 %v3432_v5, %v3234_v42  ;;  %v3111_v10 = vmul.f32 %v7181_v48, %v9077_v17  ;;  %3661 = vadd.xlane.f32.xlu0 %v3189_v38  ;;  %v3236_v17 = vld [vmem:[#allocation2 + $0x138] sm:$0xff]  ;;  %v3239_v38 = vld [vmem:[#allocation2 + $0x150] sm:$0xff] }
 0x317   : > { %v3793_v49 = vadd.f32 %v3590_v59, %v3313_v2  ;;  %v7185_v56 = vpop.eup %7184  ;;  %7202 = vrcp.f32 %v2712_v30  ;;  %v2713_v27 = vadd.f32 1.0, %v7183_v57  ;;  %3503 = vadd.xlane.f32.xlu1 %v3110_v36  ;;  %v3317_v30 = vld [vmem:[#allocation2 + $0x3c0] sm:$0xff]  ;;  %v3318_v57 = vld [vmem:[#allocation2 + $0x3c8] sm:$0xff]  ;;  %v3240_v36 = vld [vmem:[#allocation2 + $0x158] sm:$0xff] }
 0x318   : > { %v7187_v52 = vpop.eup %7186  ;;  %3875 = vst.msk [vmem:[#allocation2 + $0x128] sm:$0xff] %vm3837_vm1, %v3714_v39  ;;  %v2714_v6 = vadd.f32 1.0, %v7185_v56 }
 0x319   : > { %3954 = vst.msk [vmem:[#allocation2 + $0x3a0] sm:$0xff] %vm3837_vm1, %v3793_v49  ;;  %v7189_v9 = vpop.eup %7188  ;;  %7204 = vrcp.f32 %v2713_v27  ;;  %v2634_v62 = vadd.f32 1.0, %v7187_v52  ;;  %v3592_v16 = vpop.xlane.xlu1 %3591  ;;  %v3319_v52 = vld [vmem:[#allocation2 + $0x3d0] sm:$0xff] }
 0x31a   : > { %v3434_v28 = vpop.xlane.xlu0 %3433  ;;  %v7191_v46 = vpop.eup %7190  ;;  %v2635_v20 = vadd.f32 1.0, %v7189_v9  ;;  %v3794_v32 = vadd.f32 %v3592_v16, %v3314_v33  ;;  %3505 = vadd.xlane.f32.xlu0 %v3111_v10 }
 0x31b   : > { %v3715_v60 = vadd.f32 %v3434_v28, %v3235_v61  ;;  %v7193_v18 = vpop.eup %7192  ;;  %7206 = vrcp.f32 %v2634_v62  ;;  %v2715_v3 = vadd.f32 1.0, %v7191_v46  ;;  %3663 = vadd.xlane.f32.xlu1 %v3190_v13  ;;  %v3320_v46 = vld [vmem:[#allocation2 + $0x3d8] sm:$0xff] }
 0x31c   : > { %7208 = vrcp.f32 %v2635_v20  ;;  %3955 = vst.msk [vmem:[#allocation2 + $0x3a8] sm:$0xff] %vm3837_vm1, %v3794_v32  ;;  %v3191_v51 = vmul.f32 %v7193_v18, %v9079_v35  ;;  %v3241_v20 = vld [vmem:[#allocation2 + $0x160] sm:$0xff] }
 0x31d   : > { %3876 = vst.msk [vmem:[#allocation2 + $0x130] sm:$0xff] %vm3837_vm1, %v3715_v60  ;;  %v7195_v12 = vpop.eup %7194  ;;  %v3436_v14 = vpop.xlane.xlu1 %3435  ;;  %7210 = vrcp.f32 %v2714_v6 }
 0x31e   : > { %v3594_v34 = vpop.xlane.xlu0 %3593  ;;  %v7197_v29 = vpop.eup %7196  ;;  %v3716_v31 = vadd.f32 %v3436_v14, %v3236_v17  ;;  %v3112_v4 = vmul.f32 %v7195_v12, %v9089_v25  ;;  %3665 = vadd.xlane.f32.xlu0 %v3191_v51  ;;  %7212 = vrcp.f32 %v2715_v3  ;;  %v3238_v25 = vld [vmem:[#allocation2 + $0x148] sm:$0xff]  ;;  %v3321_v17 = vld [vmem:[#allocation2 + $0x3e0] sm:$0xff] }
 0x31f   : > { %v3795_v55 = vadd.f32 %v3594_v34, %v3315_v8  ;;  %v7199_v19 = vpop.eup %7198  ;;  %v3113_v23 = vmul.f32 %v7197_v29, %v9098_v26  ;;  %v3322_v14 = vld [vmem:[#allocation2 + $0x3e8] sm:$0xff]  ;;  %v3243_v29 = vld [vmem:[#allocation2 + $0x170] sm:$0xff] }
 0x320   : > { %v7201_v22 = vpop.eup %7200  ;;  %3877 = vst.msk [vmem:[#allocation2 + $0x138] sm:$0xff] %vm3837_vm1, %v3716_v31  ;;  %3507 = vadd.xlane.f32.xlu1 %v3112_v4  ;;  %v2716_v11 = vadd.f32 1.0, %v7199_v19 }
 0x321   : > { %3956 = vst.msk [vmem:[#allocation2 + $0x3b0] sm:$0xff] %vm3837_vm1, %v3795_v55  ;;  %v7203_v50 = vpop.eup %7202  ;;  %v2636_v35 = vadd.f32 1.0, %v7201_v22  ;;  %v3596_v53 = vpop.xlane.xlu1 %3595 }
 0x322   : > { %v3438_v1 = vpop.xlane.xlu0 %3437  ;;  %v3796_v15 = vadd.f32 %v3596_v53, %v3316_v58  ;;  %v3192_v26 = vmul.f32 %v7203_v50, %v9087_v21  ;;  %3509 = vadd.xlane.f32.xlu0 %v3113_v23  ;;  %v3244_v58 = vld [vmem:[#allocation2 + $0x178] sm:$0xff] }
 0x323   : > { %v3717_v24 = vadd.f32 %v3438_v1, %v3237_v47  ;;  %v7205_v7 = vpop.eup %7204  ;;  %7214 = vrcp.f32 %v2636_v35  ;;  %v3324_v50 = vld [vmem:[#allocation2 + $0x3f8] sm:$0xff]  ;;  %v3245_v35 = vld [vmem:[#allocation2 + $0x180] sm:$0xff] }
 0x324   : > { %3957 = vst.msk [vmem:[#allocation2 + $0x3b8] sm:$0xff] %vm3837_vm1, %v3796_v15  ;;  %v3193_v48 = vmul.f32 %v7205_v7, %v9100_v54  ;;  %3667 = vadd.xlane.f32.xlu1 %v3192_v26  ;;  %7216 = vrcp.f32 %v2716_v11  ;;  %v3325_v7 = vld [vmem:[#allocation2 + $0x400] sm:$0xff]  ;;  %v3246_v11 = vld [vmem:[#allocation2 + $0x188] sm:$0xff] }
 0x325   : > { %3878 = vst.msk [vmem:[#allocation2 + $0x140] sm:$0xff] %vm3837_vm1, %v3717_v24  ;;  %v7207_v2 = vpop.eup %7206  ;;  %v3440_v45 = vpop.xlane.xlu1 %3439 }
 0x326   : > { %v3598_v42 = vpop.xlane.xlu0 %3597  ;;  %v7209_v0 = vpop.eup %7208  ;;  %v3718_v5 = vadd.f32 %v3440_v45, %v3238_v25  ;;  %v3114_v49 = vmul.f32 %v7207_v2, %v9110_v40  ;;  %3669 = vadd.xlane.f32.xlu0 %v3193_v48  ;;  %v3247_v45 = vld [vmem:[#allocation2 + $0x190] sm:$0xff] }
 0x327   : > { %v3797_v59 = vadd.f32 %v3598_v42, %v3317_v30  ;;  %v3115_v21 = vmul.f32 %v7209_v0, %v9119_v41  ;;  %v7211_v39 = vpop.eup %7210  ;;  %v3326_v42 = vld [vmem:[#allocation2 + $0x408] sm:$0xff] }
 0x328   : > { %3879 = vst.msk [vmem:[#allocation2 + $0x148] sm:$0xff] %vm3837_vm1, %v3718_v5  ;;  %3511 = vadd.xlane.f32.xlu1 %v3114_v49  ;;  %v7213_v61 = vpop.eup %7212  ;;  %v3194_v10 = vmul.f32 %v7211_v39, %v9108_v44 }
 0x329   : > { %3958 = vst.msk [vmem:[#allocation2 + $0x3c0] sm:$0xff] %vm3837_vm1, %v3797_v59  ;;  %v3600_v56 = vpop.xlane.xlu1 %3599  ;;  %v3195_v62 = vmul.f32 %v7213_v61, %v9125_v63  ;;  %v3242_v63 = vld [vmem:[#allocation2 + $0x168] sm:$0xff] }
 0x32a   : > { %v3442_v27 = vpop.xlane.xlu0 %3441  ;;  %v3798_v54 = vadd.f32 %v3600_v56, %v3318_v57  ;;  %3513 = vadd.xlane.f32.xlu0 %v3115_v21  ;;  %v3327_v57 = vld [vmem:[#allocation2 + $0x410] sm:$0xff] }
 0x32b   : > { %v3719_v33 = vadd.f32 %v3442_v27, %v3239_v38  ;;  %v3248_v38 = vld [vmem:[#allocation2 + $0x198] sm:$0xff] }
 0x32c   : > { %3959 = vst.msk [vmem:[#allocation2 + $0x3c8] sm:$0xff] %vm3837_vm1, %v3798_v54  ;;  %3671 = vadd.xlane.f32.xlu1 %v3194_v10  ;;  %v3328_v27 = vld [vmem:[#allocation2 + $0x418] sm:$0xff]  ;;  %v3249_v54 = vld [vmem:[#allocation2 + $0x1a0] sm:$0xff] }
 0x32d   : > { %3880 = vst.msk [vmem:[#allocation2 + $0x150] sm:$0xff] %vm3837_vm1, %v3719_v33  ;;  %v7215_v40 = vpop.eup %7214  ;;  %v3444_v9 = vpop.xlane.xlu1 %3443  ;;  %v3329_v10 = vld [vmem:[#allocation2 + $0x420] sm:$0xff] }
 0x32e   : > { %v3602_v41 = vpop.xlane.xlu0 %3601  ;;  %v3720_v28 = vadd.f32 %v3444_v9, %v3240_v36  ;;  %v3116_v32 = vmul.f32 %v7215_v40, %v9129_v37  ;;  %3673 = vadd.xlane.f32.xlu0 %v3195_v62  ;;  %v7217_v44 = vpop.eup %7216  ;;  %v3250_v40 = vld [vmem:[#allocation2 + $0x1a8] sm:$0xff] }
 0x32f   : > { %v3799_v16 = vadd.f32 %v3602_v41, %v3319_v52  ;;  %v3196_v13 = vmul.f32 %v7217_v44, %v9131_v43  ;;  %v3323_v43 = vld [vmem:[#allocation2 + $0x3f0] sm:$0xff] }
 0x330   : > { %3881 = vst.msk [vmem:[#allocation2 + $0x158] sm:$0xff] %vm3837_vm1, %v3720_v28  ;;  %3515 = vadd.xlane.f32.xlu1 %v3116_v32  ;;  %v3330_v28 = vld [vmem:[#allocation2 + $0x428] sm:$0xff] }
 0x331   : > { %3960 = vst.msk [vmem:[#allocation2 + $0x3d0] sm:$0xff] %vm3837_vm1, %v3799_v16  ;;  %v3604_v60 = vpop.xlane.xlu1 %3603 }
 0x332   : > { %v3446_v18 = vpop.xlane.xlu0 %3445  ;;  %v3800_v6 = vadd.f32 %v3604_v60, %v3320_v46  ;;  %v3251_v46 = vld [vmem:[#allocation2 + $0x1b0] sm:$0xff] }
 0x333   : > { %v3721_v8 = vadd.f32 %v3446_v18, %v3241_v20  ;;  %v3331_v18 = vld [vmem:[#allocation2 + $0x430] sm:$0xff] }
 0x334   : > { %3961 = vst.msk [vmem:[#allocation2 + $0x3d8] sm:$0xff] %vm3837_vm1, %v3800_v6  ;;  %3675 = vadd.xlane.f32.xlu1 %v3196_v13  ;;  %v3252_v6 = vld [vmem:[#allocation2 + $0x1b8] sm:$0xff] }
 0x335   : > { %3882 = vst.msk [vmem:[#allocation2 + $0x160] sm:$0xff] %vm3837_vm1, %v3721_v8  ;;  %v3448_v12 = vpop.xlane.xlu1 %3447 }
 0x336   : > { %v3606_v37 = vpop.xlane.xlu0 %3605  ;;  %v3722_v34 = vadd.f32 %v3448_v12, %v3242_v63  ;;  %v3332_v12 = vld [vmem:[#allocation2 + $0x438] sm:$0xff] }
 0x337   : > { %v3801_v3 = vadd.f32 %v3606_v37, %v3321_v17  ;;  %v3253_v37 = vld [vmem:[#allocation2 + $0x1c0] sm:$0xff] }
 0x338   : > { %3883 = vst.msk [vmem:[#allocation2 + $0x168] sm:$0xff] %vm3837_vm1, %v3722_v34 }
 0x339   : > { %3962 = vst.msk [vmem:[#allocation2 + $0x3e0] sm:$0xff] %vm3837_vm1, %v3801_v3  ;;  %v3608_v51 = vpop.xlane.xlu1 %3607 }
 0x33a   : > { %v3450_v55 = vpop.xlane.xlu0 %3449  ;;  %v3802_v31 = vadd.f32 %v3608_v51, %v3322_v14  ;;  %v3333_v51 = vld [vmem:[#allocation2 + $0x440] sm:$0xff] }
 0x33b   : > { %v3723_v19 = vadd.f32 %v3450_v55, %v3243_v29  ;;  %v3254_v55 = vld [vmem:[#allocation2 + $0x1c8] sm:$0xff] }
 0x33c   : > { %3963 = vst.msk [vmem:[#allocation2 + $0x3e8] sm:$0xff] %vm3837_vm1, %v3802_v31 }
 0x33d   : > { %3884 = vst.msk [vmem:[#allocation2 + $0x170] sm:$0xff] %vm3837_vm1, %v3723_v19  ;;  %v3452_v22 = vpop.xlane.xlu1 %3451 }
 0x33e   : > { %v3610_v47 = vpop.xlane.xlu0 %3609  ;;  %v3724_v23 = vadd.f32 %v3452_v22, %v3244_v58  ;;  %v3334_v22 = vld [vmem:[#allocation2 + $0x448] sm:$0xff] }
 0x33f   : > { %v3803_v4 = vadd.f32 %v3610_v47, %v3323_v43  ;;  %v3255_v47 = vld [vmem:[#allocation2 + $0x1d0] sm:$0xff] }
 0x340   : > { %3885 = vst.msk [vmem:[#allocation2 + $0x178] sm:$0xff] %vm3837_vm1, %v3724_v23 }
 0x341   : > { %3964 = vst.msk [vmem:[#allocation2 + $0x3f0] sm:$0xff] %vm3837_vm1, %v3803_v4  ;;  %v3612_v53 = vpop.xlane.xlu1 %3611 }
 0x342   : > { %v3454_v1 = vpop.xlane.xlu0 %3453  ;;  %v3804_v15 = vadd.f32 %v3612_v53, %v3324_v50  ;;  %v3335_v53 = vld [vmem:[#allocation2 + $0x450] sm:$0xff] }
 0x343   : > { %v3725_v24 = vadd.f32 %v3454_v1, %v3245_v35  ;;  %v3256_v1 = vld [vmem:[#allocation2 + $0x1d8] sm:$0xff] }
 0x344   : > { %3965 = vst.msk [vmem:[#allocation2 + $0x3f8] sm:$0xff] %vm3837_vm1, %v3804_v15 }
 0x345   : > { %3886 = vst.msk [vmem:[#allocation2 + $0x180] sm:$0xff] %vm3837_vm1, %v3725_v24  ;;  %v3456_v25 = vpop.xlane.xlu1 %3455 }
 0x346   : > { %v3614_v30 = vpop.xlane.xlu0 %3613  ;;  %v3726_v2 = vadd.f32 %v3456_v25, %v3246_v11  ;;  %v3336_v25 = vld [vmem:[#allocation2 + $0x458] sm:$0xff] }
 0x347   : > { %v3805_v26 = vadd.f32 %v3614_v30, %v3325_v7  ;;  %v3257_v30 = vld [vmem:[#allocation2 + $0x1e0] sm:$0xff] }
 0x348   : > { %3887 = vst.msk [vmem:[#allocation2 + $0x188] sm:$0xff] %vm3837_vm1, %v3726_v2 }
 0x349   : > { %3966 = vst.msk [vmem:[#allocation2 + $0x400] sm:$0xff] %vm3837_vm1, %v3805_v26  ;;  %v3616_v0 = vpop.xlane.xlu1 %3615 }
 0x34a   : > { %v3458_v48 = vpop.xlane.xlu0 %3457  ;;  %v3806_v59 = vadd.f32 %v3616_v0, %v3326_v42  ;;  %v3337_v0 = vld [vmem:[#allocation2 + $0x460] sm:$0xff] }
 0x34b   : > { %v3727_v5 = vadd.f32 %v3458_v48, %v3247_v45 }
 0x34c   : > { %3967 = vst.msk [vmem:[#allocation2 + $0x408] sm:$0xff] %vm3837_vm1, %v3806_v59  ;;  %v3258_v59 = vld [vmem:[#allocation2 + $0x1e8] sm:$0xff] }
 0x34d   : > { %3888 = vst.msk [vmem:[#allocation2 + $0x190] sm:$0xff] %vm3837_vm1, %v3727_v5  ;;  %v3460_v21 = vpop.xlane.xlu1 %3459 }
 0x34e   : > { %v3618_v49 = vpop.xlane.xlu0 %3617  ;;  %v3728_v56 = vadd.f32 %v3460_v21, %v3248_v38  ;;  %v3259_v38 = vld [vmem:[#allocation2 + $0x1f0] sm:$0xff]  ;;  %v3338_v21 = vld [vmem:[#allocation2 + $0x468] sm:$0xff] }
 0x34f   : > { %v3807_v39 = vadd.f32 %v3618_v49, %v3327_v57 }
 0x350   : > { %3889 = vst.msk [vmem:[#allocation2 + $0x198] sm:$0xff] %vm3837_vm1, %v3728_v56 }
 0x351   : > { %3968 = vst.msk [vmem:[#allocation2 + $0x410] sm:$0xff] %vm3837_vm1, %v3807_v39  ;;  %v3620_v33 = vpop.xlane.xlu1 %3619 }
 0x352   : > { %v3462_v61 = vpop.xlane.xlu0 %3461  ;;  %v3808_v52 = vadd.f32 %v3620_v33, %v3328_v27 }
 0x353   : > { %v3729_v36 = vadd.f32 %v3462_v61, %v3249_v54  ;;  %v3339_v54 = vld [vmem:[#allocation2 + $0x470] sm:$0xff] }
 0x354   : > { %3969 = vst.msk [vmem:[#allocation2 + $0x418] sm:$0xff] %vm3837_vm1, %v3808_v52  ;;  %v3260_v52 = vld [vmem:[#allocation2 + $0x1f8] sm:$0xff] }
 0x355   : > { %3890 = vst.msk [vmem:[#allocation2 + $0x1a0] sm:$0xff] %vm3837_vm1, %v3729_v36  ;;  %v3464_v9 = vpop.xlane.xlu1 %3463 }
 0x356   : > { %v3622_v41 = vpop.xlane.xlu0 %3621  ;;  %v3730_v16 = vadd.f32 %v3464_v9, %v3250_v40  ;;  %v3261_v40 = vld [vmem:[#allocation2 + $0x200] sm:$0xff]  ;;  %v3340_v9 = vld [vmem:[#allocation2 + $0x478] sm:$0xff] }
 0x357   : > { %v3809_v62 = vadd.f32 %v3622_v41, %v3329_v10 }
 0x358   : > { %3891 = vst.msk [vmem:[#allocation2 + $0x1a8] sm:$0xff] %vm3837_vm1, %v3730_v16 }
 0x359   : > { %3970 = vst.msk [vmem:[#allocation2 + $0x420] sm:$0xff] %vm3837_vm1, %v3809_v62  ;;  %v3624_v20 = vpop.xlane.xlu1 %3623 }
 0x35a   : > { %v3466_v32 = vpop.xlane.xlu0 %3465  ;;  %v3810_v44 = vadd.f32 %v3624_v20, %v3330_v28 }
 0x35b   : > { %v3731_v60 = vadd.f32 %v3466_v32, %v3251_v46  ;;  %v3341_v46 = vld [vmem:[#allocation2 + $0x480] sm:$0xff] }
 0x35c   : > { %3971 = vst.msk [vmem:[#allocation2 + $0x428] sm:$0xff] %vm3837_vm1, %v3810_v44  ;;  %v3262_v44 = vld [vmem:[#allocation2 + $0x208] sm:$0xff] }
 0x35d   : > { %3892 = vst.msk [vmem:[#allocation2 + $0x1b0] sm:$0xff] %vm3837_vm1, %v3731_v60  ;;  %v3468_v63 = vpop.xlane.xlu1 %3467 }
 0x35e   : > { %v3626_v8 = vpop.xlane.xlu0 %3625  ;;  %v3732_v13 = vadd.f32 %v3468_v63, %v3252_v6  ;;  %v3263_v6 = vld [vmem:[#allocation2 + $0x210] sm:$0xff] }
 0x35f   : > { %v3811_v17 = vadd.f32 %v3626_v8, %v3331_v18 }
 0x360   : > { %3893 = vst.msk [vmem:[#allocation2 + $0x1b8] sm:$0xff] %vm3837_vm1, %v3732_v13 }
 0x361   : > { %3972 = vst.msk [vmem:[#allocation2 + $0x430] sm:$0xff] %vm3837_vm1, %v3811_v17  ;;  %v3628_v34 = vpop.xlane.xlu1 %3627  ;;  %v3342_v17 = vld [vmem:[#allocation2 + $0x488] sm:$0xff] }
 0x362   : > { %v3470_v3 = vpop.xlane.xlu0 %3469  ;;  %v3812_v29 = vadd.f32 %v3628_v34, %v3332_v12  ;;  %v3343_v12 = vld [vmem:[#allocation2 + $0x490] sm:$0xff] }
 0x363   : > { %v3733_v14 = vadd.f32 %v3470_v3, %v3253_v37 }
 0x364   : > { %3973 = vst.msk [vmem:[#allocation2 + $0x438] sm:$0xff] %vm3837_vm1, %v3812_v29 }
 0x365   : > { %3894 = vst.msk [vmem:[#allocation2 + $0x1c0] sm:$0xff] %vm3837_vm1, %v3733_v14  ;;  %v3472_v43 = vpop.xlane.xlu1 %3471  ;;  %v3264_v14 = vld [vmem:[#allocation2 + $0x218] sm:$0xff] }
 0x366   : > { %v3630_v31 = vpop.xlane.xlu0 %3629  ;;  %v3734_v58 = vadd.f32 %v3472_v43, %v3254_v55  ;;  %v3265_v55 = vld [vmem:[#allocation2 + $0x220] sm:$0xff] }
 0x367   : > { %v3813_v19 = vadd.f32 %v3630_v31, %v3333_v51 }
 0x368   : > { %3895 = vst.msk [vmem:[#allocation2 + $0x1c8] sm:$0xff] %vm3837_vm1, %v3734_v58 }
 0x369   : > { %3974 = vst.msk [vmem:[#allocation2 + $0x440] sm:$0xff] %vm3837_vm1, %v3813_v19  ;;  %v3632_v23 = vpop.xlane.xlu1 %3631  ;;  %v3344_v19 = vld [vmem:[#allocation2 + $0x498] sm:$0xff] }
 0x36a   : > { %v3474_v4 = vpop.xlane.xlu0 %3473  ;;  %v3814_v35 = vadd.f32 %v3632_v23, %v3334_v22  ;;  %v3345_v22 = vld [vmem:[#allocation2 + $0x4a0] sm:$0xff] }
 0x36b   : > { %v3735_v50 = vadd.f32 %v3474_v4, %v3255_v47 }
 0x36c   : > { %3975 = vst.msk [vmem:[#allocation2 + $0x448] sm:$0xff] %vm3837_vm1, %v3814_v35 }
 0x36d   : > { %3896 = vst.msk [vmem:[#allocation2 + $0x1d0] sm:$0xff] %vm3837_vm1, %v3735_v50  ;;  %v3476_v7 = vpop.xlane.xlu1 %3475  ;;  %v3266_v50 = vld [vmem:[#allocation2 + $0x228] sm:$0xff] }
 0x36e   : > { %v3634_v15 = vpop.xlane.xlu0 %3633  ;;  %v3736_v11 = vadd.f32 %v3476_v7, %v3256_v1  ;;  %v3267_v1 = vld [vmem:[#allocation2 + $0x230] sm:$0xff] }
 0x36f   : > { %v3815_v24 = vadd.f32 %v3634_v15, %v3335_v53 }
 0x370   : > { %3897 = vst.msk [vmem:[#allocation2 + $0x1d8] sm:$0xff] %vm3837_vm1, %v3736_v11 }
 0x371   : > { %3976 = vst.msk [vmem:[#allocation2 + $0x450] sm:$0xff] %vm3837_vm1, %v3815_v24  ;;  %v3636_v2 = vpop.xlane.xlu1 %3635  ;;  %v3346_v24 = vld [vmem:[#allocation2 + $0x4a8] sm:$0xff] }
 0x372   : > { %v3478_v26 = vpop.xlane.xlu0 %3477  ;;  %v3816_v45 = vadd.f32 %v3636_v2, %v3336_v25  ;;  %v3347_v25 = vld [vmem:[#allocation2 + $0x4b0] sm:$0xff] }
 0x373   : > { %v3737_v42 = vadd.f32 %v3478_v26, %v3257_v30 }
 0x374   : > { %3977 = vst.msk [vmem:[#allocation2 + $0x458] sm:$0xff] %vm3837_vm1, %v3816_v45 }
 0x375   : > { %3898 = vst.msk [vmem:[#allocation2 + $0x1e0] sm:$0xff] %vm3837_vm1, %v3737_v42  ;;  %v3480_v57 = vpop.xlane.xlu1 %3479  ;;  %v3268_v42 = vld [vmem:[#allocation2 + $0x238] sm:$0xff] }
 0x376   : > { %v3638_v48 = vpop.xlane.xlu0 %3637  ;;  %v3738_v49 = vadd.f32 %v3480_v57, %v3258_v59 }
 0x377   : > { %v3817_v5 = vadd.f32 %v3638_v48, %v3337_v0  ;;  %v3269_v48 = vld [vmem:[#allocation2 + $0x240] sm:$0xff] }
 0x378   : > { %3899 = vst.msk [vmem:[#allocation2 + $0x1e8] sm:$0xff] %vm3837_vm1, %v3738_v49 }
 0x379   : > { %3978 = vst.msk [vmem:[#allocation2 + $0x460] sm:$0xff] %vm3837_vm1, %v3817_v5  ;;  %v3640_v27 = vpop.xlane.xlu1 %3639  ;;  %v3348_v5 = vld [vmem:[#allocation2 + $0x4b8] sm:$0xff] }
 0x37a   : > { %v3482_v39 = vpop.xlane.xlu0 %3481  ;;  %v3818_v33 = vadd.f32 %v3640_v27, %v3338_v21  ;;  %v3349_v21 = vld [vmem:[#allocation2 + $0x4c0] sm:$0xff]  ;;  %v3270_v27 = vld [vmem:[#allocation2 + $0x248] sm:$0xff] }
 0x37b   : > { %v3739_v56 = vadd.f32 %v3482_v39, %v3259_v38 }
 0x37c   : > { %3979 = vst.msk [vmem:[#allocation2 + $0x468] sm:$0xff] %vm3837_vm1, %v3818_v33 }
 0x37d   : > { %3900 = vst.msk [vmem:[#allocation2 + $0x1f0] sm:$0xff] %vm3837_vm1, %v3739_v56  ;;  %v3484_v10 = vpop.xlane.xlu1 %3483 }
 0x37e   : > { %v3642_v61 = vpop.xlane.xlu0 %3641  ;;  %v3740_v41 = vadd.f32 %v3484_v10, %v3260_v52 }
 0x37f   : > { %v3819_v36 = vadd.f32 %v3642_v61, %v3339_v54  ;;  %v3271_v61 = vld [vmem:[#allocation2 + $0x250] sm:$0xff] }
 0x380   : > { %3901 = vst.msk [vmem:[#allocation2 + $0x1f8] sm:$0xff] %vm3837_vm1, %v3740_v41 }
 0x381   : > { %3980 = vst.msk [vmem:[#allocation2 + $0x470] sm:$0xff] %vm3837_vm1, %v3819_v36  ;;  %v3644_v28 = vpop.xlane.xlu1 %3643  ;;  %v3350_v36 = vld [vmem:[#allocation2 + $0x4c8] sm:$0xff] }
 0x382   : > { %v3486_v62 = vpop.xlane.xlu0 %3485  ;;  %v3820_v20 = vadd.f32 %v3644_v28, %v3340_v9  ;;  %v3351_v9 = vld [vmem:[#allocation2 + $0x4d0] sm:$0xff]  ;;  %v3272_v28 = vld [vmem:[#allocation2 + $0x258] sm:$0xff] }
 0x383   : > { %v3741_v16 = vadd.f32 %v3486_v62, %v3261_v40 }
 0x384   : > { %3981 = vst.msk [vmem:[#allocation2 + $0x478] sm:$0xff] %vm3837_vm1, %v3820_v20 }
 0x385   : > { %3902 = vst.msk [vmem:[#allocation2 + $0x200] sm:$0xff] %vm3837_vm1, %v3741_v16  ;;  %v3488_v18 = vpop.xlane.xlu1 %3487 }
 0x386   : > { %v3646_v32 = vpop.xlane.xlu0 %3645  ;;  %v3742_v8 = vadd.f32 %v3488_v18, %v3262_v44 }
 0x387   : > { %v3821_v60 = vadd.f32 %v3646_v32, %v3341_v46  ;;  %v3273_v32 = vld [vmem:[#allocation2 + $0x260] sm:$0xff] }
 0x388   : > { %3903 = vst.msk [vmem:[#allocation2 + $0x208] sm:$0xff] %vm3837_vm1, %v3742_v8 }
 0x389   : > { %3982 = vst.msk [vmem:[#allocation2 + $0x480] sm:$0xff] %vm3837_vm1, %v3821_v60  ;;  %v3648_v37 = vpop.xlane.xlu1 %3647  ;;  %v3352_v60 = vld [vmem:[#allocation2 + $0x4d8] sm:$0xff] }
 0x38a   : > { %v3490_v63 = vpop.xlane.xlu0 %3489  ;;  %v3822_v3 = vadd.f32 %v3648_v37, %v3342_v17  ;;  %v3353_v17 = vld [vmem:[#allocation2 + $0x4e0] sm:$0xff]  ;;  %v3274_v37 = vld [vmem:[#allocation2 + $0x268] sm:$0xff] }
 0x38b   : > { %v3743_v13 = vadd.f32 %v3490_v63, %v3263_v6 }
 0x38c   : > { %3983 = vst.msk [vmem:[#allocation2 + $0x488] sm:$0xff] %vm3837_vm1, %v3822_v3 }
 0x38d   : > { %3904 = vst.msk [vmem:[#allocation2 + $0x210] sm:$0xff] %vm3837_vm1, %v3743_v13  ;;  %v3492_v51 = vpop.xlane.xlu1 %3491 }
 0x38e   : > { %v3650_v34 = vpop.xlane.xlu0 %3649  ;;  %v3744_v31 = vadd.f32 %v3492_v51, %v3264_v14 }
 0x38f   : > { %v3823_v29 = vadd.f32 %v3650_v34, %v3343_v12  ;;  %v3275_v34 = vld [vmem:[#allocation2 + $0x270] sm:$0xff] }
 0x390   : > { %3905 = vst.msk [vmem:[#allocation2 + $0x218] sm:$0xff] %vm3837_vm1, %v3744_v31 }
 0x391   : > { %3984 = vst.msk [vmem:[#allocation2 + $0x490] sm:$0xff] %vm3837_vm1, %v3823_v29  ;;  %v3652_v47 = vpop.xlane.xlu1 %3651  ;;  %v3354_v29 = vld [vmem:[#allocation2 + $0x4e8] sm:$0xff] }
 0x392   : > { %v3494_v43 = vpop.xlane.xlu0 %3493  ;;  %v3824_v4 = vadd.f32 %v3652_v47, %v3344_v19  ;;  %v3355_v19 = vld [vmem:[#allocation2 + $0x4f0] sm:$0xff]  ;;  %v3276_v47 = vld [vmem:[#allocation2 + $0x278] sm:$0xff] }
 0x393   : > { %v3745_v58 = vadd.f32 %v3494_v43, %v3265_v55 }
 0x394   : > { %3985 = vst.msk [vmem:[#allocation2 + $0x498] sm:$0xff] %vm3837_vm1, %v3824_v4 }
 0x395   : > { %3906 = vst.msk [vmem:[#allocation2 + $0x220] sm:$0xff] %vm3837_vm1, %v3745_v58  ;;  %v3496_v53 = vpop.xlane.xlu1 %3495 }
 0x396   : > { %v3654_v23 = vpop.xlane.xlu0 %3653  ;;  %v3746_v15 = vadd.f32 %v3496_v53, %v3266_v50  ;;  %v3356_v50 = vld [vmem:[#allocation2 + $0x4f8] sm:$0xff] }
 0x397   : > { %v3825_v35 = vadd.f32 %v3654_v23, %v3345_v22 }
 0x398   : > { %3907 = vst.msk [vmem:[#allocation2 + $0x228] sm:$0xff] %vm3837_vm1, %v3746_v15  ;;  %v4002_v15 = vld [vmem:[#allocation2] sm:$0xff] (!%p6194_p7) }
 0x399   : > { %3986 = vst.msk [vmem:[#allocation2 + $0x4a0] sm:$0xff] %vm3837_vm1, %v3825_v35  ;;  %v3656_v30 = vpop.xlane.xlu1 %3655 }
 0x39a   : > { %v3498_v7 = vpop.xlane.xlu0 %3497  ;;  %v3826_v26 = vadd.f32 %v3656_v30, %v3346_v24  ;;  %v4005_v24 = vld [vmem:[#allocation2 + $0x18] sm:$0xff] (!%p6194_p7)  ;;  %v4162_v30 = vmul.f32 (!%p6194_p7), 0.00390625, %v4002_v15  ;;  %v4035_v15 = vld [vmem:[#allocation2 + $0x108] sm:$0xff] (!%p6194_p7) }
 0x39b   : > { %v3747_v11 = vadd.f32 %v3498_v7, %v3267_v1  ;;  %v4004_v1 = vld [vmem:[#allocation2 + $0x10] sm:$0xff] (!%p6194_p7)  ;;  %v7380_v7 = vmov (!%p6194_p7), 0  }
 0x39c   : > { %3987 = vst.msk [vmem:[#allocation2 + $0x4a8] sm:$0xff] %vm3837_vm1, %v3826_v26  ;;  %7219 = vset.pattern.permute.xlu1 (!%p6194_p7), %v7380_v7  ;;  %7218 = vset.pattern.permute.xlu0 (!%p6194_p7), %v7380_v7  ;;  %v4165_v26 = vmul.f32 (!%p6194_p7), 0.00390625, %v4005_v24  ;;  %v4034_v24 = vld [vmem:[#allocation2 + $0x100] sm:$0xff] (!%p6194_p7)  ;;  %v4195_v7 = vmul.f32 (!%p6194_p7), 0.00390625, %v4035_v15  ;;  %v4067_v15 = vld [vmem:[#allocation2 + $0x208] sm:$0xff] (!%p6194_p7) }
 0x39d   : > { %3908 = vst.msk [vmem:[#allocation2 + $0x230] sm:$0xff] %vm3837_vm1, %v3747_v11  ;;  %v3500_v0 = vpop.xlane.xlu1 %3499  ;;  %v4164_v11 = vmul.f32 (!%p6194_p7), 0.00390625, %v4004_v1  ;;  %4484 = vperm.xlu0 (!%p6194_p7), %7218, %v4162_v30   ;;  %v4037_v30 = vld [vmem:[#allocation2 + $0x118] sm:$0xff] (!%p6194_p7) }
 0x39e   : > { %v3658_v2 = vpop.xlane.xlu0 %3657  ;;  %v3748_v59 = vadd.f32 %v3500_v0, %v3268_v42  ;;  %v4007_v42 = vld [vmem:[#allocation2 + $0x28] sm:$0xff] (!%p6194_p7) }
 0x39f   : > { %v3827_v45 = vadd.f32 %v3658_v2, %v3347_v25  ;;  %v4003_v25 = vld [vmem:[#allocation2 + $0x8] sm:$0xff] (!%p6194_p7)  ;;  %4494 = vperm.xlu1 (!%p6194_p7), %7219, %v4164_v11   ;;  %v4167_v0 = vmul.f32 (!%p6194_p7), 0.00390625, %v4007_v42  ;;  %v4194_v11 = vmul.f32 (!%p6194_p7), 0.00390625, %v4034_v24  ;;  %v4066_v24 = vld [vmem:[#allocation2 + $0x200] sm:$0xff] (!%p6194_p7) }
 0x3a0   : > { %3909 = vst.msk [vmem:[#allocation2 + $0x238] sm:$0xff] %vm3837_vm1, %v3748_v59  ;;  %v4163_v2 = vmul.f32 (!%p6194_p7), 0.00390625, %v4003_v25  ;;  %v4009_v59 = vld [vmem:[#allocation2 + $0x38] sm:$0xff] (!%p6194_p7)  ;;  %v4036_v25 = vld [vmem:[#allocation2 + $0x110] sm:$0xff] (!%p6194_p7)  ;;  %v4039_v42 = vld [vmem:[#allocation2 + $0x128] sm:$0xff] (!%p6194_p7) }
 0x3a1   : > { %3988 = vst.msk [vmem:[#allocation2 + $0x4b0] sm:$0xff] %vm3837_vm1, %v3827_v45  ;;  %v3660_v49 = vpop.xlane.xlu1 %3659  ;;  %v4006_v45 = vld [vmem:[#allocation2 + $0x20] sm:$0xff] (!%p6194_p7) }
 0x3a2   : > { %v3502_v57 = vpop.xlane.xlu0 %3501  ;;  %v3828_v39 = vadd.f32 %v3660_v49, %v3348_v5  ;;  %4489 = vperm.xlu0 (!%p6194_p7), %7218, %v4163_v2   ;;  %v4008_v5 = vld [vmem:[#allocation2 + $0x30] sm:$0xff] (!%p6194_p7)  ;;  %v4011_v49 = vld [vmem:[#allocation2 + $0x48] sm:$0xff] (!%p6194_p7)  ;;  %v4196_v2 = vmul.f32 (!%p6194_p7), 0.00390625, %v4036_v25 }
 0x3a3   : > { %v3749_v38 = vadd.f32 %v3502_v57, %v3269_v48  ;;  %4499 = vperm.xlu1 (!%p6194_p7), %7219, %v4165_v26   ;;  %v4166_v48 = vmul.f32 (!%p6194_p7), 0.00390625, %v4006_v45  ;;  %v4169_v57 = vmul.f32 (!%p6194_p7), 0.00390625, %v4009_v59  ;;  %v4197_v26 = vmul.f32 (!%p6194_p7), 0.00390625, %v4037_v30  ;;  %v4038_v45 = vld [vmem:[#allocation2 + $0x120] sm:$0xff] (!%p6194_p7)  ;;  %v4041_v59 = vld [vmem:[#allocation2 + $0x138] sm:$0xff] (!%p6194_p7)  ;;  %v4068_v25 = vld [vmem:[#allocation2 + $0x210] sm:$0xff] (!%p6194_p7) }
 0x3a4   : > { %3989 = vst.msk [vmem:[#allocation2 + $0x4b8] sm:$0xff] %vm3837_vm1, %v3828_v39  ;;  %v4171_v39 = vmul.f32 (!%p6194_p7), 0.00390625, %v4011_v49  ;;  %v4043_v49 = vld [vmem:[#allocation2 + $0x148] sm:$0xff] (!%p6194_p7)  ;;  %v4069_v30 = vld [vmem:[#allocation2 + $0x218] sm:$0xff] (!%p6194_p7) }
 0x3a5   : > { %3910 = vst.msk [vmem:[#allocation2 + $0x240] sm:$0xff] %vm3837_vm1, %v3749_v38  ;;  %v3504_v33 = vpop.xlane.xlu1 %3503  ;;  %v4168_v38 = vmul.f32 (!%p6194_p7), 0.00390625, %v4008_v5  ;;  %v4040_v5 = vld [vmem:[#allocation2 + $0x130] sm:$0xff] (!%p6194_p7) }
 0x3a6   : > { %v3662_v56 = vpop.xlane.xlu0 %3661  ;;  %v3750_v52 = vadd.f32 %v3504_v33, %v3270_v27  ;;  %4504 = vperm.xlu0 (!%p6194_p7), %7218, %v4166_v48   ;;  %v4013_v27 = vld [vmem:[#allocation2 + $0x58] sm:$0xff] (!%p6194_p7)  ;;  %v4198_v48 = vmul.f32 (!%p6194_p7), 0.00390625, %v4038_v45  ;;  %v4324_v45 = vld [vmem:[%s9954_s2 + $0x10] sm:$0xff] (!%p6194_p7) }
 0x3a7   : > { %v3829_v54 = vadd.f32 %v3662_v56, %v3349_v21  ;;  %4509 = vperm.xlu1 (!%p6194_p7), %7219, %v4167_v0   ;;  %v4010_v21 = vld [vmem:[#allocation2 + $0x40] sm:$0xff] (!%p6194_p7)  ;;  %v4173_v33 = vmul.f32 (!%p6194_p7), 0.00390625, %v4013_v27  ;;  %v4199_v0 = vmul.f32 (!%p6194_p7), 0.00390625, %v4039_v42  ;;  %v4045_v27 = vld [vmem:[#allocation2 + $0x158] sm:$0xff] (!%p6194_p7) }
 0x3a8   : > { %3911 = vst.msk [vmem:[#allocation2 + $0x248] sm:$0xff] %vm3837_vm1, %v3750_v52  ;;  %v4170_v56 = vmul.f32 (!%p6194_p7), 0.00390625, %v4010_v21  ;;  %v4015_v52 = vld [vmem:[#allocation2 + $0x68] sm:$0xff] (!%p6194_p7)  ;;  %v4042_v21 = vld [vmem:[#allocation2 + $0x140] sm:$0xff] (!%p6194_p7) }
 0x3a9   : > { %3990 = vst.msk [vmem:[#allocation2 + $0x4c0] sm:$0xff] %vm3837_vm1, %v3829_v54  ;;  %v3664_v41 = vpop.xlane.xlu1 %3663  ;;  %v4012_v54 = vld [vmem:[#allocation2 + $0x50] sm:$0xff] (!%p6194_p7) }
 0x3aa   : > { %v3506_v10 = vpop.xlane.xlu0 %3505  ;;  %v3830_v62 = vadd.f32 %v3664_v41, %v3350_v36  ;;  %4514 = vperm.xlu0 (!%p6194_p7), %7218, %v4168_v38   ;;  %v4014_v36 = vld [vmem:[#allocation2 + $0x60] sm:$0xff] (!%p6194_p7)  ;;  %v4017_v41 = vld [vmem:[#allocation2 + $0x78] sm:$0xff] (!%p6194_p7)  ;;  %v4200_v38 = vmul.f32 (!%p6194_p7), 0.00390625, %v4040_v5  ;;  %v4071_v5 = vld [vmem:[#allocation2 + $0x228] sm:$0xff] (!%p6194_p7) }
 0x3ab   : > { %v3751_v40 = vadd.f32 %v3506_v10, %v3271_v61  ;;  %4519 = vperm.xlu1 (!%p6194_p7), %7219, %v4169_v57   ;;  %v4172_v61 = vmul.f32 (!%p6194_p7), 0.00390625, %v4012_v54  ;;  %v4175_v10 = vmul.f32 (!%p6194_p7), 0.00390625, %v4015_v52  ;;  %v4201_v57 = vmul.f32 (!%p6194_p7), 0.00390625, %v4041_v59  ;;  %v4044_v54 = vld [vmem:[#allocation2 + $0x150] sm:$0xff] (!%p6194_p7)  ;;  %v4047_v52 = vld [vmem:[#allocation2 + $0x168] sm:$0xff] (!%p6194_p7) }
 0x3ac   : > { %3991 = vst.msk [vmem:[#allocation2 + $0x4c8] sm:$0xff] %vm3837_vm1, %v3830_v62  ;;  %v4177_v62 = vmul.f32 (!%p6194_p7), 0.00390625, %v4017_v41  ;;  %v4049_v41 = vld [vmem:[#allocation2 + $0x178] sm:$0xff] (!%p6194_p7)  ;;  %v4323_v59 = vld [vmem:[%s9954_s2 + $0x8] sm:$0xff] (!%p6194_p7) }
 0x3ad   : > { %3912 = vst.msk [vmem:[#allocation2 + $0x250] sm:$0xff] %vm3837_vm1, %v3751_v40  ;;  %v3508_v20 = vpop.xlane.xlu1 %3507  ;;  %v4174_v40 = vmul.f32 (!%p6194_p7), 0.00390625, %v4014_v36  ;;  %v4046_v36 = vld [vmem:[#allocation2 + $0x160] sm:$0xff] (!%p6194_p7) }
 0x3ae   : > { %v3666_v16 = vpop.xlane.xlu0 %3665  ;;  %v3752_v44 = vadd.f32 %v3508_v20, %v3272_v28  ;;  %4524 = vperm.xlu0 (!%p6194_p7), %7218, %v4170_v56   ;;  %v4019_v28 = vld [vmem:[#allocation2 + $0x88] sm:$0xff] (!%p6194_p7)  ;;  %v4202_v56 = vmul.f32 (!%p6194_p7), 0.00390625, %v4042_v21 }
 0x3af   : > { %v3831_v46 = vadd.f32 %v3666_v16, %v3351_v9  ;;  %4529 = vperm.xlu1 (!%p6194_p7), %7219, %v4171_v39   ;;  %v4016_v9 = vld [vmem:[#allocation2 + $0x70] sm:$0xff] (!%p6194_p7)  ;;  %v4179_v20 = vmul.f32 (!%p6194_p7), 0.00390625, %v4019_v28  ;;  %v4203_v39 = vmul.f32 (!%p6194_p7), 0.00390625, %v4043_v49  ;;  %v4051_v28 = vld [vmem:[#allocation2 + $0x188] sm:$0xff] (!%p6194_p7)  ;;  %v4325_v49 = vld [vmem:[%s9954_s2 + $0x18] sm:$0xff] (!%p6194_p7) }
 0x3b0   : > { %3913 = vst.msk [vmem:[#allocation2 + $0x258] sm:$0xff] %vm3837_vm1, %v3752_v44  ;;  %v4176_v16 = vmul.f32 (!%p6194_p7), 0.00390625, %v4016_v9  ;;  %v4021_v44 = vld [vmem:[#allocation2 + $0x98] sm:$0xff] (!%p6194_p7)  ;;  %v4048_v9 = vld [vmem:[#allocation2 + $0x170] sm:$0xff] (!%p6194_p7) }
 0x3b1   : > { %3992 = vst.msk [vmem:[#allocation2 + $0x4d0] sm:$0xff] %vm3837_vm1, %v3831_v46  ;;  %v3668_v8 = vpop.xlane.xlu1 %3667  ;;  %v4018_v46 = vld [vmem:[#allocation2 + $0x80] sm:$0xff] (!%p6194_p7) }
 0x3b2   : > { %v3510_v18 = vpop.xlane.xlu0 %3509  ;;  %v3832_v63 = vadd.f32 %v3668_v8, %v3352_v60  ;;  %4534 = vperm.xlu0 (!%p6194_p7), %7218, %v4172_v61   ;;  %v4020_v60 = vld [vmem:[#allocation2 + $0x90] sm:$0xff] (!%p6194_p7)  ;;  %v4023_v8 = vld [vmem:[#allocation2 + $0xa8] sm:$0xff] (!%p6194_p7)  ;;  %v4204_v61 = vmul.f32 (!%p6194_p7), 0.00390625, %v4044_v54  ;;  %v4231_v54 = vmul.f32 (!%p6194_p7), 0.00390625, %v4071_v5 }
 0x3b3   : > { %v3753_v6 = vadd.f32 %v3510_v18, %v3273_v32  ;;  %4539 = vperm.xlu1 (!%p6194_p7), %7219, %v4173_v33   ;;  %v4178_v32 = vmul.f32 (!%p6194_p7), 0.00390625, %v4018_v46  ;;  %v4181_v18 = vmul.f32 (!%p6194_p7), 0.00390625, %v4021_v44  ;;  %v4205_v33 = vmul.f32 (!%p6194_p7), 0.00390625, %v4045_v27  ;;  %v4050_v46 = vld [vmem:[#allocation2 + $0x180] sm:$0xff] (!%p6194_p7)  ;;  %v4053_v44 = vld [vmem:[#allocation2 + $0x198] sm:$0xff] (!%p6194_p7) }
 0x3b4   : > { %3993 = vst.msk [vmem:[#allocation2 + $0x4d8] sm:$0xff] %vm3837_vm1, %v3832_v63  ;;  %v4183_v63 = vmul.f32 (!%p6194_p7), 0.00390625, %v4023_v8  ;;  %v4055_v8 = vld [vmem:[#allocation2 + $0x1a8] sm:$0xff] (!%p6194_p7) }
 0x3b5   : > { %3914 = vst.msk [vmem:[#allocation2 + $0x260] sm:$0xff] %vm3837_vm1, %v3753_v6  ;;  %v3512_v3 = vpop.xlane.xlu1 %3511  ;;  %v4180_v6 = vmul.f32 (!%p6194_p7), 0.00390625, %v4020_v60  ;;  %v4052_v60 = vld [vmem:[#allocation2 + $0x190] sm:$0xff] (!%p6194_p7) }
 0x3b6   : > { %v3670_v13 = vpop.xlane.xlu0 %3669  ;;  %v3754_v14 = vadd.f32 %v3512_v3, %v3274_v37  ;;  %4544 = vperm.xlu0 (!%p6194_p7), %7218, %v4174_v40   ;;  %v4025_v37 = vld [vmem:[#allocation2 + $0xb8] sm:$0xff] (!%p6194_p7)  ;;  %v4206_v40 = vmul.f32 (!%p6194_p7), 0.00390625, %v4046_v36  ;;  %v4072_v36 = vld [vmem:[#allocation2 + $0x230] sm:$0xff] (!%p6194_p7) }
 0x3b7   : > { %v3833_v12 = vadd.f32 %v3670_v13, %v3353_v17  ;;  %4549 = vperm.xlu1 (!%p6194_p7), %7219, %v4175_v10   ;;  %v4022_v17 = vld [vmem:[#allocation2 + $0xa0] sm:$0xff] (!%p6194_p7)  ;;  %v4185_v3 = vmul.f32 (!%p6194_p7), 0.00390625, %v4025_v37  ;;  %v4207_v10 = vmul.f32 (!%p6194_p7), 0.00390625, %v4047_v52  ;;  %v4057_v37 = vld [vmem:[#allocation2 + $0x1b8] sm:$0xff] (!%p6194_p7) }
 0x3b8   : > { %3915 = vst.msk [vmem:[#allocation2 + $0x268] sm:$0xff] %vm3837_vm1, %v3754_v14  ;;  %v4182_v13 = vmul.f32 (!%p6194_p7), 0.00390625, %v4022_v17  ;;  %v4027_v14 = vld [vmem:[#allocation2 + $0xc8] sm:$0xff] (!%p6194_p7)  ;;  %v4054_v17 = vld [vmem:[#allocation2 + $0x1a0] sm:$0xff] (!%p6194_p7)  ;;  %v4073_v52 = vld [vmem:[#allocation2 + $0x238] sm:$0xff] (!%p6194_p7) }
 0x3b9   : > { %3994 = vst.msk [vmem:[#allocation2 + $0x4e0] sm:$0xff] %vm3837_vm1, %v3833_v12  ;;  %v3672_v31 = vpop.xlane.xlu1 %3671  ;;  %v4024_v12 = vld [vmem:[#allocation2 + $0xb0] sm:$0xff] (!%p6194_p7) }
 0x3ba   : > { %v3514_v51 = vpop.xlane.xlu0 %3513  ;;  %v3834_v43 = vadd.f32 %v3672_v31, %v3354_v29  ;;  %4554 = vperm.xlu0 (!%p6194_p7), %7218, %v4176_v16   ;;  %v4026_v29 = vld [vmem:[#allocation2 + $0xc0] sm:$0xff] (!%p6194_p7)  ;;  %v4029_v31 = vld [vmem:[#allocation2 + $0xd8] sm:$0xff] (!%p6194_p7)  ;;  %v4208_v16 = vmul.f32 (!%p6194_p7), 0.00390625, %v4048_v9 }
 0x3bb   : > { %v3755_v55 = vadd.f32 %v3514_v51, %v3275_v34  ;;  %4559 = vperm.xlu1 (!%p6194_p7), %7219, %v4177_v62   ;;  %v4184_v34 = vmul.f32 (!%p6194_p7), 0.00390625, %v4024_v12  ;;  %v4187_v51 = vmul.f32 (!%p6194_p7), 0.00390625, %v4027_v14  ;;  %v4209_v62 = vmul.f32 (!%p6194_p7), 0.00390625, %v4049_v41  ;;  %v4056_v12 = vld [vmem:[#allocation2 + $0x1b0] sm:$0xff] (!%p6194_p7)  ;;  %v4059_v14 = vld [vmem:[#allocation2 + $0x1c8] sm:$0xff] (!%p6194_p7) }
 0x3bc   : > { %3995 = vst.msk [vmem:[#allocation2 + $0x4e8] sm:$0xff] %vm3837_vm1, %v3834_v43  ;;  %v4189_v43 = vmul.f32 (!%p6194_p7), 0.00390625, %v4029_v31  ;;  %v4061_v31 = vld [vmem:[#allocation2 + $0x1d8] sm:$0xff] (!%p6194_p7) }
 0x3bd   : > { %3916 = vst.msk [vmem:[#allocation2 + $0x270] sm:$0xff] %vm3837_vm1, %v3755_v55  ;;  %v3516_v4 = vpop.xlane.xlu1 %3515  ;;  %v4186_v55 = vmul.f32 (!%p6194_p7), 0.00390625, %v4026_v29  ;;  %v4058_v29 = vld [vmem:[#allocation2 + $0x1c0] sm:$0xff] (!%p6194_p7) }
 0x3be   : > { %v3674_v58 = vpop.xlane.xlu0 %3673  ;;  %v3756_v23 = vadd.f32 %v3516_v4, %v3276_v47  ;;  %4001 = sbr.rel (%p6194_p7) target bundleno = 1394 (0x572), region = 48  ;;  %4564 = vperm.xlu0 (!%p6194_p7), %7218, %v4178_v32   ;;  %v4031_v47 = vld [vmem:[#allocation2 + $0xe8] sm:$0xff] (!%p6194_p7)  ;;  %v4210_v32 = vmul.f32 (!%p6194_p7), 0.00390625, %v4050_v46 }
 0x3bf   : > { %v3835_v22 = vadd.f32 %v3674_v58, %v3355_v19  ;;  %4569 = vperm.xlu1 (!%p6194_p7), %7219, %v4179_v20   ;;  %v4028_v19 = vld [vmem:[#allocation2 + $0xd0] sm:$0xff] (!%p6194_p7)  ;;  %v4191_v4 = vmul.f32 (!%p6194_p7), 0.00390625, %v4031_v47  ;;  %v4211_v20 = vmul.f32 (!%p6194_p7), 0.00390625, %v4051_v28  ;;  %v4063_v47 = vld [vmem:[#allocation2 + $0x1e8] sm:$0xff] (!%p6194_p7) }
 0x3c0   : > { %3917 = vst.msk [vmem:[#allocation2 + $0x278] sm:$0xff] %vm3837_vm1, %v3756_v23  ;;  %v4188_v58 = vmul.f32 (!%p6194_p7), 0.00390625, %v4028_v19  ;;  %v4060_v19 = vld [vmem:[#allocation2 + $0x1d0] sm:$0xff] (!%p6194_p7) }
 0x3c1   : > { %3996 = vst.msk [vmem:[#allocation2 + $0x4f0] sm:$0xff] %vm3837_vm1, %v3835_v22  ;;  %v3676_v35 = vpop.xlane.xlu1 %3675  ;;  %v4030_v22 = vld [vmem:[#allocation2 + $0xe0] sm:$0xff] (!%p6194_p7) }
 0x3c2   : > { %v3836_v53 = vadd.f32 %v3676_v35, %v3356_v50  ;;  %4574 = vperm.xlu0 (!%p6194_p7), %7218, %v4180_v6   ;;  %v4190_v23 = vmul.f32 (!%p6194_p7), 0.00390625, %v4030_v22  ;;  %v4033_v50 = vld [vmem:[#allocation2 + $0xf8] sm:$0xff] (!%p6194_p7)  ;;  %v4032_v35 = vld [vmem:[#allocation2 + $0xf0] sm:$0xff] (!%p6194_p7)  ;;  %v4212_v6 = vmul.f32 (!%p6194_p7), 0.00390625, %v4052_v60  ;;  %v4062_v22 = vld [vmem:[#allocation2 + $0x1e0] sm:$0xff] (!%p6194_p7) }
 0x3c3   : > { %4579 = vperm.xlu1 (!%p6194_p7), %7219, %v4181_v18   ;;  %v4192_v1 = vmul.f32 (!%p6194_p7), 0.00390625, %v4032_v35  ;;  %v4213_v18 = vmul.f32 (!%p6194_p7), 0.00390625, %v4053_v44  ;;  %v4064_v35 = vld [vmem:[#allocation2 + $0x1f0] sm:$0xff] (!%p6194_p7)  ;;  %v4232_v44 = vmul.f32 (!%p6194_p7), 0.00390625, %v4072_v36 }
 0x3c4   : > { %3997 = vst.msk [vmem:[#allocation2 + $0x4f8] sm:$0xff] %vm3837_vm1, %v3836_v53  ;;  %v4193_v53 = vmul.f32 (!%p6194_p7), 0.00390625, %v4033_v50  ;;  %v4065_v50 = vld [vmem:[#allocation2 + $0x1f8] sm:$0xff] (!%p6194_p7) }
 0x3c6   : > { %4584 = vperm.xlu0 %7218, %v4182_v13   ;;  %v4214_v13 = vmul.f32 0.00390625, %v4054_v17 }
 0x3c7   : > { %4589 = vperm.xlu1 %7219, %v4183_v63   ;;  %v4215_v63 = vmul.f32 0.00390625, %v4055_v8  ;;  %v4074_v8 = vld [vmem:[#allocation2 + $0x240] sm:$0xff] }
 0x3ca   : > { %4594 = vperm.xlu0 %7218, %v4184_v34   ;;  %v4216_v34 = vmul.f32 0.00390625, %v4056_v12 }
 0x3cb   : > { %4599 = vperm.xlu1 %7219, %v4185_v3   ;;  %v4217_v3 = vmul.f32 0.00390625, %v4057_v37  ;;  %v4329_v37 = vld [vmem:[%s9954_s2 + $0x38] sm:$0xff] }
 0x3ce   : > { %4604 = vperm.xlu0 %7218, %v4186_v55   ;;  %v4218_v55 = vmul.f32 0.00390625, %v4058_v29 }
 0x3cf   : > { %4609 = vperm.xlu1 %7219, %v4187_v51   ;;  %v4219_v51 = vmul.f32 0.00390625, %v4059_v14 }
 0x3d2   : > { %4614 = vperm.xlu0 %7218, %v4188_v58   ;;  %v4220_v58 = vmul.f32 0.00390625, %v4060_v19  ;;  %v4077_v19 = vld [vmem:[#allocation2 + $0x258] sm:$0xff] }
 0x3d3   : > { %4619 = vperm.xlu1 %7219, %v4189_v43   ;;  %v4221_v43 = vmul.f32 0.00390625, %v4061_v31  ;;  %v4330_v31 = vld [vmem:[%s9954_s2 + $0x40] sm:$0xff] }
 0x3d6   : > { %4624 = vperm.xlu0 %7218, %v4190_v23   ;;  %v4222_v23 = vmul.f32 0.00390625, %v4062_v22 }
 0x3d7   : > { %4629 = vperm.xlu1 %7219, %v4191_v4   ;;  %v4223_v4 = vmul.f32 0.00390625, %v4063_v47 }
 0x3da   : > { %4634 = vperm.xlu0 %7218, %v4192_v1   ;;  %v4224_v1 = vmul.f32 0.00390625, %v4064_v35 }
 0x3db   : > { %4639 = vperm.xlu1 %7219, %v4193_v53   ;;  %v4225_v53 = vmul.f32 0.00390625, %v4065_v50 }
 0x3de   : > { %4644 = vperm.xlu0 %7218, %v4194_v11   ;;  %v4226_v11 = vmul.f32 0.00390625, %v4066_v24 }
 0x3df   : > { %4649 = vperm.xlu1 %7219, %v4195_v7   ;;  %v4227_v7 = vmul.f32 0.00390625, %v4067_v15 }
 0x3e2   : > { %4654 = vperm.xlu0 %7218, %v4196_v2   ;;  %v4322_v2 = vld [vmem:[%s9954_s2] sm:$0xff] }
 0x3e3   : > { %4659 = vperm.xlu1 %7219, %v4197_v26  }
 0x3e6   : > { %4664 = vperm.xlu0 %7218, %v4198_v48   ;;  %v4228_v48 = vmul.f32 0.00390625, %v4068_v25 }
 0x3e7   : > { %4669 = vperm.xlu1 %7219, %v4199_v0   ;;  %v4229_v0 = vmul.f32 0.00390625, %v4069_v30  ;;  %v4078_v30 = vld [vmem:[#allocation2 + $0x260] sm:$0xff] }
 0x3ea   : > { %4674 = vperm.xlu0 %7218, %v4200_v38  }
 0x3eb   : > { %4679 = vperm.xlu1 %7219, %v4201_v57   ;;  %v4070_v57 = vld [vmem:[#allocation2 + $0x220] sm:$0xff] }
 0x3ee   : > { %4684 = vperm.xlu0 %7218, %v4202_v56  }
 0x3ef   : > { %4689 = vperm.xlu1 %7219, %v4203_v39  }
 0x3f2   : > { %4694 = vperm.xlu0 %7218, %v4204_v61   ;;  %v4326_v61 = vld [vmem:[%s9954_s2 + $0x20] sm:$0xff] }
 0x3f3   : > { %4699 = vperm.xlu1 %7219, %v4205_v33   ;;  %v4230_v33 = vmul.f32 0.00390625, %v4070_v57  ;;  %v4238_v57 = vmul.f32 0.00390625, %v4078_v30 }
 0x3f6   : > { %4704 = vperm.xlu0 %7218, %v4206_v40  }
 0x3f7   : > { %4709 = vperm.xlu1 %7219, %v4207_v10  }
 0x3fa   : > { %4714 = vperm.xlu0 %7218, %v4208_v16  }
 0x3fb   : > { %4719 = vperm.xlu1 %7219, %v4209_v62   ;;  %v4327_v62 = vld [vmem:[%s9954_s2 + $0x28] sm:$0xff] }
 0x3fe   : > { %4724 = vperm.xlu0 %7218, %v4210_v32   ;;  %v4233_v32 = vmul.f32 0.00390625, %v4073_v52 }
 0x3ff   : > { %4729 = vperm.xlu1 %7219, %v4211_v20  }
 0x402   : > { %4734 = vperm.xlu0 %7218, %v4212_v6   ;;  %v4075_v6 = vld [vmem:[#allocation2 + $0x248] sm:$0xff] }
 0x403   : > { %4739 = vperm.xlu1 %7219, %v4213_v18   ;;  %v4328_v18 = vld [vmem:[%s9954_s2 + $0x30] sm:$0xff]  ;;  %v4235_v29 = vmul.f32 0.00390625, %v4075_v6 }
 0x406   : > { %4744 = vperm.xlu0 %7218, %v4214_v13  }
 0x407   : > { %4749 = vperm.xlu1 %7219, %v4215_v63  }
 0x40a   : > { %4754 = vperm.xlu0 %7218, %v4216_v34  }
 0x40b   : > { %4759 = vperm.xlu1 %7219, %v4217_v3  }
 0x40e   : > { %4764 = vperm.xlu0 %7218, %v4218_v55  }
 0x40f   : > { %4769 = vperm.xlu1 %7219, %v4219_v51   ;;  %v4234_v51 = vmul.f32 0.00390625, %v4074_v8 }
 0x412   : > { %4774 = vperm.xlu0 %7218, %v4220_v58  }
 0x413   : > { %4779 = vperm.xlu1 %7219, %v4221_v43   ;;  %v4076_v43 = vld [vmem:[#allocation2 + $0x250] sm:$0xff] }
 0x414   : > { %v4236_v15 = vmul.f32 0.00390625, %v4076_v43 }
 0x416   : > { %4784 = vperm.xlu0 %7218, %v4222_v23  }
 0x417   : > { %4789 = vperm.xlu1 %7219, %v4223_v4   ;;  %v4331_v4 = vld [vmem:[%s9954_s2 + $0x48] sm:$0xff] }
 0x41a   : > { %4794 = vperm.xlu0 %7218, %v4224_v1   ;;  %v4237_v1 = vmul.f32 0.00390625, %v4077_v19 }
 0x41b   : > { %4799 = vperm.xlu1 %7219, %v4225_v53  }
 0x41c   : > { %v4485_v42 = vpop.permute.xlu0 %4484 }
 0x41d   : > { %v5282_v38 = vmul.f32 %v4485_v42, %v4322_v2  ;;  %v4333_v42 = vld [vmem:[%s9954_s2 + $0x58] sm:$0xff] }
 0x41e   : > { %v4495_v26 = vpop.permute.xlu1 %4494  ;;  %4804 = vperm.xlu0 %7218, %v4226_v11   ;;  %v4079_v11 = vld [vmem:[#allocation2 + $0x268] sm:$0xff] }
 0x41f   : > { %4809 = vperm.xlu1 %7219, %v4227_v7   ;;  %v5284_v56 = vmul.f32 %v4495_v26, %v4324_v45  ;;  %v5443_v10 = vsel %vm5442_vm2, %v5282_v38, 0.0  ;;  %v4332_v7 = vld [vmem:[%s9954_s2 + $0x50] sm:$0xff]  ;;  %v4239_v5 = vmul.f32 0.00390625, %v4079_v11 }
 0x421   : > { %v4490_v39 = vpop.permute.xlu0 %4489  ;;  %v5446_v46 = vsel %vm5442_vm2, %v5284_v56, 0.0 }
 0x422   : > { %v4500_v21 = vpop.permute.xlu1 %4499  ;;  %v5283_v27 = vmul.f32 %v4490_v39, %v4323_v59  ;;  %4814 = vperm.xlu0 %7218, %v4228_v48   ;;  %v4080_v39 = vld [vmem:[#allocation2 + $0x270] sm:$0xff] }
 0x423   : > { %4819 = vperm.xlu1 %7219, %v4229_v0   ;;  %v5285_v40 = vmul.f32 %v4500_v21, %v4325_v49  ;;  %v4334_v49 = vld [vmem:[%s9954_s2 + $0x60] sm:$0xff]  ;;  %v4081_v21 = vld [vmem:[#allocation2 + $0x278] sm:$0xff] }
 0x424   : > { %v5444_v41 = vsel %vm5442_vm2, %v5283_v27, 0.0 }
 0x425   : > { %v5445_v9 = vadd.f32 %v5444_v41, %v5443_v10  ;;  %v4505_v28 = vpop.permute.xlu0 %4504  ;;  %v5448_v17 = vsel %vm5442_vm2, %v5285_v40, 0.0  ;;  %v4241_v40 = vmul.f32 0.00390625, %v4081_v21  ;;  %v4240_v41 = vmul.f32 0.00390625, %v4080_v39 }
 0x426   : > { %v4510_v16 = vpop.permute.xlu1 %4509  ;;  %v5286_v20 = vmul.f32 %v4505_v28, %v4326_v61  ;;  %4824 = vperm.xlu0 %7218, %v4230_v33   ;;  %v4335_v33 = vld [vmem:[%s9954_s2 + $0x68] sm:$0xff]  ;;  %v4082_v28 = vld [vmem:[#allocation2 + $0x280] sm:$0xff] }
 0x427   : > { %4829 = vperm.xlu1 %7219, %v4231_v54   ;;  %v5447_v60 = vadd.f32 %v5446_v46, %v5445_v9  ;;  %v5287_v63 = vmul.f32 %v4510_v16, %v4327_v62  ;;  %v4336_v62 = vld [vmem:[%s9954_s2 + $0x70] sm:$0xff]  ;;  %v4083_v16 = vld [vmem:[#allocation2 + $0x288] sm:$0xff] }
 0x428   : > { %v5450_v34 = vsel %vm5442_vm2, %v5286_v20, 0.0 }
 0x429   : > { %v5449_v13 = vadd.f32 %v5448_v17, %v5447_v60  ;;  %v4515_v3 = vpop.permute.xlu0 %4514  ;;  %v5452_v58 = vsel %vm5442_vm2, %v5287_v63, 0.0  ;;  %v4243_v17 = vmul.f32 0.00390625, %v4083_v16  ;;  %v4242_v63 = vmul.f32 0.00390625, %v4082_v28 }
 0x42a   : > { %v4520_v12 = vpop.permute.xlu1 %4519  ;;  %v5288_v14 = vmul.f32 %v4515_v3, %v4328_v18  ;;  %4834 = vperm.xlu0 %7218, %v4232_v44   ;;  %v4337_v44 = vld [vmem:[%s9954_s2 + $0x78] sm:$0xff]  ;;  %v4084_v3 = vld [vmem:[#allocation2 + $0x290] sm:$0xff] }
 0x42b   : > { %4839 = vperm.xlu1 %7219, %v4233_v32   ;;  %v5451_v55 = vadd.f32 %v5450_v34, %v5449_v13  ;;  %v5289_v47 = vmul.f32 %v4520_v12, %v4329_v37  ;;  %v4338_v37 = vld [vmem:[%s9954_s2 + $0x80] sm:$0xff]  ;;  %v4085_v12 = vld [vmem:[#allocation2 + $0x298] sm:$0xff] }
 0x42c   : > { %v5454_v35 = vsel %vm5442_vm2, %v5288_v14, 0.0 }
 0x42d   : > { %v5453_v22 = vadd.f32 %v5452_v58, %v5451_v55  ;;  %v4525_v50 = vpop.permute.xlu0 %4524  ;;  %v5456_v25 = vsel %vm5442_vm2, %v5289_v47, 0.0  ;;  %v4245_v58 = vmul.f32 0.00390625, %v4085_v12  ;;  %v4244_v47 = vmul.f32 0.00390625, %v4084_v3 }
 0x42e   : > { %v4530_v23 = vpop.permute.xlu1 %4529  ;;  %v5290_v53 = vmul.f32 %v4525_v50, %v4330_v31  ;;  %4844 = vperm.xlu0 %7218, %v4234_v51   ;;  %v4339_v51 = vld [vmem:[%s9954_s2 + $0x88] sm:$0xff]  ;;  %v4086_v50 = vld [vmem:[#allocation2 + $0x2a0] sm:$0xff] }
 0x42f   : > { %4849 = vperm.xlu1 %7219, %v4235_v29   ;;  %v5455_v24 = vadd.f32 %v5454_v35, %v5453_v22  ;;  %v5291_v26 = vmul.f32 %v4530_v23, %v4331_v4  ;;  %v4340_v4 = vld [vmem:[%s9954_s2 + $0x90] sm:$0xff]  ;;  %v4087_v23 = vld [vmem:[#allocation2 + $0x2a8] sm:$0xff] }
 0x430   : > { %v5458_v48 = vsel %vm5442_vm2, %v5290_v53, 0.0 }
 0x431   : > { %v5457_v2 = vadd.f32 %v5456_v25, %v5455_v24  ;;  %v4535_v0 = vpop.permute.xlu0 %4534  ;;  %v5460_v56 = vsel %vm5442_vm2, %v5291_v26, 0.0  ;;  %v4247_v25 = vmul.f32 0.00390625, %v4087_v23  ;;  %v4246_v26 = vmul.f32 0.00390625, %v4086_v50 }
 0x432   : > { %v4540_v45 = vpop.permute.xlu1 %4539  ;;  %v5292_v59 = vmul.f32 %v4535_v0, %v4332_v7  ;;  %4854 = vperm.xlu0 %7218, %v4236_v15   ;;  %v4341_v15 = vld [vmem:[%s9954_s2 + $0x98] sm:$0xff]  ;;  %v4088_v0 = vld [vmem:[#allocation2 + $0x2b0] sm:$0xff] }
 0x433   : > { %4859 = vperm.xlu1 %7219, %v4237_v1   ;;  %v5459_v38 = vadd.f32 %v5458_v48, %v5457_v2  ;;  %v5293_v27 = vmul.f32 %v4540_v45, %v4333_v42  ;;  %v4342_v42 = vld [vmem:[%s9954_s2 + $0xa0] sm:$0xff]  ;;  %v4089_v45 = vld [vmem:[#allocation2 + $0x2b8] sm:$0xff] }
 0x434   : > { %v5462_v36 = vsel %vm5442_vm2, %v5292_v59, 0.0 }
 0x435   : > { %v5461_v54 = vadd.f32 %v5460_v56, %v5459_v38  ;;  %v4545_v52 = vpop.permute.xlu0 %4544  ;;  %v5464_v46 = vsel %vm5442_vm2, %v5293_v27, 0.0  ;;  %v4249_v56 = vmul.f32 0.00390625, %v4089_v45  ;;  %v4248_v27 = vmul.f32 0.00390625, %v4088_v0 }
 0x436   : > { %v4550_v61 = vpop.permute.xlu1 %4549  ;;  %v5294_v10 = vmul.f32 %v4545_v52, %v4334_v49  ;;  %4864 = vperm.xlu0 %7218, %v4238_v57   ;;  %v4343_v57 = vld [vmem:[%s9954_s2 + $0xa8] sm:$0xff]  ;;  %v4090_v52 = vld [vmem:[#allocation2 + $0x2c0] sm:$0xff] }
 0x437   : > { %4869 = vperm.xlu1 %7219, %v4239_v5   ;;  %v5463_v9 = vadd.f32 %v5462_v36, %v5461_v54  ;;  %v5295_v20 = vmul.f32 %v4550_v61, %v4335_v33  ;;  %v4344_v33 = vld [vmem:[%s9954_s2 + $0xb0] sm:$0xff]  ;;  %v4091_v61 = vld [vmem:[#allocation2 + $0x2c8] sm:$0xff] }
 0x438   : > { %v5466_v6 = vsel %vm5442_vm2, %v5294_v10, 0.0 }
 0x439   : > { %v5465_v32 = vadd.f32 %v5464_v46, %v5463_v9  ;;  %v4555_v18 = vpop.permute.xlu0 %4554  ;;  %v5468_v34 = vsel %vm5442_vm2, %v5295_v20, 0.0  ;;  %v4251_v46 = vmul.f32 0.00390625, %v4091_v61  ;;  %v4250_v20 = vmul.f32 0.00390625, %v4090_v52 }
 0x43a   : > { %v4560_v60 = vpop.permute.xlu1 %4559  ;;  %v5296_v8 = vmul.f32 %v4555_v18, %v4336_v62  ;;  %4874 = vperm.xlu0 %7218, %v4240_v41   ;;  %v4345_v41 = vld [vmem:[%s9954_s2 + $0xb8] sm:$0xff]  ;;  %v4092_v18 = vld [vmem:[#allocation2 + $0x2d0] sm:$0xff] }
 0x43b   : > { %4879 = vperm.xlu1 %7219, %v4241_v40   ;;  %v5467_v13 = vadd.f32 %v5466_v6, %v5465_v32  ;;  %v5297_v14 = vmul.f32 %v4560_v60, %v4337_v44  ;;  %v4346_v44 = vld [vmem:[%s9954_s2 + $0xc0] sm:$0xff]  ;;  %v4093_v60 = vld [vmem:[#allocation2 + $0x2d8] sm:$0xff] }
 0x43c   : > { %v5470_v19 = vsel %vm5442_vm2, %v5296_v8, 0.0 }
 0x43d   : > { %v5469_v29 = vadd.f32 %v5468_v34, %v5467_v13  ;;  %v4565_v31 = vpop.permute.xlu0 %4564  ;;  %v5472_v35 = vsel %vm5442_vm2, %v5297_v14, 0.0  ;;  %v4253_v34 = vmul.f32 0.00390625, %v4093_v60  ;;  %v4252_v14 = vmul.f32 0.00390625, %v4092_v18 }
 0x43e   : > { %v4570_v55 = vpop.permute.xlu1 %4569  ;;  %v5298_v43 = vmul.f32 %v4565_v31, %v4338_v37  ;;  %4884 = vperm.xlu0 %7218, %v4242_v63   ;;  %v4347_v63 = vld [vmem:[%s9954_s2 + $0xc8] sm:$0xff]  ;;  %v4094_v31 = vld [vmem:[#allocation2 + $0x2e0] sm:$0xff] }
 0x43f   : > { %4889 = vperm.xlu1 %7219, %v4243_v17   ;;  %v5471_v22 = vadd.f32 %v5470_v19, %v5469_v29  ;;  %v5299_v53 = vmul.f32 %v4570_v55, %v4339_v51  ;;  %v4348_v51 = vld [vmem:[%s9954_s2 + $0xd0] sm:$0xff]  ;;  %v4095_v55 = vld [vmem:[#allocation2 + $0x2e8] sm:$0xff] }
 0x440   : > { %v5474_v11 = vsel %vm5442_vm2, %v5298_v43, 0.0 }
 0x441   : > { %v5473_v1 = vadd.f32 %v5472_v35, %v5471_v22  ;;  %v4575_v7 = vpop.permute.xlu0 %4574  ;;  %v5476_v48 = vsel %vm5442_vm2, %v5299_v53, 0.0  ;;  %v4255_v35 = vmul.f32 0.00390625, %v4095_v55  ;;  %v4254_v53 = vmul.f32 0.00390625, %v4094_v31 }
 0x442   : > { %v4580_v24 = vpop.permute.xlu1 %4579  ;;  %v5300_v30 = vmul.f32 %v4575_v7, %v4340_v4  ;;  %4894 = vperm.xlu0 %7218, %v4244_v47   ;;  %v4349_v47 = vld [vmem:[%s9954_s2 + $0xd8] sm:$0xff]  ;;  %v4096_v7 = vld [vmem:[#allocation2 + $0x2f0] sm:$0xff] }
 0x443   : > { %4899 = vperm.xlu1 %7219, %v4245_v58   ;;  %v5475_v2 = vadd.f32 %v5474_v11, %v5473_v1  ;;  %v5301_v59 = vmul.f32 %v4580_v24, %v4341_v15  ;;  %v4350_v15 = vld [vmem:[%s9954_s2 + $0xe0] sm:$0xff]  ;;  %v4097_v24 = vld [vmem:[#allocation2 + $0x2f8] sm:$0xff] }
 0x444   : > { %v5478_v21 = vsel %vm5442_vm2, %v5300_v30, 0.0 }
 0x445   : > { %v5477_v5 = vadd.f32 %v5476_v48, %v5475_v2  ;;  %v4585_v49 = vpop.permute.xlu0 %4584  ;;  %v5480_v36 = vsel %vm5442_vm2, %v5301_v59, 0.0  ;;  %v4257_v48 = vmul.f32 0.00390625, %v4097_v24  ;;  %v4256_v59 = vmul.f32 0.00390625, %v4096_v7 }
 0x446   : > { %v4590_v38 = vpop.permute.xlu1 %4589  ;;  %v5302_v39 = vmul.f32 %v4585_v49, %v4342_v42  ;;  %4904 = vperm.xlu0 %7218, %v4246_v26   ;;  %v4351_v26 = vld [vmem:[%s9954_s2 + $0xe8] sm:$0xff]  ;;  %v4098_v49 = vld [vmem:[#allocation2 + $0x300] sm:$0xff] }
 0x447   : > { %4909 = vperm.xlu1 %7219, %v4247_v25   ;;  %v5479_v54 = vadd.f32 %v5478_v21, %v5477_v5  ;;  %v5303_v10 = vmul.f32 %v4590_v38, %v4343_v57  ;;  %v4352_v57 = vld [vmem:[%s9954_s2 + $0xf0] sm:$0xff]  ;;  %v4099_v38 = vld [vmem:[#allocation2 + $0x308] sm:$0xff] }
 0x448   : > { %v5482_v16 = vsel %vm5442_vm2, %v5302_v39, 0.0 }
 0x449   : > { %v5481_v40 = vadd.f32 %v5480_v36, %v5479_v54  ;;  %v4595_v62 = vpop.permute.xlu0 %4594  ;;  %v5484_v6 = vsel %vm5442_vm2, %v5303_v10, 0.0  ;;  %v4259_v36 = vmul.f32 0.00390625, %v4099_v38  ;;  %v4258_v10 = vmul.f32 0.00390625, %v4098_v49 }
 0x44a   : > { %v4600_v9 = vpop.permute.xlu1 %4599  ;;  %v5304_v28 = vmul.f32 %v4595_v62, %v4344_v33  ;;  %4914 = vperm.xlu0 %7218, %v4248_v27   ;;  %v4353_v27 = vld [vmem:[%s9954_s2 + $0xf8] sm:$0xff]  ;;  %v4100_v62 = vld [vmem:[#allocation2 + $0x310] sm:$0xff] }
 0x44b   : > { %4919 = vperm.xlu1 %7219, %v4249_v56   ;;  %v5483_v32 = vadd.f32 %v5482_v16, %v5481_v40  ;;  %v5305_v8 = vmul.f32 %v4600_v9, %v4345_v41  ;;  %v4354_v41 = vld [vmem:[%s9954_s2 + $0x100] sm:$0xff]  ;;  %v4101_v9 = vld [vmem:[#allocation2 + $0x318] sm:$0xff] }
 0x44c   : > { %v5486_v12 = vsel %vm5442_vm2, %v5304_v28, 0.0 }
 0x44d   : > { %v5485_v17 = vadd.f32 %v5484_v6, %v5483_v32  ;;  %v4605_v37 = vpop.permute.xlu0 %4604  ;;  %v5488_v19 = vsel %vm5442_vm2, %v5305_v8, 0.0  ;;  %v4261_v6 = vmul.f32 0.00390625, %v4101_v9  ;;  %v4260_v8 = vmul.f32 0.00390625, %v4100_v62 }
 0x44e   : > { %v4610_v13 = vpop.permute.xlu1 %4609  ;;  %v5306_v3 = vmul.f32 %v4605_v37, %v4346_v44  ;;  %4924 = vperm.xlu0 %7218, %v4250_v20   ;;  %v4355_v20 = vld [vmem:[%s9954_s2 + $0x108] sm:$0xff]  ;;  %v4102_v37 = vld [vmem:[#allocation2 + $0x320] sm:$0xff] }
 0x44f   : > { %4929 = vperm.xlu1 %7219, %v4251_v46   ;;  %v5487_v29 = vadd.f32 %v5486_v12, %v5485_v17  ;;  %v5307_v43 = vmul.f32 %v4610_v13, %v4347_v63  ;;  %v4356_v63 = vld [vmem:[%s9954_s2 + $0x110] sm:$0xff]  ;;  %v4103_v13 = vld [vmem:[#allocation2 + $0x328] sm:$0xff] }
 0x450   : > { %v5490_v23 = vsel %vm5442_vm2, %v5306_v3, 0.0 }
 0x451   : > { %v5489_v58 = vadd.f32 %v5488_v19, %v5487_v29  ;;  %v4615_v4 = vpop.permute.xlu0 %4614  ;;  %v5492_v11 = vsel %vm5442_vm2, %v5307_v43, 0.0  ;;  %v4263_v19 = vmul.f32 0.00390625, %v4103_v13  ;;  %v4262_v43 = vmul.f32 0.00390625, %v4102_v37 }
 0x452   : > { %v4620_v22 = vpop.permute.xlu1 %4619  ;;  %v5308_v50 = vmul.f32 %v4615_v4, %v4348_v51  ;;  %4934 = vperm.xlu0 %7218, %v4252_v14   ;;  %v4357_v14 = vld [vmem:[%s9954_s2 + $0x118] sm:$0xff]  ;;  %v4104_v4 = vld [vmem:[#allocation2 + $0x330] sm:$0xff] }
 0x453   : > { %4939 = vperm.xlu1 %7219, %v4253_v34   ;;  %v5491_v1 = vadd.f32 %v5490_v23, %v5489_v58  ;;  %v5309_v30 = vmul.f32 %v4620_v22, %v4349_v47  ;;  %v4358_v47 = vld [vmem:[%s9954_s2 + $0x120] sm:$0xff]  ;;  %v4105_v22 = vld [vmem:[#allocation2 + $0x338] sm:$0xff] }
 0x454   : > { %v5494_v45 = vsel %vm5442_vm2, %v5308_v50, 0.0 }
 0x455   : > { %v5493_v25 = vadd.f32 %v5492_v11, %v5491_v1  ;;  %v4625_v42 = vpop.permute.xlu0 %4624  ;;  %v5496_v21 = vsel %vm5442_vm2, %v5309_v30, 0.0  ;;  %v4265_v11 = vmul.f32 0.00390625, %v4105_v22  ;;  %v4264_v30 = vmul.f32 0.00390625, %v4104_v4 }
 0x456   : > { %v4630_v2 = vpop.permute.xlu1 %4629  ;;  %v5310_v0 = vmul.f32 %v4625_v42, %v4350_v15  ;;  %4944 = vperm.xlu0 %7218, %v4254_v53   ;;  %v4359_v53 = vld [vmem:[%s9954_s2 + $0x128] sm:$0xff]  ;;  %v4106_v42 = vld [vmem:[#allocation2 + $0x340] sm:$0xff] }
 0x457   : > { %4949 = vperm.xlu1 %7219, %v4255_v35   ;;  %v5495_v5 = vadd.f32 %v5494_v45, %v5493_v25  ;;  %v5311_v39 = vmul.f32 %v4630_v2, %v4351_v26  ;;  %v4360_v26 = vld [vmem:[%s9954_s2 + $0x130] sm:$0xff]  ;;  %v4107_v2 = vld [vmem:[#allocation2 + $0x348] sm:$0xff] }
 0x458   : > { %v5498_v61 = vsel %vm5442_vm2, %v5310_v0, 0.0 }
 0x459   : > { %v5497_v56 = vadd.f32 %v5496_v21, %v5495_v5  ;;  %v4635_v33 = vpop.permute.xlu0 %4634  ;;  %v5500_v16 = vsel %vm5442_vm2, %v5311_v39, 0.0  ;;  %v4267_v21 = vmul.f32 0.00390625, %v4107_v2  ;;  %v4266_v39 = vmul.f32 0.00390625, %v4106_v42 }
 0x45a   : > { %v4640_v54 = vpop.permute.xlu1 %4639  ;;  %v5312_v52 = vmul.f32 %v4635_v33, %v4352_v57  ;;  %4954 = vperm.xlu0 %7218, %v4256_v59   ;;  %v4361_v59 = vld [vmem:[%s9954_s2 + $0x138] sm:$0xff]  ;;  %v4108_v33 = vld [vmem:[#allocation2 + $0x350] sm:$0xff] }
 0x45b   : > { %4959 = vperm.xlu1 %7219, %v4257_v48   ;;  %v5499_v40 = vadd.f32 %v5498_v61, %v5497_v56  ;;  %v5313_v28 = vmul.f32 %v4640_v54, %v4353_v27  ;;  %v4362_v27 = vld [vmem:[%s9954_s2 + $0x140] sm:$0xff]  ;;  %v4109_v54 = vld [vmem:[#allocation2 + $0x358] sm:$0xff] }
 0x45c   : > { %v5502_v60 = vsel %vm5442_vm2, %v5312_v52, 0.0 }
 0x45d   : > { %v5501_v46 = vadd.f32 %v5500_v16, %v5499_v40  ;;  %v4645_v44 = vpop.permute.xlu0 %4644  ;;  %v5504_v12 = vsel %vm5442_vm2, %v5313_v28, 0.0  ;;  %v4269_v16 = vmul.f32 0.00390625, %v4109_v54  ;;  %v4268_v28 = vmul.f32 0.00390625, %v4108_v33 }
 0x45e   : > { %v4650_v32 = vpop.permute.xlu1 %4649  ;;  %v5314_v18 = vmul.f32 %v4645_v44, %v4354_v41  ;;  %4964 = vperm.xlu0 %7218, %v4258_v10   ;;  %v4363_v10 = vld [vmem:[%s9954_s2 + $0x148] sm:$0xff]  ;;  %v4110_v44 = vld [vmem:[#allocation2 + $0x360] sm:$0xff] }
 0x45f   : > { %4969 = vperm.xlu1 %7219, %v4259_v36   ;;  %v5503_v17 = vadd.f32 %v5502_v60, %v5501_v46  ;;  %v5315_v3 = vmul.f32 %v4650_v32, %v4355_v20  ;;  %v4364_v20 = vld [vmem:[%s9954_s2 + $0x150] sm:$0xff]  ;;  %v4111_v32 = vld [vmem:[#allocation2 + $0x368] sm:$0xff] }
 0x460   : > { %v5506_v55 = vsel %vm5442_vm2, %v5314_v18, 0.0 }
 0x461   : > { %v5505_v34 = vadd.f32 %v5504_v12, %v5503_v17  ;;  %v4655_v51 = vpop.permute.xlu0 %4654  ;;  %v5508_v23 = vsel %vm5442_vm2, %v5315_v3, 0.0  ;;  %v4271_v12 = vmul.f32 0.00390625, %v4111_v32  ;;  %v4270_v3 = vmul.f32 0.00390625, %v4110_v44 }
 0x462   : > { %v4660_v29 = vpop.permute.xlu1 %4659  ;;  %v5316_v31 = vmul.f32 %v4655_v51, %v4356_v63  ;;  %4974 = vperm.xlu0 %7218, %v4260_v8   ;;  %v4365_v8 = vld [vmem:[%s9954_s2 + $0x158] sm:$0xff]  ;;  %v4112_v51 = vld [vmem:[#allocation2 + $0x370] sm:$0xff] }
 0x463   : > { %4979 = vperm.xlu1 %7219, %v4261_v6   ;;  %v5507_v58 = vadd.f32 %v5506_v55, %v5505_v34  ;;  %v5317_v50 = vmul.f32 %v4660_v29, %v4357_v14  ;;  %v4366_v14 = vld [vmem:[%s9954_s2 + $0x160] sm:$0xff]  ;;  %v4113_v29 = vld [vmem:[#allocation2 + $0x378] sm:$0xff] }
 0x464   : > { %v5510_v24 = vsel %vm5442_vm2, %v5316_v31, 0.0 }
 0x465   : > { %v5509_v35 = vadd.f32 %v5508_v23, %v5507_v58  ;;  %v4665_v15 = vpop.permute.xlu0 %4664  ;;  %v5512_v45 = vsel %vm5442_vm2, %v5317_v50, 0.0  ;;  %v4273_v23 = vmul.f32 0.00390625, %v4113_v29  ;;  %v4272_v50 = vmul.f32 0.00390625, %v4112_v51 }
 0x466   : > { %v4670_v1 = vpop.permute.xlu1 %4669  ;;  %v5318_v7 = vmul.f32 %v4665_v15, %v4358_v47  ;;  %4984 = vperm.xlu0 %7218, %v4262_v43   ;;  %v4367_v43 = vld [vmem:[%s9954_s2 + $0x168] sm:$0xff]  ;;  %v4114_v15 = vld [vmem:[#allocation2 + $0x380] sm:$0xff] }
 0x467   : > { %4989 = vperm.xlu1 %7219, %v4263_v19   ;;  %v5511_v25 = vadd.f32 %v5510_v24, %v5509_v35  ;;  %v5319_v0 = vmul.f32 %v4670_v1, %v4359_v53  ;;  %v4368_v53 = vld [vmem:[%s9954_s2 + $0x170] sm:$0xff]  ;;  %v4115_v1 = vld [vmem:[#allocation2 + $0x388] sm:$0xff] }
 0x468   : > { %v5514_v38 = vsel %vm5442_vm2, %v5318_v7, 0.0 }
 0x469   : > { %v5513_v48 = vadd.f32 %v5512_v45, %v5511_v25  ;;  %v4675_v57 = vpop.permute.xlu0 %4674  ;;  %v5516_v61 = vsel %vm5442_vm2, %v5319_v0, 0.0  ;;  %v4275_v45 = vmul.f32 0.00390625, %v4115_v1  ;;  %v4274_v0 = vmul.f32 0.00390625, %v4114_v15 }
 0x46a   : > { %v4680_v5 = vpop.permute.xlu1 %4679  ;;  %v5320_v49 = vmul.f32 %v4675_v57, %v4360_v26  ;;  %4994 = vperm.xlu0 %7218, %v4264_v30   ;;  %v4369_v30 = vld [vmem:[%s9954_s2 + $0x178] sm:$0xff]  ;;  %v4116_v57 = vld [vmem:[#allocation2 + $0x390] sm:$0xff] }
 0x46b   : > { %4999 = vperm.xlu1 %7219, %v4265_v11   ;;  %v5515_v56 = vadd.f32 %v5514_v38, %v5513_v48  ;;  %v5321_v52 = vmul.f32 %v4680_v5, %v4361_v59  ;;  %v4370_v59 = vld [vmem:[%s9954_s2 + $0x180] sm:$0xff]  ;;  %v4117_v5 = vld [vmem:[#allocation2 + $0x398] sm:$0xff] }
 0x46c   : > { %v5518_v9 = vsel %vm5442_vm2, %v5320_v49, 0.0 }
 0x46d   : > { %v5517_v36 = vadd.f32 %v5516_v61, %v5515_v56  ;;  %v4685_v41 = vpop.permute.xlu0 %4684  ;;  %v5520_v60 = vsel %vm5442_vm2, %v5321_v52, 0.0  ;;  %v4277_v61 = vmul.f32 0.00390625, %v4117_v5  ;;  %v4276_v52 = vmul.f32 0.00390625, %v4116_v57 }
 0x46e   : > { %v4690_v40 = vpop.permute.xlu1 %4689  ;;  %v5322_v62 = vmul.f32 %v4685_v41, %v4362_v27  ;;  %5004 = vperm.xlu0 %7218, %v4266_v39   ;;  %v4371_v39 = vld [vmem:[%s9954_s2 + $0x188] sm:$0xff]  ;;  %v4118_v41 = vld [vmem:[#allocation2 + $0x3a0] sm:$0xff] }
 0x46f   : > { %5009 = vperm.xlu1 %7219, %v4267_v21   ;;  %v5519_v46 = vadd.f32 %v5518_v9, %v5517_v36  ;;  %v5323_v18 = vmul.f32 %v4690_v40, %v4363_v10  ;;  %v4372_v10 = vld [vmem:[%s9954_s2 + $0x190] sm:$0xff]  ;;  %v4119_v40 = vld [vmem:[#allocation2 + $0x3a8] sm:$0xff] }
 0x470   : > { %v5522_v13 = vsel %vm5442_vm2, %v5322_v62, 0.0 }
 0x471   : > { %v5521_v6 = vadd.f32 %v5520_v60, %v5519_v46  ;;  %v4695_v63 = vpop.permute.xlu0 %4694  ;;  %v5524_v55 = vsel %vm5442_vm2, %v5323_v18, 0.0  ;;  %v4279_v60 = vmul.f32 0.00390625, %v4119_v40  ;;  %v4278_v18 = vmul.f32 0.00390625, %v4118_v41 }
 0x472   : > { %v4700_v17 = vpop.permute.xlu1 %4699  ;;  %v5324_v37 = vmul.f32 %v4695_v63, %v4364_v20  ;;  %5014 = vperm.xlu0 %7218, %v4268_v28   ;;  %v4373_v28 = vld [vmem:[%s9954_s2 + $0x198] sm:$0xff]  ;;  %v4120_v63 = vld [vmem:[#allocation2 + $0x3b0] sm:$0xff] }
 0x473   : > { %5019 = vperm.xlu1 %7219, %v4269_v16   ;;  %v5523_v34 = vadd.f32 %v5522_v13, %v5521_v6  ;;  %v5325_v31 = vmul.f32 %v4700_v17, %v4365_v8  ;;  %v4374_v8 = vld [vmem:[%s9954_s2 + $0x1a0] sm:$0xff]  ;;  %v4121_v17 = vld [vmem:[#allocation2 + $0x3b8] sm:$0xff] }
 0x474   : > { %v5526_v22 = vsel %vm5442_vm2, %v5324_v37, 0.0 }
 0x475   : > { %v5525_v19 = vadd.f32 %v5524_v55, %v5523_v34  ;;  %v4705_v47 = vpop.permute.xlu0 %4704  ;;  %v5528_v24 = vsel %vm5442_vm2, %v5325_v31, 0.0  ;;  %v4281_v55 = vmul.f32 0.00390625, %v4121_v17  ;;  %v4280_v31 = vmul.f32 0.00390625, %v4120_v63 }
 0x476   : > { %v4710_v58 = vpop.permute.xlu1 %4709  ;;  %v5326_v4 = vmul.f32 %v4705_v47, %v4366_v14  ;;  %5024 = vperm.xlu0 %7218, %v4270_v3   ;;  %v4375_v3 = vld [vmem:[%s9954_s2 + $0x1a8] sm:$0xff]  ;;  %v4122_v47 = vld [vmem:[#allocation2 + $0x3c0] sm:$0xff] }
 0x477   : > { %5029 = vperm.xlu1 %7219, %v4271_v12   ;;  %v5527_v35 = vadd.f32 %v5526_v22, %v5525_v19  ;;  %v5327_v7 = vmul.f32 %v4710_v58, %v4367_v43  ;;  %v4376_v43 = vld [vmem:[%s9954_s2 + $0x1b0] sm:$0xff]  ;;  %v4123_v58 = vld [vmem:[#allocation2 + $0x3c8] sm:$0xff] }
 0x478   : > { %v5530_v2 = vsel %vm5442_vm2, %v5326_v4, 0.0 }
 0x479   : > { %v5529_v11 = vadd.f32 %v5528_v24, %v5527_v35  ;;  %v4715_v26 = vpop.permute.xlu0 %4714  ;;  %v5532_v38 = vsel %vm5442_vm2, %v5327_v7, 0.0  ;;  %v4283_v24 = vmul.f32 0.00390625, %v4123_v58  ;;  %v4282_v7 = vmul.f32 0.00390625, %v4122_v47 }
 0x47a   : > { %v4720_v25 = vpop.permute.xlu1 %4719  ;;  %v5328_v42 = vmul.f32 %v4715_v26, %v4368_v53  ;;  %5034 = vperm.xlu0 %7218, %v4272_v50   ;;  %v4377_v50 = vld [vmem:[%s9954_s2 + $0x1b8] sm:$0xff]  ;;  %v4124_v26 = vld [vmem:[#allocation2 + $0x3d0] sm:$0xff] }
 0x47b   : > { %5039 = vperm.xlu1 %7219, %v4273_v23   ;;  %v5531_v48 = vadd.f32 %v5530_v2, %v5529_v11  ;;  %v5329_v49 = vmul.f32 %v4720_v25, %v4369_v30  ;;  %v4378_v30 = vld [vmem:[%s9954_s2 + $0x1c0] sm:$0xff]  ;;  %v4125_v25 = vld [vmem:[#allocation2 + $0x3d8] sm:$0xff] }
 0x47c   : > { %v5534_v54 = vsel %vm5442_vm2, %v5328_v42, 0.0 }
 0x47d   : > { %v5533_v21 = vadd.f32 %v5532_v38, %v5531_v48  ;;  %v4725_v27 = vpop.permute.xlu0 %4724  ;;  %v5536_v9 = vsel %vm5442_vm2, %v5329_v49, 0.0  ;;  %v4285_v38 = vmul.f32 0.00390625, %v4125_v25  ;;  %v4284_v49 = vmul.f32 0.00390625, %v4124_v26 }
 0x47e   : > { %v4730_v56 = vpop.permute.xlu1 %4729  ;;  %v5330_v33 = vmul.f32 %v4725_v27, %v4370_v59  ;;  %5044 = vperm.xlu0 %7218, %v4274_v0   ;;  %v4379_v0 = vld [vmem:[%s9954_s2 + $0x1c8] sm:$0xff]  ;;  %v4126_v27 = vld [vmem:[#allocation2 + $0x3e0] sm:$0xff] }
 0x47f   : > { %5049 = vperm.xlu1 %7219, %v4275_v45   ;;  %v5535_v36 = vadd.f32 %v5534_v54, %v5533_v21  ;;  %v5331_v62 = vmul.f32 %v4730_v56, %v4371_v39  ;;  %v4380_v39 = vld [vmem:[%s9954_s2 + $0x1d0] sm:$0xff]  ;;  %v4127_v56 = vld [vmem:[#allocation2 + $0x3e8] sm:$0xff] }
 0x480   : > { %v5538_v32 = vsel %vm5442_vm2, %v5330_v33, 0.0 }
 0x481   : > { %v5537_v16 = vadd.f32 %v5536_v9, %v5535_v36  ;;  %v4735_v20 = vpop.permute.xlu0 %4734  ;;  %v5540_v13 = vsel %vm5442_vm2, %v5331_v62, 0.0  ;;  %v4287_v9 = vmul.f32 0.00390625, %v4127_v56  ;;  %v4286_v62 = vmul.f32 0.00390625, %v4126_v27 }
 0x482   : > { %v4740_v46 = vpop.permute.xlu1 %4739  ;;  %v5332_v44 = vmul.f32 %v4735_v20, %v4372_v10  ;;  %5054 = vperm.xlu0 %7218, %v4276_v52   ;;  %v4381_v52 = vld [vmem:[%s9954_s2 + $0x1d8] sm:$0xff]  ;;  %v4128_v20 = vld [vmem:[#allocation2 + $0x3f0] sm:$0xff] }
 0x483   : > { %5059 = vperm.xlu1 %7219, %v4277_v61   ;;  %v5539_v6 = vadd.f32 %v5538_v32, %v5537_v16  ;;  %v5333_v37 = vmul.f32 %v4740_v46, %v4373_v28  ;;  %v4382_v28 = vld [vmem:[%s9954_s2 + $0x1e0] sm:$0xff]  ;;  %v4129_v46 = vld [vmem:[#allocation2 + $0x3f8] sm:$0xff] }
 0x484   : > { %v5542_v29 = vsel %vm5442_vm2, %v5332_v44, 0.0 }
 0x485   : > { %v5541_v12 = vadd.f32 %v5540_v13, %v5539_v6  ;;  %v4745_v14 = vpop.permute.xlu0 %4744  ;;  %v5544_v22 = vsel %vm5442_vm2, %v5333_v37, 0.0  ;;  %v4289_v13 = vmul.f32 0.00390625, %v4129_v46  ;;  %v4288_v37 = vmul.f32 0.00390625, %v4128_v20 }
 0x486   : > { %v4750_v34 = vpop.permute.xlu1 %4749  ;;  %v5334_v51 = vmul.f32 %v4745_v14, %v4374_v8  ;;  %5064 = vperm.xlu0 %7218, %v4278_v18   ;;  %v4383_v18 = vld [vmem:[%s9954_s2 + $0x1e8] sm:$0xff]  ;;  %v4130_v14 = vld [vmem:[#allocation2 + $0x400] sm:$0xff] }
 0x487   : > { %5069 = vperm.xlu1 %7219, %v4279_v60   ;;  %v5543_v19 = vadd.f32 %v5542_v29, %v5541_v12  ;;  %v5335_v4 = vmul.f32 %v4750_v34, %v4375_v3  ;;  %v4384_v3 = vld [vmem:[%s9954_s2 + $0x1f0] sm:$0xff]  ;;  %v4131_v34 = vld [vmem:[#allocation2 + $0x408] sm:$0xff] }
 0x488   : > { %v5546_v1 = vsel %vm5442_vm2, %v5334_v51, 0.0 }
 0x489   : > { %v5545_v23 = vadd.f32 %v5544_v22, %v5543_v19  ;;  %v4755_v53 = vpop.permute.xlu0 %4754  ;;  %v5548_v2 = vsel %vm5442_vm2, %v5335_v4, 0.0  ;;  %v4291_v22 = vmul.f32 0.00390625, %v4131_v34  ;;  %v4290_v4 = vmul.f32 0.00390625, %v4130_v14 }
 0x48a   : > { %v4760_v35 = vpop.permute.xlu1 %4759  ;;  %v5336_v15 = vmul.f32 %v4755_v53, %v4376_v43  ;;  %5074 = vperm.xlu0 %7218, %v4280_v31   ;;  %v4385_v31 = vld [vmem:[%s9954_s2 + $0x1f8] sm:$0xff]  ;;  %v4132_v53 = vld [vmem:[#allocation2 + $0x410] sm:$0xff] }
 0x48b   : > { %5079 = vperm.xlu1 %7219, %v4281_v55   ;;  %v5547_v11 = vadd.f32 %v5546_v1, %v5545_v23  ;;  %v5337_v42 = vmul.f32 %v4760_v35, %v4377_v50  ;;  %v4386_v50 = vld [vmem:[%s9954_s2 + $0x200] sm:$0xff]  ;;  %v4133_v35 = vld [vmem:[#allocation2 + $0x418] sm:$0xff] }
 0x48c   : > { %v5550_v5 = vsel %vm5442_vm2, %v5336_v15, 0.0 }
 0x48d   : > { %v5549_v45 = vadd.f32 %v5548_v2, %v5547_v11  ;;  %v4765_v59 = vpop.permute.xlu0 %4764  ;;  %v5552_v54 = vsel %vm5442_vm2, %v5337_v42, 0.0  ;;  %v4293_v2 = vmul.f32 0.00390625, %v4133_v35  ;;  %v4292_v42 = vmul.f32 0.00390625, %v4132_v53 }
 0x48e   : > { %v4770_v48 = vpop.permute.xlu1 %4769  ;;  %v5338_v57 = vmul.f32 %v4765_v59, %v4378_v30  ;;  %5084 = vperm.xlu0 %7218, %v4282_v7   ;;  %v4387_v7 = vld [vmem:[%s9954_s2 + $0x208] sm:$0xff]  ;;  %v4134_v59 = vld [vmem:[#allocation2 + $0x420] sm:$0xff] }
 0x48f   : > { %5089 = vperm.xlu1 %7219, %v4283_v24   ;;  %v5551_v21 = vadd.f32 %v5550_v5, %v5549_v45  ;;  %v5339_v33 = vmul.f32 %v4770_v48, %v4379_v0  ;;  %v4388_v0 = vld [vmem:[%s9954_s2 + $0x210] sm:$0xff]  ;;  %v4135_v48 = vld [vmem:[#allocation2 + $0x428] sm:$0xff] }
 0x490   : > { %v5554_v40 = vsel %vm5442_vm2, %v5338_v57, 0.0 }
 0x491   : > { %v5553_v61 = vadd.f32 %v5552_v54, %v5551_v21  ;;  %v4775_v10 = vpop.permute.xlu0 %4774  ;;  %v5556_v32 = vsel %vm5442_vm2, %v5339_v33, 0.0  ;;  %v4295_v54 = vmul.f32 0.00390625, %v4135_v48  ;;  %v4294_v33 = vmul.f32 0.00390625, %v4134_v59 }
 0x492   : > { %v4780_v36 = vpop.permute.xlu1 %4779  ;;  %v5340_v41 = vmul.f32 %v4775_v10, %v4380_v39  ;;  %5094 = vperm.xlu0 %7218, %v4284_v49   ;;  %v4389_v49 = vld [vmem:[%s9954_s2 + $0x218] sm:$0xff]  ;;  %v4136_v10 = vld [vmem:[#allocation2 + $0x430] sm:$0xff] }
 0x493   : > { %5099 = vperm.xlu1 %7219, %v4285_v38   ;;  %v5555_v16 = vadd.f32 %v5554_v40, %v5553_v61  ;;  %v5341_v44 = vmul.f32 %v4780_v36, %v4381_v52  ;;  %v4390_v52 = vld [vmem:[%s9954_s2 + $0x220] sm:$0xff]  ;;  %v4137_v36 = vld [vmem:[#allocation2 + $0x438] sm:$0xff] }
 0x494   : > { %v5558_v17 = vsel %vm5442_vm2, %v5340_v41, 0.0 }
 0x495   : > { %v5557_v60 = vadd.f32 %v5556_v32, %v5555_v16  ;;  %v4785_v8 = vpop.permute.xlu0 %4784  ;;  %v5560_v29 = vsel %vm5442_vm2, %v5341_v44, 0.0  ;;  %v4297_v32 = vmul.f32 0.00390625, %v4137_v36  ;;  %v4296_v44 = vmul.f32 0.00390625, %v4136_v10 }
 0x496   : > { %v4790_v6 = vpop.permute.xlu1 %4789  ;;  %v5342_v63 = vmul.f32 %v4785_v8, %v4382_v28  ;;  %5104 = vperm.xlu0 %7218, %v4286_v62   ;;  %v4391_v62 = vld [vmem:[%s9954_s2 + $0x228] sm:$0xff]  ;;  %v4138_v8 = vld [vmem:[#allocation2 + $0x440] sm:$0xff] }
 0x497   : > { %5109 = vperm.xlu1 %7219, %v4287_v9   ;;  %v5559_v12 = vadd.f32 %v5558_v17, %v5557_v60  ;;  %v5343_v51 = vmul.f32 %v4790_v6, %v4383_v18  ;;  %v4392_v18 = vld [vmem:[%s9954_s2 + $0x230] sm:$0xff]  ;;  %v4139_v6 = vld [vmem:[#allocation2 + $0x448] sm:$0xff] }
 0x498   : > { %v5562_v58 = vsel %vm5442_vm2, %v5342_v63, 0.0 }
 0x499   : > { %v5561_v55 = vadd.f32 %v5560_v29, %v5559_v12  ;;  %v4795_v43 = vpop.permute.xlu0 %4794  ;;  %v5564_v1 = vsel %vm5442_vm2, %v5343_v51, 0.0  ;;  %v4299_v29 = vmul.f32 0.00390625, %v4139_v6  ;;  %v4298_v51 = vmul.f32 0.00390625, %v4138_v8 }
 0x49a   : > { %v4800_v19 = vpop.permute.xlu1 %4799  ;;  %v5344_v47 = vmul.f32 %v4795_v43, %v4384_v3  ;;  %5114 = vperm.xlu0 %7218, %v4288_v37   ;;  %v4393_v37 = vld [vmem:[%s9954_s2 + $0x238] sm:$0xff]  ;;  %v4140_v43 = vld [vmem:[#allocation2 + $0x450] sm:$0xff] }
 0x49b   : > { %5119 = vperm.xlu1 %7219, %v4289_v13   ;;  %v5563_v23 = vadd.f32 %v5562_v58, %v5561_v55  ;;  %v5345_v15 = vmul.f32 %v4800_v19, %v4385_v31  ;;  %v4394_v31 = vld [vmem:[%s9954_s2 + $0x240] sm:$0xff]  ;;  %v4141_v19 = vld [vmem:[#allocation2 + $0x458] sm:$0xff] }
 0x49c   : > { %v5566_v25 = vsel %vm5442_vm2, %v5344_v47, 0.0 }
 0x49d   : > { %v5565_v24 = vadd.f32 %v5564_v1, %v5563_v23  ;;  %v4805_v30 = vpop.permute.xlu0 %4804  ;;  %v5568_v5 = vsel %vm5442_vm2, %v5345_v15, 0.0  ;;  %v4301_v1 = vmul.f32 0.00390625, %v4141_v19  ;;  %v4300_v15 = vmul.f32 0.00390625, %v4140_v43 }
 0x49e   : > { %v4810_v11 = vpop.permute.xlu1 %4809  ;;  %v5346_v26 = vmul.f32 %v4805_v30, %v4386_v50  ;;  %5124 = vperm.xlu0 %7218, %v4290_v4   ;;  %v4395_v4 = vld [vmem:[%s9954_s2 + $0x248] sm:$0xff]  ;;  %v4142_v30 = vld [vmem:[#allocation2 + $0x460] sm:$0xff] }
 0x49f   : > { %5129 = vperm.xlu1 %7219, %v4291_v22   ;;  %v5567_v45 = vadd.f32 %v5566_v25, %v5565_v24  ;;  %v5347_v57 = vmul.f32 %v4810_v11, %v4387_v7  ;;  %v4396_v7 = vld [vmem:[%s9954_s2 + $0x250] sm:$0xff]  ;;  %v4143_v11 = vld [vmem:[#allocation2 + $0x468] sm:$0xff] }
 0x4a0   : > { %v5570_v56 = vsel %vm5442_vm2, %v5346_v26, 0.0 }
 0x4a1   : > { %v5569_v38 = vadd.f32 %v5568_v5, %v5567_v45  ;;  %v4815_v39 = vpop.permute.xlu0 %4814  ;;  %v5572_v40 = vsel %vm5442_vm2, %v5347_v57, 0.0  ;;  %v4303_v5 = vmul.f32 0.00390625, %v4143_v11  ;;  %v4302_v57 = vmul.f32 0.00390625, %v4142_v30 }
 0x4a2   : > { %v4820_v21 = vpop.permute.xlu1 %4819  ;;  %v5348_v27 = vmul.f32 %v4815_v39, %v4388_v0  ;;  %5134 = vperm.xlu0 %7218, %v4292_v42   ;;  %v4397_v42 = vld [vmem:[%s9954_s2 + $0x258] sm:$0xff]  ;;  %v4144_v39 = vld [vmem:[#allocation2 + $0x470] sm:$0xff] }
 0x4a3   : > { %5139 = vperm.xlu1 %7219, %v4293_v2   ;;  %v5571_v61 = vadd.f32 %v5570_v56, %v5569_v38  ;;  %v5349_v41 = vmul.f32 %v4820_v21, %v4389_v49  ;;  %v4398_v49 = vld [vmem:[%s9954_s2 + $0x260] sm:$0xff]  ;;  %v4145_v21 = vld [vmem:[#allocation2 + $0x478] sm:$0xff] }
 0x4a4   : > { %v5574_v46 = vsel %vm5442_vm2, %v5348_v27, 0.0 }
 0x4a5   : > { %v5573_v9 = vadd.f32 %v5572_v40, %v5571_v61  ;;  %v4825_v28 = vpop.permute.xlu0 %4824  ;;  %v5576_v17 = vsel %vm5442_vm2, %v5349_v41, 0.0  ;;  %v4305_v40 = vmul.f32 0.00390625, %v4145_v21  ;;  %v4304_v41 = vmul.f32 0.00390625, %v4144_v39 }
 0x4a6   : > { %v4830_v16 = vpop.permute.xlu1 %4829  ;;  %v5350_v20 = vmul.f32 %v4825_v28, %v4390_v52  ;;  %5144 = vperm.xlu0 %7218, %v4294_v33   ;;  %v4399_v33 = vld [vmem:[%s9954_s2 + $0x268] sm:$0xff]  ;;  %v4146_v28 = vld [vmem:[#allocation2 + $0x480] sm:$0xff] }
 0x4a7   : > { %5149 = vperm.xlu1 %7219, %v4295_v54   ;;  %v5575_v60 = vadd.f32 %v5574_v46, %v5573_v9  ;;  %v5351_v63 = vmul.f32 %v4830_v16, %v4391_v62  ;;  %v4400_v62 = vld [vmem:[%s9954_s2 + $0x270] sm:$0xff]  ;;  %v4147_v16 = vld [vmem:[#allocation2 + $0x488] sm:$0xff] }
 0x4a8   : > { %v5578_v34 = vsel %vm5442_vm2, %v5350_v20, 0.0 }
 0x4a9   : > { %v5577_v13 = vadd.f32 %v5576_v17, %v5575_v60  ;;  %v4835_v3 = vpop.permute.xlu0 %4834  ;;  %v5580_v58 = vsel %vm5442_vm2, %v5351_v63, 0.0  ;;  %v4307_v17 = vmul.f32 0.00390625, %v4147_v16  ;;  %v4306_v63 = vmul.f32 0.00390625, %v4146_v28 }
 0x4aa   : > { %v4840_v12 = vpop.permute.xlu1 %4839  ;;  %v5352_v14 = vmul.f32 %v4835_v3, %v4392_v18  ;;  %5154 = vperm.xlu0 %7218, %v4296_v44   ;;  %v4401_v44 = vld [vmem:[%s9954_s2 + $0x278] sm:$0xff]  ;;  %v4148_v3 = vld [vmem:[#allocation2 + $0x490] sm:$0xff] }
 0x4ab   : > { %5159 = vperm.xlu1 %7219, %v4297_v32   ;;  %v5579_v55 = vadd.f32 %v5578_v34, %v5577_v13  ;;  %v5353_v47 = vmul.f32 %v4840_v12, %v4393_v37  ;;  %v4402_v37 = vld [vmem:[%s9954_s2 + $0x280] sm:$0xff]  ;;  %v4149_v12 = vld [vmem:[#allocation2 + $0x498] sm:$0xff] }
 0x4ac   : > { %v5582_v35 = vsel %vm5442_vm2, %v5352_v14, 0.0 }
 0x4ad   : > { %v5581_v22 = vadd.f32 %v5580_v58, %v5579_v55  ;;  %v4845_v50 = vpop.permute.xlu0 %4844  ;;  %v5584_v25 = vsel %vm5442_vm2, %v5353_v47, 0.0  ;;  %v4309_v58 = vmul.f32 0.00390625, %v4149_v12  ;;  %v4308_v47 = vmul.f32 0.00390625, %v4148_v3 }
 0x4ae   : > { %v4850_v23 = vpop.permute.xlu1 %4849  ;;  %v5354_v53 = vmul.f32 %v4845_v50, %v4394_v31  ;;  %5164 = vperm.xlu0 %7218, %v4298_v51   ;;  %v4403_v51 = vld [vmem:[%s9954_s2 + $0x288] sm:$0xff]  ;;  %v4150_v50 = vld [vmem:[#allocation2 + $0x4a0] sm:$0xff] }
 0x4af   : > { %5169 = vperm.xlu1 %7219, %v4299_v29   ;;  %v5583_v24 = vadd.f32 %v5582_v35, %v5581_v22  ;;  %v5355_v26 = vmul.f32 %v4850_v23, %v4395_v4  ;;  %v4404_v4 = vld [vmem:[%s9954_s2 + $0x290] sm:$0xff]  ;;  %v4151_v23 = vld [vmem:[#allocation2 + $0x4a8] sm:$0xff] }
 0x4b0   : > { %v5586_v48 = vsel %vm5442_vm2, %v5354_v53, 0.0 }
 0x4b1   : > { %v5585_v2 = vadd.f32 %v5584_v25, %v5583_v24  ;;  %v4855_v0 = vpop.permute.xlu0 %4854  ;;  %v5588_v56 = vsel %vm5442_vm2, %v5355_v26, 0.0  ;;  %v4311_v25 = vmul.f32 0.00390625, %v4151_v23  ;;  %v4310_v26 = vmul.f32 0.00390625, %v4150_v50 }
 0x4b2   : > { %v4860_v45 = vpop.permute.xlu1 %4859  ;;  %v5356_v59 = vmul.f32 %v4855_v0, %v4396_v7  ;;  %5174 = vperm.xlu0 %7218, %v4300_v15   ;;  %v4405_v15 = vld [vmem:[%s9954_s2 + $0x298] sm:$0xff]  ;;  %v4152_v0 = vld [vmem:[#allocation2 + $0x4b0] sm:$0xff] }
 0x4b3   : > { %5179 = vperm.xlu1 %7219, %v4301_v1   ;;  %v5587_v38 = vadd.f32 %v5586_v48, %v5585_v2  ;;  %v5357_v27 = vmul.f32 %v4860_v45, %v4397_v42  ;;  %v4406_v42 = vld [vmem:[%s9954_s2 + $0x2a0] sm:$0xff]  ;;  %v4153_v45 = vld [vmem:[#allocation2 + $0x4b8] sm:$0xff] }
 0x4b4   : > { %v5590_v36 = vsel %vm5442_vm2, %v5356_v59, 0.0 }
 0x4b5   : > { %v5589_v54 = vadd.f32 %v5588_v56, %v5587_v38  ;;  %v4865_v52 = vpop.permute.xlu0 %4864  ;;  %v5592_v46 = vsel %vm5442_vm2, %v5357_v27, 0.0  ;;  %v4313_v56 = vmul.f32 0.00390625, %v4153_v45  ;;  %v4312_v27 = vmul.f32 0.00390625, %v4152_v0 }
 0x4b6   : > { %v4870_v61 = vpop.permute.xlu1 %4869  ;;  %v5358_v10 = vmul.f32 %v4865_v52, %v4398_v49  ;;  %5184 = vperm.xlu0 %7218, %v4302_v57   ;;  %v4407_v57 = vld [vmem:[%s9954_s2 + $0x2a8] sm:$0xff]  ;;  %v4154_v52 = vld [vmem:[#allocation2 + $0x4c0] sm:$0xff] }
 0x4b7   : > { %5189 = vperm.xlu1 %7219, %v4303_v5   ;;  %v5591_v9 = vadd.f32 %v5590_v36, %v5589_v54  ;;  %v5359_v20 = vmul.f32 %v4870_v61, %v4399_v33  ;;  %v4408_v33 = vld [vmem:[%s9954_s2 + $0x2b0] sm:$0xff]  ;;  %v4155_v61 = vld [vmem:[#allocation2 + $0x4c8] sm:$0xff] }
 0x4b8   : > { %v5594_v6 = vsel %vm5442_vm2, %v5358_v10, 0.0 }
 0x4b9   : > { %v5593_v32 = vadd.f32 %v5592_v46, %v5591_v9  ;;  %v4875_v18 = vpop.permute.xlu0 %4874  ;;  %v5596_v34 = vsel %vm5442_vm2, %v5359_v20, 0.0  ;;  %v4315_v46 = vmul.f32 0.00390625, %v4155_v61  ;;  %v4314_v20 = vmul.f32 0.00390625, %v4154_v52  ;;  %v4418_v52 = vld [vmem:[%s9954_s2 + $0x300] sm:$0xff] }
 0x4ba   : > { %v4880_v60 = vpop.permute.xlu1 %4879  ;;  %v5360_v8 = vmul.f32 %v4875_v18, %v4400_v62  ;;  %5194 = vperm.xlu0 %7218, %v4304_v41   ;;  %v4409_v41 = vld [vmem:[%s9954_s2 + $0x2b8] sm:$0xff]  ;;  %v4156_v18 = vld [vmem:[#allocation2 + $0x4d0] sm:$0xff] }
 0x4bb   : > { %5199 = vperm.xlu1 %7219, %v4305_v40   ;;  %v5595_v13 = vadd.f32 %v5594_v6, %v5593_v32  ;;  %v5361_v14 = vmul.f32 %v4880_v60, %v4401_v44  ;;  %v4410_v44 = vld [vmem:[%s9954_s2 + $0x2c0] sm:$0xff]  ;;  %v4157_v60 = vld [vmem:[#allocation2 + $0x4d8] sm:$0xff] }
 0x4bc   : > { %v5598_v19 = vsel %vm5442_vm2, %v5360_v8, 0.0 }
 0x4bd   : > { %v5597_v29 = vadd.f32 %v5596_v34, %v5595_v13  ;;  %v4885_v31 = vpop.permute.xlu0 %4884  ;;  %v5600_v35 = vsel %vm5442_vm2, %v5361_v14, 0.0  ;;  %v4317_v34 = vmul.f32 0.00390625, %v4157_v60  ;;  %v4316_v14 = vmul.f32 0.00390625, %v4156_v18  ;;  %v4421_v18 = vld [vmem:[%s9954_s2 + $0x318] sm:$0xff] }
 0x4be   : > { %v4890_v55 = vpop.permute.xlu1 %4889  ;;  %v5362_v43 = vmul.f32 %v4885_v31, %v4402_v37  ;;  %5204 = vperm.xlu0 %7218, %v4306_v63   ;;  %v4411_v63 = vld [vmem:[%s9954_s2 + $0x2c8] sm:$0xff]  ;;  %v4158_v31 = vld [vmem:[#allocation2 + $0x4e0] sm:$0xff] }
 0x4bf   : > { %5209 = vperm.xlu1 %7219, %v4307_v17   ;;  %v5599_v22 = vadd.f32 %v5598_v19, %v5597_v29  ;;  %v5363_v53 = vmul.f32 %v4890_v55, %v4403_v51  ;;  %v4412_v51 = vld [vmem:[%s9954_s2 + $0x2d0] sm:$0xff]  ;;  %v4159_v55 = vld [vmem:[#allocation2 + $0x4e8] sm:$0xff] }
 0x4c0   : > { %v5602_v11 = vsel %vm5442_vm2, %v5362_v43, 0.0 }
 0x4c1   : > { %v5601_v1 = vadd.f32 %v5600_v35, %v5599_v22  ;;  %v4895_v7 = vpop.permute.xlu0 %4894  ;;  %v5604_v48 = vsel %vm5442_vm2, %v5363_v53, 0.0  ;;  %v4319_v35 = vmul.f32 0.00390625, %v4159_v55  ;;  %v4318_v53 = vmul.f32 0.00390625, %v4158_v31 }
 0x4c2   : > { %v4900_v24 = vpop.permute.xlu1 %4899  ;;  %v5364_v30 = vmul.f32 %v4895_v7, %v4404_v4  ;;  %5214 = vperm.xlu0 %7218, %v4308_v47   ;;  %v4413_v47 = vld [vmem:[%s9954_s2 + $0x2d8] sm:$0xff]  ;;  %v4160_v7 = vld [vmem:[#allocation2 + $0x4f0] sm:$0xff] }
 0x4c3   : > { %5219 = vperm.xlu1 %7219, %v4309_v58   ;;  %v5603_v2 = vadd.f32 %v5602_v11, %v5601_v1  ;;  %v5365_v59 = vmul.f32 %v4900_v24, %v4405_v15  ;;  %v4414_v15 = vld [vmem:[%s9954_s2 + $0x2e0] sm:$0xff]  ;;  %v4161_v24 = vld [vmem:[#allocation2 + $0x4f8] sm:$0xff] }
 0x4c4   : > { %v5606_v21 = vsel %vm5442_vm2, %v5364_v30, 0.0 }
 0x4c5   : > { %v5605_v5 = vadd.f32 %v5604_v48, %v5603_v2  ;;  %v4905_v49 = vpop.permute.xlu0 %4904  ;;  %v5608_v36 = vsel %vm5442_vm2, %v5365_v59, 0.0  ;;  %v4321_v48 = vmul.f32 0.00390625, %v4161_v24  ;;  %v4320_v59 = vmul.f32 0.00390625, %v4160_v7 }
 0x4c6   : > { %v4910_v38 = vpop.permute.xlu1 %4909  ;;  %v5366_v39 = vmul.f32 %v4905_v49, %v4406_v42  ;;  %5224 = vperm.xlu0 %7218, %v4310_v26   ;;  %v4415_v26 = vld [vmem:[%s9954_s2 + $0x2e8] sm:$0xff] }
 0x4c7   : > { %5229 = vperm.xlu1 %7219, %v4311_v25   ;;  %v5607_v54 = vadd.f32 %v5606_v21, %v5605_v5  ;;  %v5367_v10 = vmul.f32 %v4910_v38, %v4407_v57  ;;  %v4416_v57 = vld [vmem:[%s9954_s2 + $0x2f0] sm:$0xff] }
 0x4c8   : > { %v5610_v16 = vsel %vm5442_vm2, %v5366_v39, 0.0  ;;  %v4417_v39 = vld [vmem:[%s9954_s2 + $0x2f8] sm:$0xff] }
 0x4c9   : > { %v5609_v40 = vadd.f32 %v5608_v36, %v5607_v54  ;;  %v4915_v62 = vpop.permute.xlu0 %4914  ;;  %v5612_v6 = vsel %vm5442_vm2, %v5367_v10, 0.0 }
 0x4ca   : > { %v4920_v9 = vpop.permute.xlu1 %4919  ;;  %v5368_v28 = vmul.f32 %v4915_v62, %v4408_v33  ;;  %5234 = vperm.xlu0 %7218, %v4312_v27  }
 0x4cb   : > { %5239 = vperm.xlu1 %7219, %v4313_v56   ;;  %v5611_v32 = vadd.f32 %v5610_v16, %v5609_v40  ;;  %v5369_v8 = vmul.f32 %v4920_v9, %v4409_v41  ;;  %v4419_v41 = vld [vmem:[%s9954_s2 + $0x308] sm:$0xff] }
 0x4cc   : > { %v5614_v12 = vsel %vm5442_vm2, %v5368_v28, 0.0 }
 0x4cd   : > { %v5613_v17 = vadd.f32 %v5612_v6, %v5611_v32  ;;  %v4925_v37 = vpop.permute.xlu0 %4924  ;;  %v5616_v19 = vsel %vm5442_vm2, %v5369_v8, 0.0 }
 0x4ce   : > { %v4930_v13 = vpop.permute.xlu1 %4929  ;;  %v5370_v3 = vmul.f32 %v4925_v37, %v4410_v44  ;;  %5244 = vperm.xlu0 %7218, %v4314_v20   ;;  %v4420_v20 = vld [vmem:[%s9954_s2 + $0x310] sm:$0xff]  ;;  %v4422_v37 = vld [vmem:[%s9954_s2 + $0x320] sm:$0xff] }
 0x4cf   : > { %5249 = vperm.xlu1 %7219, %v4315_v46   ;;  %v5615_v29 = vadd.f32 %v5614_v12, %v5613_v17  ;;  %v5371_v43 = vmul.f32 %v4930_v13, %v4411_v63 }
 0x4d0   : > { %v5618_v23 = vsel %vm5442_vm2, %v5370_v3, 0.0 }
 0x4d1   : > { %v5617_v58 = vadd.f32 %v5616_v19, %v5615_v29  ;;  %v4935_v4 = vpop.permute.xlu0 %4934  ;;  %v5620_v11 = vsel %vm5442_vm2, %v5371_v43, 0.0  ;;  %v4424_v43 = vld [vmem:[%s9954_s2 + $0x330] sm:$0xff] }
 0x4d2   : > { %v4940_v22 = vpop.permute.xlu1 %4939  ;;  %v5372_v50 = vmul.f32 %v4935_v4, %v4412_v51  ;;  %5254 = vperm.xlu0 %7218, %v4316_v14   ;;  %v4423_v14 = vld [vmem:[%s9954_s2 + $0x328] sm:$0xff]  ;;  %v4425_v4 = vld [vmem:[%s9954_s2 + $0x338] sm:$0xff] }
 0x4d3   : > { %5259 = vperm.xlu1 %7219, %v4317_v34   ;;  %v5619_v1 = vadd.f32 %v5618_v23, %v5617_v58  ;;  %v5373_v30 = vmul.f32 %v4940_v22, %v4413_v47 }
 0x4d4   : > { %v5622_v45 = vsel %vm5442_vm2, %v5372_v50, 0.0 }
 0x4d5   : > { %v5621_v25 = vadd.f32 %v5620_v11, %v5619_v1  ;;  %v4945_v42 = vpop.permute.xlu0 %4944  ;;  %v5624_v38 = vsel %vm5442_vm2, %v5373_v30, 0.0  ;;  %v4427_v30 = vld [vmem:[%s9954_s2 + $0x348] sm:$0xff] }
 0x4d6   : > { %v4950_v2 = vpop.permute.xlu1 %4949  ;;  %v5374_v0 = vmul.f32 %v4945_v42, %v4414_v15  ;;  %5264 = vperm.xlu0 %7218, %v4318_v53   ;;  %v4426_v15 = vld [vmem:[%s9954_s2 + $0x340] sm:$0xff] }
 0x4d7   : > { %5269 = vperm.xlu1 %7219, %v4319_v35   ;;  %v5623_v5 = vadd.f32 %v5622_v45, %v5621_v25  ;;  %v5375_v49 = vmul.f32 %v4950_v2, %v4415_v26 }
 0x4d8   : > { %v5626_v54 = vsel %vm5442_vm2, %v5374_v0, 0.0  ;;  %v4428_v0 = vld [vmem:[%s9954_s2 + $0x350] sm:$0xff] }
 0x4d9   : > { %v5625_v21 = vadd.f32 %v5624_v38, %v5623_v5  ;;  %v4955_v27 = vpop.permute.xlu0 %4954  ;;  %v5628_v36 = vsel %vm5442_vm2, %v5375_v49, 0.0 }
 0x4da   : > { %v4960_v56 = vpop.permute.xlu1 %4959  ;;  %v5376_v33 = vmul.f32 %v4955_v27, %v4416_v57  ;;  %5274 = vperm.xlu0 %7218, %v4320_v59   ;;  %v4429_v57 = vld [vmem:[%s9954_s2 + $0x358] sm:$0xff]  ;;  %v4430_v27 = vld [vmem:[%s9954_s2 + $0x360] sm:$0xff] }
 0x4db   : > { %5279 = vperm.xlu1 %7219, %v4321_v48   ;;  %v5627_v61 = vadd.f32 %v5626_v54, %v5625_v21  ;;  %v5377_v10 = vmul.f32 %v4960_v56, %v4417_v39 }
 0x4dc   : > { %v5630_v16 = vsel %vm5442_vm2, %v5376_v33, 0.0 }
 0x4dd   : > { %v5629_v40 = vadd.f32 %v5628_v36, %v5627_v61  ;;  %v4965_v62 = vpop.permute.xlu0 %4964  ;;  %v5632_v32 = vsel %vm5442_vm2, %v5377_v10, 0.0 }
 0x4de   : > { %v4970_v9 = vpop.permute.xlu1 %4969  ;;  %v5378_v28 = vmul.f32 %v4965_v62, %v4418_v52  ;;  %v4431_v52 = vld [vmem:[%s9954_s2 + $0x368] sm:$0xff]  ;;  %v4432_v62 = vld [vmem:[%s9954_s2 + $0x370] sm:$0xff] }
 0x4df   : > { %v5631_v46 = vadd.f32 %v5630_v16, %v5629_v40  ;;  %v5379_v44 = vmul.f32 %v4970_v9, %v4419_v41 }
 0x4e0   : > { %v5634_v17 = vsel %vm5442_vm2, %v5378_v28, 0.0 }
 0x4e1   : > { %v5633_v60 = vadd.f32 %v5632_v32, %v5631_v46  ;;  %v4975_v8 = vpop.permute.xlu0 %4974  ;;  %v5636_v12 = vsel %vm5442_vm2, %v5379_v44, 0.0 }
 0x4e2   : > { %v4980_v6 = vpop.permute.xlu1 %4979  ;;  %v5380_v63 = vmul.f32 %v4975_v8, %v4420_v20  ;;  %v4433_v20 = vld [vmem:[%s9954_s2 + $0x378] sm:$0xff]  ;;  %v4434_v8 = vld [vmem:[%s9954_s2 + $0x380] sm:$0xff] }
 0x4e3   : > { %v5635_v13 = vadd.f32 %v5634_v17, %v5633_v60  ;;  %v5381_v3 = vmul.f32 %v4980_v6, %v4421_v18 }
 0x4e4   : > { %v5638_v55 = vsel %vm5442_vm2, %v5380_v63, 0.0 }
 0x4e5   : > { %v5637_v34 = vadd.f32 %v5636_v12, %v5635_v13  ;;  %v4985_v51 = vpop.permute.xlu0 %4984  ;;  %v5640_v58 = vsel %vm5442_vm2, %v5381_v3, 0.0 }
 0x4e6   : > { %v4990_v29 = vpop.permute.xlu1 %4989  ;;  %v5382_v31 = vmul.f32 %v4985_v51, %v4422_v37  ;;  %v4435_v37 = vld [vmem:[%s9954_s2 + $0x388] sm:$0xff]  ;;  %v4436_v51 = vld [vmem:[%s9954_s2 + $0x390] sm:$0xff] }
 0x4e7   : > { %v5639_v19 = vadd.f32 %v5638_v55, %v5637_v34  ;;  %v5383_v47 = vmul.f32 %v4990_v29, %v4423_v14 }
 0x4e8   : > { %v5642_v35 = vsel %vm5442_vm2, %v5382_v31, 0.0 }
 0x4e9   : > { %v5641_v22 = vadd.f32 %v5640_v58, %v5639_v19  ;;  %v4995_v50 = vpop.permute.xlu0 %4994  ;;  %v5644_v24 = vsel %vm5442_vm2, %v5383_v47, 0.0 }
 0x4ea   : > { %v5000_v23 = vpop.permute.xlu1 %4999  ;;  %v5384_v53 = vmul.f32 %v4995_v50, %v4424_v43  ;;  %v4437_v43 = vld [vmem:[%s9954_s2 + $0x398] sm:$0xff]  ;;  %v4438_v50 = vld [vmem:[%s9954_s2 + $0x3a0] sm:$0xff] }
 0x4eb   : > { %v5643_v1 = vadd.f32 %v5642_v35, %v5641_v22  ;;  %v5385_v7 = vmul.f32 %v5000_v23, %v4425_v4 }
 0x4ec   : > { %v5646_v2 = vsel %vm5442_vm2, %v5384_v53, 0.0 }
 0x4ed   : > { %v5645_v11 = vadd.f32 %v5644_v24, %v5643_v1  ;;  %v5005_v26 = vpop.permute.xlu0 %5004  ;;  %v5648_v48 = vsel %vm5442_vm2, %v5385_v7, 0.0 }
 0x4ee   : > { %v5010_v25 = vpop.permute.xlu1 %5009  ;;  %v5386_v42 = vmul.f32 %v5005_v26, %v4426_v15  ;;  %v4439_v15 = vld [vmem:[%s9954_s2 + $0x3a8] sm:$0xff]  ;;  %v4440_v26 = vld [vmem:[%s9954_s2 + $0x3b0] sm:$0xff] }
 0x4ef   : > { %v5647_v45 = vadd.f32 %v5646_v2, %v5645_v11  ;;  %v5387_v59 = vmul.f32 %v5010_v25, %v4427_v30 }
 0x4f0   : > { %v5650_v21 = vsel %vm5442_vm2, %v5386_v42, 0.0 }
 0x4f1   : > { %v5649_v5 = vadd.f32 %v5648_v48, %v5647_v45  ;;  %v5015_v49 = vpop.permute.xlu0 %5014  ;;  %v5652_v54 = vsel %vm5442_vm2, %v5387_v59, 0.0 }
 0x4f2   : > { %v5020_v38 = vpop.permute.xlu1 %5019  ;;  %v5388_v39 = vmul.f32 %v5015_v49, %v4428_v0  ;;  %v4441_v0 = vld [vmem:[%s9954_s2 + $0x3b8] sm:$0xff]  ;;  %v4442_v49 = vld [vmem:[%s9954_s2 + $0x3c0] sm:$0xff] }
 0x4f3   : > { %v5651_v56 = vadd.f32 %v5650_v21, %v5649_v5  ;;  %v5389_v33 = vmul.f32 %v5020_v38, %v4429_v57 }
 0x4f4   : > { %v5654_v40 = vsel %vm5442_vm2, %v5388_v39, 0.0 }
 0x4f5   : > { %v5653_v61 = vadd.f32 %v5652_v54, %v5651_v56  ;;  %v5025_v10 = vpop.permute.xlu0 %5024  ;;  %v5656_v16 = vsel %vm5442_vm2, %v5389_v33, 0.0 }
 0x4f6   : > { %v5030_v36 = vpop.permute.xlu1 %5029  ;;  %v5390_v41 = vmul.f32 %v5025_v10, %v4430_v27  ;;  %v4443_v27 = vld [vmem:[%s9954_s2 + $0x3c8] sm:$0xff]  ;;  %v4444_v10 = vld [vmem:[%s9954_s2 + $0x3d0] sm:$0xff] }
 0x4f7   : > { %v5655_v9 = vadd.f32 %v5654_v40, %v5653_v61  ;;  %v5391_v28 = vmul.f32 %v5030_v36, %v4431_v52 }
 0x4f8   : > { %v5658_v60 = vsel %vm5442_vm2, %v5390_v41, 0.0 }
 0x4f9   : > { %v5657_v46 = vadd.f32 %v5656_v16, %v5655_v9  ;;  %v5035_v44 = vpop.permute.xlu0 %5034  ;;  %v5660_v17 = vsel %vm5442_vm2, %v5391_v28, 0.0 }
 0x4fa   : > { %v5040_v32 = vpop.permute.xlu1 %5039  ;;  %v5392_v18 = vmul.f32 %v5035_v44, %v4432_v62  ;;  %v4445_v62 = vld [vmem:[%s9954_s2 + $0x3d8] sm:$0xff]  ;;  %v4446_v44 = vld [vmem:[%s9954_s2 + $0x3e0] sm:$0xff] }
 0x4fb   : > { %v5659_v6 = vadd.f32 %v5658_v60, %v5657_v46  ;;  %v5393_v63 = vmul.f32 %v5040_v32, %v4433_v20 }
 0x4fc   : > { %v5662_v34 = vsel %vm5442_vm2, %v5392_v18, 0.0 }
 0x4fd   : > { %v5661_v13 = vadd.f32 %v5660_v17, %v5659_v6  ;;  %v5045_v3 = vpop.permute.xlu0 %5044  ;;  %v5664_v55 = vsel %vm5442_vm2, %v5393_v63, 0.0 }
 0x4fe   : > { %v5050_v12 = vpop.permute.xlu1 %5049  ;;  %v5394_v14 = vmul.f32 %v5045_v3, %v4434_v8  ;;  %v4447_v8 = vld [vmem:[%s9954_s2 + $0x3e8] sm:$0xff]  ;;  %v4448_v3 = vld [vmem:[%s9954_s2 + $0x3f0] sm:$0xff] }
 0x4ff   : > { %v5663_v29 = vadd.f32 %v5662_v34, %v5661_v13  ;;  %v5395_v31 = vmul.f32 %v5050_v12, %v4435_v37 }
 0x500   : > { %v5666_v22 = vsel %vm5442_vm2, %v5394_v14, 0.0 }
 0x501   : > { %v5665_v19 = vadd.f32 %v5664_v55, %v5663_v29  ;;  %v5055_v47 = vpop.permute.xlu0 %5054  ;;  %v5668_v35 = vsel %vm5442_vm2, %v5395_v31, 0.0 }
 0x502   : > { %v5060_v58 = vpop.permute.xlu1 %5059  ;;  %v5396_v4 = vmul.f32 %v5055_v47, %v4436_v51  ;;  %v4449_v51 = vld [vmem:[%s9954_s2 + $0x3f8] sm:$0xff]  ;;  %v4450_v47 = vld [vmem:[%s9954_s2 + $0x400] sm:$0xff] }
 0x503   : > { %v5667_v23 = vadd.f32 %v5666_v22, %v5665_v19  ;;  %v5397_v53 = vmul.f32 %v5060_v58, %v4437_v43 }
 0x504   : > { %v5670_v11 = vsel %vm5442_vm2, %v5396_v4, 0.0 }
 0x505   : > { %v5669_v1 = vadd.f32 %v5668_v35, %v5667_v23  ;;  %v5065_v7 = vpop.permute.xlu0 %5064  ;;  %v5672_v2 = vsel %vm5442_vm2, %v5397_v53, 0.0 }
 0x506   : > { %v5070_v24 = vpop.permute.xlu1 %5069  ;;  %v5398_v30 = vmul.f32 %v5065_v7, %v4438_v50  ;;  %v4451_v50 = vld [vmem:[%s9954_s2 + $0x408] sm:$0xff]  ;;  %v4452_v7 = vld [vmem:[%s9954_s2 + $0x410] sm:$0xff] }
 0x507   : > { %v5671_v25 = vadd.f32 %v5670_v11, %v5669_v1  ;;  %v5399_v42 = vmul.f32 %v5070_v24, %v4439_v15 }
 0x508   : > { %v5674_v5 = vsel %vm5442_vm2, %v5398_v30, 0.0 }
 0x509   : > { %v5673_v45 = vadd.f32 %v5672_v2, %v5671_v25  ;;  %v5075_v59 = vpop.permute.xlu0 %5074  ;;  %v5676_v21 = vsel %vm5442_vm2, %v5399_v42, 0.0 }
 0x50a   : > { %v5080_v48 = vpop.permute.xlu1 %5079  ;;  %v5400_v57 = vmul.f32 %v5075_v59, %v4440_v26  ;;  %v4453_v26 = vld [vmem:[%s9954_s2 + $0x418] sm:$0xff]  ;;  %v4454_v59 = vld [vmem:[%s9954_s2 + $0x420] sm:$0xff] }
 0x50b   : > { %v5675_v38 = vadd.f32 %v5674_v5, %v5673_v45  ;;  %v5401_v39 = vmul.f32 %v5080_v48, %v4441_v0 }
 0x50c   : > { %v5678_v61 = vsel %vm5442_vm2, %v5400_v57, 0.0 }
 0x50d   : > { %v5677_v56 = vadd.f32 %v5676_v21, %v5675_v38  ;;  %v5085_v33 = vpop.permute.xlu0 %5084  ;;  %v5680_v40 = vsel %vm5442_vm2, %v5401_v39, 0.0 }
 0x50e   : > { %v5090_v54 = vpop.permute.xlu1 %5089  ;;  %v5402_v52 = vmul.f32 %v5085_v33, %v4442_v49  ;;  %v4455_v49 = vld [vmem:[%s9954_s2 + $0x428] sm:$0xff]  ;;  %v4456_v33 = vld [vmem:[%s9954_s2 + $0x430] sm:$0xff] }
 0x50f   : > { %v5679_v36 = vadd.f32 %v5678_v61, %v5677_v56  ;;  %v5403_v41 = vmul.f32 %v5090_v54, %v4443_v27 }
 0x510   : > { %v5682_v46 = vsel %vm5442_vm2, %v5402_v52, 0.0 }
 0x511   : > { %v5681_v9 = vadd.f32 %v5680_v40, %v5679_v36  ;;  %v5095_v28 = vpop.permute.xlu0 %5094  ;;  %v5684_v60 = vsel %vm5442_vm2, %v5403_v41, 0.0 }
 0x512   : > { %v5100_v16 = vpop.permute.xlu1 %5099  ;;  %v5404_v20 = vmul.f32 %v5095_v28, %v4444_v10  ;;  %v4457_v10 = vld [vmem:[%s9954_s2 + $0x438] sm:$0xff]  ;;  %v4458_v28 = vld [vmem:[%s9954_s2 + $0x440] sm:$0xff] }
 0x513   : > { %v5683_v32 = vadd.f32 %v5682_v46, %v5681_v9  ;;  %v5405_v18 = vmul.f32 %v5100_v16, %v4445_v62 }
 0x514   : > { %v5686_v13 = vsel %vm5442_vm2, %v5404_v20, 0.0 }
 0x515   : > { %v5685_v6 = vadd.f32 %v5684_v60, %v5683_v32  ;;  %v5105_v63 = vpop.permute.xlu0 %5104  ;;  %v5688_v34 = vsel %vm5442_vm2, %v5405_v18, 0.0 }
 0x516   : > { %v5110_v17 = vpop.permute.xlu1 %5109  ;;  %v5406_v37 = vmul.f32 %v5105_v63, %v4446_v44  ;;  %v4459_v44 = vld [vmem:[%s9954_s2 + $0x448] sm:$0xff]  ;;  %v4460_v63 = vld [vmem:[%s9954_s2 + $0x450] sm:$0xff] }
 0x517   : > { %v5687_v12 = vadd.f32 %v5686_v13, %v5685_v6  ;;  %v5407_v14 = vmul.f32 %v5110_v17, %v4447_v8 }
 0x518   : > { %v5690_v19 = vsel %vm5442_vm2, %v5406_v37, 0.0 }
 0x519   : > { %v5689_v29 = vadd.f32 %v5688_v34, %v5687_v12  ;;  %v5115_v31 = vpop.permute.xlu0 %5114  ;;  %v5692_v22 = vsel %vm5442_vm2, %v5407_v14, 0.0 }
 0x51a   : > { %v5120_v55 = vpop.permute.xlu1 %5119  ;;  %v5408_v43 = vmul.f32 %v5115_v31, %v4448_v3  ;;  %v4461_v3 = vld [vmem:[%s9954_s2 + $0x458] sm:$0xff]  ;;  %v4462_v31 = vld [vmem:[%s9954_s2 + $0x460] sm:$0xff] }
 0x51b   : > { %v5691_v58 = vadd.f32 %v5690_v19, %v5689_v29  ;;  %v5409_v4 = vmul.f32 %v5120_v55, %v4449_v51 }
 0x51c   : > { %v5694_v1 = vsel %vm5442_vm2, %v5408_v43, 0.0 }
 0x51d   : > { %v5693_v23 = vadd.f32 %v5692_v22, %v5691_v58  ;;  %v5125_v53 = vpop.permute.xlu0 %5124  ;;  %v5696_v11 = vsel %vm5442_vm2, %v5409_v4, 0.0 }
 0x51e   : > { %v5130_v35 = vpop.permute.xlu1 %5129  ;;  %v5410_v15 = vmul.f32 %v5125_v53, %v4450_v47  ;;  %v4463_v47 = vld [vmem:[%s9954_s2 + $0x468] sm:$0xff]  ;;  %v4464_v53 = vld [vmem:[%s9954_s2 + $0x470] sm:$0xff] }
 0x51f   : > { %v5695_v24 = vadd.f32 %v5694_v1, %v5693_v23  ;;  %v5411_v30 = vmul.f32 %v5130_v35, %v4451_v50 }
 0x520   : > { %v5698_v45 = vsel %vm5442_vm2, %v5410_v15, 0.0 }
 0x521   : > { %v5697_v25 = vadd.f32 %v5696_v11, %v5695_v24  ;;  %v5135_v42 = vpop.permute.xlu0 %5134  ;;  %v5700_v5 = vsel %vm5442_vm2, %v5411_v30, 0.0 }
 0x522   : > { %v5140_v2 = vpop.permute.xlu1 %5139  ;;  %v5412_v0 = vmul.f32 %v5135_v42, %v4452_v7  ;;  %v4465_v7 = vld [vmem:[%s9954_s2 + $0x478] sm:$0xff]  ;;  %v4466_v42 = vld [vmem:[%s9954_s2 + $0x480] sm:$0xff] }
 0x523   : > { %v5699_v48 = vadd.f32 %v5698_v45, %v5697_v25  ;;  %v5413_v57 = vmul.f32 %v5140_v2, %v4453_v26 }
 0x524   : > { %v5702_v56 = vsel %vm5442_vm2, %v5412_v0, 0.0 }
 0x525   : > { %v5701_v38 = vadd.f32 %v5700_v5, %v5699_v48  ;;  %v5145_v39 = vpop.permute.xlu0 %5144  ;;  %v5704_v61 = vsel %vm5442_vm2, %v5413_v57, 0.0 }
 0x526   : > { %v5150_v21 = vpop.permute.xlu1 %5149  ;;  %v5414_v27 = vmul.f32 %v5145_v39, %v4454_v59  ;;  %v4467_v59 = vld [vmem:[%s9954_s2 + $0x488] sm:$0xff]  ;;  %v4468_v39 = vld [vmem:[%s9954_s2 + $0x490] sm:$0xff] }
 0x527   : > { %v5703_v54 = vadd.f32 %v5702_v56, %v5701_v38  ;;  %v5415_v52 = vmul.f32 %v5150_v21, %v4455_v49 }
 0x528   : > { %v5706_v9 = vsel %vm5442_vm2, %v5414_v27, 0.0 }
 0x529   : > { %v5705_v36 = vadd.f32 %v5704_v61, %v5703_v54  ;;  %v5155_v41 = vpop.permute.xlu0 %5154  ;;  %v5708_v46 = vsel %vm5442_vm2, %v5415_v52, 0.0 }
 0x52a   : > { %v5160_v40 = vpop.permute.xlu1 %5159  ;;  %v5416_v62 = vmul.f32 %v5155_v41, %v4456_v33  ;;  %v4469_v33 = vld [vmem:[%s9954_s2 + $0x498] sm:$0xff]  ;;  %v4470_v41 = vld [vmem:[%s9954_s2 + $0x4a0] sm:$0xff] }
 0x52b   : > { %v5707_v16 = vadd.f32 %v5706_v9, %v5705_v36  ;;  %v5417_v20 = vmul.f32 %v5160_v40, %v4457_v10 }
 0x52c   : > { %v5710_v6 = vsel %vm5442_vm2, %v5416_v62, 0.0 }
 0x52d   : > { %v5709_v32 = vadd.f32 %v5708_v46, %v5707_v16  ;;  %v5165_v18 = vpop.permute.xlu0 %5164  ;;  %v5712_v13 = vsel %vm5442_vm2, %v5417_v20, 0.0 }
 0x52e   : > { %v5170_v60 = vpop.permute.xlu1 %5169  ;;  %v5418_v8 = vmul.f32 %v5165_v18, %v4458_v28  ;;  %v4471_v28 = vld [vmem:[%s9954_s2 + $0x4a8] sm:$0xff]  ;;  %v4472_v18 = vld [vmem:[%s9954_s2 + $0x4b0] sm:$0xff] }
 0x52f   : > { %v5711_v17 = vadd.f32 %v5710_v6, %v5709_v32  ;;  %v5419_v37 = vmul.f32 %v5170_v60, %v4459_v44 }
 0x530   : > { %v5714_v29 = vsel %vm5442_vm2, %v5418_v8, 0.0 }
 0x531   : > { %v5713_v12 = vadd.f32 %v5712_v13, %v5711_v17  ;;  %v5175_v14 = vpop.permute.xlu0 %5174  ;;  %v5716_v19 = vsel %vm5442_vm2, %v5419_v37, 0.0 }
 0x532   : > { %v5180_v34 = vpop.permute.xlu1 %5179  ;;  %v5420_v51 = vmul.f32 %v5175_v14, %v4460_v63  ;;  %v4473_v63 = vld [vmem:[%s9954_s2 + $0x4b8] sm:$0xff]  ;;  %v4474_v14 = vld [vmem:[%s9954_s2 + $0x4c0] sm:$0xff] }
 0x533   : > { %v5715_v55 = vadd.f32 %v5714_v29, %v5713_v12  ;;  %v5421_v43 = vmul.f32 %v5180_v34, %v4461_v3 }
 0x534   : > { %v5718_v23 = vsel %vm5442_vm2, %v5420_v51, 0.0 }
 0x535   : > { %v5717_v58 = vadd.f32 %v5716_v19, %v5715_v55  ;;  %v5185_v4 = vpop.permute.xlu0 %5184  ;;  %v5720_v1 = vsel %vm5442_vm2, %v5421_v43, 0.0 }
 0x536   : > { %v5190_v22 = vpop.permute.xlu1 %5189  ;;  %v5422_v50 = vmul.f32 %v5185_v4, %v4462_v31  ;;  %v4475_v31 = vld [vmem:[%s9954_s2 + $0x4c8] sm:$0xff]  ;;  %v4476_v4 = vld [vmem:[%s9954_s2 + $0x4d0] sm:$0xff] }
 0x537   : > { %v5719_v35 = vadd.f32 %v5718_v23, %v5717_v58  ;;  %v5423_v15 = vmul.f32 %v5190_v22, %v4463_v47 }
 0x538   : > { %v5722_v25 = vsel %vm5442_vm2, %v5422_v50, 0.0 }
 0x539   : > { %v5721_v24 = vadd.f32 %v5720_v1, %v5719_v35  ;;  %v5195_v30 = vpop.permute.xlu0 %5194  ;;  %v5724_v45 = vsel %vm5442_vm2, %v5423_v15, 0.0 }
 0x53a   : > { %v5200_v11 = vpop.permute.xlu1 %5199  ;;  %v5424_v26 = vmul.f32 %v5195_v30, %v4464_v53  ;;  %v4477_v53 = vld [vmem:[%s9954_s2 + $0x4d8] sm:$0xff]  ;;  %v4478_v30 = vld [vmem:[%s9954_s2 + $0x4e0] sm:$0xff] }
 0x53b   : > { %v5723_v2 = vadd.f32 %v5722_v25, %v5721_v24  ;;  %v5425_v0 = vmul.f32 %v5200_v11, %v4465_v7 }
 0x53c   : > { %v5726_v38 = vsel %vm5442_vm2, %v5424_v26, 0.0 }
 0x53d   : > { %v5725_v48 = vadd.f32 %v5724_v45, %v5723_v2  ;;  %v5205_v57 = vpop.permute.xlu0 %5204  ;;  %v5728_v56 = vsel %vm5442_vm2, %v5425_v0, 0.0 }
 0x53e   : > { %v5210_v5 = vpop.permute.xlu1 %5209  ;;  %v5426_v49 = vmul.f32 %v5205_v57, %v4466_v42  ;;  %v4479_v42 = vld [vmem:[%s9954_s2 + $0x4e8] sm:$0xff]  ;;  %v4480_v57 = vld [vmem:[%s9954_s2 + $0x4f0] sm:$0xff] }
 0x53f   : > { %v5727_v21 = vadd.f32 %v5726_v38, %v5725_v48  ;;  %v5427_v27 = vmul.f32 %v5210_v5, %v4467_v59 }
 0x540   : > { %v5730_v36 = vsel %vm5442_vm2, %v5426_v49, 0.0 }
 0x541   : > { %v5729_v54 = vadd.f32 %v5728_v56, %v5727_v21  ;;  %v5215_v52 = vpop.permute.xlu0 %5214  ;;  %v5732_v9 = vsel %vm5442_vm2, %v5427_v27, 0.0 }
 0x542   : > { %v5220_v61 = vpop.permute.xlu1 %5219  ;;  %v5428_v10 = vmul.f32 %v5215_v52, %v4468_v39  ;;  %v4481_v39 = vld [vmem:[%s9954_s2 + $0x4f8] sm:$0xff] }
 0x543   : > { %v5731_v40 = vadd.f32 %v5730_v36, %v5729_v54  ;;  %v5429_v62 = vmul.f32 %v5220_v61, %v4469_v33 }
 0x544   : > { %v5734_v32 = vsel %vm5442_vm2, %v5428_v10, 0.0 }
 0x545   : > { %v5733_v16 = vadd.f32 %v5732_v9, %v5731_v40  ;;  %v5225_v20 = vpop.permute.xlu0 %5224  ;;  %v5736_v6 = vsel %vm5442_vm2, %v5429_v62, 0.0 }
 0x546   : > { %v5230_v46 = vpop.permute.xlu1 %5229  ;;  %v5430_v44 = vmul.f32 %v5225_v20, %v4470_v41 }
 0x547   : > { %v5735_v60 = vadd.f32 %v5734_v32, %v5733_v16  ;;  %v5431_v8 = vmul.f32 %v5230_v46, %v4471_v28 }
 0x548   : > { %v5738_v12 = vsel %vm5442_vm2, %v5430_v44, 0.0  ;;  %v5768_v44 = vld [vmem:[%s9955_s3] sm:$0x1] }
 0x549   : > { %v5737_v17 = vadd.f32 %v5736_v6, %v5735_v60  ;;  %v5235_v37 = vpop.permute.xlu0 %5234  ;;  %v5740_v29 = vsel %vm5442_vm2, %v5431_v8, 0.0 }
 0x54a   : > { %v5240_v13 = vpop.permute.xlu1 %5239  ;;  %v5432_v3 = vmul.f32 %v5235_v37, %v4472_v18 }
 0x54b   : > { %v5739_v34 = vadd.f32 %v5738_v12, %v5737_v17  ;;  %v5433_v51 = vmul.f32 %v5240_v13, %v4473_v63 }
 0x54c   : > { %v5742_v58 = vsel %vm5442_vm2, %v5432_v3, 0.0 }
 0x54d   : > { %v5741_v55 = vadd.f32 %v5740_v29, %v5739_v34  ;;  %v5245_v43 = vpop.permute.xlu0 %5244  ;;  %v5744_v23 = vsel %vm5442_vm2, %v5433_v51, 0.0 }
 0x54e   : > { %v5250_v19 = vpop.permute.xlu1 %5249  ;;  %v5434_v47 = vmul.f32 %v5245_v43, %v4474_v14 }
 0x54f   : > { %v5743_v22 = vadd.f32 %v5742_v58, %v5741_v55  ;;  %v5435_v50 = vmul.f32 %v5250_v19, %v4475_v31 }
 0x550   : > { %v5746_v24 = vsel %vm5442_vm2, %v5434_v47, 0.0 }
 0x551   : > { %v5745_v35 = vadd.f32 %v5744_v23, %v5743_v22  ;;  %v5255_v15 = vpop.permute.xlu0 %5254  ;;  %v5748_v25 = vsel %vm5442_vm2, %v5435_v50, 0.0 }
 0x552   : > { %v5260_v1 = vpop.permute.xlu1 %5259  ;;  %v5436_v7 = vmul.f32 %v5255_v15, %v4476_v4 }
 0x553   : > { %v5747_v11 = vadd.f32 %v5746_v24, %v5745_v35  ;;  %v5437_v26 = vmul.f32 %v5260_v1, %v4477_v53 }
 0x554   : > { %v5750_v48 = vsel %vm5442_vm2, %v5436_v7, 0.0 }
 0x555   : > { %v5749_v2 = vadd.f32 %v5748_v25, %v5747_v11  ;;  %v5265_v0 = vpop.permute.xlu0 %5264  ;;  %v5752_v38 = vsel %vm5442_vm2, %v5437_v26, 0.0 }
 0x556   : > { %v5270_v45 = vpop.permute.xlu1 %5269  ;;  %v5438_v59 = vmul.f32 %v5265_v0, %v4478_v30 }
 0x557   : > { %v5751_v5 = vadd.f32 %v5750_v48, %v5749_v2  ;;  %v5439_v49 = vmul.f32 %v5270_v45, %v4479_v42 }
 0x558   : > { %v5754_v54 = vsel %vm5442_vm2, %v5438_v59, 0.0 }
 0x559   : > { %v5753_v21 = vadd.f32 %v5752_v38, %v5751_v5  ;;  %v5275_v27 = vpop.permute.xlu0 %5274  ;;  %v5756_v52 = vsel %vm5442_vm2, %v5439_v49, 0.0 }
 0x55a   : > { %v5280_v56 = vpop.permute.xlu1 %5279  ;;  %v5440_v33 = vmul.f32 %v5275_v27, %v4480_v57 }
 0x55b   : > { %v5755_v61 = vadd.f32 %v5754_v54, %v5753_v21  ;;  %v5441_v36 = vmul.f32 %v5280_v56, %v4481_v39 }
 0x55c   : > { %v5758_v40 = vsel %vm5442_vm2, %v5440_v33, 0.0 }
 0x55d   : > { %v5757_v10 = vadd.f32 %v5756_v52, %v5755_v61  ;;  %v5760_v9 = vsel %vm5442_vm2, %v5441_v36, 0.0 }
 0x55f   : > { %v5759_v41 = vadd.f32 %v5758_v40, %v5757_v10 }
 0x561   : > { %v5761_v62 = vadd.f32 %v5760_v9, %v5759_v41 }
 0x563   : > { %v5762_v16 = vrot.slane %v5761_v62, 4 }
 0x565   : > { %v5763_v28 = vadd.f32 %v5762_v16, %v5761_v62 }
 0x567   : > { %v5764_v46 = vrot.slane %v5763_v28, 2 }
 0x569   : > { %v5765_v20 = vadd.f32 %v5764_v46, %v5763_v28 }
 0x56b   : > { %v5766_v32 = vrot.slane %v5765_v20, 1 }
 0x56d   : > { %v5767_v60 = vadd.f32 %v5766_v32, %v5765_v20 }
 0x56f   : > { %v5769_v18 = vadd.f32 %v5768_v44, %v5767_v60 }
 0x571   : > { %5771 = vst.msk [vmem:[%s7562_s29] sm:$0x1] %vm5770_vm3, %v5769_v18 }
 0x572 PF: > { %s6195_s28 = sshll.u32 %s7360_s22, 4  ;;  %s5785_s26 = sshll.u32 %s7562_s29, 4  ;;  %s5786_s26 = int_to_ptr.vmem [resolvable:$true] %s5785_s26 }
 0x573   : > { %s9893_s30 = scalar_lea.hbm %s9956_s4, %s6195_s28  ;;  %s5773_s6 = scalar_lea.sflag [#allocation5], %s228_s27 }
 0x574   : > { %s7250_s5 = scalar_lea.vmem %s5786_s26, 16  ;;  %p9968_p4 = scmp.ne.s32.totalorder %s9964_s11, 0 }
 0x575   : > { %p7251_p2 = scmp.ne.s32.totalorder %s5786_s26, %s7250_s5  ;;  %s7381_s12 = smov [#allocation6]  }
 0x576   : > { %s7254_s9 = sshll.u32 %s7381_s12, 4  ;;  %s7255_s9 = int_to_ptr.vmem [resolvable:$false] %s7254_s9 }
 0x577   : > { %p7252_p0 = pnand %p7251_p2, %p9968_p4  ;;  %s7256_s10 = scalar_lea.vmem %s7255_s9, 32 }
 0x578   : > { %p7257_p5 = scmp.lt.s32.totalorder %s5786_s26, %s7255_s9  ;;  %p7258_p8 = scmp.lt.s32.totalorder %s7256_s10, %s7250_s5 }
 0x579   : > { %p7253_p1 = pneg %p7252_p0 }
 0x57a   : > { %p7259_p3 = por %p7258_p8, %p7257_p5 }
 0x57c   : > { %p7260_p10 = pnand %p7259_p3, %p7253_p1 }
 0x57e   : > { %7263 = shalt.err (!%p7260_p10)
}
 0x57f   : > { %s7264_s22 = scalar_lea.hbm %s9893_s30, 16  ;;  %s7268_s18 = scalar_lea.hbm %s9956_s4, 32 }
 0x580   : > { %p7265_p11 = scmp.ne.s32.totalorder %s9893_s30, %s7264_s22  ;;  %p7269_p13 = scmp.lt.u32.totalorder %s9893_s30, %s9956_s4 }
 0x581   : > { %p7270_p12 = scmp.lt.u32.totalorder %s7268_s18, %s7264_s22  ;;  %p7272_p2 = scmp.lt.u32.totalorder %s7264_s22, %s9893_s30 }
 0x582   : > { %p7266_p6 = pnand %p7265_p11, %p9968_p4 }
 0x583   : > { %p7271_p7 = por %p7270_p12, %p7269_p13 }
 0x584   : > { %p7267_p9 = pneg %p7266_p6 }
 0x585   : > { %p7273_p0 = por %p7272_p2, %p7271_p7 }
 0x587   : > { %p7274_p1 = pnand %p7273_p0, %p7267_p9 }
 0x589   : > { %7277 = shalt.err (!%p7274_p1)
}
 0x58a   : > { %6232 = dma.vmem_to_hbm [thread:$0]  (%p9968_p4), %s5786_s26, 16, %s9893_s30, %s5773_s6  }
 0x58b PF: > { %p6243_p5 = scmp.ge.s32.totalorder %s7372_s25, 2  ;;  %s5797_s8 = sand.u32 1, %s7332_s15  }
 0x58c   : > { %p9969_p8 = scmp.ne.s32.totalorder %s9966_s14, 0  ;;  %s5798_s21 = scalar_lea.sflag [#allocation5], %s5797_s8 }
 0x58e   : > { %p6239_p3 = pnand %p6243_p5, %p9969_p8 }
 0x590   : > { %7327 = dma.done.wait (!%p6239_p3), %s5798_s21, 16  }
 0x591   : > { %7329 = vsyncadd (!%p6239_p3), %s5798_s21, 4294967280  ;;  %s20_s25 = sadd.s32 1, %s7372_s25   ;;  %s9970_s5 = sld [smem:[#allocation11_spill]] }
 0x592   : > { %p17_p10 = scmp.ge.s32.totalorder %s20_s25, 6   ;;  %s9971_s11 = sld [smem:[#allocation9_spill]] }
 0x593   : > { %s9972_s30 = sld [smem:[#allocation10_spill]]  ;;  %s9973_s15 = smov %s7336_s16 }
 0x594   : > { %s9974_s16 = smov %s7340_s17  ;;  %s9976_s18 = smov %s7348_s19 }
 0x595   : > { %s9977_s19 = smov %s7352_s20  ;;  %s9978_s20 = smov %s7497_s13 }
 0x596   : > { %s9979_s21 = smov %s7364_s23  ;;  %s9980_s22 = smov %s7368_s24 }
 0x597   : > { %s9975_s17 = smov %s9970_s5  ;;  %19 = sbr.rel (!%p17_p10) target bundleno = 9 (0x9), region = 89 }
 0x598   : > { %s9981_s23 = smov %s9971_s11 }
 0x599   : > { %s9982_s24 = smov %s9972_s30 }
 0x59e   :  { %5802 = vsyncpa [#allocation4], 1 }
 0x59f   :  { %5804 = vsyncpa [#allocation4 + $0x1], 1 }
 0x5a0   :  { %5805 = vsyncpa [#allocation5], 1 }
 0x5a1   :  { %5807 = vsyncpa [#allocation5 + $0x1], 1 }

</bundles_post_ra>
